<compile_context>
chip_gen: v7x
topology: tpu7x:2x2x1
jax: 0.10.0
libtpu: 0.0.40
codegen_flags: <defaults>
</compile_context>

<pallas_src>
import functools

import jax
import jax.numpy as jnp
from jax.experimental import pallas as pl
from jax.experimental.pallas import tpu as pltpu

CP = 128      # padded channel width for the 32/64/96-wide intermediates (lane-dense)
_EPS = 1e-3


# --------------------------------------------------------------------------- #
# Kernels
# --------------------------------------------------------------------------- #
def _mm_stats_kernel(x_ref, w_ref, y_ref, stats_ref):
    """Y = X @ W (bf16 in, f32 accum) + per-tile channel sum / sum-of-squares."""
    y = jnp.dot(x_ref[...], w_ref[...], preferred_element_type=jnp.float32)
    y_ref[...] = y
    s = jnp.sum(y, axis=0, keepdims=True)         # (1, C)
    ss = jnp.sum(y * y, axis=0, keepdims=True)    # (1, C)
    stats_ref[...] = jnp.concatenate([s, ss], axis=0)   # (2, C)


def _bn_relu_kernel(y_ref, scale_ref, shift_ref, o_ref):
    """Folded BN (y*scale + shift) + ReLU, emitted as bf16 activations."""
    o_ref[...] = jnp.maximum(
        y_ref[...] * scale_ref[...] + shift_ref[...], 0.0
    ).astype(o_ref.dtype)


def _residual_head_kernel(yc3_ref, sc3_ref, sh3_ref, a_ref, b1_ref,
                          wf0_ref, wf1_ref, wf2_ref, bias_ref, x_ref, o_ref,
                          *, res_scale):
    """Fused epilogue: BN+ReLU of branch2's last conv, 1x1 (96->256) conv + bias,
    residual scale-add with x, final ReLU.  Output is 256-wide (lane dense)."""
    b2 = jnp.maximum(yc3_ref[...] * sc3_ref[...] + sh3_ref[...], 0.0)
    y = jnp.dot(a_ref[...], wf0_ref[...], preferred_element_type=jnp.float32)
    y = y + jnp.dot(b1_ref[...], wf1_ref[...], preferred_element_type=jnp.float32)
    y = y + jnp.dot(b2.astype(jnp.bfloat16), wf2_ref[...],
                    preferred_element_type=jnp.float32)
    y = y + bias_ref[...]
    o_ref[...] = jnp.maximum(y * res_scale + x_ref[...], 0.0).astype(o_ref.dtype)


# --------------------------------------------------------------------------- #
# pallas_call wrappers
# --------------------------------------------------------------------------- #
def _pick_tm(m, cap):
    for t in (2048, 1024, 512, 256, 128, 64, 32, 16, 8):
        if t <= cap and m % t == 0:
            return t
    return m


def _matmul_stats(x_bf16, w_bf16, tm):
    m, k = x_bf16.shape
    c = w_bf16.shape[1]
    g = m // tm
    flops = 2 * m * k * c
    bytes_accessed = x_bf16.size * 2 + w_bf16.size * 2 + m * c * 4 + g * 2 * c * 4
    return pl.pallas_call(
        _mm_stats_kernel,
        grid=(g,),
        in_specs=[pl.BlockSpec((tm, k), lambda i: (i, 0)),
                  pl.BlockSpec((k, c), lambda i: (0, 0))],
        out_specs=(pl.BlockSpec((tm, c), lambda i: (i, 0)),
                   pl.BlockSpec((None, 2, c), lambda i: (i, 0, 0))),
        out_shape=(jax.ShapeDtypeStruct((m, c), jnp.float32),
                   jax.ShapeDtypeStruct((g, 2, c), jnp.float32)),
        compiler_params=pltpu.CompilerParams(dimension_semantics=("parallel",)),
        cost_estimate=pl.CostEstimate(flops=flops, transcendentals=0,
                                      bytes_accessed=bytes_accessed),
    )(x_bf16, w_bf16)


def _bn_params(stats, m_total, gamma, beta, eps):
    s = jnp.sum(stats[:, 0, :], axis=0)
    ss = jnp.sum(stats[:, 1, :], axis=0)
    mean = s / m_total
    var = jnp.maximum(ss / m_total - mean * mean, 0.0)   # f32; clamp cancellation
    invstd = jax.lax.rsqrt(var + eps)
    scale = gamma * invstd
    shift = beta - mean * scale
    return (scale.reshape(1, -1).astype(jnp.float32),
            shift.reshape(1, -1).astype(jnp.float32))


def _bn_relu(y, scale, shift, tm):
    m, c = y.shape
    return pl.pallas_call(
        _bn_relu_kernel,
        grid=(m // tm,),
        in_specs=[pl.BlockSpec((tm, c), lambda i: (i, 0)),
                  pl.BlockSpec((1, c), lambda i: (0, 0)),
                  pl.BlockSpec((1, c), lambda i: (0, 0))],
        out_specs=pl.BlockSpec((tm, c), lambda i: (i, 0)),
        out_shape=jax.ShapeDtypeStruct((m, c), jnp.bfloat16),
        compiler_params=pltpu.CompilerParams(dimension_semantics=("parallel",)),
    )(y, scale, shift)


def _conv_mm_stage(x_bf16, w_pad, gamma_pad, beta_pad, tm, eps):
    y, stats = _matmul_stats(x_bf16, w_pad, tm)
    scale, shift = _bn_params(stats, x_bf16.shape[0], gamma_pad, beta_pad, eps)
    return y, scale, shift


# --------------------------------------------------------------------------- #
# Parameter / layout glue (plain JAX)
# --------------------------------------------------------------------------- #
def _w_1x1(w_oihw):                         # (Cout, Cin, 1, 1) -> (Cin, Cout)
    return jnp.transpose(w_oihw[:, :, 0, 0], (1, 0))


def _w_3x3(w_oihw):                         # (Cout, Cin, 3, 3) -> (9*Cin, Cout), (kh,kw,cin)
    cout = w_oihw.shape[0]
    return jnp.transpose(w_oihw, (2, 3, 1, 0)).reshape(-1, cout)


def _w_3x3_pair_blockdiag(w1_oihw, w2_oihw):
    """Two independent 3x3 convs (32->32 each) -> one block-diagonal (9*64, 64) weight.
    Input channel order matches im2col on the concatenated [a1 | a2] activations."""
    w1 = jnp.transpose(w1_oihw, (2, 3, 1, 0))   # (3,3,32,32)
    w2 = jnp.transpose(w2_oihw, (2, 3, 1, 0))   # (3,3,32,32)
    z = jnp.zeros_like(w1)
    top = jnp.concatenate([w1, z], axis=3)       # cin = a1 -> [out1 | 0]
    bot = jnp.concatenate([z, w2], axis=3)       # cin = a2 -> [0 | out2]
    wc = jnp.concatenate([top, bot], axis=2)     # (3,3,64,64)
    return wc.reshape(-1, 64)                    # (576, 64)


def _pad_cols(w, cp):
    return jnp.pad(w, ((0, 0), (0, cp - w.shape[1])))


def _pad_gb(g, b, cp):
    pad = cp - g.shape[0]
    g = jnp.concatenate([g.astype(jnp.float32), jnp.ones((pad,), jnp.float32)])
    b = jnp.concatenate([b.astype(jnp.float32), jnp.zeros((pad,), jnp.float32)])
    return g, b


def _im2col_3x3(a_flat, n, h, w):
    """(n*h*w, c) activation -> (n*h*w, 9*c) patches, pad=1, stride=1, (kh,kw,cin)."""
    c = a_flat.shape[1]
    img = a_flat.reshape(n, h, w, c)
    img = jnp.pad(img, ((0, 0), (1, 1), (1, 1), (0, 0)))
    cols = [img[:, kh:kh + h, kw:kw + w, :] for kh in range(3) for kw in range(3)]
    return jnp.concatenate(cols, axis=-1).reshape(n * h * w, 9 * c)


# --------------------------------------------------------------------------- #
# Block35 forward
# --------------------------------------------------------------------------- #
def block35(x_nchw, p, *, scale=1.0, eps=_EPS, block_rows=512):
    n, cin, h, w = x_nchw.shape
    assert cin == 256, "Block35 expects 256 input channels"
    m = n * h * w
    tm = _pick_tm(m, block_rows)

    x_flat = jnp.transpose(x_nchw, (0, 2, 3, 1)).reshape(m, cin).astype(jnp.float32)
    xb = x_flat.astype(jnp.bfloat16)

    # ---- fused 1x1 heads: branch0, branch1.conv1, branch2.conv1 (256 -> 96, pad 128)
    w_head = jnp.concatenate(
        [_w_1x1(p["b0_w"]), _w_1x1(p["b1c1_w"]), _w_1x1(p["b2c1_w"])], axis=1)
    w_head = _pad_cols(w_head, CP).astype(jnp.bfloat16)
    g_head = jnp.concatenate([p["b0_g"], p["b1c1_g"], p["b2c1_g"]])
    b_head = jnp.concatenate([p["b0_b"], p["b1c1_b"], p["b2c1_b"]])
    g_head, b_head = _pad_gb(g_head, b_head, CP)
    y, sc, sh = _conv_mm_stage(xb, w_head, g_head, b_head, tm, eps)
    a = _bn_relu(y, sc, sh, tm)                  # (m, 128) bf16: [a0 | a1 | a2 | 0]

    # ---- fused branch1.conv2 + branch2.conv2: one block-diagonal 3x3 on [a1 | a2]
    p12 = _im2col_3x3(a[:, 32:96], n, h, w)                     # (m, 576) bf16
    w12 = _pad_cols(_w_3x3_pair_blockdiag(p["b1c2_w"], p["b2c2_w"]), CP).astype(jnp.bfloat16)
    g12 = jnp.concatenate([p["b1c2_g"], p["b2c2_g"]])
    b12 = jnp.concatenate([p["b1c2_b"], p["b2c2_b"]])
    g12, b12 = _pad_gb(g12, b12, CP)
    y, sc, sh = _conv_mm_stage(p12, w12, g12, b12, tm, eps)
    br12 = _bn_relu(y, sc, sh, tm)               # (m, 128) bf16: [branch1 | br2_mid | 0]

    # ---- branch2.conv3: 3x3 on br2_mid (its BN+ReLU is fused into the epilogue)
    p3 = _im2col_3x3(br12[:, 32:64], n, h, w)                   # (m, 288) bf16
    w2c3 = _pad_cols(_w_3x3(p["b2c3_w"]), CP).astype(jnp.bfloat16)
    g3p, b3p = _pad_gb(p["b2c3_g"], p["b2c3_b"], CP)
    y_c3, sc3, sh3 = _conv_mm_stage(p3, w2c3, g3p, b3p, tm, eps)

    # ---- fused epilogue: bn+relu(y_c3), 1x1 96->256 conv + bias, *scale + x, relu
    wf = _w_1x1(p["fin_w"])                                  # (96, 256)
    wf0 = jnp.pad(wf[0:32], ((0, CP - 32), (0, 0))).astype(jnp.bfloat16)   # a0 rows
    wf1 = jnp.pad(wf[32:64], ((0, CP - 32), (0, 0))).astype(jnp.bfloat16)  # branch1 rows
    wf2 = jnp.pad(wf[64:96], ((0, CP - 32), (0, 0))).astype(jnp.bfloat16)  # branch2 rows
    bias = p["fin_bias"].reshape(1, 256).astype(jnp.float32)

    cout = 256
    out_flat = pl.pallas_call(
        functools.partial(_residual_head_kernel, res_scale=float(scale)),
        grid=(m // tm,),
        in_specs=[pl.BlockSpec((tm, CP), lambda i: (i, 0)),      # y_c3
                  pl.BlockSpec((1, CP), lambda i: (0, 0)),       # sc3
                  pl.BlockSpec((1, CP), lambda i: (0, 0)),       # sh3
                  pl.BlockSpec((tm, CP), lambda i: (i, 0)),      # a (branch0 slot)
                  pl.BlockSpec((tm, CP), lambda i: (i, 0)),      # br12 (branch1 slot)
                  pl.BlockSpec((CP, cout), lambda i: (0, 0)),    # wf0
                  pl.BlockSpec((CP, cout), lambda i: (0, 0)),    # wf1
                  pl.BlockSpec((CP, cout), lambda i: (0, 0)),    # wf2
                  pl.BlockSpec((1, cout), lambda i: (0, 0)),     # bias
                  pl.BlockSpec((tm, cout), lambda i: (i, 0))],   # residual x
        out_specs=pl.BlockSpec((tm, cout), lambda i: (i, 0)),
        out_shape=jax.ShapeDtypeStruct((m, cout), jnp.float32),
        compiler_params=pltpu.CompilerParams(dimension_semantics=("parallel",)),
        cost_estimate=pl.CostEstimate(
            flops=2 * m * 3 * CP * cout, transcendentals=0,
            bytes_accessed=m * (3 * CP * 2 + CP * 4 + cout * 4 * 2) + 3 * CP * cout * 2),
    )(y_c3, sc3, sh3, a, br12, wf0, wf1, wf2, bias, x_flat)

    return jnp.transpose(out_flat.reshape(n, h, w, cout), (0, 3, 1, 2))


# --------------------------------------------------------------------------- #
# Plain-XLA reference (independent plumbing path, same bf16 matmul precision)
# --------------------------------------------------------------------------- #
def _ref_basic_conv(x, w, g, b, eps, padding=0):
    y = jax.lax.conv_general_dilated(
        x.astype(jnp.bfloat16), w.astype(jnp.bfloat16),
        window_strides=(1, 1),
        padding=[(padding, padding), (padding, padding)],
        dimension_numbers=("NCHW", "OIHW", "NCHW"),
        preferred_element_type=jnp.float32)
    mean = jnp.mean(y, axis=(0, 2, 3), keepdims=True)
    var = jnp.mean(jnp.square(y - mean), axis=(0, 2, 3), keepdims=True)
    y = (y - mean) * jax.lax.rsqrt(var + eps)
    return jnp.maximum(y * g.reshape(1, -1, 1, 1) + b.reshape(1, -1, 1, 1), 0.0)


def block35_reference(x, p, *, scale=1.0, eps=_EPS):
    x0 = _ref_basic_conv(x, p["b0_w"], p["b0_g"], p["b0_b"], eps)
    x1 = _ref_basic_conv(x, p["b1c1_w"], p["b1c1_g"], p["b1c1_b"], eps)
    x1 = _ref_basic_conv(x1, p["b1c2_w"], p["b1c2_g"], p["b1c2_b"], eps, padding=1)
    x2 = _ref_basic_conv(x, p["b2c1_w"], p["b2c1_g"], p["b2c1_b"], eps)
    x2 = _ref_basic_conv(x2, p["b2c2_w"], p["b2c2_g"], p["b2c2_b"], eps, padding=1)
    x2 = _ref_basic_conv(x2, p["b2c3_w"], p["b2c3_g"], p["b2c3_b"], eps, padding=1)
    cat = jnp.concatenate([x0, x1, x2], axis=1)
    out = jax.lax.conv_general_dilated(
        cat.astype(jnp.bfloat16), p["fin_w"].astype(jnp.bfloat16),
        window_strides=(1, 1), padding=[(0, 0), (0, 0)],
        dimension_numbers=("NCHW", "OIHW", "NCHW"),
        preferred_element_type=jnp.float32)
    out = out + p["fin_bias"].reshape(1, -1, 1, 1)
    return jnp.maximum(out * scale + x, 0.0)


# --------------------------------------------------------------------------- #
if __name__ == "__main__":
    N, C, H, W = 2, 256, 16, 16

    key = jax.random.PRNGKey(0)
    ks = list(jax.random.split(key, 24))

    def conv_w(k, cout, cin, kh, kw):
        fan_in = cin * kh * kw
        return jax.random.normal(k, (cout, cin, kh, kw), jnp.float32) * (2.0 / fan_in) ** 0.5

    def bn_gb(kg, kb, c):
        g = 1.0 + 0.1 * jax.random.normal(kg, (c,), jnp.float32)
        b = 0.1 * jax.random.normal(kb, (c,), jnp.float32)
        return g, b

    p = {}
    p["b0_w"] = conv_w(ks[0], 32, 256, 1, 1);   p["b0_g"], p["b0_b"] = bn_gb(ks[1], ks[2], 32)
    p["b1c1_w"] = conv_w(ks[3], 32, 256, 1, 1); p["b1c1_g"], p["b1c1_b"] = bn_gb(ks[4], ks[5], 32)
    p["b1c2_w"] = conv_w(ks[6], 32, 32, 3, 3);  p["b1c2_g"], p["b1c2_b"] = bn_gb(ks[7], ks[8], 32)
    p["b2c1_w"] = conv_w(ks[9], 32, 256, 1, 1); p["b2c1_g"], p["b2c1_b"] = bn_gb(ks[10], ks[11], 32)
    p["b2c2_w"] = conv_w(ks[12], 32, 32, 3, 3); p["b2c2_g"], p["b2c2_b"] = bn_gb(ks[13], ks[14], 32)
    p["b2c3_w"] = conv_w(ks[15], 32, 32, 3, 3); p["b2c3_g"], p["b2c3_b"] = bn_gb(ks[16], ks[17], 32)
    p["fin_w"] = conv_w(ks[18], 256, 96, 1, 1)
    p["fin_bias"] = 0.05 * jax.random.normal(ks[19], (256,), jnp.float32)

    x = jax.random.normal(ks[20], (N, C, H, W), jnp.float32)

    scale = 1.0  # Block35() default
    run = jax.jit(functools.partial(block35, scale=scale, eps=_EPS, block_rows=512))
    y = run(x, p)
    jax.block_until_ready(y)
    assert y.shape == (N, 256, H, W)

    # sanity-check the Pallas path against a plain-XLA reference of the same module
    y_ref = jax.jit(functools.partial(block35_reference, scale=scale, eps=_EPS))(x, p)
    err = jnp.max(jnp.abs(y - y_ref) / (jnp.abs(y_ref) + 1.0))
    assert bool(err < 2e-2), f"mismatch vs reference: {err}"

    print("KERNEL_OK")
</pallas_src>

<mosaic_0001>
module attributes {stable_mosaic.version = 11 : i64} {
  func.func @_mm_stats_kernel(%arg0: i32, %arg1: memref<512x256xbf16, #tpu.memory_space<vmem>>, %arg2: memref<256x128xbf16, #tpu.memory_space<vmem>>, %arg3: memref<512x128xf32, #tpu.memory_space<vmem>>, %arg4: memref<1x2x128xf32, #tpu.memory_space<vmem>>) attributes {dimension_semantics = [#tpu.dimension_semantics<parallel>], iteration_bounds = array<i64: 1>, scalar_prefetch = 0 : i64, scratch_operands = 0 : i64, tpu.core_type = #tpu.core_type<tc>, window_params = [{transform_indices = @transform_0, window_bounds = array<i64: 512, 256>}, {pipeline_mode = #tpu.pipeline_mode<synchronous>, transform_indices = @transform_1, window_bounds = array<i64: 256, 128>}, {transform_indices = @transform_2, window_bounds = array<i64: 512, 128>}, {transform_indices = @transform_3, window_bounds = array<i64: 1, 2, 128>}]} {
    %c0 = arith.constant 0 : index
    %c0_0 = arith.constant 0 : index
    %0 = vector.load %arg1[%c0, %c0_0] : memref<512x256xbf16, #tpu.memory_space<vmem>>, vector<512x256xbf16>
    %c0_1 = arith.constant 0 : index
    %c0_2 = arith.constant 0 : index
    %1 = vector.load %arg2[%c0_1, %c0_2] : memref<256x128xbf16, #tpu.memory_space<vmem>>, vector<256x128xbf16>
    %cst = arith.constant dense<0.000000e+00> : vector<512x128xf32>
    %2 = tpu.matmul %0, %1, %cst {dimension_numbers = #tpu.dot_dimension_numbers<[1], [0], [0], [1], [0, 0, 1, 1], [], []>} : vector<512x256xbf16>, vector<256x128xbf16>, vector<512x128xf32> -> vector<512x128xf32>
    %c0_3 = arith.constant 0 : index
    %c0_4 = arith.constant 0 : index
    %3 = vector.load %arg3[%c0_3, %c0_4] : memref<512x128xf32, #tpu.memory_space<vmem>>, vector<512x128xf32>
    tpu.vector_store %arg3[%c0_3, %c0_4], %2 {strides = array<i32>} : memref<512x128xf32, #tpu.memory_space<vmem>>, vector<512x128xf32>,
    %cst_5 = arith.constant dense<0.000000e+00> : vector<128xf32>
    %4 = vector.multi_reduction <add>, %2, %cst_5 [0] : vector<512x128xf32> to vector<128xf32>
    %5 = vector.shape_cast %4 : vector<128xf32> to vector<1x128xf32>
    %6 = arith.mulf %2, %2 : vector<512x128xf32>
    %cst_6 = arith.constant dense<0.000000e+00> : vector<128xf32>
    %7 = vector.multi_reduction <add>, %6, %cst_6 [0] : vector<512x128xf32> to vector<128xf32>
    %8 = vector.shape_cast %7 : vector<128xf32> to vector<1x128xf32>
    %9 = tpu.concatenate %5, %8 in 0 : vector<1x128xf32>, vector<1x128xf32> -> vector<2x128xf32>
    %c0_7 = arith.constant 0 : index
    %c0_8 = arith.constant 0 : index
    %c0_9 = arith.constant 0 : index
    %10 = vector.load %arg4[%c0_7, %c0_8, %c0_9] : memref<1x2x128xf32, #tpu.memory_space<vmem>>, vector<1x2x128xf32>
    %11 = vector.shape_cast %10 : vector<1x2x128xf32> to vector<2x128xf32>
    %12 = vector.shape_cast %9 : vector<2x128xf32> to vector<1x2x128xf32>
    tpu.vector_store %arg4[%c0_7, %c0_8, %c0_9], %12 {strides = array<i32>} : memref<1x2x128xf32, #tpu.memory_space<vmem>>, vector<1x2x128xf32>,
    return
  }
  func.func @transform_0(%arg0: i32) -> (i32, i32) {
    %c0_i32 = arith.constant 0 : i32
    %c0_i32_0 = arith.constant 0 : i32
    return %arg0, %c0_i32 : i32, i32
  }
  func.func @transform_1(%arg0: i32) -> (i32, i32) {
    %c0_i32 = arith.constant 0 : i32
    %c0_i32_0 = arith.constant 0 : i32
    %c0_i32_1 = arith.constant 0 : i32
    return %c0_i32, %c0_i32_0 : i32, i32
  }
  func.func @transform_2(%arg0: i32) -> (i32, i32) {
    %c0_i32 = arith.constant 0 : i32
    %c0_i32_0 = arith.constant 0 : i32
    return %arg0, %c0_i32 : i32, i32
  }
  func.func @transform_3(%arg0: i32) -> (i32, i32, i32) {
    %c0_i32 = arith.constant 0 : i32
    %c0_i32_0 = arith.constant 0 : i32
    %c0_i32_1 = arith.constant 0 : i32
    return %arg0, %c0_i32, %c0_i32_0 : i32, i32, i32
  }
}

module attributes {stable_mosaic.version = 11 : i64} {
  func.func @_bn_relu_kernel(%arg0: i32, %arg1: memref<512x128xf32, #tpu.memory_space<vmem>>, %arg2: memref<1x128xf32, #tpu.memory_space<vmem>>, %arg3: memref<1x128xf32, #tpu.memory_space<vmem>>, %arg4: memref<512x128xbf16, #tpu.memory_space<vmem>>) attributes {dimension_semantics = [#tpu.dimension_semantics<parallel>], iteration_bounds = array<i64: 1>, scalar_prefetch = 0 : i64, scratch_operands = 0 : i64, tpu.core_type = #tpu.core_type<tc>, window_params = [{transform_indices = @transform_0, window_bounds = array<i64: 512, 128>}, {pipeline_mode = #tpu.pipeline_mode<synchronous>, transform_indices = @transform_1, window_bounds = array<i64: 1, 128>}, {pipeline_mode = #tpu.pipeline_mode<synchronous>, transform_indices = @transform_2, window_bounds = array<i64: 1, 128>}, {transform_indices = @transform_3, window_bounds = array<i64: 512, 128>}]} {
    %c0 = arith.constant 0 : index
    %c0_0 = arith.constant 0 : index
    %0 = vector.load %arg1[%c0, %c0_0] : memref<512x128xf32, #tpu.memory_space<vmem>>, vector<512x128xf32>
    %c0_1 = arith.constant 0 : index
    %c0_2 = arith.constant 0 : index
    %1 = vector.load %arg2[%c0_1, %c0_2] : memref<1x128xf32, #tpu.memory_space<vmem>>, vector<1x128xf32>
    %2 = vector.broadcast %1 : vector<1x128xf32> to vector<512x128xf32>
    %3 = arith.mulf %0, %2 : vector<512x128xf32>
    %c0_3 = arith.constant 0 : index
    %c0_4 = arith.constant 0 : index
    %4 = vector.load %arg3[%c0_3, %c0_4] : memref<1x128xf32, #tpu.memory_space<vmem>>, vector<1x128xf32>
    %5 = vector.broadcast %4 : vector<1x128xf32> to vector<512x128xf32>
    %6 = arith.addf %3, %5 : vector<512x128xf32>
    %cst = arith.constant 0.000000e+00 : f32
    %7 = vector.broadcast %cst : f32 to vector<512x128xf32>
    %8 = arith.maximumf %6, %7 : vector<512x128xf32>
    %9 = arith.truncf %8 : vector<512x128xf32> to vector<512x128xbf16>
    %c0_5 = arith.constant 0 : index
    %c0_6 = arith.constant 0 : index
    %10 = vector.load %arg4[%c0_5, %c0_6] : memref<512x128xbf16, #tpu.memory_space<vmem>>, vector<512x128xbf16>
    tpu.vector_store %arg4[%c0_5, %c0_6], %9 {strides = array<i32>} : memref<512x128xbf16, #tpu.memory_space<vmem>>, vector<512x128xbf16>,
    return
  }
  func.func @transform_0(%arg0: i32) -> (i32, i32) {
    %c0_i32 = arith.constant 0 : i32
    %c0_i32_0 = arith.constant 0 : i32
    return %arg0, %c0_i32 : i32, i32
  }
  func.func @transform_1(%arg0: i32) -> (i32, i32) {
    %c0_i32 = arith.constant 0 : i32
    %c0_i32_0 = arith.constant 0 : i32
    %c0_i32_1 = arith.constant 0 : i32
    return %c0_i32, %c0_i32_0 : i32, i32
  }
  func.func @transform_2(%arg0: i32) -> (i32, i32) {
    %c0_i32 = arith.constant 0 : i32
    %c0_i32_0 = arith.constant 0 : i32
    %c0_i32_1 = arith.constant 0 : i32
    return %c0_i32, %c0_i32_0 : i32, i32
  }
  func.func @transform_3(%arg0: i32) -> (i32, i32) {
    %c0_i32 = arith.constant 0 : i32
    %c0_i32_0 = arith.constant 0 : i32
    return %arg0, %c0_i32 : i32, i32
  }
}

module attributes {stable_mosaic.version = 11 : i64} {
  func.func @_mm_stats_kernel(%arg0: i32, %arg1: memref<512x576xbf16, #tpu.memory_space<vmem>>, %arg2: memref<576x128xbf16, #tpu.memory_space<vmem>>, %arg3: memref<512x128xf32, #tpu.memory_space<vmem>>, %arg4: memref<1x2x128xf32, #tpu.memory_space<vmem>>) attributes {dimension_semantics = [#tpu.dimension_semantics<parallel>], iteration_bounds = array<i64: 1>, scalar_prefetch = 0 : i64, scratch_operands = 0 : i64, tpu.core_type = #tpu.core_type<tc>, window_params = [{transform_indices = @transform_0, window_bounds = array<i64: 512, 576>}, {pipeline_mode = #tpu.pipeline_mode<synchronous>, transform_indices = @transform_1, window_bounds = array<i64: 576, 128>}, {transform_indices = @transform_2, window_bounds = array<i64: 512, 128>}, {transform_indices = @transform_3, window_bounds = array<i64: 1, 2, 128>}]} {
    %c0 = arith.constant 0 : index
    %c0_0 = arith.constant 0 : index
    %0 = vector.load %arg1[%c0, %c0_0] : memref<512x576xbf16, #tpu.memory_space<vmem>>, vector<512x576xbf16>
    %c0_1 = arith.constant 0 : index
    %c0_2 = arith.constant 0 : index
    %1 = vector.load %arg2[%c0_1, %c0_2] : memref<576x128xbf16, #tpu.memory_space<vmem>>, vector<576x128xbf16>
    %cst = arith.constant dense<0.000000e+00> : vector<512x128xf32>
    %2 = tpu.matmul %0, %1, %cst {dimension_numbers = #tpu.dot_dimension_numbers<[1], [0], [0], [1], [0, 0, 1, 1], [], []>} : vector<512x576xbf16>, vector<576x128xbf16>, vector<512x128xf32> -> vector<512x128xf32>
    %c0_3 = arith.constant 0 : index
    %c0_4 = arith.constant 0 : index
    %3 = vector.load %arg3[%c0_3, %c0_4] : memref<512x128xf32, #tpu.memory_space<vmem>>, vector<512x128xf32>
    tpu.vector_store %arg3[%c0_3, %c0_4], %2 {strides = array<i32>} : memref<512x128xf32, #tpu.memory_space<vmem>>, vector<512x128xf32>,
    %cst_5 = arith.constant dense<0.000000e+00> : vector<128xf32>
    %4 = vector.multi_reduction <add>, %2, %cst_5 [0] : vector<512x128xf32> to vector<128xf32>
    %5 = vector.shape_cast %4 : vector<128xf32> to vector<1x128xf32>
    %6 = arith.mulf %2, %2 : vector<512x128xf32>
    %cst_6 = arith.constant dense<0.000000e+00> : vector<128xf32>
    %7 = vector.multi_reduction <add>, %6, %cst_6 [0] : vector<512x128xf32> to vector<128xf32>
    %8 = vector.shape_cast %7 : vector<128xf32> to vector<1x128xf32>
    %9 = tpu.concatenate %5, %8 in 0 : vector<1x128xf32>, vector<1x128xf32> -> vector<2x128xf32>
    %c0_7 = arith.constant 0 : index
    %c0_8 = arith.constant 0 : index
    %c0_9 = arith.constant 0 : index
    %10 = vector.load %arg4[%c0_7, %c0_8, %c0_9] : memref<1x2x128xf32, #tpu.memory_space<vmem>>, vector<1x2x128xf32>
    %11 = vector.shape_cast %10 : vector<1x2x128xf32> to vector<2x128xf32>
    %12 = vector.shape_cast %9 : vector<2x128xf32> to vector<1x2x128xf32>
    tpu.vector_store %arg4[%c0_7, %c0_8, %c0_9], %12 {strides = array<i32>} : memref<1x2x128xf32, #tpu.memory_space<vmem>>, vector<1x2x128xf32>,
    return
  }
  func.func @transform_0(%arg0: i32) -> (i32, i32) {
    %c0_i32 = arith.constant 0 : i32
    %c0_i32_0 = arith.constant 0 : i32
    return %arg0, %c0_i32 : i32, i32
  }
  func.func @transform_1(%arg0: i32) -> (i32, i32) {
    %c0_i32 = arith.constant 0 : i32
    %c0_i32_0 = arith.constant 0 : i32
    %c0_i32_1 = arith.constant 0 : i32
    return %c0_i32, %c0_i32_0 : i32, i32
  }
  func.func @transform_2(%arg0: i32) -> (i32, i32) {
    %c0_i32 = arith.constant 0 : i32
    %c0_i32_0 = arith.constant 0 : i32
    return %arg0, %c0_i32 : i32, i32
  }
  func.func @transform_3(%arg0: i32) -> (i32, i32, i32) {
    %c0_i32 = arith.constant 0 : i32
    %c0_i32_0 = arith.constant 0 : i32
    %c0_i32_1 = arith.constant 0 : i32
    return %arg0, %c0_i32, %c0_i32_0 : i32, i32, i32
  }
}

module attributes {stable_mosaic.version = 11 : i64} {
  func.func @_mm_stats_kernel(%arg0: i32, %arg1: memref<512x288xbf16, #tpu.memory_space<vmem>>, %arg2: memref<288x128xbf16, #tpu.memory_space<vmem>>, %arg3: memref<512x128xf32, #tpu.memory_space<vmem>>, %arg4: memref<1x2x128xf32, #tpu.memory_space<vmem>>) attributes {dimension_semantics = [#tpu.dimension_semantics<parallel>], iteration_bounds = array<i64: 1>, scalar_prefetch = 0 : i64, scratch_operands = 0 : i64, tpu.core_type = #tpu.core_type<tc>, window_params = [{transform_indices = @transform_0, window_bounds = array<i64: 512, 288>}, {pipeline_mode = #tpu.pipeline_mode<synchronous>, transform_indices = @transform_1, window_bounds = array<i64: 288, 128>}, {transform_indices = @transform_2, window_bounds = array<i64: 512, 128>}, {transform_indices = @transform_3, window_bounds = array<i64: 1, 2, 128>}]} {
    %c0 = arith.constant 0 : index
    %c0_0 = arith.constant 0 : index
    %0 = vector.load %arg1[%c0, %c0_0] : memref<512x288xbf16, #tpu.memory_space<vmem>>, vector<512x288xbf16>
    %c0_1 = arith.constant 0 : index
    %c0_2 = arith.constant 0 : index
    %1 = vector.load %arg2[%c0_1, %c0_2] : memref<288x128xbf16, #tpu.memory_space<vmem>>, vector<288x128xbf16>
    %cst = arith.constant dense<0.000000e+00> : vector<512x128xf32>
    %2 = tpu.matmul %0, %1, %cst {dimension_numbers = #tpu.dot_dimension_numbers<[1], [0], [0], [1], [0, 0, 1, 1], [], []>} : vector<512x288xbf16>, vector<288x128xbf16>, vector<512x128xf32> -> vector<512x128xf32>
    %c0_3 = arith.constant 0 : index
    %c0_4 = arith.constant 0 : index
    %3 = vector.load %arg3[%c0_3, %c0_4] : memref<512x128xf32, #tpu.memory_space<vmem>>, vector<512x128xf32>
    tpu.vector_store %arg3[%c0_3, %c0_4], %2 {strides = array<i32>} : memref<512x128xf32, #tpu.memory_space<vmem>>, vector<512x128xf32>,
    %cst_5 = arith.constant dense<0.000000e+00> : vector<128xf32>
    %4 = vector.multi_reduction <add>, %2, %cst_5 [0] : vector<512x128xf32> to vector<128xf32>
    %5 = vector.shape_cast %4 : vector<128xf32> to vector<1x128xf32>
    %6 = arith.mulf %2, %2 : vector<512x128xf32>
    %cst_6 = arith.constant dense<0.000000e+00> : vector<128xf32>
    %7 = vector.multi_reduction <add>, %6, %cst_6 [0] : vector<512x128xf32> to vector<128xf32>
    %8 = vector.shape_cast %7 : vector<128xf32> to vector<1x128xf32>
    %9 = tpu.concatenate %5, %8 in 0 : vector<1x128xf32>, vector<1x128xf32> -> vector<2x128xf32>
    %c0_7 = arith.constant 0 : index
    %c0_8 = arith.constant 0 : index
    %c0_9 = arith.constant 0 : index
    %10 = vector.load %arg4[%c0_7, %c0_8, %c0_9] : memref<1x2x128xf32, #tpu.memory_space<vmem>>, vector<1x2x128xf32>
    %11 = vector.shape_cast %10 : vector<1x2x128xf32> to vector<2x128xf32>
    %12 = vector.shape_cast %9 : vector<2x128xf32> to vector<1x2x128xf32>
    tpu.vector_store %arg4[%c0_7, %c0_8, %c0_9], %12 {strides = array<i32>} : memref<1x2x128xf32, #tpu.memory_space<vmem>>, vector<1x2x128xf32>,
    return
  }
  func.func @transform_0(%arg0: i32) -> (i32, i32) {
    %c0_i32 = arith.constant 0 : i32
    %c0_i32_0 = arith.constant 0 : i32
    return %arg0, %c0_i32 : i32, i32
  }
  func.func @transform_1(%arg0: i32) -> (i32, i32) {
    %c0_i32 = arith.constant 0 : i32
    %c0_i32_0 = arith.constant 0 : i32
    %c0_i32_1 = arith.constant 0 : i32
    return %c0_i32, %c0_i32_0 : i32, i32
  }
  func.func @transform_2(%arg0: i32) -> (i32, i32) {
    %c0_i32 = arith.constant 0 : i32
    %c0_i32_0 = arith.constant 0 : i32
    return %arg0, %c0_i32 : i32, i32
  }
  func.func @transform_3(%arg0: i32) -> (i32, i32, i32) {
    %c0_i32 = arith.constant 0 : i32
    %c0_i32_0 = arith.constant 0 : i32
    %c0_i32_1 = arith.constant 0 : i32
    return %arg0, %c0_i32, %c0_i32_0 : i32, i32, i32
  }
}

module attributes {stable_mosaic.version = 11 : i64} {
  func.func @_residual_head_kernel(%arg0: i32, %arg1: memref<512x128xf32, #tpu.memory_space<vmem>>, %arg2: memref<1x128xf32, #tpu.memory_space<vmem>>, %arg3: memref<1x128xf32, #tpu.memory_space<vmem>>, %arg4: memref<512x128xbf16, #tpu.memory_space<vmem>>, %arg5: memref<512x128xbf16, #tpu.memory_space<vmem>>, %arg6: memref<128x256xbf16, #tpu.memory_space<vmem>>, %arg7: memref<128x256xbf16, #tpu.memory_space<vmem>>, %arg8: memref<128x256xbf16, #tpu.memory_space<vmem>>, %arg9: memref<1x256xf32, #tpu.memory_space<vmem>>, %arg10: memref<512x256xf32, #tpu.memory_space<vmem>>, %arg11: memref<512x256xf32, #tpu.memory_space<vmem>>) attributes {dimension_semantics = [#tpu.dimension_semantics<parallel>], iteration_bounds = array<i64: 1>, scalar_prefetch = 0 : i64, scratch_operands = 0 : i64, tpu.core_type = #tpu.core_type<tc>, window_params = [{transform_indices = @transform_0, window_bounds = array<i64: 512, 128>}, {pipeline_mode = #tpu.pipeline_mode<synchronous>, transform_indices = @transform_1, window_bounds = array<i64: 1, 128>}, {pipeline_mode = #tpu.pipeline_mode<synchronous>, transform_indices = @transform_2, window_bounds = array<i64: 1, 128>}, {transform_indices = @transform_3, window_bounds = array<i64: 512, 128>}, {transform_indices = @transform_4, window_bounds = array<i64: 512, 128>}, {pipeline_mode = #tpu.pipeline_mode<synchronous>, transform_indices = @transform_5, window_bounds = array<i64: 128, 256>}, {pipeline_mode = #tpu.pipeline_mode<synchronous>, transform_indices = @transform_6, window_bounds = array<i64: 128, 256>}, {pipeline_mode = #tpu.pipeline_mode<synchronous>, transform_indices = @transform_7, window_bounds = array<i64: 128, 256>}, {pipeline_mode = #tpu.pipeline_mode<synchronous>, transform_indices = @transform_8, window_bounds = array<i64: 1, 256>}, {transform_indices = @transform_9, window_bounds = array<i64: 512, 256>}, {transform_indices = @transform_10, window_bounds = array<i64: 512, 256>}]} {
    %c0 = arith.constant 0 : index
    %c0_0 = arith.constant 0 : index
    %0 = vector.load %arg1[%c0, %c0_0] : memref<512x128xf32, #tpu.memory_space<vmem>>, vector<512x128xf32>
    %c0_1 = arith.constant 0 : index
    %c0_2 = arith.constant 0 : index
    %1 = vector.load %arg2[%c0_1, %c0_2] : memref<1x128xf32, #tpu.memory_space<vmem>>, vector<1x128xf32>
    %2 = vector.broadcast %1 : vector<1x128xf32> to vector<512x128xf32>
    %3 = arith.mulf %0, %2 : vector<512x128xf32>
    %c0_3 = arith.constant 0 : index
    %c0_4 = arith.constant 0 : index
    %4 = vector.load %arg3[%c0_3, %c0_4] : memref<1x128xf32, #tpu.memory_space<vmem>>, vector<1x128xf32>
    %5 = vector.broadcast %4 : vector<1x128xf32> to vector<512x128xf32>
    %6 = arith.addf %3, %5 : vector<512x128xf32>
    %cst = arith.constant 0.000000e+00 : f32
    %7 = vector.broadcast %cst : f32 to vector<512x128xf32>
    %8 = arith.maximumf %6, %7 : vector<512x128xf32>
    %c0_5 = arith.constant 0 : index
    %c0_6 = arith.constant 0 : index
    %9 = vector.load %arg4[%c0_5, %c0_6] : memref<512x128xbf16, #tpu.memory_space<vmem>>, vector<512x128xbf16>
    %c0_7 = arith.constant 0 : index
    %c0_8 = arith.constant 0 : index
    %10 = vector.load %arg6[%c0_7, %c0_8] : memref<128x256xbf16, #tpu.memory_space<vmem>>, vector<128x256xbf16>
    %cst_9 = arith.constant dense<0.000000e+00> : vector<512x256xf32>
    %11 = tpu.matmul %9, %10, %cst_9 {dimension_numbers = #tpu.dot_dimension_numbers<[1], [0], [0], [1], [0, 0, 1, 1], [], []>} : vector<512x128xbf16>, vector<128x256xbf16>, vector<512x256xf32> -> vector<512x256xf32>
    %c0_10 = arith.constant 0 : index
    %c0_11 = arith.constant 0 : index
    %12 = vector.load %arg5[%c0_10, %c0_11] : memref<512x128xbf16, #tpu.memory_space<vmem>>, vector<512x128xbf16>
    %c0_12 = arith.constant 0 : index
    %c0_13 = arith.constant 0 : index
    %13 = vector.load %arg7[%c0_12, %c0_13] : memref<128x256xbf16, #tpu.memory_space<vmem>>, vector<128x256xbf16>
    %cst_14 = arith.constant dense<0.000000e+00> : vector<512x256xf32>
    %14 = tpu.matmul %12, %13, %cst_14 {dimension_numbers = #tpu.dot_dimension_numbers<[1], [0], [0], [1], [0, 0, 1, 1], [], []>} : vector<512x128xbf16>, vector<128x256xbf16>, vector<512x256xf32> -> vector<512x256xf32>
    %15 = arith.addf %11, %14 : vector<512x256xf32>
    %16 = arith.truncf %8 : vector<512x128xf32> to vector<512x128xbf16>
    %c0_15 = arith.constant 0 : index
    %c0_16 = arith.constant 0 : index
    %17 = vector.load %arg8[%c0_15, %c0_16] : memref<128x256xbf16, #tpu.memory_space<vmem>>, vector<128x256xbf16>
    %cst_17 = arith.constant dense<0.000000e+00> : vector<512x256xf32>
    %18 = tpu.matmul %16, %17, %cst_17 {dimension_numbers = #tpu.dot_dimension_numbers<[1], [0], [0], [1], [0, 0, 1, 1], [], []>} : vector<512x128xbf16>, vector<128x256xbf16>, vector<512x256xf32> -> vector<512x256xf32>
    %19 = arith.addf %15, %18 : vector<512x256xf32>
    %c0_18 = arith.constant 0 : index
    %c0_19 = arith.constant 0 : index
    %20 = vector.load %arg9[%c0_18, %c0_19] : memref<1x256xf32, #tpu.memory_space<vmem>>, vector<1x256xf32>
    %21 = vector.broadcast %20 : vector<1x256xf32> to vector<512x256xf32>
    %22 = arith.addf %19, %21 : vector<512x256xf32>
    %cst_20 = arith.constant 1.000000e+00 : f32
    %23 = vector.broadcast %cst_20 : f32 to vector<512x256xf32>
    %24 = arith.mulf %22, %23 : vector<512x256xf32>
    %c0_21 = arith.constant 0 : index
    %c0_22 = arith.constant 0 : index
    %25 = vector.load %arg10[%c0_21, %c0_22] : memref<512x256xf32, #tpu.memory_space<vmem>>, vector<512x256xf32>
    %26 = arith.addf %24, %25 : vector<512x256xf32>
    %cst_23 = arith.constant 0.000000e+00 : f32
    %27 = vector.broadcast %cst_23 : f32 to vector<512x256xf32>
    %28 = arith.maximumf %26, %27 : vector<512x256xf32>
    %c0_24 = arith.constant 0 : index
    %c0_25 = arith.constant 0 : index
    %29 = vector.load %arg11[%c0_24, %c0_25] : memref<512x256xf32, #tpu.memory_space<vmem>>, vector<512x256xf32>
    tpu.vector_store %arg11[%c0_24, %c0_25], %28 {strides = array<i32>} : memref<512x256xf32, #tpu.memory_space<vmem>>, vector<512x256xf32>,
    return
  }
  func.func @transform_0(%arg0: i32) -> (i32, i32) {
    %c0_i32 = arith.constant 0 : i32
    %c0_i32_0 = arith.constant 0 : i32
    return %arg0, %c0_i32 : i32, i32
  }
  func.func @transform_1(%arg0: i32) -> (i32, i32) {
    %c0_i32 = arith.constant 0 : i32
    %c0_i32_0 = arith.constant 0 : i32
    %c0_i32_1 = arith.constant 0 : i32
    return %c0_i32, %c0_i32_0 : i32, i32
  }
  func.func @transform_2(%arg0: i32) -> (i32, i32) {
    %c0_i32 = arith.constant 0 : i32
    %c0_i32_0 = arith.constant 0 : i32
    %c0_i32_1 = arith.constant 0 : i32
    return %c0_i32, %c0_i32_0 : i32, i32
  }
  func.func @transform_3(%arg0: i32) -> (i32, i32) {
    %c0_i32 = arith.constant 0 : i32
    %c0_i32_0 = arith.constant 0 : i32
    return %arg0, %c0_i32 : i32, i32
  }
  func.func @transform_4(%arg0: i32) -> (i32, i32) {
    %c0_i32 = arith.constant 0 : i32
    %c0_i32_0 = arith.constant 0 : i32
    return %arg0, %c0_i32 : i32, i32
  }
  func.func @transform_5(%arg0: i32) -> (i32, i32) {
    %c0_i32 = arith.constant 0 : i32
    %c0_i32_0 = arith.constant 0 : i32
    %c0_i32_1 = arith.constant 0 : i32
    return %c0_i32, %c0_i32_0 : i32, i32
  }
  func.func @transform_6(%arg0: i32) -> (i32, i32) {
    %c0_i32 = arith.constant 0 : i32
    %c0_i32_0 = arith.constant 0 : i32
    %c0_i32_1 = arith.constant 0 : i32
    return %c0_i32, %c0_i32_0 : i32, i32
  }
  func.func @transform_7(%arg0: i32) -> (i32, i32) {
    %c0_i32 = arith.constant 0 : i32
    %c0_i32_0 = arith.constant 0 : i32
    %c0_i32_1 = arith.constant 0 : i32
    return %c0_i32, %c0_i32_0 : i32, i32
  }
  func.func @transform_8(%arg0: i32) -> (i32, i32) {
    %c0_i32 = arith.constant 0 : i32
    %c0_i32_0 = arith.constant 0 : i32
    %c0_i32_1 = arith.constant 0 : i32
    return %c0_i32, %c0_i32_0 : i32, i32
  }
  func.func @transform_9(%arg0: i32) -> (i32, i32) {
    %c0_i32 = arith.constant 0 : i32
    %c0_i32_0 = arith.constant 0 : i32
    return %arg0, %c0_i32 : i32, i32
  }
  func.func @transform_10(%arg0: i32) -> (i32, i32) {
    %c0_i32 = arith.constant 0 : i32
    %c0_i32_0 = arith.constant 0 : i32
    return %arg0, %c0_i32 : i32, i32
  }
}

</mosaic_0001>

<bundles_post_ra>
// kernel: block35.7
= control target key start
LH: loop header
LB: loop body
LE: loop exit
PB: predicated region body
PF: predicated region fallthrough
CT: control target
= control target key end

     0   :  { %s1375_s0 = inlined_call_operand.vmem [shape: f32[512,128], index: 0, kind: input, shape index: {}]   ;;  %s1376_s1 = inlined_call_operand.vmem [shape: f32[1,128], index: 1, kind: input, shape index: {}]   ;;  %s1377_s2 = inlined_call_operand.vmem [shape: f32[1,128], index: 2, kind: input, shape index: {}]   ;;  %s1378_s3 = inlined_call_operand.vmem [shape: bf16[512,128], index: 3, kind: output, shape index: {}]  }
   0x1   :  { %v14_v0 = vld [vmem:[%s1375_s0] sm:$0xff]  ;;  %v15_v1 = vld [vmem:[%s1375_s0 + $0x8] sm:$0xff]  ;;  %v16_v6 = vld [vmem:[%s1375_s0 + $0x10] sm:$0xff] }
   0x2   :  { %v958_v2 = vld [vmem:[%s1376_s1] ss:$0 sm:$0xff]  ;;  %v17_v7 = vld [vmem:[%s1375_s0 + $0x18] sm:$0xff]  ;;  %v19_v11 = vld [vmem:[%s1375_s0 + $0x28] sm:$0xff] }
   0x3   :  { %v85_v3 = vmul.f32 %v958_v2, %v14_v0  ;;  %v86_v4 = vmul.f32 %v958_v2, %v15_v1  ;;  %v965_v5 = vld [vmem:[%s1377_s2] ss:$0 sm:$0xff]  ;;  %v87_v8 = vmul.f32 %v958_v2, %v16_v6  ;;  %v88_v9 = vmul.f32 %v958_v2, %v17_v7  ;;  %v20_v12 = vld [vmem:[%s1375_s0 + $0x30] sm:$0xff]  ;;  %v21_v17 = vld [vmem:[%s1375_s0 + $0x38] sm:$0xff] }
   0x4   :  { %v18_v10 = vld [vmem:[%s1375_s0 + $0x20] sm:$0xff]  ;;  %v90_v16 = vmul.f32 %v958_v2, %v19_v11  ;;  %v91_v20 = vmul.f32 %v958_v2, %v20_v12  ;;  %v92_v21 = vmul.f32 %v958_v2, %v21_v17  ;;  %v23_v27 = vld [vmem:[%s1375_s0 + $0x48] sm:$0xff]  ;;  %v24_v32 = vld [vmem:[%s1375_s0 + $0x50] sm:$0xff] }
   0x5   :  { %v156_v13 = vadd.f32 %v965_v5, %v85_v3  ;;  %v157_v14 = vadd.f32 %v965_v5, %v86_v4  ;;  %v89_v15 = vmul.f32 %v958_v2, %v18_v10  ;;  %v158_v18 = vadd.f32 %v965_v5, %v87_v8  ;;  %v22_v22 = vld [vmem:[%s1375_s0 + $0x40] sm:$0xff]  ;;  %v25_v33 = vld [vmem:[%s1375_s0 + $0x58] sm:$0xff]  ;;  %v27_v39 = vld [vmem:[%s1375_s0 + $0x68] sm:$0xff] }
   0x6   :  { %v159_v19 = vadd.f32 %v965_v5, %v88_v9  ;;  %v161_v26 = vadd.f32 %v965_v5, %v90_v16  ;;  %v162_v30 = vadd.f32 %v965_v5, %v91_v20  ;;  %v163_v31 = vadd.f32 %v965_v5, %v92_v21  ;;  %v26_v38 = vld [vmem:[%s1375_s0 + $0x60] sm:$0xff]  ;;  %v28_v44 = vld [vmem:[%s1375_s0 + $0x70] sm:$0xff]  ;;  %v29_v49 = vld [vmem:[%s1375_s0 + $0x78] sm:$0xff] }
   0x7   :  { %v220_v23 = vmax.f32 %v156_v13, 0.0  ;;  %v221_v24 = vmax.f32 %v157_v14, 0.0  ;;  %v160_v25 = vadd.f32 %v965_v5, %v89_v15  ;;  %v222_v28 = vmax.f32 %v158_v18, 0.0  ;;  %v30_v54 = vld [vmem:[%s1375_s0 + $0x80] sm:$0xff]  ;;  %v31_v63 = vld [vmem:[%s1375_s0 + $0x88] sm:$0xff]  ;;  %v32_v6 = vld [vmem:[%s1375_s0 + $0x90] sm:$0xff] }
   0x8   :  { %v223_v29 = vmax.f32 %v159_v19, 0.0  ;;  %v225_v36 = vmax.f32 %v161_v26, 0.0  ;;  %v93_v37 = vmul.f32 %v958_v2, %v22_v22  ;;  %v226_v41 = vmax.f32 %v162_v30, 0.0  ;;  %v33_v7 = vld [vmem:[%s1375_s0 + $0x98] sm:$0xff]  ;;  %v34_v12 = vld [vmem:[%s1375_s0 + $0xa0] sm:$0xff]  ;;  %v35_v13 = vld [vmem:[%s1375_s0 + $0xa8] sm:$0xff] }
   0x9   :  { %v741_v34 = vpack.c.bf16 %v221_v24, %v220_v23  ;;  %v224_v35 = vmax.f32 %v160_v25, 0.0  ;;  %v227_v42 = vmax.f32 %v163_v31, 0.0  ;;  %v94_v43 = vmul.f32 %v958_v2, %v23_v27  ;;  %v36_v18 = vld [vmem:[%s1375_s0 + $0xb0] sm:$0xff]  ;;  %v37_v23 = vld [vmem:[%s1375_s0 + $0xb8] sm:$0xff] }
   0xa   :  { %v746_v40 = vpack.c.bf16 %v223_v29, %v222_v28  ;;  %v164_v46 = vadd.f32 %v965_v5, %v93_v37  ;;  %v95_v47 = vmul.f32 %v958_v2, %v24_v32  ;;  %v96_v48 = vmul.f32 %v958_v2, %v25_v33  ;;  %v38_v28 = vld [vmem:[%s1375_s0 + $0xc0] sm:$0xff]  ;;  %v39_v37 = vld [vmem:[%s1375_s0 + $0xc8] sm:$0xff] }
   0xb   :  { %742 = vst [vmem:[%s1378_s3] sm:$0xff] %v741_v34   ;;  %v751_v45 = vpack.c.bf16 %v225_v36, %v224_v35  ;;  %v756_v50 = vpack.c.bf16 %v227_v42, %v226_v41  ;;  %v165_v51 = vadd.f32 %v965_v5, %v94_v43  ;;  %v97_v52 = vmul.f32 %v958_v2, %v26_v38  ;;  %v40_v42 = vld [vmem:[%s1375_s0 + $0xd0] sm:$0xff]  ;;  %v41_v43 = vld [vmem:[%s1375_s0 + $0xd8] sm:$0xff] }
   0xc   :  { %898 = vst [vmem:[%s1378_s3 + $0x8] sm:$0xff] %v746_v40   ;;  %v98_v53 = vmul.f32 %v958_v2, %v27_v39  ;;  %v228_v55 = vmax.f32 %v164_v46, 0.0  ;;  %v166_v56 = vadd.f32 %v965_v5, %v95_v47  ;;  %v167_v57 = vadd.f32 %v965_v5, %v96_v48  ;;  %v42_v48 = vld [vmem:[%s1375_s0 + $0xe0] sm:$0xff] }
   0xd   :  { %899 = vst [vmem:[%s1378_s3 + $0x10] sm:$0xff] %v751_v45   ;;  %v99_v58 = vmul.f32 %v958_v2, %v28_v44  ;;  %900 = vst [vmem:[%s1378_s3 + $0x18] sm:$0xff] %v756_v50   ;;  %v229_v59 = vmax.f32 %v165_v51, 0.0  ;;  %v168_v60 = vadd.f32 %v965_v5, %v97_v52  ;;  %v100_v62 = vmul.f32 %v958_v2, %v29_v49  ;;  %v43_v49 = vld [vmem:[%s1375_s0 + $0xe8] sm:$0xff] }
   0xe   :  { %v169_v61 = vadd.f32 %v965_v5, %v98_v53  ;;  %v230_v0 = vmax.f32 %v166_v56, 0.0  ;;  %v231_v1 = vmax.f32 %v167_v57, 0.0  ;;  %v101_v4 = vmul.f32 %v958_v2, %v30_v54  ;;  %v44_v54 = vld [vmem:[%s1375_s0 + $0xf0] sm:$0xff] }
   0xf   :  { %v170_v3 = vadd.f32 %v965_v5, %v99_v58  ;;  %v761_v8 = vpack.c.bf16 %v229_v59, %v228_v55  ;;  %v232_v9 = vmax.f32 %v168_v60, 0.0  ;;  %v171_v11 = vadd.f32 %v965_v5, %v100_v62  ;;  %v45_v59 = vld [vmem:[%s1375_s0 + $0xf8] sm:$0xff] }
  0x10   :  { %v233_v10 = vmax.f32 %v169_v61, 0.0  ;;  %v766_v14 = vpack.c.bf16 %v231_v1, %v230_v0  ;;  %v102_v16 = vmul.f32 %v958_v2, %v31_v63  ;;  %v172_v17 = vadd.f32 %v965_v5, %v101_v4  ;;  %v46_v0 = vld [vmem:[%s1375_s0 + $0x100] sm:$0xff] }
  0x11   :  { %v234_v15 = vmax.f32 %v170_v3, 0.0  ;;  %901 = vst [vmem:[%s1378_s3 + $0x20] sm:$0xff] %v761_v8   ;;  %v235_v20 = vmax.f32 %v171_v11, 0.0  ;;  %v103_v21 = vmul.f32 %v958_v2, %v32_v6  ;;  %v104_v22 = vmul.f32 %v958_v2, %v33_v7  ;;  %v47_v11 = vld [vmem:[%s1375_s0 + $0x108] sm:$0xff] }
  0x12   :  { %v771_v19 = vpack.c.bf16 %v233_v10, %v232_v9  ;;  %902 = vst [vmem:[%s1378_s3 + $0x28] sm:$0xff] %v766_v14   ;;  %v173_v24 = vadd.f32 %v965_v5, %v102_v16  ;;  %v236_v25 = vmax.f32 %v172_v17, 0.0  ;;  %v105_v26 = vmul.f32 %v958_v2, %v34_v12  ;;  %v48_v16 = vld [vmem:[%s1375_s0 + $0x110] sm:$0xff]  ;;  %v49_v17 = vld [vmem:[%s1375_s0 + $0x118] sm:$0xff] }
  0x13   :  { %v106_v27 = vmul.f32 %v958_v2, %v35_v13  ;;  %v776_v29 = vpack.c.bf16 %v235_v20, %v234_v15  ;;  %v174_v30 = vadd.f32 %v965_v5, %v103_v21  ;;  %v175_v31 = vadd.f32 %v965_v5, %v104_v22  ;;  %v50_v22 = vld [vmem:[%s1375_s0 + $0x120] sm:$0xff] }
  0x14   :  { %903 = vst [vmem:[%s1378_s3 + $0x30] sm:$0xff] %v771_v19   ;;  %v107_v32 = vmul.f32 %v958_v2, %v36_v18  ;;  %v237_v33 = vmax.f32 %v173_v24, 0.0  ;;  %v176_v34 = vadd.f32 %v965_v5, %v105_v26  ;;  %v108_v36 = vmul.f32 %v958_v2, %v37_v23  ;;  %v51_v23 = vld [vmem:[%s1375_s0 + $0x128] sm:$0xff] }
  0x15   :  { %v177_v35 = vadd.f32 %v965_v5, %v106_v27  ;;  %904 = vst [vmem:[%s1378_s3 + $0x38] sm:$0xff] %v776_v29   ;;  %v238_v38 = vmax.f32 %v174_v30, 0.0  ;;  %v239_v39 = vmax.f32 %v175_v31, 0.0  ;;  %v109_v41 = vmul.f32 %v958_v2, %v38_v28  ;;  %v52_v28 = vld [vmem:[%s1375_s0 + $0x130] sm:$0xff] }
  0x16   :  { %v178_v40 = vadd.f32 %v965_v5, %v107_v32  ;;  %v781_v44 = vpack.c.bf16 %v237_v33, %v236_v25  ;;  %v240_v45 = vmax.f32 %v176_v34, 0.0  ;;  %v179_v47 = vadd.f32 %v965_v5, %v108_v36  ;;  %v53_v33 = vld [vmem:[%s1375_s0 + $0x138] sm:$0xff] }
  0x17   :  { %v241_v46 = vmax.f32 %v177_v35, 0.0  ;;  %v786_v50 = vpack.c.bf16 %v239_v39, %v238_v38  ;;  %v110_v52 = vmul.f32 %v958_v2, %v39_v37  ;;  %v180_v53 = vadd.f32 %v965_v5, %v109_v41  ;;  %v54_v38 = vld [vmem:[%s1375_s0 + $0x140] sm:$0xff] }
  0x18   :  { %v242_v51 = vmax.f32 %v178_v40, 0.0  ;;  %905 = vst [vmem:[%s1378_s3 + $0x40] sm:$0xff] %v781_v44   ;;  %v243_v56 = vmax.f32 %v179_v47, 0.0  ;;  %v111_v57 = vmul.f32 %v958_v2, %v40_v42  ;;  %v112_v58 = vmul.f32 %v958_v2, %v41_v43  ;;  %v55_v47 = vld [vmem:[%s1375_s0 + $0x148] sm:$0xff] }
  0x19   :  { %v791_v55 = vpack.c.bf16 %v241_v46, %v240_v45  ;;  %906 = vst [vmem:[%s1378_s3 + $0x48] sm:$0xff] %v786_v50   ;;  %v181_v60 = vadd.f32 %v965_v5, %v110_v52  ;;  %v244_v61 = vmax.f32 %v180_v53, 0.0  ;;  %v113_v62 = vmul.f32 %v958_v2, %v42_v48  ;;  %v56_v52 = vld [vmem:[%s1375_s0 + $0x150] sm:$0xff]  ;;  %v57_v53 = vld [vmem:[%s1375_s0 + $0x158] sm:$0xff] }
  0x1a   :  { %v114_v63 = vmul.f32 %v958_v2, %v43_v49  ;;  %v796_v1 = vpack.c.bf16 %v243_v56, %v242_v51  ;;  %v182_v3 = vadd.f32 %v965_v5, %v111_v57  ;;  %v183_v4 = vadd.f32 %v965_v5, %v112_v58  ;;  %v58_v58 = vld [vmem:[%s1375_s0 + $0x160] sm:$0xff] }
  0x1b   :  { %907 = vst [vmem:[%s1378_s3 + $0x50] sm:$0xff] %v791_v55   ;;  %v115_v6 = vmul.f32 %v958_v2, %v44_v54  ;;  %v245_v7 = vmax.f32 %v181_v60, 0.0  ;;  %v184_v8 = vadd.f32 %v965_v5, %v113_v62  ;;  %v116_v10 = vmul.f32 %v958_v2, %v45_v59  ;;  %v59_v59 = vld [vmem:[%s1375_s0 + $0x168] sm:$0xff] }
  0x1c   :  { %v185_v9 = vadd.f32 %v965_v5, %v114_v63  ;;  %908 = vst [vmem:[%s1378_s3 + $0x58] sm:$0xff] %v796_v1   ;;  %v246_v12 = vmax.f32 %v182_v3, 0.0  ;;  %v247_v13 = vmax.f32 %v183_v4, 0.0  ;;  %v117_v15 = vmul.f32 %v958_v2, %v46_v0  ;;  %v60_v0 = vld [vmem:[%s1375_s0 + $0x170] sm:$0xff] }
  0x1d   :  { %v186_v14 = vadd.f32 %v965_v5, %v115_v6  ;;  %v801_v18 = vpack.c.bf16 %v245_v7, %v244_v61  ;;  %v248_v19 = vmax.f32 %v184_v8, 0.0  ;;  %v187_v21 = vadd.f32 %v965_v5, %v116_v10  ;;  %v61_v7 = vld [vmem:[%s1375_s0 + $0x178] sm:$0xff] }
  0x1e   :  { %v249_v20 = vmax.f32 %v185_v9, 0.0  ;;  %v806_v24 = vpack.c.bf16 %v247_v13, %v246_v12  ;;  %v118_v26 = vmul.f32 %v958_v2, %v47_v11  ;;  %v188_v27 = vadd.f32 %v965_v5, %v117_v15  ;;  %v62_v12 = vld [vmem:[%s1375_s0 + $0x180] sm:$0xff] }
  0x1f   :  { %v250_v25 = vmax.f32 %v186_v14, 0.0  ;;  %909 = vst [vmem:[%s1378_s3 + $0x60] sm:$0xff] %v801_v18   ;;  %v251_v30 = vmax.f32 %v187_v21, 0.0  ;;  %v119_v31 = vmul.f32 %v958_v2, %v48_v16  ;;  %v120_v32 = vmul.f32 %v958_v2, %v49_v17  ;;  %v63_v21 = vld [vmem:[%s1375_s0 + $0x188] sm:$0xff] }
  0x20   :  { %v811_v29 = vpack.c.bf16 %v249_v20, %v248_v19  ;;  %910 = vst [vmem:[%s1378_s3 + $0x68] sm:$0xff] %v806_v24   ;;  %v189_v34 = vadd.f32 %v965_v5, %v118_v26  ;;  %v252_v35 = vmax.f32 %v188_v27, 0.0  ;;  %v121_v36 = vmul.f32 %v958_v2, %v50_v22  ;;  %v64_v26 = vld [vmem:[%s1375_s0 + $0x190] sm:$0xff]  ;;  %v65_v27 = vld [vmem:[%s1375_s0 + $0x198] sm:$0xff] }
  0x21   :  { %v122_v37 = vmul.f32 %v958_v2, %v51_v23  ;;  %v816_v39 = vpack.c.bf16 %v251_v30, %v250_v25  ;;  %v190_v40 = vadd.f32 %v965_v5, %v119_v31  ;;  %v191_v41 = vadd.f32 %v965_v5, %v120_v32  ;;  %v66_v32 = vld [vmem:[%s1375_s0 + $0x1a0] sm:$0xff] }
  0x22   :  { %911 = vst [vmem:[%s1378_s3 + $0x70] sm:$0xff] %v811_v29   ;;  %v123_v42 = vmul.f32 %v958_v2, %v52_v28  ;;  %v253_v43 = vmax.f32 %v189_v34, 0.0  ;;  %v192_v44 = vadd.f32 %v965_v5, %v121_v36  ;;  %v124_v46 = vmul.f32 %v958_v2, %v53_v33  ;;  %v67_v33 = vld [vmem:[%s1375_s0 + $0x1a8] sm:$0xff] }
  0x23   :  { %v193_v45 = vadd.f32 %v965_v5, %v122_v37  ;;  %912 = vst [vmem:[%s1378_s3 + $0x78] sm:$0xff] %v816_v39   ;;  %v254_v48 = vmax.f32 %v190_v40, 0.0  ;;  %v255_v49 = vmax.f32 %v191_v41, 0.0  ;;  %v125_v51 = vmul.f32 %v958_v2, %v54_v38  ;;  %v68_v38 = vld [vmem:[%s1375_s0 + $0x1b0] sm:$0xff] }
  0x24   :  { %v194_v50 = vadd.f32 %v965_v5, %v123_v42  ;;  %v821_v54 = vpack.c.bf16 %v253_v43, %v252_v35  ;;  %v256_v55 = vmax.f32 %v192_v44, 0.0  ;;  %v195_v57 = vadd.f32 %v965_v5, %v124_v46  ;;  %v69_v43 = vld [vmem:[%s1375_s0 + $0x1b8] sm:$0xff] }
  0x25   :  { %v257_v56 = vmax.f32 %v193_v45, 0.0  ;;  %v826_v60 = vpack.c.bf16 %v255_v49, %v254_v48  ;;  %v126_v62 = vmul.f32 %v958_v2, %v55_v47  ;;  %v196_v63 = vadd.f32 %v965_v5, %v125_v51  ;;  %v70_v48 = vld [vmem:[%s1375_s0 + $0x1c0] sm:$0xff] }
  0x26   :  { %v258_v61 = vmax.f32 %v194_v50, 0.0  ;;  %913 = vst [vmem:[%s1378_s3 + $0x80] sm:$0xff] %v821_v54   ;;  %v259_v3 = vmax.f32 %v195_v57, 0.0  ;;  %v127_v4 = vmul.f32 %v958_v2, %v56_v52  ;;  %v128_v6 = vmul.f32 %v958_v2, %v57_v53  ;;  %v71_v57 = vld [vmem:[%s1375_s0 + $0x1c8] sm:$0xff] }
  0x27   :  { %v831_v1 = vpack.c.bf16 %v257_v56, %v256_v55  ;;  %914 = vst [vmem:[%s1378_s3 + $0x88] sm:$0xff] %v826_v60   ;;  %v197_v8 = vadd.f32 %v965_v5, %v126_v62  ;;  %v260_v9 = vmax.f32 %v196_v63, 0.0  ;;  %v129_v10 = vmul.f32 %v958_v2, %v58_v58  ;;  %v72_v62 = vld [vmem:[%s1375_s0 + $0x1d0] sm:$0xff]  ;;  %v73_v63 = vld [vmem:[%s1375_s0 + $0x1d8] sm:$0xff] }
  0x28   :  { %v130_v11 = vmul.f32 %v958_v2, %v59_v59  ;;  %v836_v13 = vpack.c.bf16 %v259_v3, %v258_v61  ;;  %v198_v14 = vadd.f32 %v965_v5, %v127_v4  ;;  %v199_v15 = vadd.f32 %v965_v5, %v128_v6  ;;  %v74_v6 = vld [vmem:[%s1375_s0 + $0x1e0] sm:$0xff] }
  0x29   :  { %915 = vst [vmem:[%s1378_s3 + $0x90] sm:$0xff] %v831_v1   ;;  %v131_v16 = vmul.f32 %v958_v2, %v60_v0  ;;  %v261_v17 = vmax.f32 %v197_v8, 0.0  ;;  %v200_v18 = vadd.f32 %v965_v5, %v129_v10  ;;  %v132_v20 = vmul.f32 %v958_v2, %v61_v7  ;;  %v75_v7 = vld [vmem:[%s1375_s0 + $0x1e8] sm:$0xff] }
  0x2a   :  { %v201_v19 = vadd.f32 %v965_v5, %v130_v11  ;;  %916 = vst [vmem:[%s1378_s3 + $0x98] sm:$0xff] %v836_v13   ;;  %v262_v22 = vmax.f32 %v198_v14, 0.0  ;;  %v263_v23 = vmax.f32 %v199_v15, 0.0  ;;  %v133_v25 = vmul.f32 %v958_v2, %v62_v12  ;;  %v76_v12 = vld [vmem:[%s1375_s0 + $0x1f0] sm:$0xff] }
  0x2b   :  { %v202_v24 = vadd.f32 %v965_v5, %v131_v16  ;;  %v841_v28 = vpack.c.bf16 %v261_v17, %v260_v9  ;;  %v264_v29 = vmax.f32 %v200_v18, 0.0  ;;  %v203_v31 = vadd.f32 %v965_v5, %v132_v20  ;;  %v77_v17 = vld [vmem:[%s1375_s0 + $0x1f8] sm:$0xff] }
  0x2c   :  { %v265_v30 = vmax.f32 %v201_v19, 0.0  ;;  %v846_v34 = vpack.c.bf16 %v263_v23, %v262_v22  ;;  %v134_v36 = vmul.f32 %v958_v2, %v63_v21  ;;  %v204_v37 = vadd.f32 %v965_v5, %v133_v25 }
  0x2d   :  { %v266_v35 = vmax.f32 %v202_v24, 0.0  ;;  %917 = vst [vmem:[%s1378_s3 + $0xa0] sm:$0xff] %v841_v28   ;;  %v267_v40 = vmax.f32 %v203_v31, 0.0  ;;  %v135_v41 = vmul.f32 %v958_v2, %v64_v26  ;;  %v136_v42 = vmul.f32 %v958_v2, %v65_v27 }
  0x2e   :  { %v851_v39 = vpack.c.bf16 %v265_v30, %v264_v29  ;;  %918 = vst [vmem:[%s1378_s3 + $0xa8] sm:$0xff] %v846_v34   ;;  %v205_v44 = vadd.f32 %v965_v5, %v134_v36  ;;  %v268_v45 = vmax.f32 %v204_v37, 0.0  ;;  %v137_v46 = vmul.f32 %v958_v2, %v66_v32 }
  0x2f   :  { %v138_v47 = vmul.f32 %v958_v2, %v67_v33  ;;  %v856_v49 = vpack.c.bf16 %v267_v40, %v266_v35  ;;  %v206_v50 = vadd.f32 %v965_v5, %v135_v41  ;;  %v207_v51 = vadd.f32 %v965_v5, %v136_v42 }
  0x30   :  { %919 = vst [vmem:[%s1378_s3 + $0xb0] sm:$0xff] %v851_v39   ;;  %v139_v52 = vmul.f32 %v958_v2, %v68_v38  ;;  %v269_v53 = vmax.f32 %v205_v44, 0.0  ;;  %v208_v54 = vadd.f32 %v965_v5, %v137_v46  ;;  %v140_v56 = vmul.f32 %v958_v2, %v69_v43 }
  0x31   :  { %v209_v55 = vadd.f32 %v965_v5, %v138_v47  ;;  %920 = vst [vmem:[%s1378_s3 + $0xb8] sm:$0xff] %v856_v49   ;;  %v270_v58 = vmax.f32 %v206_v50, 0.0  ;;  %v271_v59 = vmax.f32 %v207_v51, 0.0  ;;  %v141_v61 = vmul.f32 %v958_v2, %v70_v48 }
  0x32   :  { %v210_v60 = vadd.f32 %v965_v5, %v139_v52  ;;  %v861_v0 = vpack.c.bf16 %v269_v53, %v268_v45  ;;  %v272_v1 = vmax.f32 %v208_v54, 0.0  ;;  %v211_v4 = vadd.f32 %v965_v5, %v140_v56 }
  0x33   :  { %v273_v3 = vmax.f32 %v209_v55, 0.0  ;;  %v866_v8 = vpack.c.bf16 %v271_v59, %v270_v58  ;;  %v142_v10 = vmul.f32 %v958_v2, %v71_v57  ;;  %v212_v11 = vadd.f32 %v965_v5, %v141_v61 }
  0x34   :  { %v274_v9 = vmax.f32 %v210_v60, 0.0  ;;  %921 = vst [vmem:[%s1378_s3 + $0xc0] sm:$0xff] %v861_v0   ;;  %v275_v14 = vmax.f32 %v211_v4, 0.0  ;;  %v143_v15 = vmul.f32 %v958_v2, %v72_v62  ;;  %v144_v16 = vmul.f32 %v958_v2, %v73_v63 }
  0x35   :  { %v871_v13 = vpack.c.bf16 %v273_v3, %v272_v1  ;;  %922 = vst [vmem:[%s1378_s3 + $0xc8] sm:$0xff] %v866_v8   ;;  %v213_v18 = vadd.f32 %v965_v5, %v142_v10  ;;  %v276_v19 = vmax.f32 %v212_v11, 0.0  ;;  %v145_v20 = vmul.f32 %v958_v2, %v74_v6 }
  0x36   :  { %v146_v21 = vmul.f32 %v958_v2, %v75_v7  ;;  %v876_v22 = vpack.c.bf16 %v275_v14, %v274_v9  ;;  %v214_v23 = vadd.f32 %v965_v5, %v143_v15  ;;  %v215_v24 = vadd.f32 %v965_v5, %v144_v16 }
  0x37   :  { %923 = vst [vmem:[%s1378_s3 + $0xd0] sm:$0xff] %v871_v13   ;;  %v147_v25 = vmul.f32 %v958_v2, %v76_v12  ;;  %v277_v26 = vmax.f32 %v213_v18, 0.0  ;;  %v216_v27 = vadd.f32 %v965_v5, %v145_v20  ;;  %v148_v29 = vmul.f32 %v958_v2, %v77_v17 }
  0x38   :  { %v217_v28 = vadd.f32 %v965_v5, %v146_v21  ;;  %924 = vst [vmem:[%s1378_s3 + $0xd8] sm:$0xff] %v876_v22   ;;  %v278_v30 = vmax.f32 %v214_v23, 0.0  ;;  %v279_v31 = vmax.f32 %v215_v24, 0.0 }
  0x39   :  { %v218_v32 = vadd.f32 %v965_v5, %v147_v25  ;;  %v881_v33 = vpack.c.bf16 %v277_v26, %v276_v19  ;;  %v280_v34 = vmax.f32 %v216_v27, 0.0  ;;  %v219_v36 = vadd.f32 %v965_v5, %v148_v29 }
  0x3a   :  { %v281_v35 = vmax.f32 %v217_v28, 0.0  ;;  %v886_v37 = vpack.c.bf16 %v279_v31, %v278_v30 }
  0x3b   :  { %v282_v38 = vmax.f32 %v218_v32, 0.0  ;;  %925 = vst [vmem:[%s1378_s3 + $0xe0] sm:$0xff] %v881_v33   ;;  %v283_v39 = vmax.f32 %v219_v36, 0.0 }
  0x3c   :  { %v891_v2 = vpack.c.bf16 %v281_v35, %v280_v34  ;;  %926 = vst [vmem:[%s1378_s3 + $0xe8] sm:$0xff] %v886_v37  }
  0x3d   :  { %v896_v40 = vpack.c.bf16 %v283_v39, %v282_v38 }
  0x3e   :  { %927 = vst [vmem:[%s1378_s3 + $0xf0] sm:$0xff] %v891_v2  }
  0x3f   :  { %928 = vst [vmem:[%s1378_s3 + $0xf8] sm:$0xff] %v896_v40  }

// kernel: block35.6
= control target key start
LH: loop header
LB: loop body
LE: loop exit
PB: predicated region body
PF: predicated region fallthrough
CT: control target
= control target key end

     0   :  { %v1317_v0 = vmov 0   ;;  %vm1081_vm0 = vcmask 1040384   ;;  %s1997_s1 = inlined_call_operand.vmem [shape: bf16[256,128], index: 1, kind: input, shape index: {}]   ;;  %s1998_s0 = inlined_call_operand.vmem [shape: bf16[512,256], index: 0, kind: input, shape index: {}]   ;;  %s1999_s2 = inlined_call_operand.vmem [shape: f32[512,128], index: 2, kind: output, shape index: {0}]   ;;  %s2000_s3 = inlined_call_operand.vmem [shape: f32[1,2,128], index: 3, kind: output, shape index: {1}]  }
   0x1   :  { %526 = vmatprep.subr.bf16.mxu0 %v1317_v0  ;;  %v1205_v1 = vld [vmem:[%s1997_s1] sm:$0xff]   ;;  %1172 = vmatprep.subr.bf16.mxu1 %v1317_v0  ;;  %v1206_v2 = vld [vmem:[%s1997_s1 + $0x8] sm:$0xff]   ;;  %v1207_v3 = vld [vmem:[%s1997_s1 + $0x10] sm:$0xff]  }
   0x2   :  { %527 = vmatpush1.bf16.msra.mxu0 %v1205_v1  ;;  %1188 = vmatpush1.bf16.msra.mxu1 %v1205_v1  ;;  %v1208_v4 = vld [vmem:[%s1997_s1 + $0x18] sm:$0xff]   ;;  %v1209_v5 = vld [vmem:[%s1997_s1 + $0x20] sm:$0xff]   ;;  %v1210_v7 = vld [vmem:[%s1997_s1 + $0x28] sm:$0xff]  }
   0x3   :  { %528 = vmatprep.subr.bf16.mxu0 %v1317_v0  ;;  %1173 = vmatprep.subr.bf16.mxu1 %v1317_v0  ;;  %v1223_v6 = vld [vmem:[%s1998_s0 + $0x4] ss:$8 sps:$4 sm:$0xff]   ;;  %v1211_v8 = vld [vmem:[%s1997_s1 + $0x30] sm:$0xff]   ;;  %v1212_v9 = vld [vmem:[%s1997_s1 + $0x38] sm:$0xff]  }
   0x4   :  { %558 = vmatprep.mubr.bf16.mxu0 %v1223_v6  ;;  %v1247_v10 = vld [vmem:[%s1998_s0 + $0x104] ss:$8 sps:$4 sm:$0xff]   ;;  %v1215_v13 = vld [vmem:[%s1997_s1 + $0x50] sm:$0xff]   ;;  %v1216_v14 = vld [vmem:[%s1997_s1 + $0x58] sm:$0xff]  }
   0x5   :  { %686 = vmatprep.mubr.bf16.mxu1 %v1247_v10  ;;  %v1213_v11 = vld [vmem:[%s1997_s1 + $0x40] sm:$0xff]   ;;  %v1214_v12 = vld [vmem:[%s1997_s1 + $0x48] sm:$0xff]   ;;  %v1219_v17 = vld [vmem:[%s1997_s1 + $0x70] sm:$0xff]  }
   0x6   :  { %529 = vmatpush1.bf16.msra.mxu0 %v1206_v2  ;;  %1189 = vmatpush1.bf16.msra.mxu1 %v1206_v2  ;;  %v1217_v15 = vld [vmem:[%s1997_s1 + $0x60] sm:$0xff]   ;;  %v1218_v16 = vld [vmem:[%s1997_s1 + $0x68] sm:$0xff]   ;;  %v1220_v18 = vld [vmem:[%s1997_s1 + $0x78] sm:$0xff]  }
   0x7   :  { %530 = vmatprep.subr.bf16.mxu0 %v1317_v0  ;;  %1174 = vmatprep.subr.bf16.mxu1 %v1317_v0  ;;  %v1221_v19 = vld [vmem:[%s1998_s0] ss:$8 sps:$4 sm:$0xff]   ;;  %v1224_v21 = vld [vmem:[%s1998_s0 + $0x14] ss:$8 sps:$4 sm:$0xff]   ;;  %v1226_v23 = vld [vmem:[%s1998_s0 + $0x10] ss:$8 sps:$4 sm:$0xff]  }
   0x8   :  { %v1245_v20 = vld [vmem:[%s1998_s0 + $0x100] ss:$8 sps:$4 sm:$0xff]   ;;  %v1251_v22 = vld [vmem:[%s1998_s0 + $0x114] ss:$8 sps:$4 sm:$0xff]   ;;  %v1253_v24 = vld [vmem:[%s1998_s0 + $0x110] ss:$8 sps:$4 sm:$0xff]  }
   0x9   :  { %v1227_v25 = vld [vmem:[%s1998_s0 + $0x24] ss:$8 sps:$4 sm:$0xff]   ;;  %v1229_v27 = vld [vmem:[%s1998_s0 + $0x20] ss:$8 sps:$4 sm:$0xff]   ;;  %v1230_v29 = vld [vmem:[%s1998_s0 + $0x34] ss:$8 sps:$4 sm:$0xff]  }
   0xa   :  { %531 = vmatpush1.bf16.msra.mxu0 %v1207_v3  ;;  %1190 = vmatpush1.bf16.msra.mxu1 %v1207_v3  ;;  %v1257_v26 = vld [vmem:[%s1998_s0 + $0x124] ss:$8 sps:$4 sm:$0xff]   ;;  %v1259_v28 = vld [vmem:[%s1998_s0 + $0x120] ss:$8 sps:$4 sm:$0xff]   ;;  %v1263_v30 = vld [vmem:[%s1998_s0 + $0x134] ss:$8 sps:$4 sm:$0xff]  }
   0xb   :  { %532 = vmatprep.subr.bf16.mxu0 %v1317_v0  ;;  %1175 = vmatprep.subr.bf16.mxu1 %v1317_v0  ;;  %v1232_v31 = vld [vmem:[%s1998_s0 + $0x30] ss:$8 sps:$4 sm:$0xff]   ;;  %v1233_v33 = vld [vmem:[%s1998_s0 + $0x44] ss:$8 sps:$4 sm:$0xff]   ;;  %v1235_v35 = vld [vmem:[%s1998_s0 + $0x40] ss:$8 sps:$4 sm:$0xff]  }
   0xc   :  { %v1265_v32 = vld [vmem:[%s1998_s0 + $0x130] ss:$8 sps:$4 sm:$0xff]   ;;  %v1269_v34 = vld [vmem:[%s1998_s0 + $0x144] ss:$8 sps:$4 sm:$0xff]   ;;  %v1271_v36 = vld [vmem:[%s1998_s0 + $0x140] ss:$8 sps:$4 sm:$0xff]  }
   0xd   :  { %v1236_v37 = vld [vmem:[%s1998_s0 + $0x54] ss:$8 sps:$4 sm:$0xff]   ;;  %v1238_v39 = vld [vmem:[%s1998_s0 + $0x50] ss:$8 sps:$4 sm:$0xff]   ;;  %v1239_v41 = vld [vmem:[%s1998_s0 + $0x64] ss:$8 sps:$4 sm:$0xff]  }
   0xe   :  { %533 = vmatpush1.bf16.msra.mxu0 %v1208_v4  ;;  %1191 = vmatpush1.bf16.msra.mxu1 %v1208_v4  ;;  %v1275_v38 = vld [vmem:[%s1998_s0 + $0x154] ss:$8 sps:$4 sm:$0xff]   ;;  %v1277_v40 = vld [vmem:[%s1998_s0 + $0x150] ss:$8 sps:$4 sm:$0xff]   ;;  %v1281_v42 = vld [vmem:[%s1998_s0 + $0x164] ss:$8 sps:$4 sm:$0xff]  }
   0xf   :  { %534 = vmatprep.subr.bf16.mxu0 %v1317_v0  ;;  %1176 = vmatprep.subr.bf16.mxu1 %v1317_v0  ;;  %v1241_v43 = vld [vmem:[%s1998_s0 + $0x60] ss:$8 sps:$4 sm:$0xff]   ;;  %v1242_v45 = vld [vmem:[%s1998_s0 + $0x74] ss:$8 sps:$4 sm:$0xff]   ;;  %v1244_v47 = vld [vmem:[%s1998_s0 + $0x70] ss:$8 sps:$4 sm:$0xff]  }
  0x10   :  { %v1283_v44 = vld [vmem:[%s1998_s0 + $0x160] ss:$8 sps:$4 sm:$0xff]   ;;  %v1287_v46 = vld [vmem:[%s1998_s0 + $0x174] ss:$8 sps:$4 sm:$0xff]   ;;  %v1289_v48 = vld [vmem:[%s1998_s0 + $0x170] ss:$8 sps:$4 sm:$0xff]  }
  0x11   :  { %v1248_v49 = vld [vmem:[%s1998_s0 + $0x84] ss:$8 sps:$4 sm:$0xff]   ;;  %v1250_v51 = vld [vmem:[%s1998_s0 + $0x80] ss:$8 sps:$4 sm:$0xff]   ;;  %v1254_v53 = vld [vmem:[%s1998_s0 + $0x94] ss:$8 sps:$4 sm:$0xff]  }
  0x12   :  { %535 = vmatpush1.bf16.msra.mxu0 %v1209_v5  ;;  %1192 = vmatpush1.bf16.msra.mxu1 %v1209_v5  ;;  %v1293_v50 = vld [vmem:[%s1998_s0 + $0x184] ss:$8 sps:$4 sm:$0xff]   ;;  %v1295_v52 = vld [vmem:[%s1998_s0 + $0x180] ss:$8 sps:$4 sm:$0xff]   ;;  %v1296_v54 = vld [vmem:[%s1998_s0 + $0x194] ss:$8 sps:$4 sm:$0xff]  }
  0x13   :  { %536 = vmatprep.subr.bf16.mxu0 %v1317_v0  ;;  %1177 = vmatprep.subr.bf16.mxu1 %v1317_v0  ;;  %v1256_v55 = vld [vmem:[%s1998_s0 + $0x90] ss:$8 sps:$4 sm:$0xff]   ;;  %v1260_v57 = vld [vmem:[%s1998_s0 + $0xa4] ss:$8 sps:$4 sm:$0xff]   ;;  %v1262_v59 = vld [vmem:[%s1998_s0 + $0xa0] ss:$8 sps:$4 sm:$0xff]  }
  0x14   :  { %v1298_v56 = vld [vmem:[%s1998_s0 + $0x190] ss:$8 sps:$4 sm:$0xff]   ;;  %v1299_v58 = vld [vmem:[%s1998_s0 + $0x1a4] ss:$8 sps:$4 sm:$0xff]   ;;  %v1301_v60 = vld [vmem:[%s1998_s0 + $0x1a0] ss:$8 sps:$4 sm:$0xff]  }
  0x15   :  { %v1266_v61 = vld [vmem:[%s1998_s0 + $0xb4] ss:$8 sps:$4 sm:$0xff]   ;;  %v1268_v63 = vld [vmem:[%s1998_s0 + $0xb0] ss:$8 sps:$4 sm:$0xff]   ;;  %v1272_v1 = vld [vmem:[%s1998_s0 + $0xc4] ss:$8 sps:$4 sm:$0xff]  }
  0x16   :  { %537 = vmatpush1.bf16.msra.mxu0 %v1210_v7  ;;  %1193 = vmatpush1.bf16.msra.mxu1 %v1210_v7  ;;  %v1302_v62 = vld [vmem:[%s1998_s0 + $0x1b4] ss:$8 sps:$4 sm:$0xff]   ;;  %v1305_v2 = vld [vmem:[%s1998_s0 + $0x1c4] ss:$8 sps:$4 sm:$0xff]   ;;  %v1274_v3 = vld [vmem:[%s1998_s0 + $0xc0] ss:$8 sps:$4 sm:$0xff]  }
  0x17   :  { %538 = vmatprep.subr.bf16.mxu0 %v1317_v0  ;;  %1178 = vmatprep.subr.bf16.mxu1 %v1317_v0  ;;  %v1307_v4 = vld [vmem:[%s1998_s0 + $0x1c0] ss:$8 sps:$4 sm:$0xff]   ;;  %v1278_v5 = vld [vmem:[%s1998_s0 + $0xd4] ss:$8 sps:$4 sm:$0xff]   ;;  %v1280_v7 = vld [vmem:[%s1998_s0 + $0xd0] ss:$8 sps:$4 sm:$0xff]  }
  0x18   :  { %v1308_v6 = vld [vmem:[%s1998_s0 + $0x1d4] ss:$8 sps:$4 sm:$0xff]   ;;  %v1311_v10 = vld [vmem:[%s1998_s0 + $0x1e4] ss:$8 sps:$4 sm:$0xff]  }
  0x1a   :  { %539 = vmatpush1.bf16.msra.mxu0 %v1211_v8  ;;  %1194 = vmatpush1.bf16.msra.mxu1 %v1211_v8  ;;  %v1310_v8 = vld [vmem:[%s1998_s0 + $0x1d0] ss:$8 sps:$4 sm:$0xff]  }
  0x1b   :  { %540 = vmatprep.subr.bf16.mxu0 %v1317_v0  ;;  %1179 = vmatprep.subr.bf16.mxu1 %v1317_v0 }
  0x1e   :  { %541 = vmatpush1.bf16.msra.mxu0 %v1212_v9  ;;  %1195 = vmatpush1.bf16.msra.mxu1 %v1212_v9  ;;  %v1284_v9 = vld [vmem:[%s1998_s0 + $0xe4] ss:$8 sps:$4 sm:$0xff]  }
  0x1f   :  { %542 = vmatprep.subr.bf16.mxu0 %v1317_v0  ;;  %1180 = vmatprep.subr.bf16.mxu1 %v1317_v0 }
  0x22   :  { %543 = vmatpush1.bf16.msra.mxu0 %v1213_v11  ;;  %1196 = vmatpush1.bf16.msra.mxu1 %v1213_v11  ;;  %v1286_v11 = vld [vmem:[%s1998_s0 + $0xe0] ss:$8 sps:$4 sm:$0xff]  }
  0x23   :  { %544 = vmatprep.subr.bf16.mxu0 %v1317_v0  ;;  %1181 = vmatprep.subr.bf16.mxu1 %v1317_v0 }
  0x26   :  { %545 = vmatpush1.bf16.msra.mxu0 %v1214_v12  ;;  %1197 = vmatpush1.bf16.msra.mxu1 %v1214_v12  ;;  %v1313_v12 = vld [vmem:[%s1998_s0 + $0x1e0] ss:$8 sps:$4 sm:$0xff]  }
  0x27   :  { %546 = vmatprep.subr.bf16.mxu0 %v1317_v0  ;;  %1182 = vmatprep.subr.bf16.mxu1 %v1317_v0 }
  0x2a   :  { %547 = vmatpush1.bf16.msra.mxu0 %v1215_v13  ;;  %1198 = vmatpush1.bf16.msra.mxu1 %v1215_v13  ;;  %v1290_v13 = vld [vmem:[%s1998_s0 + $0xf4] ss:$8 sps:$4 sm:$0xff]  }
  0x2b   :  { %548 = vmatprep.subr.bf16.mxu0 %v1317_v0  ;;  %1183 = vmatprep.subr.bf16.mxu1 %v1317_v0 }
  0x2e   :  { %549 = vmatpush1.bf16.msra.mxu0 %v1216_v14  ;;  %1199 = vmatpush1.bf16.msra.mxu1 %v1216_v14  ;;  %v1314_v14 = vld [vmem:[%s1998_s0 + $0x1f4] ss:$8 sps:$4 sm:$0xff]  }
  0x2f   :  { %550 = vmatprep.subr.bf16.mxu0 %v1317_v0  ;;  %1184 = vmatprep.subr.bf16.mxu1 %v1317_v0 }
  0x32   :  { %551 = vmatpush1.bf16.msra.mxu0 %v1217_v15  ;;  %1200 = vmatpush1.bf16.msra.mxu1 %v1217_v15  ;;  %v1292_v15 = vld [vmem:[%s1998_s0 + $0xf0] ss:$8 sps:$4 sm:$0xff]  }
  0x33   :  { %552 = vmatprep.subr.bf16.mxu0 %v1317_v0  ;;  %1185 = vmatprep.subr.bf16.mxu1 %v1317_v0 }
  0x36   :  { %553 = vmatpush1.bf16.msra.mxu0 %v1218_v16  ;;  %1201 = vmatpush1.bf16.msra.mxu1 %v1218_v16  ;;  %v1316_v16 = vld [vmem:[%s1998_s0 + $0x1f0] ss:$8 sps:$4 sm:$0xff]  }
  0x37   :  { %554 = vmatprep.subr.bf16.mxu0 %v1317_v0  ;;  %1186 = vmatprep.subr.bf16.mxu1 %v1317_v0 }
  0x3a   :  { %555 = vmatpush1.bf16.msra.mxu0 %v1219_v17  ;;  %1202 = vmatpush1.bf16.msra.mxu1 %v1219_v17 }
  0x3b   :  { %556 = vmatprep.subr.bf16.mxu0 %v1317_v0  ;;  %1187 = vmatprep.subr.bf16.mxu1 %v1317_v0  ;;  %v1304_v0 = vld [vmem:[%s1998_s0 + $0x1b0] ss:$8 sps:$4 sm:$0xff]  }
  0x3e   :  { %557 = vmatpush1.bf16.msra.mxu0 %v1220_v18  ;;  %1203 = vmatpush1.bf16.msra.mxu1 %v1220_v18 }
  0x41   :  { %559 = vmatmul.mubr.bf16.vlgmr.msra.gmra.mrb[0].mxu0 %v1221_v19  ;;  %687 = vmatmul.mubr.bf16.vlgmr.msra.gmra.mrb[0].mxu1 %v1245_v20 }
  0x42   :  { %566 = vmatprep.mubr.bf16.mxu0 %v1224_v21  ;;  %694 = vmatprep.mubr.bf16.mxu1 %v1251_v22 }
  0x49   :  { %567 = vmatmul.mubr.bf16.gmra.mrb[4].mxu0 %v1226_v23  ;;  %695 = vmatmul.mubr.bf16.gmra.mrb[4].mxu1 %v1253_v24 }
  0x4a   :  { %574 = vmatprep.mubr.bf16.mxu0 %v1227_v25  ;;  %702 = vmatprep.mubr.bf16.mxu1 %v1257_v26 }
  0x51   :  { %575 = vmatmul.mubr.bf16.gmra.mrb[8].mxu0 %v1229_v27  ;;  %703 = vmatmul.mubr.bf16.gmra.mrb[8].mxu1 %v1259_v28 }
  0x52   :  { %582 = vmatprep.mubr.bf16.mxu0 %v1230_v29  ;;  %710 = vmatprep.mubr.bf16.mxu1 %v1263_v30 }
  0x59   :  { %583 = vmatmul.mubr.bf16.gmra.mrb[12].mxu0 %v1232_v31  ;;  %711 = vmatmul.mubr.bf16.gmra.mrb[12].mxu1 %v1265_v32 }
  0x5a   :  { %590 = vmatprep.mubr.bf16.mxu0 %v1233_v33  ;;  %718 = vmatprep.mubr.bf16.mxu1 %v1269_v34 }
  0x61   :  { %591 = vmatmul.mubr.bf16.gmra.mrb[16].mxu0 %v1235_v35  ;;  %719 = vmatmul.mubr.bf16.gmra.mrb[16].mxu1 %v1271_v36 }
  0x62   :  { %598 = vmatprep.mubr.bf16.mxu0 %v1236_v37  ;;  %726 = vmatprep.mubr.bf16.mxu1 %v1275_v38 }
  0x69   :  { %599 = vmatmul.mubr.bf16.gmra.mrb[20].mxu0 %v1238_v39  ;;  %727 = vmatmul.mubr.bf16.gmra.mrb[20].mxu1 %v1277_v40 }
  0x6a   :  { %606 = vmatprep.mubr.bf16.mxu0 %v1239_v41  ;;  %734 = vmatprep.mubr.bf16.mxu1 %v1281_v42 }
  0x71   :  { %607 = vmatmul.mubr.bf16.gmra.mrb[24].mxu0 %v1241_v43  ;;  %735 = vmatmul.mubr.bf16.gmra.mrb[24].mxu1 %v1283_v44 }
  0x72   :  { %614 = vmatprep.mubr.bf16.mxu0 %v1242_v45  ;;  %742 = vmatprep.mubr.bf16.mxu1 %v1287_v46 }
  0x79   :  { %615 = vmatmul.mubr.bf16.gmra.mrb[28].mxu0 %v1244_v47  ;;  %743 = vmatmul.mubr.bf16.gmra.mrb[28].mxu1 %v1289_v48 }
  0x7a   :  { %622 = vmatprep.mubr.bf16.mxu0 %v1248_v49  ;;  %750 = vmatprep.mubr.bf16.mxu1 %v1293_v50 }
  0x81   :  { %623 = vmatmul.mubr.bf16.gmra.mrb[32].mxu0 %v1250_v51  ;;  %751 = vmatmul.mubr.bf16.gmra.mrb[32].mxu1 %v1295_v52 }
  0x82   :  { %630 = vmatprep.mubr.bf16.mxu0 %v1254_v53  ;;  %758 = vmatprep.mubr.bf16.mxu1 %v1296_v54 }
  0x89   :  { %631 = vmatmul.mubr.bf16.gmra.mrb[36].mxu0 %v1256_v55  ;;  %759 = vmatmul.mubr.bf16.gmra.mrb[36].mxu1 %v1298_v56 }
  0x8a   :  { %638 = vmatprep.mubr.bf16.mxu0 %v1260_v57  ;;  %766 = vmatprep.mubr.bf16.mxu1 %v1299_v58 }
  0x91   :  { %639 = vmatmul.mubr.bf16.gmra.mrb[40].mxu0 %v1262_v59  ;;  %767 = vmatmul.mubr.bf16.gmra.mrb[40].mxu1 %v1301_v60 }
  0x92   :  { %646 = vmatprep.mubr.bf16.mxu0 %v1266_v61  ;;  %774 = vmatprep.mubr.bf16.mxu1 %v1302_v62 }
  0x99   :  { %647 = vmatmul.mubr.bf16.gmra.mrb[44].mxu0 %v1268_v63  ;;  %775 = vmatmul.mubr.bf16.gmra.mrb[44].mxu1 %v1304_v0 }
  0x9a   :  { %654 = vmatprep.mubr.bf16.mxu0 %v1272_v1  ;;  %782 = vmatprep.mubr.bf16.mxu1 %v1305_v2 }
  0xa1   :  { %655 = vmatmul.mubr.bf16.gmra.mrb[48].mxu0 %v1274_v3  ;;  %783 = vmatmul.mubr.bf16.gmra.mrb[48].mxu1 %v1307_v4 }
  0xa2   :  { %662 = vmatprep.mubr.bf16.mxu0 %v1278_v5  ;;  %790 = vmatprep.mubr.bf16.mxu1 %v1308_v6 }
  0xa9   :  { %663 = vmatmul.mubr.bf16.gmra.mrb[52].mxu0 %v1280_v7  ;;  %791 = vmatmul.mubr.bf16.gmra.mrb[52].mxu1 %v1310_v8 }
  0xaa   :  { %670 = vmatprep.mubr.bf16.mxu0 %v1284_v9  ;;  %798 = vmatprep.mubr.bf16.mxu1 %v1311_v10 }
  0xb1   :  { %671 = vmatmul.mubr.bf16.gmra.mrb[56].mxu0 %v1286_v11  ;;  %799 = vmatmul.mubr.bf16.gmra.mrb[56].mxu1 %v1313_v12 }
  0xb2   :  { %678 = vmatprep.mubr.bf16.mxu0 %v1290_v13  ;;  %806 = vmatprep.mubr.bf16.mxu1 %v1314_v14 }
  0xb9   :  { %679 = vmatmul.mubr.bf16.gmra.mrb[60].mxu0 %v1292_v15  ;;  %807 = vmatmul.mubr.bf16.gmra.mrb[60].mxu1 %v1316_v16 }
 0x114   :  { %v560_v17 = vpop.f32.mrb[0].mxu0  ;;  %v1610_v18 = vpop.f32.mrb[0].mxu1 }
 0x115   :  { %815 = vst [vmem:[%s1999_s2] sm:$0xff] %v560_v17  ;;  %v562_v19 = vpop.f32.mrb[1].mxu0  ;;  %847 = vst [vmem:[%s1999_s2 + $0x100] sm:$0xff] %v1610_v18  ;;  %v690_v20 = vpop.f32.mrb[1].mxu1  ;;  %v948_v23 = vmul.f32 %v560_v17, %v560_v17 }
 0x116   :  { %v563_v21 = vpop.f32.mrb[2].mxu0  ;;  %v1619_v22 = vpop.f32.mrb[2].mxu1 }
 0x117   :  { %816 = vst [vmem:[%s1999_s2 + $0x8] sm:$0xff] %v563_v21  ;;  %v879_v24 = vadd.f32 %v563_v21, %v560_v17  ;;  %v949_v25 = vmul.f32 %v563_v21, %v563_v21  ;;  %v565_v26 = vpop.f32.mrb[3].mxu0  ;;  %848 = vst [vmem:[%s1999_s2 + $0x108] sm:$0xff] %v1619_v22  ;;  %v693_v27 = vpop.f32.mrb[3].mxu1 }
 0x119   :  { %v1012_v28 = vadd.f32 %v949_v25, %v948_v23 }
 0x11c   :  { %v568_v29 = vpop.f32.mrb[4].mxu0  ;;  %v1628_v30 = vpop.f32.mrb[4].mxu1 }
 0x11d   :  { %817 = vst [vmem:[%s1999_s2 + $0x10] sm:$0xff] %v568_v29  ;;  %v880_v31 = vadd.f32 %v879_v24, %v568_v29  ;;  %v950_v32 = vmul.f32 %v568_v29, %v568_v29  ;;  %v570_v33 = vpop.f32.mrb[5].mxu0  ;;  %849 = vst [vmem:[%s1999_s2 + $0x110] sm:$0xff] %v1628_v30  ;;  %v698_v34 = vpop.f32.mrb[5].mxu1 }
 0x11e   :  { %v571_v35 = vpop.f32.mrb[6].mxu0  ;;  %v1637_v36 = vpop.f32.mrb[6].mxu1 }
 0x11f   :  { %v1013_v37 = vadd.f32 %v1012_v28, %v950_v32  ;;  %818 = vst [vmem:[%s1999_s2 + $0x18] sm:$0xff] %v571_v35  ;;  %v881_v38 = vadd.f32 %v880_v31, %v571_v35  ;;  %v951_v39 = vmul.f32 %v571_v35, %v571_v35  ;;  %v573_v40 = vpop.f32.mrb[7].mxu0  ;;  %850 = vst [vmem:[%s1999_s2 + $0x118] sm:$0xff] %v1637_v36  ;;  %v701_v41 = vpop.f32.mrb[7].mxu1 }
 0x121   :  { %v1014_v42 = vadd.f32 %v1013_v37, %v951_v39 }
 0x124   :  { %v576_v43 = vpop.f32.mrb[8].mxu0  ;;  %v1646_v44 = vpop.f32.mrb[8].mxu1 }
 0x125   :  { %819 = vst [vmem:[%s1999_s2 + $0x20] sm:$0xff] %v576_v43  ;;  %v882_v45 = vadd.f32 %v881_v38, %v576_v43  ;;  %v952_v46 = vmul.f32 %v576_v43, %v576_v43  ;;  %v578_v47 = vpop.f32.mrb[9].mxu0  ;;  %851 = vst [vmem:[%s1999_s2 + $0x120] sm:$0xff] %v1646_v44  ;;  %v706_v48 = vpop.f32.mrb[9].mxu1 }
 0x126   :  { %v579_v49 = vpop.f32.mrb[10].mxu0  ;;  %v1655_v50 = vpop.f32.mrb[10].mxu1 }
 0x127   :  { %v1015_v51 = vadd.f32 %v1014_v42, %v952_v46  ;;  %820 = vst [vmem:[%s1999_s2 + $0x28] sm:$0xff] %v579_v49  ;;  %v883_v52 = vadd.f32 %v882_v45, %v579_v49  ;;  %v953_v53 = vmul.f32 %v579_v49, %v579_v49  ;;  %v581_v54 = vpop.f32.mrb[11].mxu0  ;;  %852 = vst [vmem:[%s1999_s2 + $0x128] sm:$0xff] %v1655_v50  ;;  %v709_v55 = vpop.f32.mrb[11].mxu1 }
 0x129   :  { %v1016_v56 = vadd.f32 %v1015_v51, %v953_v53 }
 0x12c   :  { %v584_v57 = vpop.f32.mrb[12].mxu0  ;;  %v1664_v58 = vpop.f32.mrb[12].mxu1 }
 0x12d   :  { %821 = vst [vmem:[%s1999_s2 + $0x30] sm:$0xff] %v584_v57  ;;  %v884_v59 = vadd.f32 %v883_v52, %v584_v57  ;;  %v954_v60 = vmul.f32 %v584_v57, %v584_v57  ;;  %v586_v61 = vpop.f32.mrb[13].mxu0  ;;  %853 = vst [vmem:[%s1999_s2 + $0x130] sm:$0xff] %v1664_v58  ;;  %v714_v62 = vpop.f32.mrb[13].mxu1 }
 0x12e   :  { %v587_v63 = vpop.f32.mrb[14].mxu0  ;;  %v1673_v0 = vpop.f32.mrb[14].mxu1 }
 0x12f   :  { %v1017_v1 = vadd.f32 %v1016_v56, %v954_v60  ;;  %822 = vst [vmem:[%s1999_s2 + $0x38] sm:$0xff] %v587_v63  ;;  %v885_v2 = vadd.f32 %v884_v59, %v587_v63  ;;  %v955_v3 = vmul.f32 %v587_v63, %v587_v63  ;;  %v589_v4 = vpop.f32.mrb[15].mxu0  ;;  %854 = vst [vmem:[%s1999_s2 + $0x138] sm:$0xff] %v1673_v0  ;;  %v717_v5 = vpop.f32.mrb[15].mxu1 }
 0x131   :  { %v1018_v6 = vadd.f32 %v1017_v1, %v955_v3 }
 0x134   :  { %v592_v7 = vpop.f32.mrb[16].mxu0  ;;  %v1682_v8 = vpop.f32.mrb[16].mxu1 }
 0x135   :  { %823 = vst [vmem:[%s1999_s2 + $0x40] sm:$0xff] %v592_v7  ;;  %v886_v9 = vadd.f32 %v885_v2, %v592_v7  ;;  %v956_v10 = vmul.f32 %v592_v7, %v592_v7  ;;  %v594_v11 = vpop.f32.mrb[17].mxu0  ;;  %855 = vst [vmem:[%s1999_s2 + $0x140] sm:$0xff] %v1682_v8  ;;  %v722_v12 = vpop.f32.mrb[17].mxu1 }
 0x136   :  { %v595_v13 = vpop.f32.mrb[18].mxu0  ;;  %v1691_v14 = vpop.f32.mrb[18].mxu1 }
 0x137   :  { %v1019_v15 = vadd.f32 %v1018_v6, %v956_v10  ;;  %824 = vst [vmem:[%s1999_s2 + $0x48] sm:$0xff] %v595_v13  ;;  %v887_v16 = vadd.f32 %v886_v9, %v595_v13  ;;  %v957_v17 = vmul.f32 %v595_v13, %v595_v13  ;;  %v597_v19 = vpop.f32.mrb[19].mxu0  ;;  %856 = vst [vmem:[%s1999_s2 + $0x148] sm:$0xff] %v1691_v14  ;;  %v725_v20 = vpop.f32.mrb[19].mxu1 }
 0x139   :  { %v1020_v21 = vadd.f32 %v1019_v15, %v957_v17 }
 0x13c   :  { %v600_v23 = vpop.f32.mrb[20].mxu0  ;;  %v1700_v24 = vpop.f32.mrb[20].mxu1 }
 0x13d   :  { %825 = vst [vmem:[%s1999_s2 + $0x50] sm:$0xff] %v600_v23  ;;  %v888_v25 = vadd.f32 %v887_v16, %v600_v23  ;;  %v958_v26 = vmul.f32 %v600_v23, %v600_v23  ;;  %v602_v27 = vpop.f32.mrb[21].mxu0  ;;  %857 = vst [vmem:[%s1999_s2 + $0x150] sm:$0xff] %v1700_v24  ;;  %v730_v28 = vpop.f32.mrb[21].mxu1 }
 0x13e   :  { %v603_v29 = vpop.f32.mrb[22].mxu0  ;;  %v1709_v31 = vpop.f32.mrb[22].mxu1 }
 0x13f   :  { %v1021_v32 = vadd.f32 %v1020_v21, %v958_v26  ;;  %826 = vst [vmem:[%s1999_s2 + $0x58] sm:$0xff] %v603_v29  ;;  %v889_v33 = vadd.f32 %v888_v25, %v603_v29  ;;  %v959_v34 = vmul.f32 %v603_v29, %v603_v29  ;;  %v605_v35 = vpop.f32.mrb[23].mxu0  ;;  %858 = vst [vmem:[%s1999_s2 + $0x158] sm:$0xff] %v1709_v31  ;;  %v733_v37 = vpop.f32.mrb[23].mxu1 }
 0x141   :  { %v1022_v38 = vadd.f32 %v1021_v32, %v959_v34 }
 0x144   :  { %v608_v39 = vpop.f32.mrb[24].mxu0  ;;  %v1718_v40 = vpop.f32.mrb[24].mxu1 }
 0x145   :  { %827 = vst [vmem:[%s1999_s2 + $0x60] sm:$0xff] %v608_v39  ;;  %v890_v41 = vadd.f32 %v889_v33, %v608_v39  ;;  %v960_v42 = vmul.f32 %v608_v39, %v608_v39  ;;  %v610_v43 = vpop.f32.mrb[25].mxu0  ;;  %859 = vst [vmem:[%s1999_s2 + $0x160] sm:$0xff] %v1718_v40  ;;  %v738_v45 = vpop.f32.mrb[25].mxu1 }
 0x146   :  { %v611_v46 = vpop.f32.mrb[26].mxu0  ;;  %v1727_v47 = vpop.f32.mrb[26].mxu1 }
 0x147   :  { %v1023_v48 = vadd.f32 %v1022_v38, %v960_v42  ;;  %828 = vst [vmem:[%s1999_s2 + $0x68] sm:$0xff] %v611_v46  ;;  %v891_v49 = vadd.f32 %v890_v41, %v611_v46  ;;  %v961_v51 = vmul.f32 %v611_v46, %v611_v46  ;;  %v613_v52 = vpop.f32.mrb[27].mxu0  ;;  %860 = vst [vmem:[%s1999_s2 + $0x168] sm:$0xff] %v1727_v47  ;;  %v741_v53 = vpop.f32.mrb[27].mxu1 }
 0x149   :  { %v1024_v54 = vadd.f32 %v1023_v48, %v961_v51 }
 0x14c   :  { %v616_v55 = vpop.f32.mrb[28].mxu0  ;;  %v1736_v56 = vpop.f32.mrb[28].mxu1 }
 0x14d   :  { %829 = vst [vmem:[%s1999_s2 + $0x70] sm:$0xff] %v616_v55  ;;  %v892_v57 = vadd.f32 %v891_v49, %v616_v55  ;;  %v962_v59 = vmul.f32 %v616_v55, %v616_v55  ;;  %v618_v60 = vpop.f32.mrb[29].mxu0  ;;  %861 = vst [vmem:[%s1999_s2 + $0x170] sm:$0xff] %v1736_v56  ;;  %v746_v61 = vpop.f32.mrb[29].mxu1 }
 0x14e   :  { %v619_v62 = vpop.f32.mrb[30].mxu0  ;;  %v1745_v63 = vpop.f32.mrb[30].mxu1 }
 0x14f   :  { %v1025_v1 = vadd.f32 %v1024_v54, %v962_v59  ;;  %830 = vst [vmem:[%s1999_s2 + $0x78] sm:$0xff] %v619_v62  ;;  %v893_v2 = vadd.f32 %v892_v57, %v619_v62  ;;  %v963_v3 = vmul.f32 %v619_v62, %v619_v62  ;;  %v621_v4 = vpop.f32.mrb[31].mxu0  ;;  %862 = vst [vmem:[%s1999_s2 + $0x178] sm:$0xff] %v1745_v63  ;;  %v749_v5 = vpop.f32.mrb[31].mxu1 }
 0x151   :  { %v1026_v6 = vadd.f32 %v1025_v1, %v963_v3 }
 0x154   :  { %v624_v7 = vpop.f32.mrb[32].mxu0  ;;  %v1754_v9 = vpop.f32.mrb[32].mxu1 }
 0x155   :  { %831 = vst [vmem:[%s1999_s2 + $0x80] sm:$0xff] %v624_v7  ;;  %v894_v10 = vadd.f32 %v893_v2, %v624_v7  ;;  %v964_v11 = vmul.f32 %v624_v7, %v624_v7  ;;  %v626_v12 = vpop.f32.mrb[33].mxu0  ;;  %863 = vst [vmem:[%s1999_s2 + $0x180] sm:$0xff] %v1754_v9  ;;  %v754_v13 = vpop.f32.mrb[33].mxu1 }
 0x156   :  { %v627_v15 = vpop.f32.mrb[34].mxu0  ;;  %v1763_v16 = vpop.f32.mrb[34].mxu1 }
 0x157   :  { %v1027_v17 = vadd.f32 %v1026_v6, %v964_v11  ;;  %832 = vst [vmem:[%s1999_s2 + $0x88] sm:$0xff] %v627_v15  ;;  %v895_v19 = vadd.f32 %v894_v10, %v627_v15  ;;  %v965_v20 = vmul.f32 %v627_v15, %v627_v15  ;;  %v629_v21 = vpop.f32.mrb[35].mxu0  ;;  %864 = vst [vmem:[%s1999_s2 + $0x188] sm:$0xff] %v1763_v16  ;;  %v757_v23 = vpop.f32.mrb[35].mxu1 }
 0x159   :  { %v1028_v25 = vadd.f32 %v1027_v17, %v965_v20 }
 0x15c   :  { %v632_v26 = vpop.f32.mrb[36].mxu0  ;;  %v1772_v27 = vpop.f32.mrb[36].mxu1 }
 0x15d   :  { %833 = vst [vmem:[%s1999_s2 + $0x90] sm:$0xff] %v632_v26  ;;  %v896_v28 = vadd.f32 %v895_v19, %v632_v26  ;;  %v966_v29 = vmul.f32 %v632_v26, %v632_v26  ;;  %v634_v32 = vpop.f32.mrb[37].mxu0  ;;  %865 = vst [vmem:[%s1999_s2 + $0x190] sm:$0xff] %v1772_v27  ;;  %v762_v33 = vpop.f32.mrb[37].mxu1 }
 0x15e   :  { %v635_v34 = vpop.f32.mrb[38].mxu0  ;;  %v1781_v35 = vpop.f32.mrb[38].mxu1 }
 0x15f   :  { %v1029_v37 = vadd.f32 %v1028_v25, %v966_v29  ;;  %834 = vst [vmem:[%s1999_s2 + $0x98] sm:$0xff] %v635_v34  ;;  %v897_v38 = vadd.f32 %v896_v28, %v635_v34  ;;  %v967_v39 = vmul.f32 %v635_v34, %v635_v34  ;;  %v637_v41 = vpop.f32.mrb[39].mxu0  ;;  %866 = vst [vmem:[%s1999_s2 + $0x198] sm:$0xff] %v1781_v35  ;;  %v765_v42 = vpop.f32.mrb[39].mxu1 }
 0x161   :  { %v1030_v43 = vadd.f32 %v1029_v37, %v967_v39 }
 0x164   :  { %v640_v45 = vpop.f32.mrb[40].mxu0  ;;  %v1790_v46 = vpop.f32.mrb[40].mxu1 }
 0x165   :  { %835 = vst [vmem:[%s1999_s2 + $0xa0] sm:$0xff] %v640_v45  ;;  %v898_v48 = vadd.f32 %v897_v38, %v640_v45  ;;  %v968_v49 = vmul.f32 %v640_v45, %v640_v45  ;;  %v642_v51 = vpop.f32.mrb[41].mxu0  ;;  %867 = vst [vmem:[%s1999_s2 + $0x1a0] sm:$0xff] %v1790_v46  ;;  %v770_v52 = vpop.f32.mrb[41].mxu1 }
 0x166   :  { %v643_v53 = vpop.f32.mrb[42].mxu0  ;;  %v1799_v54 = vpop.f32.mrb[42].mxu1 }
 0x167   :  { %v1031_v55 = vadd.f32 %v1030_v43, %v968_v49  ;;  %836 = vst [vmem:[%s1999_s2 + $0xa8] sm:$0xff] %v643_v53  ;;  %v899_v57 = vadd.f32 %v898_v48, %v643_v53  ;;  %v969_v59 = vmul.f32 %v643_v53, %v643_v53  ;;  %v645_v60 = vpop.f32.mrb[43].mxu0  ;;  %868 = vst [vmem:[%s1999_s2 + $0x1a8] sm:$0xff] %v1799_v54  ;;  %v773_v61 = vpop.f32.mrb[43].mxu1 }
 0x169   :  { %v1032_v62 = vadd.f32 %v1031_v55, %v969_v59 }
 0x16c   :  { %v648_v1 = vpop.f32.mrb[44].mxu0  ;;  %v1808_v2 = vpop.f32.mrb[44].mxu1 }
 0x16d   :  { %837 = vst [vmem:[%s1999_s2 + $0xb0] sm:$0xff] %v648_v1  ;;  %v900_v3 = vadd.f32 %v899_v57, %v648_v1  ;;  %v970_v4 = vmul.f32 %v648_v1, %v648_v1  ;;  %v650_v5 = vpop.f32.mrb[45].mxu0  ;;  %869 = vst [vmem:[%s1999_s2 + $0x1b0] sm:$0xff] %v1808_v2  ;;  %v778_v6 = vpop.f32.mrb[45].mxu1 }
 0x16e   :  { %v651_v7 = vpop.f32.mrb[46].mxu0  ;;  %v1817_v10 = vpop.f32.mrb[46].mxu1 }
 0x16f   :  { %v1033_v11 = vadd.f32 %v1032_v62, %v970_v4  ;;  %838 = vst [vmem:[%s1999_s2 + $0xb8] sm:$0xff] %v651_v7  ;;  %v901_v12 = vadd.f32 %v900_v3, %v651_v7  ;;  %v971_v13 = vmul.f32 %v651_v7, %v651_v7  ;;  %v653_v15 = vpop.f32.mrb[47].mxu0  ;;  %870 = vst [vmem:[%s1999_s2 + $0x1b8] sm:$0xff] %v1817_v10  ;;  %v781_v17 = vpop.f32.mrb[47].mxu1 }
 0x171   :  { %v1034_v19 = vadd.f32 %v1033_v11, %v971_v13 }
 0x174   :  { %v656_v20 = vpop.f32.mrb[48].mxu0  ;;  %v1826_v21 = vpop.f32.mrb[48].mxu1 }
 0x175   :  { %839 = vst [vmem:[%s1999_s2 + $0xc0] sm:$0xff] %v656_v20  ;;  %v902_v23 = vadd.f32 %v901_v12, %v656_v20  ;;  %v972_v25 = vmul.f32 %v656_v20, %v656_v20  ;;  %v658_v26 = vpop.f32.mrb[49].mxu0  ;;  %871 = vst [vmem:[%s1999_s2 + $0x1c0] sm:$0xff] %v1826_v21  ;;  %v786_v28 = vpop.f32.mrb[49].mxu1 }
 0x176   :  { %v659_v29 = vpop.f32.mrb[50].mxu0  ;;  %v1835_v32 = vpop.f32.mrb[50].mxu1 }
 0x177   :  { %v1035_v33 = vadd.f32 %v1034_v19, %v972_v25  ;;  %840 = vst [vmem:[%s1999_s2 + $0xc8] sm:$0xff] %v659_v29  ;;  %v903_v34 = vadd.f32 %v902_v23, %v659_v29  ;;  %v973_v37 = vmul.f32 %v659_v29, %v659_v29  ;;  %v661_v38 = vpop.f32.mrb[51].mxu0  ;;  %872 = vst [vmem:[%s1999_s2 + $0x1c8] sm:$0xff] %v1835_v32  ;;  %v789_v39 = vpop.f32.mrb[51].mxu1 }
 0x179   :  { %v1036_v41 = vadd.f32 %v1035_v33, %v973_v37 }
 0x17c   :  { %v664_v42 = vpop.f32.mrb[52].mxu0  ;;  %v1844_v43 = vpop.f32.mrb[52].mxu1 }
 0x17d   :  { %841 = vst [vmem:[%s1999_s2 + $0xd0] sm:$0xff] %v664_v42  ;;  %v904_v45 = vadd.f32 %v903_v34, %v664_v42  ;;  %v974_v48 = vmul.f32 %v664_v42, %v664_v42  ;;  %v666_v49 = vpop.f32.mrb[53].mxu0  ;;  %873 = vst [vmem:[%s1999_s2 + $0x1d0] sm:$0xff] %v1844_v43  ;;  %v794_v51 = vpop.f32.mrb[53].mxu1 }
 0x17e   :  { %v667_v52 = vpop.f32.mrb[54].mxu0  ;;  %v1853_v53 = vpop.f32.mrb[54].mxu1  ;;  %v980_v49 = vmul.f32 %v1610_v18, %v1610_v18 }
 0x17f   :  { %v1037_v55 = vadd.f32 %v1036_v41, %v974_v48  ;;  %842 = vst [vmem:[%s1999_s2 + $0xd8] sm:$0xff] %v667_v52  ;;  %v905_v57 = vadd.f32 %v904_v45, %v667_v52  ;;  %v975_v59 = vmul.f32 %v667_v52, %v667_v52  ;;  %v669_v60 = vpop.f32.mrb[55].mxu0  ;;  %874 = vst [vmem:[%s1999_s2 + $0x1d8] sm:$0xff] %v1853_v53  ;;  %v797_v61 = vpop.f32.mrb[55].mxu1 }
 0x180   :  { %v982_v60 = vmul.f32 %v1628_v30, %v1628_v30 }
 0x181   :  { %v1038_v62 = vadd.f32 %v1037_v55, %v975_v59  ;;  %v981_v55 = vmul.f32 %v1619_v22, %v1619_v22 }
 0x184   :  { %v672_v1 = vpop.f32.mrb[56].mxu0  ;;  %v1862_v3 = vpop.f32.mrb[56].mxu1 }
 0x185   :  { %843 = vst [vmem:[%s1999_s2 + $0xe0] sm:$0xff] %v672_v1  ;;  %v906_v4 = vadd.f32 %v905_v57, %v672_v1  ;;  %v976_v5 = vmul.f32 %v672_v1, %v672_v1  ;;  %v674_v6 = vpop.f32.mrb[57].mxu0  ;;  %875 = vst [vmem:[%s1999_s2 + $0x1e0] sm:$0xff] %v1862_v3  ;;  %v802_v7 = vpop.f32.mrb[57].mxu1  ;;  %v983_v1 = vmul.f32 %v1637_v36, %v1637_v36 }
 0x186   :  { %v675_v11 = vpop.f32.mrb[58].mxu0  ;;  %v1871_v12 = vpop.f32.mrb[58].mxu1 }
 0x187   :  { %v1039_v13 = vadd.f32 %v1038_v62, %v976_v5  ;;  %844 = vst [vmem:[%s1999_s2 + $0xe8] sm:$0xff] %v675_v11  ;;  %v907_v15 = vadd.f32 %v906_v4, %v675_v11  ;;  %v977_v17 = vmul.f32 %v675_v11, %v675_v11  ;;  %v677_v19 = vpop.f32.mrb[59].mxu0  ;;  %876 = vst [vmem:[%s1999_s2 + $0x1e8] sm:$0xff] %v1871_v12  ;;  %v805_v20 = vpop.f32.mrb[59].mxu1 }
 0x189   :  { %v1040_v23 = vadd.f32 %v1039_v13, %v977_v17 }
 0x18c   :  { %v680_v25 = vpop.f32.mrb[60].mxu0  ;;  %v1880_v26 = vpop.f32.mrb[60].mxu1 }
 0x18d   :  { %845 = vst [vmem:[%s1999_s2 + $0xf0] sm:$0xff] %v680_v25  ;;  %v908_v28 = vadd.f32 %v907_v15, %v680_v25  ;;  %v978_v29 = vmul.f32 %v680_v25, %v680_v25  ;;  %v682_v33 = vpop.f32.mrb[61].mxu0  ;;  %877 = vst [vmem:[%s1999_s2 + $0x1f0] sm:$0xff] %v1880_v26  ;;  %v810_v34 = vpop.f32.mrb[61].mxu1 }
 0x18e   :  { %v683_v37 = vpop.f32.mrb[62].mxu0  ;;  %v1889_v38 = vpop.f32.mrb[62].mxu1 }
 0x18f   :  { %v1041_v39 = vadd.f32 %v1040_v23, %v978_v29  ;;  %846 = vst [vmem:[%s1999_s2 + $0xf8] sm:$0xff] %v683_v37  ;;  %v909_v41 = vadd.f32 %v908_v28, %v683_v37  ;;  %v979_v42 = vmul.f32 %v683_v37, %v683_v37  ;;  %v685_v45 = vpop.f32.mrb[63].mxu0  ;;  %878 = vst [vmem:[%s1999_s2 + $0x1f8] sm:$0xff] %v1889_v38  ;;  %v813_v48 = vpop.f32.mrb[63].mxu1 }
 0x191   :  { %v910_v51 = vadd.f32 %v909_v41, %v1610_v18  ;;  %v1042_v52 = vadd.f32 %v1041_v39, %v979_v42  ;;  %v984_v18 = vmul.f32 %v1646_v44, %v1646_v44 }
 0x193   :  { %v911_v57 = vadd.f32 %v910_v51, %v1619_v22  ;;  %v1043_v59 = vadd.f32 %v1042_v52, %v980_v49  ;;  %v985_v22 = vmul.f32 %v1655_v50, %v1655_v50 }
 0x195   :  { %v912_v61 = vadd.f32 %v911_v57, %v1628_v30  ;;  %v1044_v62 = vadd.f32 %v1043_v59, %v981_v55  ;;  %v986_v30 = vmul.f32 %v1664_v58, %v1664_v58  ;;  %v996_v57 = vmul.f32 %v1754_v9, %v1754_v9 }
 0x197   :  { %v913_v4 = vadd.f32 %v912_v61, %v1637_v36  ;;  %v1045_v5 = vadd.f32 %v1044_v62, %v982_v60  ;;  %v987_v36 = vmul.f32 %v1673_v0, %v1673_v0  ;;  %v997_v61 = vmul.f32 %v1763_v16, %v1763_v16 }
 0x199   :  { %v914_v6 = vadd.f32 %v913_v4, %v1646_v44  ;;  %v1046_v7 = vadd.f32 %v1045_v5, %v983_v1  ;;  %v988_v44 = vmul.f32 %v1682_v8, %v1682_v8  ;;  %v998_v1 = vmul.f32 %v1772_v27, %v1772_v27 }
 0x19a   :  { %v999_v5 = vmul.f32 %v1781_v35, %v1781_v35 }
 0x19b   :  { %v915_v11 = vadd.f32 %v914_v6, %v1655_v50  ;;  %v1047_v13 = vadd.f32 %v1046_v7, %v984_v18  ;;  %v989_v50 = vmul.f32 %v1691_v14, %v1691_v14  ;;  %v1000_v6 = vmul.f32 %v1790_v46, %v1790_v46 }
 0x19d   :  { %v916_v15 = vadd.f32 %v915_v11, %v1664_v58  ;;  %v1048_v17 = vadd.f32 %v1047_v13, %v985_v22  ;;  %v990_v58 = vmul.f32 %v1700_v24, %v1700_v24  ;;  %v1001_v22 = vmul.f32 %v1799_v54, %v1799_v54 }
 0x19e   :  { %v1002_v13 = vmul.f32 %v1808_v2, %v1808_v2 }
 0x19f   :  { %v917_v19 = vadd.f32 %v916_v15, %v1673_v0  ;;  %v1049_v20 = vadd.f32 %v1048_v17, %v986_v30  ;;  %v991_v0 = vmul.f32 %v1709_v31, %v1709_v31  ;;  %v1003_v15 = vmul.f32 %v1817_v10, %v1817_v10 }
 0x1a1   :  { %v1050_v23 = vadd.f32 %v1049_v20, %v987_v36  ;;  %v918_v25 = vadd.f32 %v917_v19, %v1682_v8  ;;  %v992_v8 = vmul.f32 %v1718_v40, %v1718_v40  ;;  %v1004_v36 = vmul.f32 %v1826_v21, %v1826_v21 }
 0x1a2   :  { %v1005_v20 = vmul.f32 %v1835_v32, %v1835_v32 }
 0x1a3   :  { %v919_v28 = vadd.f32 %v918_v25, %v1691_v14  ;;  %v1051_v29 = vadd.f32 %v1050_v23, %v988_v44  ;;  %v993_v14 = vmul.f32 %v1727_v47, %v1727_v47  ;;  %v1006_v23 = vmul.f32 %v1844_v43, %v1844_v43 }
 0x1a5   :  { %v920_v33 = vadd.f32 %v919_v28, %v1700_v24  ;;  %v1052_v34 = vadd.f32 %v1051_v29, %v989_v50  ;;  %v994_v24 = vmul.f32 %v1736_v56, %v1736_v56  ;;  %v1007_v50 = vmul.f32 %v1853_v53, %v1853_v53 }
 0x1a6   :  { %v1008_v29 = vmul.f32 %v1862_v3, %v1862_v3 }
 0x1a7   :  { %v921_v37 = vadd.f32 %v920_v33, %v1709_v31  ;;  %v1053_v39 = vadd.f32 %v1052_v34, %v990_v58  ;;  %v995_v31 = vmul.f32 %v1745_v63, %v1745_v63  ;;  %v1009_v33 = vmul.f32 %v1871_v12, %v1871_v12 }
 0x1a9   :  { %v922_v41 = vadd.f32 %v921_v37, %v1718_v40  ;;  %v1054_v42 = vadd.f32 %v1053_v39, %v991_v0  ;;  %v1011_v39 = vmul.f32 %v1889_v38, %v1889_v38 }
 0x1ab   :  { %v923_v45 = vadd.f32 %v922_v41, %v1727_v47  ;;  %v1055_v48 = vadd.f32 %v1054_v42, %v992_v8 }
 0x1ad   :  { %v924_v49 = vadd.f32 %v923_v45, %v1736_v56  ;;  %v1056_v51 = vadd.f32 %v1055_v48, %v993_v14 }
 0x1af   :  { %v925_v52 = vadd.f32 %v924_v49, %v1745_v63  ;;  %v1057_v55 = vadd.f32 %v1056_v51, %v994_v24 }
 0x1b1   :  { %v926_v40 = vadd.f32 %v925_v52, %v1754_v9  ;;  %v1058_v59 = vadd.f32 %v1057_v55, %v995_v31 }
 0x1b3   :  { %v1059_v47 = vadd.f32 %v1058_v59, %v996_v57  ;;  %v927_v60 = vadd.f32 %v926_v40, %v1763_v16 }
 0x1b5   :  { %v1060_v56 = vadd.f32 %v1059_v47, %v997_v61  ;;  %v928_v62 = vadd.f32 %v927_v60, %v1772_v27 }
 0x1b7   :  { %v1061_v63 = vadd.f32 %v1060_v56, %v998_v1  ;;  %v929_v4 = vadd.f32 %v928_v62, %v1781_v35 }
 0x1b9   :  { %v1062_v9 = vadd.f32 %v1061_v63, %v999_v5  ;;  %v930_v18 = vadd.f32 %v929_v4, %v1790_v46 }
 0x1bb   :  { %v1063_v7 = vadd.f32 %v1062_v9, %v1000_v6  ;;  %v931_v16 = vadd.f32 %v930_v18, %v1799_v54 }
 0x1bd   :  { %v1064_v11 = vadd.f32 %v1063_v7, %v1001_v22  ;;  %v932_v27 = vadd.f32 %v931_v16, %v1808_v2 }
 0x1bf   :  { %v1065_v30 = vadd.f32 %v1064_v11, %v1002_v13  ;;  %v933_v35 = vadd.f32 %v932_v27, %v1817_v10 }
 0x1c1   :  { %v1066_v17 = vadd.f32 %v1065_v30, %v1003_v15  ;;  %v934_v46 = vadd.f32 %v933_v35, %v1826_v21 }
 0x1c3   :  { %v1067_v19 = vadd.f32 %v1066_v17, %v1004_v36  ;;  %v935_v54 = vadd.f32 %v934_v46, %v1835_v32 }
 0x1c5   :  { %v1068_v44 = vadd.f32 %v1067_v19, %v1005_v20  ;;  %v936_v2 = vadd.f32 %v935_v54, %v1844_v43  ;;  %v1010_v43 = vmul.f32 %v1880_v26, %v1880_v26 }
 0x1c7   :  { %v1069_v25 = vadd.f32 %v1068_v44, %v1006_v23  ;;  %v937_v10 = vadd.f32 %v936_v2, %v1853_v53 }
 0x1c9   :  { %v1070_v28 = vadd.f32 %v1069_v25, %v1007_v50  ;;  %v938_v21 = vadd.f32 %v937_v10, %v1862_v3 }
 0x1cb   :  { %v1071_v58 = vadd.f32 %v1070_v28, %v1008_v29  ;;  %v939_v32 = vadd.f32 %v938_v21, %v1871_v12 }
 0x1cd   :  { %v1072_v34 = vadd.f32 %v1071_v58, %v1009_v33  ;;  %v940_v0 = vadd.f32 %v939_v32, %v1880_v26 }
 0x1cf   :  { %v1073_v37 = vadd.f32 %v1072_v34, %v1010_v43  ;;  %v941_v53 = vadd.f32 %v940_v0, %v1889_v38 }
 0x1d1   :  { %v942_v8 = vrot.slane %v941_v53, 4  ;;  %v1074_v3 = vadd.f32 %v1073_v37, %v1011_v39 }
 0x1d3   :  { %v943_v41 = vadd.f32 %v942_v8, %v941_v53  ;;  %v1075_v42 = vrot.slane %v1074_v3, 4 }
 0x1d5   :  { %v944_v14 = vrot.slane %v943_v41, 2  ;;  %v1076_v45 = vadd.f32 %v1075_v42, %v1074_v3 }
 0x1d7   :  { %v945_v48 = vadd.f32 %v944_v14, %v943_v41  ;;  %v1077_v12 = vrot.slane %v1076_v45, 2 }
 0x1d9   :  { %v946_v24 = vrot.slane %v945_v48, 1  ;;  %v1078_v49 = vadd.f32 %v1077_v12, %v1076_v45 }
 0x1db   :  { %v1079_v51 = vrot.slane %v1078_v49, 1  ;;  %v947_v31 = vadd.f32 %v946_v24, %v945_v48 }
 0x1dd   :  { %v1080_v26 = vadd.f32 %v1079_v51, %v1078_v49 }
 0x1df   :  { %v1082_v52 = vsel %vm1081_vm0, %v947_v31, %v1080_v26 }
 0x1e0   :  { %1083 = vst [vmem:[%s2000_s3] sm:$0x3] %v1082_v52 }

// kernel: block35.8
= control target key start
LH: loop header
LB: loop body
LE: loop exit
PB: predicated region body
PF: predicated region fallthrough
CT: control target
= control target key end

     0   :  { %v3244_v0 = vmov 0   ;;  %vm1294_vm0 = vcmask 523264   ;;  %vm2524_vm1 = vcmask 1040384   ;;  %s4440_s1 = inlined_call_operand.vmem [shape: bf16[576,128], index: 1, kind: input, shape index: {}]   ;;  %s4441_s0 = inlined_call_operand.vmem [shape: bf16[512,576], index: 0, kind: input, shape index: {}]   ;;  %s4442_s2 = inlined_call_operand.vmem [shape: f32[512,128], index: 2, kind: output, shape index: {0}]   ;;  %s4443_s3 = inlined_call_operand.vmem [shape: f32[1,2,128], index: 3, kind: output, shape index: {1}]  }
   0x1   :  { %1391 = vmatprep.subr.bf16.mxu0 %v3244_v0  ;;  %2871 = vmatprep.subr.bf16.mxu1 %v3244_v0  ;;  %v2984_v1 = vld [vmem:[%s4440_s1] sm:$0xff]   ;;  %v2985_v2 = vld [vmem:[%s4440_s1 + $0x8] sm:$0xff]   ;;  %v2986_v3 = vld [vmem:[%s4440_s1 + $0x10] sm:$0xff]  }
   0x2   :  { %1392 = vmatpush1.bf16.msra.mxu0 %v2984_v1  ;;  %2887 = vmatpush1.bf16.msra.mxu1 %v2984_v1  ;;  %v2987_v4 = vld [vmem:[%s4440_s1 + $0x18] sm:$0xff]   ;;  %v2988_v5 = vld [vmem:[%s4440_s1 + $0x20] sm:$0xff]   ;;  %v2989_v7 = vld [vmem:[%s4440_s1 + $0x28] sm:$0xff]  }
   0x3   :  { %1393 = vmatprep.subr.bf16.mxu0 %v3244_v0  ;;  %2872 = vmatprep.subr.bf16.mxu1 %v3244_v0  ;;  %v3002_v6 = vld [vmem:[%s4441_s0 + $0x4] ss:$20 sps:$4 sm:$0xff]   ;;  %v2990_v9 = vld [vmem:[%s4440_s1 + $0x30] sm:$0xff]   ;;  %v2993_v12 = vld [vmem:[%s4440_s1 + $0x48] sm:$0xff]  }
   0x4   :  { %v3005_v8 = vld [vmem:[%s4441_s0 + $0x144] ss:$20 sps:$4 sm:$0xff]   ;;  %1423 = vmatprep.mubr.bf16.mxu0 %v3002_v6  ;;  %v2994_v13 = vld [vmem:[%s4440_s1 + $0x50] sm:$0xff]   ;;  %v2997_v16 = vld [vmem:[%s4440_s1 + $0x68] sm:$0xff]  }
   0x5   :  { %1487 = vmatprep.mubr.bf16.mxu1 %v3005_v8  ;;  %v2991_v10 = vld [vmem:[%s4440_s1 + $0x38] sm:$0xff]   ;;  %v2992_v11 = vld [vmem:[%s4440_s1 + $0x40] sm:$0xff]   ;;  %v2998_v17 = vld [vmem:[%s4440_s1 + $0x70] sm:$0xff]  }
   0x6   :  { %1394 = vmatpush1.bf16.msra.mxu0 %v2985_v2  ;;  %2888 = vmatpush1.bf16.msra.mxu1 %v2985_v2  ;;  %v2995_v14 = vld [vmem:[%s4440_s1 + $0x58] sm:$0xff]   ;;  %v2996_v15 = vld [vmem:[%s4440_s1 + $0x60] sm:$0xff]   ;;  %v3055_v25 = vld [vmem:[%s4440_s1 + $0x108] sm:$0xff]  }
   0x7   :  { %1395 = vmatprep.subr.bf16.mxu0 %v3244_v0  ;;  %2873 = vmatprep.subr.bf16.mxu1 %v3244_v0  ;;  %v2999_v18 = vld [vmem:[%s4440_s1 + $0x78] sm:$0xff]   ;;  %v3006_v19 = vld [vmem:[%s4440_s1 + $0x100] sm:$0xff]   ;;  %v3008_v26 = vld [vmem:[%s4440_s1 + $0x88] sm:$0xff]  }
   0x8   :  { %v3000_v20 = vld [vmem:[%s4441_s0] ss:$20 sps:$4 sm:$0xff]   ;;  %v3013_v27 = vld [vmem:[%s4441_s0 + $0x28] ss:$20 sps:$4 sm:$0xff]   ;;  %v3021_v34 = vld [vmem:[%s4441_s0 + $0x50] ss:$20 sps:$4 sm:$0xff]  }
   0x9   :  { %v3003_v21 = vld [vmem:[%s4441_s0 + $0x140] ss:$20 sps:$4 sm:$0xff]   ;;  %v3014_v28 = vld [vmem:[%s4441_s0 + $0x168] ss:$20 sps:$4 sm:$0xff]   ;;  %v3022_v35 = vld [vmem:[%s4441_s0 + $0x190] ss:$20 sps:$4 sm:$0xff]  }
   0xa   :  { %1396 = vmatpush1.bf16.msra.mxu0 %v2986_v3  ;;  %2889 = vmatpush1.bf16.msra.mxu1 %v2986_v3  ;;  %v3007_v22 = vld [vmem:[%s4440_s1 + $0x80] sm:$0xff]   ;;  %v3015_v29 = vld [vmem:[%s4440_s1 + $0x90] sm:$0xff]   ;;  %v3016_v33 = vld [vmem:[%s4440_s1 + $0x98] sm:$0xff]  }
   0xb   :  { %1397 = vmatprep.subr.bf16.mxu0 %v3244_v0  ;;  %2874 = vmatprep.subr.bf16.mxu1 %v3244_v0  ;;  %v3009_v23 = vld [vmem:[%s4441_s0 + $0x2c] ss:$20 sps:$4 sm:$0xff]   ;;  %v3096_v30 = vld [vmem:[%s4440_s1 + $0x110] sm:$0xff]   ;;  %v3033_v43 = vld [vmem:[%s4441_s0 + $0xa4] ss:$20 sps:$4 sm:$0xff]  }
   0xc   :  { %v3011_v24 = vld [vmem:[%s4441_s0 + $0x16c] ss:$20 sps:$4 sm:$0xff]   ;;  %v3017_v31 = vld [vmem:[%s4441_s0 + $0x54] ss:$20 sps:$4 sm:$0xff]   ;;  %v3025_v37 = vld [vmem:[%s4441_s0 + $0x7c] ss:$20 sps:$4 sm:$0xff]  }
   0xd   :  { %v3019_v32 = vld [vmem:[%s4441_s0 + $0x194] ss:$20 sps:$4 sm:$0xff]   ;;  %v3023_v36 = vld [vmem:[%s4440_s1 + $0xa0] sm:$0xff]   ;;  %v3027_v38 = vld [vmem:[%s4441_s0 + $0x1bc] ss:$20 sps:$4 sm:$0xff]  }
   0xe   :  { %1398 = vmatpush1.bf16.msra.mxu0 %v2987_v4  ;;  %2890 = vmatpush1.bf16.msra.mxu1 %v2987_v4  ;;  %v3024_v39 = vld [vmem:[%s4440_s1 + $0xa8] sm:$0xff]   ;;  %v3031_v42 = vld [vmem:[%s4440_s1 + $0xb0] sm:$0xff]   ;;  %v3133_v44 = vld [vmem:[%s4440_s1 + $0x118] sm:$0xff]  }
   0xf   :  { %1399 = vmatprep.subr.bf16.mxu0 %v3244_v0  ;;  %2875 = vmatprep.subr.bf16.mxu1 %v3244_v0  ;;  %v3029_v40 = vld [vmem:[%s4441_s0 + $0x78] ss:$20 sps:$4 sm:$0xff]   ;;  %v3037_v47 = vld [vmem:[%s4441_s0 + $0xa0] ss:$20 sps:$4 sm:$0xff]   ;;  %v3045_v53 = vld [vmem:[%s4441_s0 + $0xc8] ss:$20 sps:$4 sm:$0xff]  }
  0x10   :  { %v3030_v41 = vld [vmem:[%s4441_s0 + $0x1b8] ss:$20 sps:$4 sm:$0xff]   ;;  %v3038_v48 = vld [vmem:[%s4441_s0 + $0x1e0] ss:$20 sps:$4 sm:$0xff]   ;;  %v3046_v54 = vld [vmem:[%s4441_s0 + $0x208] ss:$20 sps:$4 sm:$0xff]  }
  0x11   :  { %v3035_v45 = vld [vmem:[%s4441_s0 + $0x1e4] ss:$20 sps:$4 sm:$0xff]   ;;  %v3041_v50 = vld [vmem:[%s4441_s0 + $0xcc] ss:$20 sps:$4 sm:$0xff]   ;;  %v3047_v55 = vld [vmem:[%s4440_s1 + $0xd0] sm:$0xff]  }
  0x12   :  { %1400 = vmatpush1.bf16.msra.mxu0 %v2988_v5  ;;  %2891 = vmatpush1.bf16.msra.mxu1 %v2988_v5  ;;  %v3032_v46 = vld [vmem:[%s4440_s1 + $0xb8] sm:$0xff]   ;;  %v3039_v49 = vld [vmem:[%s4440_s1 + $0xc0] sm:$0xff]   ;;  %v3040_v52 = vld [vmem:[%s4440_s1 + $0xc8] sm:$0xff]  }
  0x13   :  { %1401 = vmatprep.subr.bf16.mxu0 %v3244_v0  ;;  %2876 = vmatprep.subr.bf16.mxu1 %v3244_v0  ;;  %v3043_v51 = vld [vmem:[%s4441_s0 + $0x20c] ss:$20 sps:$4 sm:$0xff]   ;;  %v3049_v56 = vld [vmem:[%s4441_s0 + $0xf4] ss:$20 sps:$4 sm:$0xff]   ;;  %v3048_v58 = vld [vmem:[%s4440_s1 + $0xd8] sm:$0xff]  }
  0x14   :  { %v3051_v57 = vld [vmem:[%s4441_s0 + $0x234] ss:$20 sps:$4 sm:$0xff]   ;;  %v3053_v59 = vld [vmem:[%s4441_s0 + $0xf0] ss:$20 sps:$4 sm:$0xff]   ;;  %v3062_v2 = vld [vmem:[%s4441_s0 + $0x118] ss:$20 sps:$4 sm:$0xff]  }
  0x15   :  { %v3054_v60 = vld [vmem:[%s4441_s0 + $0x230] ss:$20 sps:$4 sm:$0xff]   ;;  %v3057_v1 = vld [vmem:[%s4440_s1 + $0xe8] sm:$0xff]  }
  0x16   :  { %1402 = vmatpush1.bf16.msra.mxu0 %v2989_v7  ;;  %2892 = vmatpush1.bf16.msra.mxu1 %v2989_v7  ;;  %v3056_v61 = vld [vmem:[%s4440_s1 + $0xe0] sm:$0xff]   ;;  %v3058_v62 = vld [vmem:[%s4441_s0 + $0x11c] ss:$20 sps:$4 sm:$0xff]   ;;  %v3063_v3 = vld [vmem:[%s4441_s0 + $0x258] ss:$20 sps:$4 sm:$0xff]  }
  0x17   :  { %1403 = vmatprep.subr.bf16.mxu0 %v3244_v0  ;;  %2877 = vmatprep.subr.bf16.mxu1 %v3244_v0  ;;  %v3060_v63 = vld [vmem:[%s4441_s0 + $0x25c] ss:$20 sps:$4 sm:$0xff]   ;;  %v3066_v5 = vld [vmem:[%s4441_s0 + $0x284] ss:$20 sps:$4 sm:$0xff]   ;;  %v3070_v6 = vld [vmem:[%s4441_s0 + $0xc] ss:$20 sps:$4 sm:$0xff]  }
  0x18   :  { %v3064_v4 = vld [vmem:[%s4440_s1 + $0xf0] sm:$0xff]   ;;  %v3065_v7 = vld [vmem:[%s4440_s1 + $0xf8] sm:$0xff]  }
  0x19   :  { %v3068_v8 = vld [vmem:[%s4441_s0 + $0x8] ss:$20 sps:$4 sm:$0xff]  }
  0x1a   :  { %1404 = vmatpush1.bf16.msra.mxu0 %v2990_v9  ;;  %2893 = vmatpush1.bf16.msra.mxu1 %v2990_v9  ;;  %v3071_v9 = vld [vmem:[%s4441_s0 + $0x280] ss:$20 sps:$4 sm:$0xff]  }
  0x1b   :  { %1405 = vmatprep.subr.bf16.mxu0 %v3244_v0  ;;  %2878 = vmatprep.subr.bf16.mxu1 %v3244_v0 }
  0x1e   :  { %1406 = vmatpush1.bf16.msra.mxu0 %v2991_v10  ;;  %2894 = vmatpush1.bf16.msra.mxu1 %v2991_v10  ;;  %v3072_v10 = vld [vmem:[%s4441_s0 + $0x2ac] ss:$20 sps:$4 sm:$0xff]  }
  0x1f   :  { %1407 = vmatprep.subr.bf16.mxu0 %v3244_v0  ;;  %2879 = vmatprep.subr.bf16.mxu1 %v3244_v0 }
  0x22   :  { %1408 = vmatpush1.bf16.msra.mxu0 %v2992_v11  ;;  %2895 = vmatpush1.bf16.msra.mxu1 %v2992_v11  ;;  %v3074_v11 = vld [vmem:[%s4441_s0 + $0x34] ss:$20 sps:$4 sm:$0xff]  }
  0x23   :  { %1409 = vmatprep.subr.bf16.mxu0 %v3244_v0  ;;  %2880 = vmatprep.subr.bf16.mxu1 %v3244_v0 }
  0x26   :  { %1410 = vmatpush1.bf16.msra.mxu0 %v2993_v12  ;;  %2896 = vmatpush1.bf16.msra.mxu1 %v2993_v12  ;;  %v3077_v12 = vld [vmem:[%s4441_s0 + $0x30] ss:$20 sps:$4 sm:$0xff]  }
  0x27   :  { %1411 = vmatprep.subr.bf16.mxu0 %v3244_v0  ;;  %2881 = vmatprep.subr.bf16.mxu1 %v3244_v0 }
  0x2a   :  { %1412 = vmatpush1.bf16.msra.mxu0 %v2994_v13  ;;  %2897 = vmatpush1.bf16.msra.mxu1 %v2994_v13  ;;  %v3078_v13 = vld [vmem:[%s4441_s0 + $0x2d4] ss:$20 sps:$4 sm:$0xff]  }
  0x2b   :  { %1413 = vmatprep.subr.bf16.mxu0 %v3244_v0  ;;  %2882 = vmatprep.subr.bf16.mxu1 %v3244_v0 }
  0x2e   :  { %1414 = vmatpush1.bf16.msra.mxu0 %v2995_v14  ;;  %2898 = vmatpush1.bf16.msra.mxu1 %v2995_v14  ;;  %v3080_v14 = vld [vmem:[%s4441_s0 + $0x5c] ss:$20 sps:$4 sm:$0xff]  }
  0x2f   :  { %1415 = vmatprep.subr.bf16.mxu0 %v3244_v0  ;;  %2883 = vmatprep.subr.bf16.mxu1 %v3244_v0 }
  0x32   :  { %1416 = vmatpush1.bf16.msra.mxu0 %v2996_v15  ;;  %2899 = vmatpush1.bf16.msra.mxu1 %v2996_v15  ;;  %v3082_v15 = vld [vmem:[%s4441_s0 + $0x2d0] ss:$20 sps:$4 sm:$0xff]  }
  0x33   :  { %1417 = vmatprep.subr.bf16.mxu0 %v3244_v0  ;;  %2884 = vmatprep.subr.bf16.mxu1 %v3244_v0 }
  0x36   :  { %1418 = vmatpush1.bf16.msra.mxu0 %v2997_v16  ;;  %2900 = vmatpush1.bf16.msra.mxu1 %v2997_v16  ;;  %v3083_v16 = vld [vmem:[%s4441_s0 + $0x58] ss:$20 sps:$4 sm:$0xff]  }
  0x37   :  { %1419 = vmatprep.subr.bf16.mxu0 %v3244_v0  ;;  %2885 = vmatprep.subr.bf16.mxu1 %v3244_v0 }
  0x3a   :  { %1420 = vmatpush1.bf16.msra.mxu0 %v2998_v17  ;;  %2901 = vmatpush1.bf16.msra.mxu1 %v2998_v17  ;;  %v3084_v17 = vld [vmem:[%s4441_s0 + $0x2fc] ss:$20 sps:$4 sm:$0xff]  }
  0x3b   :  { %1421 = vmatprep.subr.bf16.mxu0 %v3244_v0  ;;  %2886 = vmatprep.subr.bf16.mxu1 %v3244_v0 }
  0x3e   :  { %1422 = vmatpush1.bf16.msra.mxu0 %v2999_v18  ;;  %2902 = vmatpush1.bf16.msra.mxu1 %v2999_v18  ;;  %v3086_v18 = vld [vmem:[%s4441_s0 + $0x84] ss:$20 sps:$4 sm:$0xff]  }
  0x3f   :  { %1680 = vmatprep.subr.bf16.mxu0 %v3244_v0  ;;  %2799 = vmatprep.subr.bf16.mxu1 %v3006_v19 }
  0x41   :  { %1424 = vmatmul.mubr.bf16.vlgmr.msra.gmra.mrb[0].mxu0 %v3000_v20  ;;  %1488 = vmatmul.mubr.bf16.vlgmr.msra.gmra.mrb[0].mxu1 %v3003_v21  ;;  %v3089_v20 = vld [vmem:[%s4441_s0 + $0x80] ss:$20 sps:$4 sm:$0xff]   ;;  %v3090_v21 = vld [vmem:[%s4441_s0 + $0x324] ss:$20 sps:$4 sm:$0xff]  }
  0x42   :  { %1681 = vmatpush1.bf16.msra.mxu0 %v3007_v22  ;;  %2800 = vmatpush3.bf16.msra.mxu1 %v3006_v19  ;;  %v3088_v19 = vld [vmem:[%s4441_s0 + $0x2f8] ss:$20 sps:$4 sm:$0xff]  }
  0x43   :  { %1682 = vmatprep.subr.bf16.mxu0 %v3244_v0  ;;  %1431 = vmatprep.mubr.bf16.mxu0 %v3009_v23  ;;  %v3092_v22 = vld [vmem:[%s4441_s0 + $0xac] ss:$20 sps:$4 sm:$0xff]  }
  0x44   :  { %1495 = vmatprep.mubr.bf16.mxu1 %v3011_v24  ;;  %2801 = vmatprep.subr.bf16.mxu1 %v3055_v25  ;;  %v3094_v23 = vld [vmem:[%s4441_s0 + $0x320] ss:$20 sps:$4 sm:$0xff]   ;;  %v3095_v24 = vld [vmem:[%s4441_s0 + $0xa8] ss:$20 sps:$4 sm:$0xff]  }
  0x46   :  { %1683 = vmatpush1.bf16.msra.mxu0 %v3008_v26  ;;  %2802 = vmatpush3.bf16.msra.mxu1 %v3055_v25  ;;  %v3097_v25 = vld [vmem:[%s4441_s0 + $0x34c] ss:$20 sps:$4 sm:$0xff]   ;;  %v3099_v26 = vld [vmem:[%s4441_s0 + $0xd4] ss:$20 sps:$4 sm:$0xff]  }
  0x47   :  { %1684 = vmatprep.subr.bf16.mxu0 %v3244_v0  ;;  %2803 = vmatprep.subr.bf16.mxu1 %v3096_v30 }
  0x49   :  { %1432 = vmatmul.mubr.bf16.gmra.mrb[4].mxu0 %v3013_v27  ;;  %1496 = vmatmul.mubr.bf16.gmra.mrb[4].mxu1 %v3014_v28  ;;  %v3101_v27 = vld [vmem:[%s4441_s0 + $0x348] ss:$20 sps:$4 sm:$0xff]   ;;  %v3102_v28 = vld [vmem:[%s4441_s0 + $0xd0] ss:$20 sps:$4 sm:$0xff]  }
  0x4a   :  { %1685 = vmatpush1.bf16.msra.mxu0 %v3015_v29  ;;  %1439 = vmatprep.mubr.bf16.mxu0 %v3017_v31  ;;  %v3103_v29 = vld [vmem:[%s4441_s0 + $0x374] ss:$20 sps:$4 sm:$0xff]   ;;  %v3107_v31 = vld [vmem:[%s4441_s0 + $0x370] ss:$20 sps:$4 sm:$0xff]  }
  0x4b   :  { %1686 = vmatprep.subr.bf16.mxu0 %v3244_v0  ;;  %1503 = vmatprep.mubr.bf16.mxu1 %v3019_v32  ;;  %v3108_v32 = vld [vmem:[%s4441_s0 + $0xf8] ss:$20 sps:$4 sm:$0xff]  }
  0x4c   :  { %2804 = vmatpush3.bf16.msra.mxu1 %v3096_v30  ;;  %v3105_v30 = vld [vmem:[%s4441_s0 + $0xfc] ss:$20 sps:$4 sm:$0xff]  }
  0x4d   :  { %2805 = vmatprep.subr.bf16.mxu1 %v3133_v44 }
  0x4e   :  { %1687 = vmatpush1.bf16.msra.mxu0 %v3016_v33  ;;  %v3109_v33 = vld [vmem:[%s4441_s0 + $0x39c] ss:$20 sps:$4 sm:$0xff]  }
  0x4f   :  { %1688 = vmatprep.subr.bf16.mxu0 %v3244_v0 }
  0x50   :  { %2806 = vmatpush3.bf16.msra.mxu1 %v3133_v44  ;;  %v3126_v44 = vld [vmem:[%s4441_s0 + $0x170] ss:$20 sps:$4 sm:$0xff]  }
  0x51   :  { %1440 = vmatmul.mubr.bf16.gmra.mrb[8].mxu0 %v3021_v34  ;;  %1504 = vmatmul.mubr.bf16.gmra.mrb[8].mxu1 %v3022_v35  ;;  %v3111_v34 = vld [vmem:[%s4441_s0 + $0x124] ss:$20 sps:$4 sm:$0xff]  }
  0x52   :  { %1689 = vmatpush1.bf16.msra.mxu0 %v3023_v36  ;;  %1447 = vmatprep.mubr.bf16.mxu0 %v3025_v37  ;;  %v3113_v35 = vld [vmem:[%s4441_s0 + $0x398] ss:$20 sps:$4 sm:$0xff]   ;;  %v3114_v36 = vld [vmem:[%s4441_s0 + $0x120] ss:$20 sps:$4 sm:$0xff]  }
  0x53   :  { %1690 = vmatprep.subr.bf16.mxu0 %v3244_v0  ;;  %1511 = vmatprep.mubr.bf16.mxu1 %v3027_v38  ;;  %v3115_v37 = vld [vmem:[%s4441_s0 + $0x3c4] ss:$20 sps:$4 sm:$0xff]   ;;  %v3117_v38 = vld [vmem:[%s4441_s0 + $0x14c] ss:$20 sps:$4 sm:$0xff]  }
  0x56   :  { %1691 = vmatpush1.bf16.msra.mxu0 %v3024_v39  ;;  %v3119_v39 = vld [vmem:[%s4441_s0 + $0x3c0] ss:$20 sps:$4 sm:$0xff]  }
  0x57   :  { %1692 = vmatprep.subr.bf16.mxu0 %v3244_v0 }
  0x59   :  { %1448 = vmatmul.mubr.bf16.gmra.mrb[12].mxu0 %v3029_v40  ;;  %1512 = vmatmul.mubr.bf16.gmra.mrb[12].mxu1 %v3030_v41  ;;  %v3120_v40 = vld [vmem:[%s4441_s0 + $0x148] ss:$20 sps:$4 sm:$0xff]   ;;  %v3121_v41 = vld [vmem:[%s4441_s0 + $0x3ec] ss:$20 sps:$4 sm:$0xff]  }
  0x5a   :  { %1693 = vmatpush1.bf16.msra.mxu0 %v3031_v42  ;;  %1455 = vmatprep.mubr.bf16.mxu0 %v3033_v43  ;;  %v3123_v42 = vld [vmem:[%s4441_s0 + $0x174] ss:$20 sps:$4 sm:$0xff]  }
  0x5b   :  { %1694 = vmatprep.subr.bf16.mxu0 %v3244_v0  ;;  %1519 = vmatprep.mubr.bf16.mxu1 %v3035_v45  ;;  %v3125_v43 = vld [vmem:[%s4441_s0 + $0x3e8] ss:$20 sps:$4 sm:$0xff]  }
  0x5c   :  { %v3127_v45 = vld [vmem:[%s4441_s0 + $0x414] ss:$20 sps:$4 sm:$0xff]  }
  0x5e   :  { %1695 = vmatpush1.bf16.msra.mxu0 %v3032_v46  ;;  %v3129_v46 = vld [vmem:[%s4441_s0 + $0x19c] ss:$20 sps:$4 sm:$0xff]  }
  0x5f   :  { %1696 = vmatprep.subr.bf16.mxu0 %v3244_v0 }
  0x61   :  { %1456 = vmatmul.mubr.bf16.gmra.mrb[16].mxu0 %v3037_v47  ;;  %1520 = vmatmul.mubr.bf16.gmra.mrb[16].mxu1 %v3038_v48  ;;  %v3131_v47 = vld [vmem:[%s4441_s0 + $0x410] ss:$20 sps:$4 sm:$0xff]   ;;  %v3132_v48 = vld [vmem:[%s4441_s0 + $0x198] ss:$20 sps:$4 sm:$0xff]  }
  0x62   :  { %1697 = vmatpush1.bf16.msra.mxu0 %v3039_v49  ;;  %1463 = vmatprep.mubr.bf16.mxu0 %v3041_v50  ;;  %v3134_v49 = vld [vmem:[%s4441_s0 + $0x43c] ss:$20 sps:$4 sm:$0xff]   ;;  %v3136_v50 = vld [vmem:[%s4441_s0 + $0x1c4] ss:$20 sps:$4 sm:$0xff]  }
  0x63   :  { %1698 = vmatprep.subr.bf16.mxu0 %v3244_v0  ;;  %1527 = vmatprep.mubr.bf16.mxu1 %v3043_v51  ;;  %v3138_v51 = vld [vmem:[%s4441_s0 + $0x438] ss:$20 sps:$4 sm:$0xff]  }
  0x66   :  { %1699 = vmatpush1.bf16.msra.mxu0 %v3040_v52  ;;  %v3139_v52 = vld [vmem:[%s4441_s0 + $0x1c0] ss:$20 sps:$4 sm:$0xff]  }
  0x67   :  { %1700 = vmatprep.subr.bf16.mxu0 %v3244_v0 }
  0x69   :  { %1464 = vmatmul.mubr.bf16.gmra.mrb[20].mxu0 %v3045_v53  ;;  %1528 = vmatmul.mubr.bf16.gmra.mrb[20].mxu1 %v3046_v54  ;;  %v3140_v53 = vld [vmem:[%s4441_s0 + $0x464] ss:$20 sps:$4 sm:$0xff]   ;;  %v3142_v54 = vld [vmem:[%s4441_s0 + $0x1ec] ss:$20 sps:$4 sm:$0xff]  }
  0x6a   :  { %1701 = vmatpush1.bf16.msra.mxu0 %v3047_v55  ;;  %1471 = vmatprep.mubr.bf16.mxu0 %v3049_v56  ;;  %v3144_v55 = vld [vmem:[%s4441_s0 + $0x460] ss:$20 sps:$4 sm:$0xff]   ;;  %v3145_v56 = vld [vmem:[%s4441_s0 + $0x1e8] ss:$20 sps:$4 sm:$0xff]  }
  0x6b   :  { %1702 = vmatprep.subr.bf16.mxu0 %v3244_v0  ;;  %1535 = vmatprep.mubr.bf16.mxu1 %v3051_v57  ;;  %v3146_v57 = vld [vmem:[%s4441_s0 + $0x48c] ss:$20 sps:$4 sm:$0xff]  }
  0x6e   :  { %1703 = vmatpush1.bf16.msra.mxu0 %v3048_v58  ;;  %v3148_v58 = vld [vmem:[%s4441_s0 + $0x214] ss:$20 sps:$4 sm:$0xff]  }
  0x6f   :  { %1704 = vmatprep.subr.bf16.mxu0 %v3244_v0 }
  0x71   :  { %1472 = vmatmul.mubr.bf16.gmra.mrb[24].mxu0 %v3053_v59  ;;  %1536 = vmatmul.mubr.bf16.gmra.mrb[24].mxu1 %v3054_v60  ;;  %v3150_v59 = vld [vmem:[%s4441_s0 + $0x488] ss:$20 sps:$4 sm:$0xff]   ;;  %v3151_v60 = vld [vmem:[%s4441_s0 + $0x210] ss:$20 sps:$4 sm:$0xff]  }
  0x72   :  { %1705 = vmatpush1.bf16.msra.mxu0 %v3056_v61  ;;  %1479 = vmatprep.mubr.bf16.mxu0 %v3058_v62  ;;  %v3152_v61 = vld [vmem:[%s4441_s0 + $0x4b4] ss:$20 sps:$4 sm:$0xff]   ;;  %v3154_v62 = vld [vmem:[%s4441_s0 + $0x23c] ss:$20 sps:$4 sm:$0xff]  }
  0x73   :  { %1706 = vmatprep.subr.bf16.mxu0 %v3244_v0  ;;  %1543 = vmatprep.mubr.bf16.mxu1 %v3060_v63  ;;  %v3156_v63 = vld [vmem:[%s4441_s0 + $0x4b0] ss:$20 sps:$4 sm:$0xff]  }
  0x76   :  { %1707 = vmatpush1.bf16.msra.mxu0 %v3057_v1  ;;  %v3157_v1 = vld [vmem:[%s4441_s0 + $0x238] ss:$20 sps:$4 sm:$0xff]  }
  0x77   :  { %1708 = vmatprep.subr.bf16.mxu0 %v3244_v0 }
  0x79   :  { %1480 = vmatmul.mubr.bf16.gmra.mrb[28].mxu0 %v3062_v2  ;;  %1544 = vmatmul.mubr.bf16.gmra.mrb[28].mxu1 %v3063_v3  ;;  %v3158_v2 = vld [vmem:[%s4441_s0 + $0x4dc] ss:$20 sps:$4 sm:$0xff]   ;;  %v3160_v3 = vld [vmem:[%s4441_s0 + $0x264] ss:$20 sps:$4 sm:$0xff]  }
  0x7a   :  { %1709 = vmatpush1.bf16.msra.mxu0 %v3064_v4  ;;  %1551 = vmatprep.mubr.bf16.mxu1 %v3066_v5  ;;  %v3162_v4 = vld [vmem:[%s4441_s0 + $0x4d8] ss:$20 sps:$4 sm:$0xff]   ;;  %v3163_v5 = vld [vmem:[%s4441_s0 + $0x260] ss:$20 sps:$4 sm:$0xff]  }
  0x7b   :  { %1710 = vmatprep.subr.bf16.mxu0 %v3244_v0  ;;  %1712 = vmatprep.mubr.bf16.mxu0 %v3070_v6  ;;  %v3076_v0 = vld [vmem:[%s4441_s0 + $0x2a8] ss:$20 sps:$4 sm:$0xff]   ;;  %v3164_v6 = vld [vmem:[%s4441_s0 + $0x28c] ss:$20 sps:$4 sm:$0xff]  }
  0x7e   :  { %1711 = vmatpush1.bf16.msra.mxu0 %v3065_v7  ;;  %v3166_v7 = vld [vmem:[%s4441_s0 + $0x10] ss:$20 sps:$4 sm:$0xff]  }
  0x81   :  { %1552 = vmatmul.mubr.bf16.gmra.mrb[32].mxu1 %v3071_v9  ;;  %1713 = vmatmul.mubr.bf16.vlgmr.msra.gmra.mrb[0].mxu0 %v3068_v8  ;;  %v3167_v8 = vld [vmem:[%s4441_s0 + $0x288] ss:$20 sps:$4 sm:$0xff]   ;;  %v3168_v9 = vld [vmem:[%s4441_s0 + $0x38] ss:$20 sps:$4 sm:$0xff]  }
  0x82   :  { %1559 = vmatprep.mubr.bf16.mxu1 %v3072_v10  ;;  %1720 = vmatprep.mubr.bf16.mxu0 %v3074_v11  ;;  %v3169_v10 = vld [vmem:[%s4441_s0 + $0x2b4] ss:$20 sps:$4 sm:$0xff]  }
  0x83   :  { %v3171_v11 = vld [vmem:[%s4441_s0 + $0x60] ss:$20 sps:$4 sm:$0xff]  }
  0x89   :  { %1560 = vmatmul.mubr.bf16.gmra.mrb[36].mxu1 %v3076_v0  ;;  %1721 = vmatmul.mubr.bf16.gmra.mrb[4].mxu0 %v3077_v12  ;;  %v3172_v0 = vld [vmem:[%s4441_s0 + $0x2b0] ss:$20 sps:$4 sm:$0xff]   ;;  %v3173_v12 = vld [vmem:[%s4441_s0 + $0x88] ss:$20 sps:$4 sm:$0xff]  }
  0x8a   :  { %1567 = vmatprep.mubr.bf16.mxu1 %v3078_v13  ;;  %1728 = vmatprep.mubr.bf16.mxu0 %v3080_v14  ;;  %v3174_v13 = vld [vmem:[%s4441_s0 + $0x2dc] ss:$20 sps:$4 sm:$0xff]  }
  0x8b   :  { %v3176_v14 = vld [vmem:[%s4441_s0 + $0xb0] ss:$20 sps:$4 sm:$0xff]  }
  0x91   :  { %1568 = vmatmul.mubr.bf16.gmra.mrb[40].mxu1 %v3082_v15  ;;  %1729 = vmatmul.mubr.bf16.gmra.mrb[8].mxu0 %v3083_v16  ;;  %v3177_v15 = vld [vmem:[%s4441_s0 + $0x2d8] ss:$20 sps:$4 sm:$0xff]  }
  0x92   :  { %1575 = vmatprep.mubr.bf16.mxu1 %v3084_v17  ;;  %1736 = vmatprep.mubr.bf16.mxu0 %v3086_v18  ;;  %v3178_v16 = vld [vmem:[%s4441_s0 + $0xd8] ss:$20 sps:$4 sm:$0xff]   ;;  %v3181_v18 = vld [vmem:[%s4441_s0 + $0x100] ss:$20 sps:$4 sm:$0xff]  }
  0x93   :  { %v3179_v17 = vld [vmem:[%s4441_s0 + $0x304] ss:$20 sps:$4 sm:$0xff]  }
  0x99   :  { %1576 = vmatmul.mubr.bf16.gmra.mrb[44].mxu1 %v3088_v19  ;;  %1737 = vmatmul.mubr.bf16.gmra.mrb[12].mxu0 %v3089_v20 }
  0x9a   :  { %1583 = vmatprep.mubr.bf16.mxu1 %v3090_v21  ;;  %1744 = vmatprep.mubr.bf16.mxu0 %v3092_v22  ;;  %v3182_v21 = vld [vmem:[%s4441_s0 + $0x300] ss:$20 sps:$4 sm:$0xff]   ;;  %v3183_v22 = vld [vmem:[%s4441_s0 + $0x128] ss:$20 sps:$4 sm:$0xff]  }
  0xa1   :  { %1584 = vmatmul.mubr.bf16.gmra.mrb[48].mxu1 %v3094_v23  ;;  %1745 = vmatmul.mubr.bf16.gmra.mrb[16].mxu0 %v3095_v24  ;;  %v3184_v24 = vld [vmem:[%s4441_s0 + $0x32c] ss:$20 sps:$4 sm:$0xff]  }
  0xa2   :  { %1591 = vmatprep.mubr.bf16.mxu1 %v3097_v25  ;;  %1752 = vmatprep.mubr.bf16.mxu0 %v3099_v26  ;;  %v3186_v25 = vld [vmem:[%s4441_s0 + $0x150] ss:$20 sps:$4 sm:$0xff]  }
  0xa9   :  { %1592 = vmatmul.mubr.bf16.gmra.mrb[52].mxu1 %v3101_v27  ;;  %1753 = vmatmul.mubr.bf16.gmra.mrb[20].mxu0 %v3102_v28 }
  0xaa   :  { %1599 = vmatprep.mubr.bf16.mxu1 %v3103_v29  ;;  %1760 = vmatprep.mubr.bf16.mxu0 %v3105_v30  ;;  %v3187_v29 = vld [vmem:[%s4441_s0 + $0x328] ss:$20 sps:$4 sm:$0xff]   ;;  %v3188_v30 = vld [vmem:[%s4441_s0 + $0x178] ss:$20 sps:$4 sm:$0xff]  }
  0xb1   :  { %1600 = vmatmul.mubr.bf16.gmra.mrb[56].mxu1 %v3107_v31  ;;  %1761 = vmatmul.mubr.bf16.gmra.mrb[24].mxu0 %v3108_v32  ;;  %v3189_v32 = vld [vmem:[%s4441_s0 + $0x354] ss:$20 sps:$4 sm:$0xff]  }
  0xb2   :  { %1607 = vmatprep.mubr.bf16.mxu1 %v3109_v33  ;;  %1768 = vmatprep.mubr.bf16.mxu0 %v3111_v34  ;;  %v3191_v33 = vld [vmem:[%s4441_s0 + $0x1a0] ss:$20 sps:$4 sm:$0xff]  }
  0xb9   :  { %1608 = vmatmul.mubr.bf16.gmra.mrb[60].mxu1 %v3113_v35  ;;  %1769 = vmatmul.mubr.bf16.gmra.mrb[28].mxu0 %v3114_v36 }
  0xba   :  { %1615 = vmatprep.mubr.bf16.mxu1 %v3115_v37  ;;  %1776 = vmatprep.mubr.bf16.mxu0 %v3117_v38  ;;  %v3192_v37 = vld [vmem:[%s4441_s0 + $0x350] ss:$20 sps:$4 sm:$0xff]   ;;  %v3193_v38 = vld [vmem:[%s4441_s0 + $0x1c8] ss:$20 sps:$4 sm:$0xff]  }
  0xc1   :  { %1616 = vmatmul.mubr.bf16.gmra.mrb[64].mxu1 %v3119_v39  ;;  %1777 = vmatmul.mubr.bf16.gmra.mrb[32].mxu0 %v3120_v40  ;;  %v3194_v40 = vld [vmem:[%s4441_s0 + $0x37c] ss:$20 sps:$4 sm:$0xff]  }
  0xc2   :  { %1623 = vmatprep.mubr.bf16.mxu1 %v3121_v41  ;;  %1784 = vmatprep.mubr.bf16.mxu0 %v3123_v42  ;;  %v3196_v41 = vld [vmem:[%s4441_s0 + $0x1f0] ss:$20 sps:$4 sm:$0xff]  }
  0xc9   :  { %1624 = vmatmul.mubr.bf16.gmra.mrb[68].mxu1 %v3125_v43  ;;  %1785 = vmatmul.mubr.bf16.gmra.mrb[36].mxu0 %v3126_v44 }
  0xca   :  { %1631 = vmatprep.mubr.bf16.mxu1 %v3127_v45  ;;  %1792 = vmatprep.mubr.bf16.mxu0 %v3129_v46  ;;  %v3197_v45 = vld [vmem:[%s4441_s0 + $0x378] ss:$20 sps:$4 sm:$0xff]  }
  0xcb   :  { %v3198_v46 = vld [vmem:[%s4441_s0 + $0x218] ss:$20 sps:$4 sm:$0xff]  }
  0xd1   :  { %1632 = vmatmul.mubr.bf16.gmra.mrb[72].mxu1 %v3131_v47  ;;  %1793 = vmatmul.mubr.bf16.gmra.mrb[40].mxu0 %v3132_v48  ;;  %v3199_v48 = vld [vmem:[%s4441_s0 + $0x3a4] ss:$20 sps:$4 sm:$0xff]  }
  0xd2   :  { %1639 = vmatprep.mubr.bf16.mxu1 %v3134_v49  ;;  %1800 = vmatprep.mubr.bf16.mxu0 %v3136_v50  ;;  %v3201_v49 = vld [vmem:[%s4441_s0 + $0x240] ss:$20 sps:$4 sm:$0xff]  }
  0xd9   :  { %1640 = vmatmul.mubr.bf16.gmra.mrb[76].mxu1 %v3138_v51  ;;  %1801 = vmatmul.mubr.bf16.gmra.mrb[44].mxu0 %v3139_v52 }
  0xda   :  { %1647 = vmatprep.mubr.bf16.mxu1 %v3140_v53  ;;  %1808 = vmatprep.mubr.bf16.mxu0 %v3142_v54  ;;  %v3202_v53 = vld [vmem:[%s4441_s0 + $0x3a0] ss:$20 sps:$4 sm:$0xff]   ;;  %v3203_v54 = vld [vmem:[%s4441_s0 + $0x268] ss:$20 sps:$4 sm:$0xff]  }
  0xe1   :  { %1648 = vmatmul.mubr.bf16.gmra.mrb[80].mxu1 %v3144_v55  ;;  %1809 = vmatmul.mubr.bf16.gmra.mrb[48].mxu0 %v3145_v56  ;;  %v3204_v56 = vld [vmem:[%s4441_s0 + $0x3cc] ss:$20 sps:$4 sm:$0xff]  }
  0xe2   :  { %1655 = vmatprep.mubr.bf16.mxu1 %v3146_v57  ;;  %1816 = vmatprep.mubr.bf16.mxu0 %v3148_v58  ;;  %v3206_v57 = vld [vmem:[%s4441_s0 + $0x290] ss:$20 sps:$4 sm:$0xff]  }
  0xe9   :  { %1656 = vmatmul.mubr.bf16.gmra.mrb[84].mxu1 %v3150_v59  ;;  %1817 = vmatmul.mubr.bf16.gmra.mrb[52].mxu0 %v3151_v60 }
  0xea   :  { %1663 = vmatprep.mubr.bf16.mxu1 %v3152_v61  ;;  %1824 = vmatprep.mubr.bf16.mxu0 %v3154_v62  ;;  %v3207_v61 = vld [vmem:[%s4441_s0 + $0x3c8] ss:$20 sps:$4 sm:$0xff]   ;;  %v3208_v62 = vld [vmem:[%s4441_s0 + $0x2b8] ss:$20 sps:$4 sm:$0xff]  }
  0xf1   :  { %1664 = vmatmul.mubr.bf16.gmra.mrb[88].mxu1 %v3156_v63  ;;  %1825 = vmatmul.mubr.bf16.gmra.mrb[56].mxu0 %v3157_v1  ;;  %v3209_v1 = vld [vmem:[%s4441_s0 + $0x3f4] ss:$20 sps:$4 sm:$0xff]  }
  0xf2   :  { %1671 = vmatprep.mubr.bf16.mxu1 %v3158_v2  ;;  %1832 = vmatprep.mubr.bf16.mxu0 %v3160_v3  ;;  %v3211_v2 = vld [vmem:[%s4441_s0 + $0x2e0] ss:$20 sps:$4 sm:$0xff]  }
  0xf9   :  { %1672 = vmatmul.mubr.bf16.gmra.mrb[92].mxu1 %v3162_v4  ;;  %1833 = vmatmul.mubr.bf16.gmra.mrb[60].mxu0 %v3163_v5 }
  0xfa   :  { %1840 = vmatprep.mubr.bf16.mxu0 %v3164_v6  ;;  %2807 = vmatprep.mubr.msk.bf16.mxu1 %vm1294_vm0, %v3166_v7  ;;  %v3212_v6 = vld [vmem:[%s4441_s0 + $0x3f0] ss:$20 sps:$4 sm:$0xff]   ;;  %v3213_v7 = vld [vmem:[%s4441_s0 + $0x308] ss:$20 sps:$4 sm:$0xff]  }
 0x101   :  { %1841 = vmatmul.mubr.bf16.gmra.mrb[64].mxu0 %v3167_v8  ;;  %2808 = vmatmul.mubr.msk.bf16.vlgmr.msra.gmra.mrb[96].mxu1 %vm1294_vm0, %v3168_v9  ;;  %v3214_v9 = vld [vmem:[%s4441_s0 + $0x41c] ss:$20 sps:$4 sm:$0xff]  }
 0x102   :  { %1848 = vmatprep.mubr.bf16.mxu0 %v3169_v10  ;;  %2811 = vmatprep.mubr.msk.bf16.mxu1 %vm1294_vm0, %v3171_v11  ;;  %v3216_v10 = vld [vmem:[%s4441_s0 + $0x330] ss:$20 sps:$4 sm:$0xff]  }
 0x109   :  { %1849 = vmatmul.mubr.bf16.gmra.mrb[68].mxu0 %v3172_v0  ;;  %2812 = vmatmul.mubr.msk.bf16.gmra.mrb[100].mxu1 %vm1294_vm0, %v3173_v12 }
 0x10a   :  { %1856 = vmatprep.mubr.bf16.mxu0 %v3174_v13  ;;  %2815 = vmatprep.mubr.msk.bf16.mxu1 %vm1294_vm0, %v3176_v14  ;;  %v3217_v13 = vld [vmem:[%s4441_s0 + $0x418] ss:$20 sps:$4 sm:$0xff]  }
 0x10b   :  { %v3218_v14 = vld [vmem:[%s4441_s0 + $0x358] ss:$20 sps:$4 sm:$0xff]  }
 0x111   :  { %1857 = vmatmul.mubr.bf16.gmra.mrb[72].mxu0 %v3177_v15  ;;  %2816 = vmatmul.mubr.msk.bf16.gmra.mrb[104].mxu1 %vm1294_vm0, %v3178_v16  ;;  %v3219_v16 = vld [vmem:[%s4441_s0 + $0x444] ss:$20 sps:$4 sm:$0xff]  }
 0x112   :  { %1864 = vmatprep.mubr.bf16.mxu0 %v3179_v17  ;;  %2819 = vmatprep.mubr.msk.bf16.mxu1 %vm1294_vm0, %v3181_v18  ;;  %v3221_v17 = vld [vmem:[%s4441_s0 + $0x380] ss:$20 sps:$4 sm:$0xff]  }
 0x114   :  { %v3758_v19 = vpop.f32.mrb[0].mxu1 }
 0x115   :  { %v1491_v20 = vpop.f32.mrb[1].mxu1 }
 0x116   :  { %v3766_v23 = vpop.f32.mrb[2].mxu1 }
 0x117   :  { %v1494_v26 = vpop.f32.mrb[3].mxu1 }
 0x118   :  { %v3223_v26 = vld [vmem:[%s4441_s0 + $0x3a8] ss:$20 sps:$4 sm:$0xff]  }
 0x119   :  { %1865 = vmatmul.mubr.bf16.gmra.mrb[76].mxu0 %v3182_v21  ;;  %2820 = vmatmul.mubr.msk.bf16.gmra.mrb[108].mxu1 %vm1294_vm0, %v3183_v22 }
 0x11a   :  { %1872 = vmatprep.mubr.bf16.mxu0 %v3184_v24  ;;  %2823 = vmatprep.mubr.msk.bf16.mxu1 %vm1294_vm0, %v3186_v25  ;;  %v3222_v25 = vld [vmem:[%s4441_s0 + $0x440] ss:$20 sps:$4 sm:$0xff]  }
 0x11c   :  { %v3776_v27 = vpop.f32.mrb[4].mxu1 }
 0x11d   :  { %v1499_v28 = vpop.f32.mrb[5].mxu1 }
 0x11e   :  { %v3784_v31 = vpop.f32.mrb[6].mxu1 }
 0x11f   :  { %v1502_v34 = vpop.f32.mrb[7].mxu1 }
 0x121   :  { %1873 = vmatmul.mubr.bf16.gmra.mrb[80].mxu0 %v3187_v29  ;;  %2824 = vmatmul.mubr.msk.bf16.gmra.mrb[112].mxu1 %vm1294_vm0, %v3188_v30  ;;  %v3224_v30 = vld [vmem:[%s4441_s0 + $0x46c] ss:$20 sps:$4 sm:$0xff]  }
 0x122   :  { %1880 = vmatprep.mubr.bf16.mxu0 %v3189_v32  ;;  %2827 = vmatprep.mubr.msk.bf16.mxu1 %vm1294_vm0, %v3191_v33  ;;  %v3226_v32 = vld [vmem:[%s4441_s0 + $0x3d0] ss:$20 sps:$4 sm:$0xff]  }
 0x124   :  { %v3794_v35 = vpop.f32.mrb[8].mxu1 }
 0x125   :  { %v1507_v36 = vpop.f32.mrb[9].mxu1 }
 0x126   :  { %v3802_v39 = vpop.f32.mrb[10].mxu1 }
 0x127   :  { %v1510_v42 = vpop.f32.mrb[11].mxu1 }
 0x128   :  { %v3228_v42 = vld [vmem:[%s4441_s0 + $0x3f8] ss:$20 sps:$4 sm:$0xff]  }
 0x129   :  { %1881 = vmatmul.mubr.bf16.gmra.mrb[84].mxu0 %v3192_v37  ;;  %2828 = vmatmul.mubr.msk.bf16.gmra.mrb[116].mxu1 %vm1294_vm0, %v3193_v38 }
 0x12a   :  { %1888 = vmatprep.mubr.bf16.mxu0 %v3194_v40  ;;  %2831 = vmatprep.mubr.msk.bf16.mxu1 %vm1294_vm0, %v3196_v41  ;;  %v3227_v41 = vld [vmem:[%s4441_s0 + $0x468] ss:$20 sps:$4 sm:$0xff]  }
 0x12c   :  { %v3812_v43 = vpop.f32.mrb[12].mxu1 }
 0x12d   :  { %v1515_v44 = vpop.f32.mrb[13].mxu1 }
 0x12e   :  { %v3820_v47 = vpop.f32.mrb[14].mxu1 }
 0x12f   :  { %v1518_v50 = vpop.f32.mrb[15].mxu1 }
 0x131   :  { %1889 = vmatmul.mubr.bf16.gmra.mrb[88].mxu0 %v3197_v45  ;;  %2832 = vmatmul.mubr.msk.bf16.gmra.mrb[120].mxu1 %vm1294_vm0, %v3198_v46  ;;  %v3229_v46 = vld [vmem:[%s4441_s0 + $0x494] ss:$20 sps:$4 sm:$0xff]  }
 0x132   :  { %1896 = vmatprep.mubr.bf16.mxu0 %v3199_v48  ;;  %2835 = vmatprep.mubr.msk.bf16.mxu1 %vm1294_vm0, %v3201_v49  ;;  %v3231_v48 = vld [vmem:[%s4441_s0 + $0x420] ss:$20 sps:$4 sm:$0xff]  }
 0x134   :  { %v3830_v51 = vpop.f32.mrb[16].mxu1 }
 0x135   :  { %v1523_v52 = vpop.f32.mrb[17].mxu1 }
 0x136   :  { %v3838_v55 = vpop.f32.mrb[18].mxu1 }
 0x137   :  { %v1526_v58 = vpop.f32.mrb[19].mxu1 }
 0x138   :  { %v3233_v58 = vld [vmem:[%s4441_s0 + $0x448] ss:$20 sps:$4 sm:$0xff]  }
 0x139   :  { %1897 = vmatmul.mubr.bf16.gmra.mrb[92].mxu0 %v3202_v53  ;;  %2836 = vmatmul.mubr.msk.bf16.gmra.mrb[124].mxu1 %vm1294_vm0, %v3203_v54 }
 0x13a   :  { %1904 = vmatprep.mubr.bf16.mxu0 %v3204_v56  ;;  %2839 = vmatprep.mubr.msk.bf16.mxu1 %vm1294_vm0, %v3206_v57  ;;  %v3232_v57 = vld [vmem:[%s4441_s0 + $0x490] ss:$20 sps:$4 sm:$0xff]  }
 0x13c   :  { %v3848_v59 = vpop.f32.mrb[20].mxu1 }
 0x13d   :  { %v1531_v60 = vpop.f32.mrb[21].mxu1 }
 0x13e   :  { %v3856_v63 = vpop.f32.mrb[22].mxu1 }
 0x13f   :  { %v1534_v3 = vpop.f32.mrb[23].mxu1 }
 0x141   :  { %1905 = vmatmul.mubr.bf16.gmra.mrb[96].mxu0 %v3207_v61  ;;  %2840 = vmatmul.mubr.msk.bf16.gmra.mrb[128].mxu1 %vm1294_vm0, %v3208_v62  ;;  %v3234_v62 = vld [vmem:[%s4441_s0 + $0x4bc] ss:$20 sps:$4 sm:$0xff]  }
 0x142   :  { %1912 = vmatprep.mubr.bf16.mxu0 %v3209_v1  ;;  %2843 = vmatprep.mubr.msk.bf16.mxu1 %vm1294_vm0, %v3211_v2  ;;  %v3236_v1 = vld [vmem:[%s4441_s0 + $0x470] ss:$20 sps:$4 sm:$0xff]  }
 0x144   :  { %v3866_v4 = vpop.f32.mrb[24].mxu1 }
 0x145   :  { %v1539_v5 = vpop.f32.mrb[25].mxu1 }
 0x146   :  { %v3874_v8 = vpop.f32.mrb[26].mxu1 }
 0x147   :  { %v1542_v11 = vpop.f32.mrb[27].mxu1 }
 0x148   :  { %v3238_v11 = vld [vmem:[%s4441_s0 + $0x498] ss:$20 sps:$4 sm:$0xff]  }
 0x149   :  { %1913 = vmatmul.mubr.bf16.gmra.mrb[100].mxu0 %v3212_v6  ;;  %2844 = vmatmul.mubr.msk.bf16.gmra.mrb[132].mxu1 %vm1294_vm0, %v3213_v7 }
 0x14a   :  { %1920 = vmatprep.mubr.bf16.mxu0 %v3214_v9  ;;  %2847 = vmatprep.mubr.msk.bf16.mxu1 %vm1294_vm0, %v3216_v10  ;;  %v3237_v10 = vld [vmem:[%s4441_s0 + $0x4b8] ss:$20 sps:$4 sm:$0xff]  }
 0x14c   :  { %v3884_v0 = vpop.f32.mrb[28].mxu1 }
 0x14d   :  { %v1547_v12 = vpop.f32.mrb[29].mxu1 }
 0x14e   :  { %v3892_v15 = vpop.f32.mrb[30].mxu1 }
 0x14f   :  { %v1550_v18 = vpop.f32.mrb[31].mxu1 }
 0x151   :  { %1921 = vmatmul.mubr.bf16.gmra.mrb[104].mxu0 %v3217_v13  ;;  %2848 = vmatmul.mubr.msk.bf16.gmra.mrb[136].mxu1 %vm1294_vm0, %v3218_v14  ;;  %v3239_v14 = vld [vmem:[%s4441_s0 + $0x4e4] ss:$20 sps:$4 sm:$0xff]  }
 0x152   :  { %1928 = vmatprep.mubr.bf16.mxu0 %v3219_v16  ;;  %2851 = vmatprep.mubr.msk.bf16.mxu1 %vm1294_vm0, %v3221_v17  ;;  %v3241_v16 = vld [vmem:[%s4441_s0 + $0x4c0] ss:$20 sps:$4 sm:$0xff]  }
 0x154   :  { %v3902_v20 = vpop.f32.mrb[32].mxu1  ;;  %v3904_v21 = vpop.f32.mrb[0].mxu0 }
 0x155   :  { %v1555_v22 = vpop.f32.mrb[33].mxu1  ;;  %v1716_v24 = vpop.f32.mrb[1].mxu0 }
 0x156   :  { %v3912_v28 = vpop.f32.mrb[34].mxu1  ;;  %v3914_v29 = vpop.f32.mrb[2].mxu0 }
 0x157   :  { %v1558_v33 = vpop.f32.mrb[35].mxu1  ;;  %v1719_v34 = vpop.f32.mrb[3].mxu0 }
 0x159   :  { %1929 = vmatmul.mubr.bf16.gmra.mrb[108].mxu0 %v3222_v25  ;;  %2852 = vmatmul.mubr.msk.bf16.gmra.mrb[140].mxu1 %vm1294_vm0, %v3223_v26 }
 0x15a   :  { %1936 = vmatprep.mubr.bf16.mxu0 %v3224_v30  ;;  %2855 = vmatprep.mubr.msk.bf16.mxu1 %vm1294_vm0, %v3226_v32  ;;  %v3242_v30 = vld [vmem:[%s4441_s0 + $0x4e0] ss:$20 sps:$4 sm:$0xff]   ;;  %v3243_v32 = vld [vmem:[%s4441_s0 + $0x4e8] ss:$20 sps:$4 sm:$0xff]  }
 0x15c   :  { %v3924_v36 = vpop.f32.mrb[36].mxu1  ;;  %v3926_v37 = vpop.f32.mrb[4].mxu0 }
 0x15d   :  { %v1563_v38 = vpop.f32.mrb[37].mxu1  ;;  %v1724_v40 = vpop.f32.mrb[5].mxu0 }
 0x15e   :  { %v3934_v44 = vpop.f32.mrb[38].mxu1  ;;  %v3936_v45 = vpop.f32.mrb[6].mxu0 }
 0x15f   :  { %v1566_v49 = vpop.f32.mrb[39].mxu1  ;;  %v1727_v50 = vpop.f32.mrb[7].mxu0 }
 0x161   :  { %1937 = vmatmul.mubr.bf16.gmra.mrb[112].mxu0 %v3227_v41  ;;  %2856 = vmatmul.mubr.msk.bf16.gmra.mrb[144].mxu1 %vm1294_vm0, %v3228_v42 }
 0x162   :  { %1944 = vmatprep.mubr.bf16.mxu0 %v3229_v46  ;;  %2859 = vmatprep.mubr.msk.bf16.mxu1 %vm1294_vm0, %v3231_v48 }
 0x164   :  { %v3946_v52 = vpop.f32.mrb[40].mxu1  ;;  %v3948_v53 = vpop.f32.mrb[8].mxu0 }
 0x165   :  { %v1571_v54 = vpop.f32.mrb[41].mxu1  ;;  %v1732_v56 = vpop.f32.mrb[9].mxu0 }
 0x166   :  { %v3956_v60 = vpop.f32.mrb[42].mxu1  ;;  %v3958_v61 = vpop.f32.mrb[10].mxu0 }
 0x167   :  { %v1574_v2 = vpop.f32.mrb[43].mxu1  ;;  %v1735_v3 = vpop.f32.mrb[11].mxu0 }
 0x169   :  { %1945 = vmatmul.mubr.bf16.gmra.mrb[116].mxu0 %v3232_v57  ;;  %2860 = vmatmul.mubr.msk.bf16.gmra.mrb[148].mxu1 %vm1294_vm0, %v3233_v58 }
 0x16a   :  { %1952 = vmatprep.mubr.bf16.mxu0 %v3234_v62  ;;  %2863 = vmatprep.mubr.msk.bf16.mxu1 %vm1294_vm0, %v3236_v1 }
 0x16c   :  { %v3968_v5 = vpop.f32.mrb[44].mxu1  ;;  %v3970_v6 = vpop.f32.mrb[12].mxu0 }
 0x16d   :  { %v1579_v7 = vpop.f32.mrb[45].mxu1  ;;  %v1740_v9 = vpop.f32.mrb[13].mxu0 }
 0x16e   :  { %v3978_v12 = vpop.f32.mrb[46].mxu1  ;;  %v3980_v13 = vpop.f32.mrb[14].mxu0 }
 0x16f   :  { %v1582_v17 = vpop.f32.mrb[47].mxu1  ;;  %v1743_v18 = vpop.f32.mrb[15].mxu0 }
 0x171   :  { %1953 = vmatmul.mubr.bf16.gmra.mrb[120].mxu0 %v3237_v10  ;;  %2864 = vmatmul.mubr.msk.bf16.gmra.mrb[152].mxu1 %vm1294_vm0, %v3238_v11 }
 0x172   :  { %1960 = vmatprep.mubr.bf16.mxu0 %v3239_v14  ;;  %2867 = vmatprep.mubr.msk.bf16.mxu1 %vm1294_vm0, %v3241_v16 }
 0x174   :  { %v3990_v22 = vpop.f32.mrb[48].mxu1  ;;  %v3992_v24 = vpop.f32.mrb[16].mxu0 }
 0x175   :  { %v1587_v25 = vpop.f32.mrb[49].mxu1  ;;  %v1748_v26 = vpop.f32.mrb[17].mxu0 }
 0x176   :  { %v4000_v33 = vpop.f32.mrb[50].mxu1  ;;  %v4002_v34 = vpop.f32.mrb[18].mxu0 }
 0x177   :  { %v1590_v38 = vpop.f32.mrb[51].mxu1  ;;  %v1751_v40 = vpop.f32.mrb[19].mxu0 }
 0x179   :  { %1961 = vmatmul.mubr.bf16.gmra.mrb[124].mxu0 %v3242_v30  ;;  %2868 = vmatmul.mubr.msk.bf16.gmra.mrb[156].mxu1 %vm1294_vm0, %v3243_v32 }
 0x17c   :  { %v4005_v41 = vpop.f32.mrb[52].mxu1  ;;  %v4007_v42 = vpop.f32.mrb[20].mxu0 }
 0x17d   :  { %v1595_v46 = vpop.f32.mrb[53].mxu1  ;;  %v1756_v48 = vpop.f32.mrb[21].mxu0 }
 0x17e   :  { %v4009_v49 = vpop.f32.mrb[54].mxu1  ;;  %v4011_v50 = vpop.f32.mrb[22].mxu0 }
 0x17f   :  { %v1598_v54 = vpop.f32.mrb[55].mxu1  ;;  %v1759_v56 = vpop.f32.mrb[23].mxu0 }
 0x184   :  { %v4013_v57 = vpop.f32.mrb[56].mxu1  ;;  %v4015_v58 = vpop.f32.mrb[24].mxu0 }
 0x185   :  { %v1603_v62 = vpop.f32.mrb[57].mxu1  ;;  %v1764_v1 = vpop.f32.mrb[25].mxu0 }
 0x186   :  { %v4017_v2 = vpop.f32.mrb[58].mxu1  ;;  %v4019_v3 = vpop.f32.mrb[26].mxu0 }
 0x187   :  { %v1606_v7 = vpop.f32.mrb[59].mxu1  ;;  %v1767_v9 = vpop.f32.mrb[27].mxu0 }
 0x18c   :  { %v4021_v10 = vpop.f32.mrb[60].mxu1  ;;  %v4023_v11 = vpop.f32.mrb[28].mxu0 }
 0x18d   :  { %v1611_v14 = vpop.f32.mrb[61].mxu1  ;;  %v1772_v16 = vpop.f32.mrb[29].mxu0 }
 0x18e   :  { %v4025_v17 = vpop.f32.mrb[62].mxu1  ;;  %v4027_v18 = vpop.f32.mrb[30].mxu0 }
 0x18f   :  { %v1614_v25 = vpop.f32.mrb[63].mxu1  ;;  %v1775_v26 = vpop.f32.mrb[31].mxu0 }
 0x194   :  { %v4029_v30 = vpop.f32.mrb[64].mxu1  ;;  %v1778_v32 = vpop.f32.mrb[32].mxu0 }
 0x195   :  { %v4032_v38 = vadd.f32 %v1778_v32, %v3758_v19  ;;  %v1619_v40 = vpop.f32.mrb[65].mxu1  ;;  %v1780_v46 = vpop.f32.mrb[33].mxu0 }
 0x196   :  { %v4034_v48 = vpop.f32.mrb[66].mxu1  ;;  %v1781_v54 = vpop.f32.mrb[34].mxu0 }
 0x197   :  { %4444 = vst [vmem:[#allocation2_spill] sm:$0xff] %v4034_v48  ;;  %v4037_v56 = vadd.f32 %v1781_v54, %v3766_v23  ;;  %v1622_v62 = vpop.f32.mrb[67].mxu1  ;;  %v1783_v1 = vpop.f32.mrb[35].mxu0 }
 0x19c   :  { %v4039_v7 = vpop.f32.mrb[68].mxu1  ;;  %v1786_v9 = vpop.f32.mrb[36].mxu0 }
 0x19d   :  { %4445 = vst [vmem:[#allocation3_spill] sm:$0xff] %v4039_v7  ;;  %v4042_v14 = vadd.f32 %v1786_v9, %v3776_v27  ;;  %v1627_v16 = vpop.f32.mrb[69].mxu1  ;;  %v1788_v25 = vpop.f32.mrb[37].mxu0 }
 0x19e   :  { %v4044_v19 = vpop.f32.mrb[70].mxu1  ;;  %v1789_v26 = vpop.f32.mrb[38].mxu0 }
 0x19f   :  { %4446 = vst [vmem:[#allocation4_spill] sm:$0xff] %v4044_v19  ;;  %v4047_v32 = vadd.f32 %v1789_v26, %v3784_v31  ;;  %v1630_v40 = vpop.f32.mrb[71].mxu1  ;;  %v1791_v46 = vpop.f32.mrb[39].mxu0 }
 0x1a4   :  { %v4049_v23 = vpop.f32.mrb[72].mxu1  ;;  %v1794_v54 = vpop.f32.mrb[40].mxu0 }
 0x1a5   :  { %4447 = vst [vmem:[#allocation5_spill] sm:$0xff] %v4049_v23  ;;  %v4052_v62 = vadd.f32 %v1794_v54, %v3794_v35  ;;  %v1635_v1 = vpop.f32.mrb[73].mxu1  ;;  %v1796_v7 = vpop.f32.mrb[41].mxu0 }
 0x1a6   :  { %v4054_v27 = vpop.f32.mrb[74].mxu1  ;;  %v1797_v9 = vpop.f32.mrb[42].mxu0 }
 0x1a7   :  { %4448 = vst [vmem:[#allocation6_spill] sm:$0xff] %v4054_v27  ;;  %v4057_v16 = vadd.f32 %v1797_v9, %v3802_v39  ;;  %v1638_v25 = vpop.f32.mrb[75].mxu1  ;;  %v1799_v19 = vpop.f32.mrb[43].mxu0 }
 0x1ac   :  { %v4059_v31 = vpop.f32.mrb[76].mxu1  ;;  %v1802_v26 = vpop.f32.mrb[44].mxu0 }
 0x1ad   :  { %4449 = vst [vmem:[#allocation7_spill] sm:$0xff] %v4059_v31  ;;  %v4062_v40 = vadd.f32 %v1802_v26, %v3812_v43  ;;  %v1643_v46 = vpop.f32.mrb[77].mxu1  ;;  %v1804_v23 = vpop.f32.mrb[45].mxu0 }
 0x1ae   :  { %v4064_v35 = vpop.f32.mrb[78].mxu1  ;;  %v1805_v54 = vpop.f32.mrb[46].mxu0 }
 0x1af   :  { %4450 = vst [vmem:[#allocation8_spill] sm:$0xff] %v4064_v35  ;;  %v4067_v7 = vadd.f32 %v1805_v54, %v3820_v47  ;;  %v1646_v1 = vpop.f32.mrb[79].mxu1  ;;  %v1807_v27 = vpop.f32.mrb[47].mxu0 }
 0x1b4   :  { %v4069_v39 = vpop.f32.mrb[80].mxu1  ;;  %v1810_v9 = vpop.f32.mrb[48].mxu0 }
 0x1b5   :  { %4451 = vst [vmem:[#allocation9_spill] sm:$0xff] %v4069_v39  ;;  %v4072_v19 = vadd.f32 %v1810_v9, %v3830_v51  ;;  %v1651_v25 = vpop.f32.mrb[81].mxu1  ;;  %v1812_v31 = vpop.f32.mrb[49].mxu0 }
 0x1b6   :  { %v4074_v43 = vpop.f32.mrb[82].mxu1  ;;  %v1813_v26 = vpop.f32.mrb[50].mxu0 }
 0x1b7   :  { %4452 = vst [vmem:[#allocation10_spill] sm:$0xff] %v4074_v43  ;;  %v4077_v23 = vadd.f32 %v1813_v26, %v3838_v55  ;;  %v1654_v46 = vpop.f32.mrb[83].mxu1  ;;  %v1815_v35 = vpop.f32.mrb[51].mxu0 }
 0x1bc   :  { %v4079_v47 = vpop.f32.mrb[84].mxu1  ;;  %v1818_v54 = vpop.f32.mrb[52].mxu0 }
 0x1bd   :  { %4453 = vst [vmem:[#allocation11_spill] sm:$0xff] %v4079_v47  ;;  %v4082_v27 = vadd.f32 %v1818_v54, %v3848_v59  ;;  %v1659_v1 = vpop.f32.mrb[85].mxu1  ;;  %v1820_v39 = vpop.f32.mrb[53].mxu0 }
 0x1be   :  { %v4084_v51 = vpop.f32.mrb[86].mxu1  ;;  %v1821_v9 = vpop.f32.mrb[54].mxu0 }
 0x1bf   :  { %4454 = vst [vmem:[#allocation12_spill] sm:$0xff] %v4084_v51  ;;  %v4087_v31 = vadd.f32 %v1821_v9, %v3856_v63  ;;  %v1662_v25 = vpop.f32.mrb[87].mxu1  ;;  %v1823_v43 = vpop.f32.mrb[55].mxu0 }
 0x1c4   :  { %v4089_v55 = vpop.f32.mrb[88].mxu1  ;;  %v1826_v26 = vpop.f32.mrb[56].mxu0 }
 0x1c5   :  { %4455 = vst [vmem:[#allocation13_spill] sm:$0xff] %v4089_v55  ;;  %v4092_v35 = vadd.f32 %v1826_v26, %v3866_v4  ;;  %v1667_v46 = vpop.f32.mrb[89].mxu1  ;;  %v1828_v47 = vpop.f32.mrb[57].mxu0 }
 0x1c6   :  { %v4094_v59 = vpop.f32.mrb[90].mxu1  ;;  %v1829_v54 = vpop.f32.mrb[58].mxu0 }
 0x1c7   :  { %4456 = vst [vmem:[#allocation14_spill] sm:$0xff] %v4094_v59  ;;  %v4097_v39 = vadd.f32 %v1829_v54, %v3874_v8  ;;  %v1670_v1 = vpop.f32.mrb[91].mxu1  ;;  %v1831_v51 = vpop.f32.mrb[59].mxu0 }
 0x1cc   :  { %v4099_v63 = vpop.f32.mrb[92].mxu1  ;;  %v1834_v9 = vpop.f32.mrb[60].mxu0 }
 0x1cd   :  { %4457 = vst [vmem:[#allocation15_spill] sm:$0xff] %v4099_v63  ;;  %v4102_v43 = vadd.f32 %v1834_v9, %v3884_v0  ;;  %v1675_v25 = vpop.f32.mrb[93].mxu1  ;;  %v1836_v55 = vpop.f32.mrb[61].mxu0 }
 0x1ce   :  { %v4104_v4 = vpop.f32.mrb[94].mxu1  ;;  %v1837_v26 = vpop.f32.mrb[62].mxu0 }
 0x1cf   :  { %4458 = vst [vmem:[#allocation16_spill] sm:$0xff] %v4104_v4  ;;  %v4107_v47 = vadd.f32 %v1837_v26, %v3892_v15  ;;  %v1678_v46 = vpop.f32.mrb[95].mxu1  ;;  %v1839_v59 = vpop.f32.mrb[63].mxu0 }
 0x1d4   :  { %v1842_v8 = vpop.f32.mrb[64].mxu0  ;;  %v2809_v54 = vpop.f32.mrb[96].mxu1 }
 0x1d5   :  { %v4110_v51 = vadd.f32 %v1842_v8, %v3902_v20  ;;  %v2012_v1 = vadd.f32 %v2809_v54, %v3926_v37  ;;  %v1844_v63 = vpop.f32.mrb[65].mxu0  ;;  %v2003_v0 = vpop.f32.mrb[97].mxu1 }
 0x1d6   :  { %v2004_v9 = vadd.f32 %v2003_v0, %v3904_v21  ;;  %v1845_v55 = vpop.f32.mrb[66].mxu0  ;;  %v2810_v25 = vpop.f32.mrb[98].mxu1 }
 0x1d7   :  { %4459 = vst [vmem:[#allocation17_spill] sm:$0xff] %v4110_v51  ;;  %2260 = vst [vmem:[%s4442_s2 + $0x10] sm:$0xff] %v2012_v1  ;;  %v4118_v15 = vadd.f32 %v1845_v55, %v3912_v28  ;;  %v2015_v59 = vadd.f32 %v2810_v25, %v3936_v45  ;;  %v2006_v26 = vpop.f32.mrb[99].mxu1  ;;  %v1847_v20 = vpop.f32.mrb[67].mxu0  ;;  %v2393_v45 = vmul.f32 %v2012_v1, %v2012_v1 }
 0x1d8   :  { %2258 = vst [vmem:[%s4442_s2] sm:$0xff] %v2004_v9  ;;  %v2007_v37 = vadd.f32 %v2006_v26, %v3914_v29  ;;  %v2391_v21 = vmul.f32 %v2004_v9, %v2004_v9 }
 0x1d9   :  { %4460 = vst [vmem:[#allocation18_spill] sm:$0xff] %v4118_v15  ;;  %2261 = vst [vmem:[%s4442_s2 + $0x18] sm:$0xff] %v2015_v59  ;;  %v2394_v20 = vmul.f32 %v2015_v59, %v2015_v59 }
 0x1da   :  { %2259 = vst [vmem:[%s4442_s2 + $0x8] sm:$0xff] %v2007_v37  ;;  %v2322_v28 = vadd.f32 %v2007_v37, %v2004_v9  ;;  %v2392_v63 = vmul.f32 %v2007_v37, %v2007_v37 }
 0x1dc   :  { %v2323_v46 = vadd.f32 %v2322_v28, %v2012_v1  ;;  %v2455_v8 = vadd.f32 %v2392_v63, %v2391_v21  ;;  %v1850_v54 = vpop.f32.mrb[68].mxu0  ;;  %v2813_v0 = vpop.f32.mrb[100].mxu1 }
 0x1dd   :  { %v4132_v55 = vadd.f32 %v1850_v54, %v3924_v36  ;;  %v2028_v29 = vadd.f32 %v2813_v0, %v3970_v6  ;;  %v1852_v25 = vpop.f32.mrb[69].mxu0  ;;  %v2019_v26 = vpop.f32.mrb[101].mxu1 }
 0x1de   :  { %v2456_v4 = vadd.f32 %v2455_v8, %v2393_v45  ;;  %v2020_v15 = vadd.f32 %v2019_v26, %v3948_v53  ;;  %v2324_v48 = vadd.f32 %v2323_v46, %v2015_v59  ;;  %v1853_v51 = vpop.f32.mrb[70].mxu0  ;;  %v2814_v9 = vpop.f32.mrb[102].mxu1 }
 0x1df   :  { %2264 = vst [vmem:[%s4442_s2 + $0x30] sm:$0xff] %v2028_v29  ;;  %v4140_v1 = vadd.f32 %v1853_v51, %v3934_v44  ;;  %v2031_v36 = vadd.f32 %v2814_v9, %v3980_v13  ;;  %v2022_v37 = vpop.f32.mrb[103].mxu1  ;;  %v1855_v6 = vpop.f32.mrb[71].mxu0  ;;  %v2397_v51 = vmul.f32 %v2028_v29, %v2028_v29 }
 0x1e0   :  { %2262 = vst [vmem:[%s4442_s2 + $0x20] sm:$0xff] %v2020_v15  ;;  %v2325_v21 = vadd.f32 %v2324_v48, %v2020_v15  ;;  %v2395_v53 = vmul.f32 %v2020_v15, %v2020_v15  ;;  %v2457_v59 = vadd.f32 %v2456_v4, %v2394_v20  ;;  %v2023_v28 = vadd.f32 %v2022_v37, %v3958_v61 }
 0x1e1   :  { %2265 = vst [vmem:[%s4442_s2 + $0x38] sm:$0xff] %v2031_v36  ;;  %v2398_v0 = vmul.f32 %v2031_v36, %v2031_v36 }
 0x1e2   :  { %v2458_v63 = vadd.f32 %v2457_v59, %v2395_v53  ;;  %2263 = vst [vmem:[%s4442_s2 + $0x28] sm:$0xff] %v2023_v28  ;;  %v2326_v44 = vadd.f32 %v2325_v21, %v2023_v28  ;;  %v2396_v13 = vmul.f32 %v2023_v28, %v2023_v28 }
 0x1e4   :  { %v2327_v45 = vadd.f32 %v2326_v44, %v2028_v29  ;;  %v2459_v46 = vadd.f32 %v2458_v63, %v2396_v13  ;;  %v1858_v8 = vpop.f32.mrb[72].mxu0  ;;  %v2817_v48 = vpop.f32.mrb[104].mxu1 }
 0x1e5   :  { %v4154_v4 = vadd.f32 %v1858_v8, %v3946_v52  ;;  %v2044_v61 = vadd.f32 %v2817_v48, %v4007_v42  ;;  %v1860_v15 = vpop.f32.mrb[73].mxu0  ;;  %v2035_v54 = vpop.f32.mrb[105].mxu1 }
 0x1e6   :  { %v2460_v25 = vadd.f32 %v2459_v46, %v2397_v51  ;;  %v2036_v26 = vadd.f32 %v2035_v54, %v3992_v24  ;;  %v2328_v20 = vadd.f32 %v2327_v45, %v2031_v36  ;;  %v1861_v9 = vpop.f32.mrb[74].mxu0  ;;  %v2818_v37 = vpop.f32.mrb[106].mxu1 }
 0x1e7   :  { %2268 = vst [vmem:[%s4442_s2 + $0x50] sm:$0xff] %v2044_v61  ;;  %v4162_v29 = vadd.f32 %v1861_v9, %v3956_v60  ;;  %v2047_v52 = vadd.f32 %v2818_v37, %v4011_v50  ;;  %v2038_v6 = vpop.f32.mrb[107].mxu1  ;;  %v1863_v42 = vpop.f32.mrb[75].mxu0  ;;  %v2401_v28 = vmul.f32 %v2044_v61, %v2044_v61 }
 0x1e8   :  { %2266 = vst [vmem:[%s4442_s2 + $0x40] sm:$0xff] %v2036_v26  ;;  %v2329_v21 = vadd.f32 %v2328_v20, %v2036_v26  ;;  %v2399_v24 = vmul.f32 %v2036_v26, %v2036_v26  ;;  %v2461_v36 = vadd.f32 %v2460_v25, %v2398_v0  ;;  %v2039_v53 = vadd.f32 %v2038_v6, %v4002_v34 }
 0x1e9   :  { %2269 = vst [vmem:[%s4442_s2 + $0x58] sm:$0xff] %v2047_v52  ;;  %v2402_v48 = vmul.f32 %v2047_v52, %v2047_v52 }
 0x1ea   :  { %v2462_v59 = vadd.f32 %v2461_v36, %v2399_v24  ;;  %2267 = vst [vmem:[%s4442_s2 + $0x48] sm:$0xff] %v2039_v53  ;;  %v2330_v60 = vadd.f32 %v2329_v21, %v2039_v53  ;;  %v2400_v50 = vmul.f32 %v2039_v53, %v2039_v53 }
 0x1ec   :  { %v2331_v63 = vadd.f32 %v2330_v60, %v2044_v61  ;;  %v2463_v44 = vadd.f32 %v2462_v59, %v2400_v50  ;;  %v1866_v13 = vpop.f32.mrb[76].mxu0  ;;  %v2821_v51 = vpop.f32.mrb[108].mxu1 }
 0x1ed   :  { %v4176_v45 = vadd.f32 %v1866_v13, %v3968_v5  ;;  %v2060_v34 = vadd.f32 %v2821_v51, %v4023_v11  ;;  %v1868_v46 = vpop.f32.mrb[77].mxu0  ;;  %v2051_v8 = vpop.f32.mrb[109].mxu1 }
 0x1ee   :  { %v2464_v15 = vadd.f32 %v2463_v44, %v2401_v28  ;;  %v2052_v54 = vadd.f32 %v2051_v8, %v4015_v58  ;;  %v2332_v0 = vadd.f32 %v2331_v63, %v2047_v52  ;;  %v1869_v25 = vpop.f32.mrb[78].mxu0  ;;  %v2822_v26 = vpop.f32.mrb[110].mxu1 }
 0x1ef   :  { %2272 = vst [vmem:[%s4442_s2 + $0x70] sm:$0xff] %v2060_v34  ;;  %v4184_v61 = vadd.f32 %v1869_v25, %v3978_v12  ;;  %v2063_v5 = vadd.f32 %v2822_v26, %v4027_v18  ;;  %v2054_v20 = vpop.f32.mrb[111].mxu1  ;;  %v1871_v11 = vpop.f32.mrb[79].mxu0  ;;  %v2405_v42 = vmul.f32 %v2060_v34, %v2060_v34 }
 0x1f0   :  { %2270 = vst [vmem:[%s4442_s2 + $0x60] sm:$0xff] %v2052_v54  ;;  %v2333_v9 = vadd.f32 %v2332_v0, %v2052_v54  ;;  %v2403_v58 = vmul.f32 %v2052_v54, %v2052_v54  ;;  %v2465_v37 = vadd.f32 %v2464_v15, %v2402_v48  ;;  %v2055_v52 = vadd.f32 %v2054_v20, %v4019_v3 }
 0x1f1   :  { %2273 = vst [vmem:[%s4442_s2 + $0x78] sm:$0xff] %v2063_v5  ;;  %v2406_v28 = vmul.f32 %v2063_v5, %v2063_v5 }
 0x1f2   :  { %v2466_v6 = vadd.f32 %v2465_v37, %v2403_v58  ;;  %2271 = vst [vmem:[%s4442_s2 + $0x68] sm:$0xff] %v2055_v52  ;;  %v2334_v12 = vadd.f32 %v2333_v9, %v2055_v52  ;;  %v2404_v18 = vmul.f32 %v2055_v52, %v2055_v52 }
 0x1f4   :  { %v2335_v21 = vadd.f32 %v2334_v12, %v2060_v34  ;;  %v2467_v24 = vadd.f32 %v2466_v6, %v2404_v18  ;;  %v1874_v36 = vpop.f32.mrb[80].mxu0  ;;  %v2825_v53 = vpop.f32.mrb[112].mxu1 }
 0x1f5   :  { %v4198_v59 = vadd.f32 %v1874_v36, %v3990_v22  ;;  %v2076_v3 = vadd.f32 %v2825_v53, %v4042_v14  ;;  %v1876_v60 = vpop.f32.mrb[81].mxu0  ;;  %v2067_v50 = vpop.f32.mrb[113].mxu1 }
 0x1f6   :  { %v2468_v63 = vadd.f32 %v2467_v24, %v2405_v42  ;;  %v2068_v44 = vadd.f32 %v2067_v50, %v4032_v38  ;;  %v2336_v13 = vadd.f32 %v2335_v21, %v2063_v5  ;;  %v1877_v51 = vpop.f32.mrb[82].mxu0  ;;  %v2826_v46 = vpop.f32.mrb[114].mxu1 }
 0x1f7   :  { %2276 = vst [vmem:[%s4442_s2 + $0x90] sm:$0xff] %v2076_v3  ;;  %v4206_v34 = vadd.f32 %v1877_v51, %v4000_v33  ;;  %v2079_v22 = vadd.f32 %v2826_v46, %v4047_v32  ;;  %v2070_v8 = vpop.f32.mrb[115].mxu1  ;;  %v1879_v14 = vpop.f32.mrb[83].mxu0  ;;  %v2409_v25 = vmul.f32 %v2076_v3, %v2076_v3 }
 0x1f8   :  { %2274 = vst [vmem:[%s4442_s2 + $0x80] sm:$0xff] %v2068_v44  ;;  %v2337_v48 = vadd.f32 %v2336_v13, %v2068_v44  ;;  %v2407_v38 = vmul.f32 %v2068_v44, %v2068_v44  ;;  %v2469_v15 = vadd.f32 %v2468_v63, %v2406_v28  ;;  %v2071_v54 = vadd.f32 %v2070_v8, %v4037_v56 }
 0x1f9   :  { %2277 = vst [vmem:[%s4442_s2 + $0x98] sm:$0xff] %v2079_v22  ;;  %v2410_v52 = vmul.f32 %v2079_v22, %v2079_v22 }
 0x1fa   :  { %v2470_v0 = vadd.f32 %v2469_v15, %v2407_v38  ;;  %2275 = vst [vmem:[%s4442_s2 + $0x88] sm:$0xff] %v2071_v54  ;;  %v2338_v33 = vadd.f32 %v2337_v48, %v2071_v54  ;;  %v2408_v32 = vmul.f32 %v2071_v54, %v2071_v54 }
 0x1fc   :  { %v2339_v26 = vadd.f32 %v2338_v33, %v2076_v3  ;;  %v2471_v5 = vadd.f32 %v2470_v0, %v2408_v32  ;;  %v1882_v20 = vpop.f32.mrb[84].mxu0  ;;  %v2829_v11 = vpop.f32.mrb[116].mxu1 }
 0x1fd   :  { %v4220_v9 = vadd.f32 %v1882_v20, %v4005_v41  ;;  %v2092_v56 = vadd.f32 %v2829_v11, %v4062_v40  ;;  %v1884_v58 = vpop.f32.mrb[85].mxu0  ;;  %v2083_v37 = vpop.f32.mrb[117].mxu1 }
 0x1fe   :  { %v2472_v6 = vadd.f32 %v2471_v5, %v2409_v25  ;;  %v2084_v12 = vadd.f32 %v2083_v37, %v4052_v62  ;;  %v2340_v18 = vadd.f32 %v2339_v26, %v2079_v22  ;;  %v1885_v42 = vpop.f32.mrb[86].mxu0  ;;  %v2830_v21 = vpop.f32.mrb[118].mxu1 }
 0x1ff   :  { %2280 = vst [vmem:[%s4442_s2 + $0xb0] sm:$0xff] %v2092_v56  ;;  %v4228_v24 = vadd.f32 %v1885_v42, %v4009_v49  ;;  %v2095_v41 = vadd.f32 %v2830_v21, %v4067_v7  ;;  %v2086_v36 = vpop.f32.mrb[119].mxu1  ;;  %v1887_v40 = vpop.f32.mrb[87].mxu0  ;;  %v2413_v28 = vmul.f32 %v2092_v56, %v2092_v56 }
 0x200   :  { %2278 = vst [vmem:[%s4442_s2 + $0xa0] sm:$0xff] %v2084_v12  ;;  %v2341_v53 = vadd.f32 %v2340_v18, %v2084_v12  ;;  %v2411_v62 = vmul.f32 %v2084_v12, %v2084_v12  ;;  %v2473_v3 = vadd.f32 %v2472_v6, %v2410_v52  ;;  %v2087_v60 = vadd.f32 %v2086_v36, %v4057_v16 }
 0x201   :  { %2281 = vst [vmem:[%s4442_s2 + $0xb8] sm:$0xff] %v2095_v41  ;;  %v2414_v14 = vmul.f32 %v2095_v41, %v2095_v41 }
 0x202   :  { %v2474_v50 = vadd.f32 %v2473_v3, %v2411_v62  ;;  %2279 = vst [vmem:[%s4442_s2 + $0xa8] sm:$0xff] %v2087_v60  ;;  %v2342_v49 = vadd.f32 %v2341_v53, %v2087_v60  ;;  %v2412_v7 = vmul.f32 %v2087_v60, %v2087_v60 }
 0x204   :  { %v2343_v63 = vadd.f32 %v2342_v49, %v2092_v56  ;;  %v2475_v44 = vadd.f32 %v2474_v50, %v2412_v7  ;;  %v1890_v13 = vpop.f32.mrb[88].mxu0  ;;  %v2833_v51 = vpop.f32.mrb[120].mxu1 }
 0x205   :  { %v4242_v46 = vadd.f32 %v1890_v13, %v4013_v57  ;;  %v2108_v16 = vadd.f32 %v2833_v51, %v4082_v27  ;;  %v1892_v22 = vpop.f32.mrb[89].mxu0  ;;  %v2099_v8 = vpop.f32.mrb[121].mxu1 }
 0x206   :  { %v2476_v48 = vadd.f32 %v2475_v44, %v2413_v28  ;;  %v2100_v38 = vadd.f32 %v2099_v8, %v4072_v19  ;;  %v2344_v15 = vadd.f32 %v2343_v63, %v2095_v41  ;;  %v1893_v54 = vpop.f32.mrb[90].mxu0  ;;  %v2834_v0 = vpop.f32.mrb[122].mxu1 }
 0x207   :  { %2284 = vst [vmem:[%s4442_s2 + $0xd0] sm:$0xff] %v2108_v16  ;;  %v4250_v33 = vadd.f32 %v1893_v54, %v4017_v2  ;;  %v2111_v57 = vadd.f32 %v2834_v0, %v4087_v31  ;;  %v2102_v32 = vpop.f32.mrb[123].mxu1  ;;  %v1895_v27 = vpop.f32.mrb[91].mxu0  ;;  %v2417_v11 = vmul.f32 %v2108_v16, %v2108_v16 }
 0x208   :  { %2282 = vst [vmem:[%s4442_s2 + $0xc0] sm:$0xff] %v2100_v38  ;;  %v2345_v25 = vadd.f32 %v2344_v15, %v2100_v38  ;;  %v2415_v19 = vmul.f32 %v2100_v38, %v2100_v38  ;;  %v2477_v26 = vadd.f32 %v2476_v48, %v2414_v14  ;;  %v2103_v5 = vadd.f32 %v2102_v32, %v4077_v23  ;;  %v4461_v38 = vld [vmem:[#allocation17_spill] sm:$0xff]  ;;  %v4462_v32 = vld [vmem:[#allocation2_spill] sm:$0xff] }
 0x209   :  { %2285 = vst [vmem:[%s4442_s2 + $0xd8] sm:$0xff] %v2111_v57  ;;  %v2418_v42 = vmul.f32 %v2111_v57, %v2111_v57 }
 0x20a   :  { %v2478_v20 = vadd.f32 %v2477_v26, %v2415_v19  ;;  %2283 = vst [vmem:[%s4442_s2 + $0xc8] sm:$0xff] %v2103_v5  ;;  %v2346_v2 = vadd.f32 %v2345_v25, %v2103_v5  ;;  %v2416_v31 = vmul.f32 %v2103_v5, %v2103_v5 }
 0x20c   :  { %v2347_v56 = vadd.f32 %v2346_v2, %v2108_v16  ;;  %v2479_v58 = vadd.f32 %v2478_v20, %v2416_v31  ;;  %v1898_v37 = vpop.f32.mrb[92].mxu0  ;;  %v2837_v52 = vpop.f32.mrb[124].mxu1  ;;  %v4463_v20 = vld [vmem:[#allocation18_spill] sm:$0xff] }
 0x20d   :  { %v4264_v6 = vadd.f32 %v1898_v37, %v4021_v10  ;;  %v2124_v23 = vadd.f32 %v2837_v52, %v4102_v43  ;;  %v1900_v12 = vpop.f32.mrb[93].mxu0  ;;  %v2115_v18 = vpop.f32.mrb[125].mxu1 }
 0x20e   :  { %v2480_v21 = vadd.f32 %v2479_v58, %v2417_v11  ;;  %v2116_v41 = vadd.f32 %v2115_v18, %v4092_v35  ;;  %v2348_v36 = vadd.f32 %v2347_v56, %v2111_v57  ;;  %v1901_v40 = vpop.f32.mrb[94].mxu0  ;;  %v2838_v53 = vpop.f32.mrb[126].mxu1  ;;  %v4464_v12 = vld [vmem:[#allocation3_spill] sm:$0xff] }
 0x20f   :  { %2288 = vst [vmem:[%s4442_s2 + $0xf0] sm:$0xff] %v2124_v23  ;;  %v4272_v62 = vadd.f32 %v1901_v40, %v4025_v17  ;;  %v2127_v10 = vadd.f32 %v2838_v53, %v4107_v47  ;;  %v2118_v3 = vpop.f32.mrb[127].mxu1  ;;  %v1903_v43 = vpop.f32.mrb[95].mxu0  ;;  %v2421_v28 = vmul.f32 %v2124_v23, %v2124_v23 }
 0x210   :  { %2286 = vst [vmem:[%s4442_s2 + $0xe0] sm:$0xff] %v2116_v41  ;;  %v2349_v60 = vadd.f32 %v2348_v36, %v2116_v41  ;;  %v2419_v35 = vmul.f32 %v2116_v41, %v2116_v41  ;;  %v2481_v50 = vadd.f32 %v2480_v21, %v2418_v42  ;;  %v2119_v49 = vadd.f32 %v2118_v3, %v4097_v39 }
 0x211   :  { %2289 = vst [vmem:[%s4442_s2 + $0xf8] sm:$0xff] %v2127_v10  ;;  %v2422_v14 = vmul.f32 %v2127_v10, %v2127_v10 }
 0x212   :  { %v2482_v7 = vadd.f32 %v2481_v50, %v2419_v35  ;;  %2287 = vst [vmem:[%s4442_s2 + $0xe8] sm:$0xff] %v2119_v49  ;;  %v2350_v17 = vadd.f32 %v2349_v60, %v2119_v49  ;;  %v2420_v47 = vmul.f32 %v2119_v49, %v2119_v49  ;;  %v4465_v60 = vld [vmem:[#allocation4_spill] sm:$0xff] }
 0x214   :  { %v2351_v63 = vadd.f32 %v2350_v17, %v2124_v23  ;;  %v2483_v44 = vadd.f32 %v2482_v7, %v2420_v47  ;;  %v1906_v13 = vpop.f32.mrb[96].mxu0  ;;  %v2841_v51 = vpop.f32.mrb[128].mxu1 }
 0x215   :  { %v4286_v16 = vadd.f32 %v1906_v13, %v4029_v30  ;;  %v2140_v39 = vadd.f32 %v2841_v51, %v4132_v55  ;;  %v1908_v22 = vpop.f32.mrb[97].mxu0  ;;  %v2131_v8 = vpop.f32.mrb[129].mxu1 }
 0x216   :  { %v2484_v48 = vadd.f32 %v2483_v44, %v2421_v28  ;;  %v2132_v15 = vadd.f32 %v2131_v8, %v4461_v38  ;;  %v2352_v54 = vadd.f32 %v2351_v63, %v2127_v10  ;;  %v1909_v0 = vpop.f32.mrb[98].mxu0  ;;  %v2842_v57 = vpop.f32.mrb[130].mxu1  ;;  %v4466_v8 = vld [vmem:[#allocation5_spill] sm:$0xff] }
 0x217   :  { %2292 = vst [vmem:[%s4442_s2 + $0x110] sm:$0xff] %v2140_v39  ;;  %v4294_v27 = vadd.f32 %v1909_v0, %v4462_v32  ;;  %v2143_v30 = vadd.f32 %v2842_v57, %v4140_v1  ;;  %v2134_v25 = vpop.f32.mrb[131].mxu1  ;;  %v1911_v55 = vpop.f32.mrb[99].mxu0  ;;  %v2425_v56 = vmul.f32 %v2140_v39, %v2140_v39 }
 0x218   :  { %2290 = vst [vmem:[%s4442_s2 + $0x100] sm:$0xff] %v2132_v15  ;;  %v2353_v19 = vadd.f32 %v2352_v54, %v2132_v15  ;;  %v2423_v26 = vmul.f32 %v2132_v15, %v2132_v15  ;;  %v2485_v5 = vadd.f32 %v2484_v48, %v2422_v14  ;;  %v2135_v2 = vadd.f32 %v2134_v25, %v4463_v20  ;;  %v4467_v25 = vld [vmem:[#allocation6_spill] sm:$0xff] }
 0x219   :  { %2293 = vst [vmem:[%s4442_s2 + $0x118] sm:$0xff] %v2143_v30  ;;  %v2426_v36 = vmul.f32 %v2143_v30, %v2143_v30 }
 0x21a   :  { %v2486_v31 = vadd.f32 %v2485_v5, %v2423_v26  ;;  %2291 = vst [vmem:[%s4442_s2 + $0x108] sm:$0xff] %v2135_v2  ;;  %v2354_v1 = vadd.f32 %v2353_v19, %v2135_v2  ;;  %v2424_v11 = vmul.f32 %v2135_v2, %v2135_v2 }
 0x21c   :  { %v2355_v58 = vadd.f32 %v2354_v1, %v2140_v39  ;;  %v2487_v37 = vadd.f32 %v2486_v31, %v2424_v11  ;;  %v1914_v52 = vpop.f32.mrb[100].mxu0  ;;  %v2845_v23 = vpop.f32.mrb[132].mxu1 }
 0x21d   :  { %v4308_v18 = vadd.f32 %v1914_v52, %v4464_v12  ;;  %v2156_v42 = vadd.f32 %v2845_v23, %v4176_v45  ;;  %v1916_v21 = vpop.f32.mrb[101].mxu0  ;;  %v2147_v41 = vpop.f32.mrb[133].mxu1  ;;  %v4468_v23 = vld [vmem:[#allocation7_spill] sm:$0xff] }
 0x21e   :  { %v2488_v40 = vadd.f32 %v2487_v37, %v2425_v56  ;;  %v2148_v53 = vadd.f32 %v2147_v41, %v4154_v4  ;;  %v2356_v10 = vadd.f32 %v2355_v58, %v2143_v30  ;;  %v1917_v3 = vpop.f32.mrb[102].mxu0  ;;  %v2846_v43 = vpop.f32.mrb[134].mxu1 }
 0x21f   :  { %2296 = vst [vmem:[%s4442_s2 + $0x130] sm:$0xff] %v2156_v42  ;;  %v4316_v35 = vadd.f32 %v1917_v3, %v4465_v60  ;;  %v2159_v50 = vadd.f32 %v2846_v43, %v4184_v61  ;;  %v2150_v49 = vpop.f32.mrb[135].mxu1  ;;  %v1919_v45 = vpop.f32.mrb[103].mxu0  ;;  %v2429_v44 = vmul.f32 %v2156_v42, %v2156_v42  ;;  %v4469_v43 = vld [vmem:[#allocation8_spill] sm:$0xff] }
 0x220   :  { %2294 = vst [vmem:[%s4442_s2 + $0x120] sm:$0xff] %v2148_v53  ;;  %v2357_v7 = vadd.f32 %v2356_v10, %v2148_v53  ;;  %v2427_v4 = vmul.f32 %v2148_v53, %v2148_v53  ;;  %v2489_v17 = vadd.f32 %v2488_v40, %v2426_v36  ;;  %v2151_v47 = vadd.f32 %v2150_v49, %v4162_v29 }
 0x221   :  { %2297 = vst [vmem:[%s4442_s2 + $0x138] sm:$0xff] %v2159_v50  ;;  %v2430_v15 = vmul.f32 %v2159_v50, %v2159_v50 }
 0x222   :  { %v2490_v28 = vadd.f32 %v2489_v17, %v2427_v4  ;;  %2295 = vst [vmem:[%s4442_s2 + $0x128] sm:$0xff] %v2151_v47  ;;  %v2358_v61 = vadd.f32 %v2357_v7, %v2151_v47  ;;  %v2428_v63 = vmul.f32 %v2151_v47, %v2151_v47 }
 0x224   :  { %v2359_v13 = vadd.f32 %v2358_v61, %v2156_v42  ;;  %v2491_v51 = vadd.f32 %v2490_v28, %v2428_v63  ;;  %v1922_v39 = vpop.f32.mrb[104].mxu0  ;;  %v2849_v22 = vpop.f32.mrb[136].mxu1 }
 0x225   :  { %v4330_v14 = vadd.f32 %v1922_v39, %v4466_v8  ;;  %v2172_v29 = vadd.f32 %v2849_v22, %v4220_v9  ;;  %v1924_v48 = vpop.f32.mrb[105].mxu0  ;;  %v2163_v38 = vpop.f32.mrb[137].mxu1 }
 0x226   :  { %v2492_v54 = vadd.f32 %v2491_v51, %v2429_v44  ;;  %v2164_v0 = vadd.f32 %v2163_v38, %v4198_v59  ;;  %v2360_v57 = vadd.f32 %v2359_v13, %v2159_v50  ;;  %v1925_v32 = vpop.f32.mrb[106].mxu0  ;;  %v2850_v30 = vpop.f32.mrb[138].mxu1  ;;  %v4470_v51 = vld [vmem:[#allocation9_spill] sm:$0xff] }
 0x227   :  { %2300 = vst [vmem:[%s4442_s2 + $0x150] sm:$0xff] %v2172_v29  ;;  %v4338_v55 = vadd.f32 %v1925_v32, %v4467_v25  ;;  %v2175_v19 = vadd.f32 %v2850_v30, %v4228_v24  ;;  %v2166_v26 = vpop.f32.mrb[139].mxu1  ;;  %v1927_v9 = vpop.f32.mrb[107].mxu0  ;;  %v2433_v11 = vmul.f32 %v2172_v29, %v2172_v29 }
 0x228   :  { %2298 = vst [vmem:[%s4442_s2 + $0x140] sm:$0xff] %v2164_v0  ;;  %v2361_v5 = vadd.f32 %v2360_v57, %v2164_v0  ;;  %v2431_v59 = vmul.f32 %v2164_v0, %v2164_v0  ;;  %v2493_v20 = vadd.f32 %v2492_v54, %v2430_v15  ;;  %v2167_v2 = vadd.f32 %v2166_v26, %v4206_v34  ;;  %v4471_v57 = vld [vmem:[#allocation10_spill] sm:$0xff] }
 0x229   :  { %2301 = vst [vmem:[%s4442_s2 + $0x158] sm:$0xff] %v2175_v19  ;;  %v2434_v41 = vmul.f32 %v2175_v19, %v2175_v19 }
 0x22a   :  { %v2494_v31 = vadd.f32 %v2493_v20, %v2431_v59  ;;  %2299 = vst [vmem:[%s4442_s2 + $0x148] sm:$0xff] %v2167_v2  ;;  %v2362_v24 = vadd.f32 %v2361_v5, %v2167_v2  ;;  %v2432_v1 = vmul.f32 %v2167_v2, %v2167_v2 }
 0x22c   :  { %v2363_v56 = vadd.f32 %v2362_v24, %v2172_v29  ;;  %v2495_v58 = vadd.f32 %v2494_v31, %v2432_v1  ;;  %v1930_v37 = vpop.f32.mrb[108].mxu0  ;;  %v2853_v52 = vpop.f32.mrb[140].mxu1 }
 0x22d   :  { %v1931_v12 = vadd.f32 %v1930_v37, %v4468_v23  ;;  %v2188_v34 = vadd.f32 %v2853_v52, %v4264_v6  ;;  %v1932_v42 = vpop.f32.mrb[109].mxu0  ;;  %v2179_v21 = vpop.f32.mrb[141].mxu1 }
 0x22e   :  { %v2496_v36 = vadd.f32 %v2495_v58, %v2433_v11  ;;  %v2180_v40 = vadd.f32 %v2179_v21, %v4242_v46  ;;  %v2364_v53 = vadd.f32 %v2363_v56, %v2175_v19  ;;  %v1933_v10 = vpop.f32.mrb[110].mxu0  ;;  %v2854_v3 = vpop.f32.mrb[142].mxu1  ;;  %v4472_v11 = vld [vmem:[#allocation11_spill] sm:$0xff] }
 0x22f   :  { %2304 = vst [vmem:[%s4442_s2 + $0x170] sm:$0xff] %v2188_v34  ;;  %v1934_v60 = vadd.f32 %v1933_v10, %v4469_v43  ;;  %v2191_v50 = vadd.f32 %v2854_v3, %v4272_v62  ;;  %v2182_v49 = vpop.f32.mrb[143].mxu1  ;;  %v1935_v45 = vpop.f32.mrb[111].mxu0  ;;  %v2437_v28 = vmul.f32 %v2188_v34, %v2188_v34 }
 0x230   :  { %2302 = vst [vmem:[%s4442_s2 + $0x160] sm:$0xff] %v2180_v40  ;;  %v2365_v6 = vadd.f32 %v2364_v53, %v2180_v40  ;;  %v2435_v7 = vmul.f32 %v2180_v40, %v2180_v40  ;;  %v2497_v46 = vadd.f32 %v2496_v36, %v2434_v41  ;;  %v2183_v4 = vadd.f32 %v2182_v49, %v4250_v33  ;;  %v4473_v36 = vld [vmem:[#allocation12_spill] sm:$0xff] }
 0x231   :  { %2305 = vst [vmem:[%s4442_s2 + $0x178] sm:$0xff] %v2191_v50  ;;  %v2438_v29 = vmul.f32 %v2191_v50, %v2191_v50 }
 0x232   :  { %v2498_v17 = vadd.f32 %v2497_v46, %v2435_v7  ;;  %2303 = vst [vmem:[%s4442_s2 + $0x168] sm:$0xff] %v2183_v4  ;;  %v2366_v62 = vadd.f32 %v2365_v6, %v2183_v4  ;;  %v2436_v47 = vmul.f32 %v2183_v4, %v2183_v4 }
 0x234   :  { %v2367_v61 = vadd.f32 %v2366_v62, %v2188_v34  ;;  %v2499_v63 = vadd.f32 %v2498_v17, %v2436_v47  ;;  %v1938_v44 = vpop.f32.mrb[112].mxu0  ;;  %v2857_v13 = vpop.f32.mrb[144].mxu1  ;;  %v4474_v62 = vld [vmem:[#allocation13_spill] sm:$0xff] }
 0x235   :  { %v4370_v39 = vadd.f32 %v1938_v44, %v4470_v51  ;;  %v2204_v33 = vadd.f32 %v2857_v13, %v4308_v18  ;;  %v1940_v22 = vpop.f32.mrb[113].mxu0  ;;  %v2195_v8 = vpop.f32.mrb[145].mxu1 }
 0x236   :  { %v2500_v48 = vadd.f32 %v2499_v63, %v2437_v28  ;;  %v2196_v38 = vadd.f32 %v2195_v8, %v4286_v16  ;;  %v2368_v15 = vadd.f32 %v2367_v61, %v2191_v50  ;;  %v1941_v54 = vpop.f32.mrb[114].mxu0  ;;  %v2858_v0 = vpop.f32.mrb[146].mxu1  ;;  %v4475_v8 = vld [vmem:[#allocation14_spill] sm:$0xff] }
 0x237   :  { %2308 = vst [vmem:[%s4442_s2 + $0x190] sm:$0xff] %v2204_v33  ;;  %v4378_v32 = vadd.f32 %v1941_v54, %v4471_v57  ;;  %v2207_v30 = vadd.f32 %v2858_v0, %v4316_v35  ;;  %v2198_v25 = vpop.f32.mrb[147].mxu1  ;;  %v1943_v18 = vpop.f32.mrb[115].mxu0  ;;  %v2441_v20 = vmul.f32 %v2204_v33, %v2204_v33 }
 0x238   :  { %2306 = vst [vmem:[%s4442_s2 + $0x180] sm:$0xff] %v2196_v38  ;;  %v2369_v19 = vadd.f32 %v2368_v15, %v2196_v38  ;;  %v2439_v16 = vmul.f32 %v2196_v38, %v2196_v38  ;;  %v2501_v26 = vadd.f32 %v2500_v48, %v2438_v29  ;;  %v2199_v9 = vadd.f32 %v2198_v25, %v4294_v27 }
 0x239   :  { %2309 = vst [vmem:[%s4442_s2 + $0x198] sm:$0xff] %v2207_v30  ;;  %v2442_v52 = vmul.f32 %v2207_v30, %v2207_v30 }
 0x23a   :  { %v2502_v5 = vadd.f32 %v2501_v26, %v2439_v16  ;;  %2307 = vst [vmem:[%s4442_s2 + $0x188] sm:$0xff] %v2199_v9  ;;  %v2370_v35 = vadd.f32 %v2369_v19, %v2199_v9  ;;  %v2440_v59 = vmul.f32 %v2199_v9, %v2199_v9 }
 0x23c   :  { %v2371_v2 = vadd.f32 %v2370_v35, %v2204_v33  ;;  %v2503_v31 = vadd.f32 %v2502_v5, %v2440_v59  ;;  %v1946_v24 = vpop.f32.mrb[116].mxu0  ;;  %v2861_v1 = vpop.f32.mrb[148].mxu1  ;;  %v4476_v35 = vld [vmem:[#allocation15_spill] sm:$0xff] }
 0x23d   :  { %v1947_v56 = vadd.f32 %v1946_v24, %v4472_v11  ;;  %v2220_v58 = vadd.f32 %v2861_v1, %v1931_v12  ;;  %v1948_v27 = vpop.f32.mrb[117].mxu0  ;;  %v2211_v37 = vpop.f32.mrb[149].mxu1 }
 0x23e   :  { %v2504_v23 = vadd.f32 %v2503_v31, %v2441_v20  ;;  %v2212_v34 = vadd.f32 %v2211_v37, %v4330_v14  ;;  %v2372_v42 = vadd.f32 %v2371_v2, %v2207_v30  ;;  %v1949_v21 = vpop.f32.mrb[118].mxu0  ;;  %v2862_v41 = vpop.f32.mrb[150].mxu1  ;;  %v4477_v27 = vld [vmem:[#allocation16_spill] sm:$0xff] }
 0x23f   :  { %2312 = vst [vmem:[%s4442_s2 + $0x1b0] sm:$0xff] %v2220_v58  ;;  %v1950_v40 = vadd.f32 %v1949_v21, %v4473_v36  ;;  %v2223_v53 = vadd.f32 %v2862_v41, %v1934_v60  ;;  %v2214_v10 = vpop.f32.mrb[151].mxu1  ;;  %v1951_v3 = vpop.f32.mrb[119].mxu0  ;;  %v2445_v6 = vmul.f32 %v2220_v58, %v2220_v58 }
 0x240   :  { %2310 = vst [vmem:[%s4442_s2 + $0x1a0] sm:$0xff] %v2212_v34  ;;  %v2373_v12 = vadd.f32 %v2372_v42, %v2212_v34  ;;  %v2443_v43 = vmul.f32 %v2212_v34, %v2212_v34  ;;  %v2505_v50 = vadd.f32 %v2504_v23, %v2442_v52  ;;  %v2215_v14 = vadd.f32 %v2214_v10, %v4338_v55 }
 0x241   :  { %2313 = vst [vmem:[%s4442_s2 + $0x1b8] sm:$0xff] %v2223_v53  ;;  %v2446_v63 = vmul.f32 %v2223_v53, %v2223_v53 }
 0x242   :  { %v2506_v49 = vadd.f32 %v2505_v50, %v2443_v43  ;;  %2311 = vst [vmem:[%s4442_s2 + $0x1a8] sm:$0xff] %v2215_v14  ;;  %v2374_v60 = vadd.f32 %v2373_v12, %v2215_v14  ;;  %v2444_v45 = vmul.f32 %v2215_v14, %v2215_v14 }
 0x244   :  { %v2375_v7 = vadd.f32 %v2374_v60, %v2220_v58  ;;  %v2507_v46 = vadd.f32 %v2506_v49, %v2444_v45  ;;  %v1954_v4 = vpop.f32.mrb[120].mxu0  ;;  %v2865_v17 = vpop.f32.mrb[152].mxu1 }
 0x245   :  { %v1955_v47 = vadd.f32 %v1954_v4, %v4474_v62  ;;  %v2236_v28 = vadd.f32 %v2865_v17, %v1947_v56  ;;  %v1956_v55 = vpop.f32.mrb[121].mxu0  ;;  %v2227_v61 = vpop.f32.mrb[153].mxu1 }
 0x246   :  { %v2508_v44 = vadd.f32 %v2507_v46, %v2445_v6  ;;  %v2228_v13 = vadd.f32 %v2227_v61, %v4370_v39  ;;  %v2376_v51 = vadd.f32 %v2375_v7, %v2223_v53  ;;  %v1957_v33 = vpop.f32.mrb[122].mxu0  ;;  %v2866_v22 = vpop.f32.mrb[154].mxu1 }
 0x247   :  { %2316 = vst [vmem:[%s4442_s2 + $0x1d0] sm:$0xff] %v2236_v28  ;;  %v1958_v29 = vadd.f32 %v1957_v33, %v4475_v8  ;;  %v2239_v48 = vadd.f32 %v2866_v22, %v1950_v40  ;;  %v2230_v38 = vpop.f32.mrb[155].mxu1  ;;  %v1959_v15 = vpop.f32.mrb[123].mxu0  ;;  %v2449_v19 = vmul.f32 %v2236_v28, %v2236_v28 }
 0x248   :  { %2314 = vst [vmem:[%s4442_s2 + $0x1c0] sm:$0xff] %v2228_v13  ;;  %v2377_v54 = vadd.f32 %v2376_v51, %v2228_v13  ;;  %v2447_v0 = vmul.f32 %v2228_v13, %v2228_v13  ;;  %v2509_v57 = vadd.f32 %v2508_v44, %v2446_v63  ;;  %v2231_v39 = vadd.f32 %v2230_v38, %v4378_v32 }
 0x249   :  { %2317 = vst [vmem:[%s4442_s2 + $0x1d8] sm:$0xff] %v2239_v48  ;;  %v2450_v2 = vmul.f32 %v2239_v48, %v2239_v48 }
 0x24a   :  { %v2510_v30 = vadd.f32 %v2509_v57, %v2447_v0  ;;  %2315 = vst [vmem:[%s4442_s2 + $0x1c8] sm:$0xff] %v2231_v39  ;;  %v2378_v25 = vadd.f32 %v2377_v54, %v2231_v39  ;;  %v2448_v18 = vmul.f32 %v2231_v39, %v2231_v39 }
 0x24c   :  { %v2379_v16 = vadd.f32 %v2378_v25, %v2236_v28  ;;  %v2511_v26 = vadd.f32 %v2510_v30, %v2448_v18  ;;  %v1962_v9 = vpop.f32.mrb[124].mxu0  ;;  %v2869_v5 = vpop.f32.mrb[156].mxu1 }
 0x24d   :  { %v1963_v59 = vadd.f32 %v1962_v9, %v4476_v35  ;;  %v1964_v20 = vpop.f32.mrb[125].mxu0  ;;  %v2243_v32 = vpop.f32.mrb[157].mxu1 }
 0x24e   :  { %v2512_v31 = vadd.f32 %v2511_v26, %v2449_v19  ;;  %v2244_v24 = vadd.f32 %v2243_v32, %v1955_v47  ;;  %v2380_v1 = vadd.f32 %v2379_v16, %v2239_v48  ;;  %v1965_v11 = vpop.f32.mrb[126].mxu0  ;;  %v2870_v56 = vpop.f32.mrb[158].mxu1 }
 0x24f   :  { %v2252_v58 = vadd.f32 %v2869_v5, %v1963_v59  ;;  %v1966_v37 = vadd.f32 %v1965_v11, %v4477_v27  ;;  %v2246_v52 = vpop.f32.mrb[159].mxu1  ;;  %v1967_v23 = vpop.f32.mrb[127].mxu0 }
 0x250   :  { %2318 = vst [vmem:[%s4442_s2 + $0x1e0] sm:$0xff] %v2244_v24  ;;  %v2381_v34 = vadd.f32 %v2380_v1, %v2244_v24  ;;  %v2451_v42 = vmul.f32 %v2244_v24, %v2244_v24  ;;  %v2513_v21 = vadd.f32 %v2512_v31, %v2450_v2  ;;  %v2247_v41 = vadd.f32 %v2246_v52, %v1958_v29 }
 0x251   :  { %2320 = vst [vmem:[%s4442_s2 + $0x1f0] sm:$0xff] %v2252_v58  ;;  %v2255_v36 = vadd.f32 %v2870_v56, %v1966_v37  ;;  %v2453_v3 = vmul.f32 %v2252_v58, %v2252_v58 }
 0x252   :  { %v2514_v40 = vadd.f32 %v2513_v21, %v2451_v42  ;;  %2319 = vst [vmem:[%s4442_s2 + $0x1e8] sm:$0xff] %v2247_v41  ;;  %v2382_v53 = vadd.f32 %v2381_v34, %v2247_v41  ;;  %v2452_v10 = vmul.f32 %v2247_v41, %v2247_v41 }
 0x253   :  { %2321 = vst [vmem:[%s4442_s2 + $0x1f8] sm:$0xff] %v2255_v36  ;;  %v2454_v50 = vmul.f32 %v2255_v36, %v2255_v36 }
 0x254   :  { %v2383_v12 = vadd.f32 %v2382_v53, %v2252_v58  ;;  %v2515_v43 = vadd.f32 %v2514_v40, %v2452_v10 }
 0x256   :  { %v2384_v14 = vadd.f32 %v2383_v12, %v2255_v36  ;;  %v2516_v49 = vadd.f32 %v2515_v43, %v2453_v3 }
 0x258   :  { %v2385_v60 = vrot.slane %v2384_v14, 4  ;;  %v2517_v45 = vadd.f32 %v2516_v49, %v2454_v50 }
 0x25a   :  { %v2386_v6 = vadd.f32 %v2385_v60, %v2384_v14  ;;  %v2518_v7 = vrot.slane %v2517_v45, 4 }
 0x25c   :  { %v2387_v46 = vrot.slane %v2386_v6, 2  ;;  %v2519_v4 = vadd.f32 %v2518_v7, %v2517_v45 }
 0x25e   :  { %v2388_v17 = vadd.f32 %v2387_v46, %v2386_v6  ;;  %v2520_v62 = vrot.slane %v2519_v4, 2 }
 0x260   :  { %v2389_v47 = vrot.slane %v2388_v17, 1  ;;  %v2521_v28 = vadd.f32 %v2520_v62, %v2519_v4 }
 0x262   :  { %v2522_v55 = vrot.slane %v2521_v28, 1  ;;  %v2390_v61 = vadd.f32 %v2389_v47, %v2388_v17 }
 0x264   :  { %v2523_v63 = vadd.f32 %v2522_v55, %v2521_v28 }
 0x266   :  { %v2525_v44 = vsel %vm2524_vm1, %v2390_v61, %v2523_v63 }
 0x267   :  { %2526 = vst [vmem:[%s4443_s3] sm:$0x3] %v2525_v44 }

// kernel: block35.10
= control target key start
LH: loop header
LB: loop body
LE: loop exit
PB: predicated region body
PF: predicated region fallthrough
CT: control target
= control target key end

     0   :  { %v2145_v0 = vmov 0   ;;  %vm766_vm0 = vcmask 261120   ;;  %vm1707_vm1 = vcmask 1040384   ;;  %s2971_s1 = inlined_call_operand.vmem [shape: bf16[288,128], index: 1, kind: input, shape index: {}]   ;;  %s2972_s0 = inlined_call_operand.vmem [shape: bf16[512,288], index: 0, kind: input, shape index: {}]   ;;  %s2973_s2 = inlined_call_operand.vmem [shape: f32[512,128], index: 2, kind: output, shape index: {0}]   ;;  %s2974_s3 = inlined_call_operand.vmem [shape: f32[1,2,128], index: 3, kind: output, shape index: {1}]  }
   0x1   :  { %863 = vmatprep.subr.bf16.mxu0 %v2145_v0  ;;  %1966 = vmatprep.subr.bf16.mxu1 %v2145_v0  ;;  %v1999_v1 = vld [vmem:[%s2971_s1] sm:$0xff]   ;;  %v2000_v2 = vld [vmem:[%s2971_s1 + $0x8] sm:$0xff]   ;;  %v2001_v3 = vld [vmem:[%s2971_s1 + $0x10] sm:$0xff]  }
   0x2   :  { %864 = vmatpush1.bf16.msra.mxu0 %v1999_v1  ;;  %1982 = vmatpush1.bf16.msra.mxu1 %v1999_v1  ;;  %v2002_v4 = vld [vmem:[%s2971_s1 + $0x18] sm:$0xff]   ;;  %v2003_v5 = vld [vmem:[%s2971_s1 + $0x20] sm:$0xff]   ;;  %v2004_v7 = vld [vmem:[%s2971_s1 + $0x28] sm:$0xff]  }
   0x3   :  { %865 = vmatprep.subr.bf16.mxu0 %v2145_v0  ;;  %1967 = vmatprep.subr.bf16.mxu1 %v2145_v0  ;;  %v2017_v6 = vld [vmem:[%s2972_s0 + $0x4] ss:$12 sps:$4 sm:$0xff]   ;;  %v2006_v10 = vld [vmem:[%s2971_s1 + $0x38] sm:$0xff]   ;;  %v2008_v12 = vld [vmem:[%s2971_s1 + $0x48] sm:$0xff]  }
   0x4   :  { %v2020_v8 = vld [vmem:[%s2972_s0 + $0x244] ss:$12 sps:$4 sm:$0xff]   ;;  %895 = vmatprep.mubr.bf16.mxu0 %v2017_v6  ;;  %v2010_v14 = vld [vmem:[%s2971_s1 + $0x58] sm:$0xff]   ;;  %v2012_v16 = vld [vmem:[%s2971_s1 + $0x68] sm:$0xff]  }
   0x5   :  { %1087 = vmatprep.mubr.bf16.mxu1 %v2020_v8  ;;  %v2005_v9 = vld [vmem:[%s2971_s1 + $0x30] sm:$0xff]   ;;  %v2007_v11 = vld [vmem:[%s2971_s1 + $0x40] sm:$0xff]   ;;  %v2014_v18 = vld [vmem:[%s2971_s1 + $0x78] sm:$0xff]  }
   0x6   :  { %866 = vmatpush1.bf16.msra.mxu0 %v2000_v2  ;;  %1983 = vmatpush1.bf16.msra.mxu1 %v2000_v2  ;;  %v2009_v13 = vld [vmem:[%s2971_s1 + $0x50] sm:$0xff]   ;;  %v2011_v15 = vld [vmem:[%s2971_s1 + $0x60] sm:$0xff]   ;;  %v2021_v22 = vld [vmem:[%s2972_s0 + $0x1c] ss:$12 sps:$4 sm:$0xff]  }
   0x7   :  { %867 = vmatprep.subr.bf16.mxu0 %v2145_v0  ;;  %1968 = vmatprep.subr.bf16.mxu1 %v2145_v0  ;;  %v2013_v17 = vld [vmem:[%s2971_s1 + $0x70] sm:$0xff]   ;;  %v2039_v19 = vld [vmem:[%s2971_s1 + $0x80] sm:$0xff]   ;;  %v2023_v23 = vld [vmem:[%s2972_s0 + $0x25c] ss:$12 sps:$4 sm:$0xff]  }
   0x8   :  { %v2015_v20 = vld [vmem:[%s2972_s0] ss:$12 sps:$4 sm:$0xff]   ;;  %v2025_v25 = vld [vmem:[%s2972_s0 + $0x18] ss:$12 sps:$4 sm:$0xff]   ;;  %v2031_v29 = vld [vmem:[%s2972_s0 + $0x30] ss:$12 sps:$4 sm:$0xff]  }
   0x9   :  { %v2018_v21 = vld [vmem:[%s2972_s0 + $0x240] ss:$12 sps:$4 sm:$0xff]   ;;  %v2026_v26 = vld [vmem:[%s2972_s0 + $0x258] ss:$12 sps:$4 sm:$0xff]   ;;  %v2032_v30 = vld [vmem:[%s2972_s0 + $0x270] ss:$12 sps:$4 sm:$0xff]  }
   0xa   :  { %868 = vmatpush1.bf16.msra.mxu0 %v2001_v3  ;;  %1984 = vmatpush1.bf16.msra.mxu1 %v2001_v3  ;;  %v2064_v24 = vld [vmem:[%s2971_s1 + $0x88] sm:$0xff]   ;;  %v2027_v27 = vld [vmem:[%s2972_s0 + $0x34] ss:$12 sps:$4 sm:$0xff]   ;;  %v2040_v35 = vld [vmem:[%s2972_s0 + $0x64] ss:$12 sps:$4 sm:$0xff]  }
   0xb   :  { %869 = vmatprep.subr.bf16.mxu0 %v2145_v0  ;;  %1969 = vmatprep.subr.bf16.mxu1 %v2145_v0  ;;  %v2029_v28 = vld [vmem:[%s2972_s0 + $0x274] ss:$12 sps:$4 sm:$0xff]   ;;  %v2033_v31 = vld [vmem:[%s2972_s0 + $0x4c] ss:$12 sps:$4 sm:$0xff]   ;;  %v2042_v36 = vld [vmem:[%s2972_s0 + $0x2a4] ss:$12 sps:$4 sm:$0xff]  }
   0xc   :  { %v2035_v32 = vld [vmem:[%s2972_s0 + $0x28c] ss:$12 sps:$4 sm:$0xff]   ;;  %v2037_v33 = vld [vmem:[%s2972_s0 + $0x48] ss:$12 sps:$4 sm:$0xff]   ;;  %v2056_v45 = vld [vmem:[%s2972_s0 + $0x90] ss:$12 sps:$4 sm:$0xff]  }
   0xd   :  { %v2038_v34 = vld [vmem:[%s2972_s0 + $0x288] ss:$12 sps:$4 sm:$0xff]   ;;  %v2044_v37 = vld [vmem:[%s2972_s0 + $0x60] ss:$12 sps:$4 sm:$0xff]   ;;  %v2050_v41 = vld [vmem:[%s2972_s0 + $0x78] ss:$12 sps:$4 sm:$0xff]  }
   0xe   :  { %870 = vmatpush1.bf16.msra.mxu0 %v2002_v4  ;;  %1985 = vmatpush1.bf16.msra.mxu1 %v2002_v4  ;;  %v2045_v38 = vld [vmem:[%s2972_s0 + $0x2a0] ss:$12 sps:$4 sm:$0xff]   ;;  %v2046_v39 = vld [vmem:[%s2972_s0 + $0x7c] ss:$12 sps:$4 sm:$0xff]   ;;  %v2051_v42 = vld [vmem:[%s2972_s0 + $0x2b8] ss:$12 sps:$4 sm:$0xff]  }
   0xf   :  { %871 = vmatprep.subr.bf16.mxu0 %v2145_v0  ;;  %1970 = vmatprep.subr.bf16.mxu1 %v2145_v0  ;;  %v2048_v40 = vld [vmem:[%s2972_s0 + $0x2bc] ss:$12 sps:$4 sm:$0xff]   ;;  %v2052_v43 = vld [vmem:[%s2972_s0 + $0x94] ss:$12 sps:$4 sm:$0xff]   ;;  %v2058_v47 = vld [vmem:[%s2972_s0 + $0xac] ss:$12 sps:$4 sm:$0xff]  }
  0x10   :  { %v2054_v44 = vld [vmem:[%s2972_s0 + $0x2d4] ss:$12 sps:$4 sm:$0xff]   ;;  %v2057_v46 = vld [vmem:[%s2972_s0 + $0x2d0] ss:$12 sps:$4 sm:$0xff]   ;;  %v2060_v48 = vld [vmem:[%s2972_s0 + $0x2ec] ss:$12 sps:$4 sm:$0xff]  }
  0x11   :  { %v2062_v49 = vld [vmem:[%s2972_s0 + $0xa8] ss:$12 sps:$4 sm:$0xff]   ;;  %v2065_v51 = vld [vmem:[%s2972_s0 + $0xc4] ss:$12 sps:$4 sm:$0xff]   ;;  %v2068_v53 = vld [vmem:[%s2972_s0 + $0xc0] ss:$12 sps:$4 sm:$0xff]  }
  0x12   :  { %872 = vmatpush1.bf16.msra.mxu0 %v2003_v5  ;;  %1986 = vmatpush1.bf16.msra.mxu1 %v2003_v5  ;;  %v2063_v50 = vld [vmem:[%s2972_s0 + $0x2e8] ss:$12 sps:$4 sm:$0xff]   ;;  %v2069_v54 = vld [vmem:[%s2972_s0 + $0x20] ss:$12 sps:$4 sm:$0xff]   ;;  %v2072_v56 = vld [vmem:[%s2972_s0 + $0x38] ss:$12 sps:$4 sm:$0xff]  }
  0x13   :  { %873 = vmatprep.subr.bf16.mxu0 %v2145_v0  ;;  %1971 = vmatprep.subr.bf16.mxu1 %v2145_v0  ;;  %v2067_v52 = vld [vmem:[%s2972_s0 + $0x8] ss:$12 sps:$4 sm:$0xff]   ;;  %v2073_v57 = vld [vmem:[%s2972_s0 + $0xd8] ss:$12 sps:$4 sm:$0xff]   ;;  %v2074_v58 = vld [vmem:[%s2972_s0 + $0x50] ss:$12 sps:$4 sm:$0xff]  }
  0x14   :  { %v2070_v55 = vld [vmem:[%s2972_s0 + $0xdc] ss:$12 sps:$4 sm:$0xff]   ;;  %v2075_v59 = vld [vmem:[%s2972_s0 + $0xf4] ss:$12 sps:$4 sm:$0xff]   ;;  %v2080_v63 = vld [vmem:[%s2972_s0 + $0x10c] ss:$12 sps:$4 sm:$0xff]  }
  0x15   :  { %v2077_v60 = vld [vmem:[%s2972_s0 + $0x68] ss:$12 sps:$4 sm:$0xff]   ;;  %v2078_v61 = vld [vmem:[%s2972_s0 + $0xf0] ss:$12 sps:$4 sm:$0xff]   ;;  %v2079_v62 = vld [vmem:[%s2972_s0 + $0x80] ss:$12 sps:$4 sm:$0xff]  }
  0x16   :  { %874 = vmatpush1.bf16.msra.mxu0 %v2004_v7  ;;  %1987 = vmatpush1.bf16.msra.mxu1 %v2004_v7  ;;  %v2083_v1 = vld [vmem:[%s2972_s0 + $0x108] ss:$12 sps:$4 sm:$0xff]   ;;  %v2084_v2 = vld [vmem:[%s2972_s0 + $0xb0] ss:$12 sps:$4 sm:$0xff]   ;;  %v2088_v5 = vld [vmem:[%s2972_s0 + $0x120] ss:$12 sps:$4 sm:$0xff]  }
  0x17   :  { %875 = vmatprep.subr.bf16.mxu0 %v2145_v0  ;;  %1972 = vmatprep.subr.bf16.mxu1 %v2145_v0  ;;  %v2085_v3 = vld [vmem:[%s2972_s0 + $0x124] ss:$12 sps:$4 sm:$0xff]   ;;  %v2087_v4 = vld [vmem:[%s2972_s0 + $0xc8] ss:$12 sps:$4 sm:$0xff]   ;;  %v2089_v6 = vld [vmem:[%s2972_s0 + $0xe0] ss:$12 sps:$4 sm:$0xff]  }
  0x18   :  { %v2090_v7 = vld [vmem:[%s2972_s0 + $0x13c] ss:$12 sps:$4 sm:$0xff]   ;;  %v2092_v8 = vld [vmem:[%s2972_s0 + $0xf8] ss:$12 sps:$4 sm:$0xff]  }
  0x1a   :  { %876 = vmatpush1.bf16.msra.mxu0 %v2005_v9  ;;  %1988 = vmatpush1.bf16.msra.mxu1 %v2005_v9  ;;  %v2093_v9 = vld [vmem:[%s2972_s0 + $0x138] ss:$12 sps:$4 sm:$0xff]  }
  0x1b   :  { %877 = vmatprep.subr.bf16.mxu0 %v2145_v0  ;;  %1973 = vmatprep.subr.bf16.mxu1 %v2145_v0 }
  0x1e   :  { %878 = vmatpush1.bf16.msra.mxu0 %v2006_v10  ;;  %1989 = vmatpush1.bf16.msra.mxu1 %v2006_v10  ;;  %v2094_v10 = vld [vmem:[%s2972_s0 + $0x110] ss:$12 sps:$4 sm:$0xff]  }
  0x1f   :  { %879 = vmatprep.subr.bf16.mxu0 %v2145_v0  ;;  %1974 = vmatprep.subr.bf16.mxu1 %v2145_v0 }
  0x22   :  { %880 = vmatpush1.bf16.msra.mxu0 %v2007_v11  ;;  %1990 = vmatpush1.bf16.msra.mxu1 %v2007_v11  ;;  %v2095_v11 = vld [vmem:[%s2972_s0 + $0x154] ss:$12 sps:$4 sm:$0xff]  }
  0x23   :  { %881 = vmatprep.subr.bf16.mxu0 %v2145_v0  ;;  %1975 = vmatprep.subr.bf16.mxu1 %v2145_v0 }
  0x26   :  { %882 = vmatpush1.bf16.msra.mxu0 %v2008_v12  ;;  %1991 = vmatpush1.bf16.msra.mxu1 %v2008_v12  ;;  %v2097_v12 = vld [vmem:[%s2972_s0 + $0x128] ss:$12 sps:$4 sm:$0xff]  }
  0x27   :  { %883 = vmatprep.subr.bf16.mxu0 %v2145_v0  ;;  %1976 = vmatprep.subr.bf16.mxu1 %v2145_v0 }
  0x2a   :  { %884 = vmatpush1.bf16.msra.mxu0 %v2009_v13  ;;  %1992 = vmatpush1.bf16.msra.mxu1 %v2009_v13  ;;  %v2098_v13 = vld [vmem:[%s2972_s0 + $0x150] ss:$12 sps:$4 sm:$0xff]  }
  0x2b   :  { %885 = vmatprep.subr.bf16.mxu0 %v2145_v0  ;;  %1977 = vmatprep.subr.bf16.mxu1 %v2145_v0 }
  0x2e   :  { %886 = vmatpush1.bf16.msra.mxu0 %v2010_v14  ;;  %1993 = vmatpush1.bf16.msra.mxu1 %v2010_v14  ;;  %v2099_v14 = vld [vmem:[%s2972_s0 + $0x140] ss:$12 sps:$4 sm:$0xff]  }
  0x2f   :  { %887 = vmatprep.subr.bf16.mxu0 %v2145_v0  ;;  %1978 = vmatprep.subr.bf16.mxu1 %v2145_v0 }
  0x32   :  { %888 = vmatpush1.bf16.msra.mxu0 %v2011_v15  ;;  %1994 = vmatpush1.bf16.msra.mxu1 %v2011_v15  ;;  %v2100_v15 = vld [vmem:[%s2972_s0 + $0x16c] ss:$12 sps:$4 sm:$0xff]  }
  0x33   :  { %889 = vmatprep.subr.bf16.mxu0 %v2145_v0  ;;  %1979 = vmatprep.subr.bf16.mxu1 %v2145_v0 }
  0x36   :  { %890 = vmatpush1.bf16.msra.mxu0 %v2012_v16  ;;  %1995 = vmatpush1.bf16.msra.mxu1 %v2012_v16  ;;  %v2102_v16 = vld [vmem:[%s2972_s0 + $0x158] ss:$12 sps:$4 sm:$0xff]  }
  0x37   :  { %891 = vmatprep.subr.bf16.mxu0 %v2145_v0  ;;  %1980 = vmatprep.subr.bf16.mxu1 %v2145_v0 }
  0x3a   :  { %892 = vmatpush1.bf16.msra.mxu0 %v2013_v17  ;;  %1996 = vmatpush1.bf16.msra.mxu1 %v2013_v17  ;;  %v2103_v17 = vld [vmem:[%s2972_s0 + $0x168] ss:$12 sps:$4 sm:$0xff]  }
  0x3b   :  { %893 = vmatprep.subr.bf16.mxu0 %v2145_v0  ;;  %1981 = vmatprep.subr.bf16.mxu1 %v2145_v0  ;;  %v2082_v0 = vld [vmem:[%s2972_s0 + $0x98] ss:$12 sps:$4 sm:$0xff]  }
  0x3e   :  { %894 = vmatpush1.bf16.msra.mxu0 %v2014_v18  ;;  %1997 = vmatpush1.bf16.msra.mxu1 %v2014_v18  ;;  %v2104_v18 = vld [vmem:[%s2972_s0 + $0x170] ss:$12 sps:$4 sm:$0xff]  }
  0x3f   :  { %1898 = vmatprep.subr.bf16.mxu1 %v2039_v19 }
  0x41   :  { %896 = vmatmul.mubr.bf16.vlgmr.msra.gmra.mrb[0].mxu0 %v2015_v20  ;;  %1088 = vmatmul.mubr.bf16.vlgmr.msra.gmra.mrb[0].mxu1 %v2018_v21  ;;  %v2107_v20 = vld [vmem:[%s2972_s0 + $0x188] ss:$12 sps:$4 sm:$0xff]   ;;  %v2108_v21 = vld [vmem:[%s2972_s0 + $0x180] ss:$12 sps:$4 sm:$0xff]  }
  0x42   :  { %903 = vmatprep.mubr.bf16.mxu0 %v2021_v22  ;;  %1095 = vmatprep.mubr.bf16.mxu1 %v2023_v23  ;;  %v2109_v22 = vld [vmem:[%s2972_s0 + $0x1a0] ss:$12 sps:$4 sm:$0xff]   ;;  %v2110_v23 = vld [vmem:[%s2972_s0 + $0x19c] ss:$12 sps:$4 sm:$0xff]  }
  0x43   :  { %1899 = vmatpush3.bf16.msra.mxu1 %v2039_v19  ;;  %v2105_v19 = vld [vmem:[%s2972_s0 + $0x184] ss:$12 sps:$4 sm:$0xff]  }
  0x44   :  { %1900 = vmatprep.subr.bf16.mxu1 %v2064_v24 }
  0x47   :  { %1901 = vmatpush3.bf16.msra.mxu1 %v2064_v24  ;;  %v2112_v24 = vld [vmem:[%s2972_s0 + $0x1b8] ss:$12 sps:$4 sm:$0xff]  }
  0x49   :  { %904 = vmatmul.mubr.bf16.gmra.mrb[4].mxu0 %v2025_v25  ;;  %1096 = vmatmul.mubr.bf16.gmra.mrb[4].mxu1 %v2026_v26  ;;  %v2113_v25 = vld [vmem:[%s2972_s0 + $0x198] ss:$12 sps:$4 sm:$0xff]   ;;  %v2114_v26 = vld [vmem:[%s2972_s0 + $0x1d0] ss:$12 sps:$4 sm:$0xff]  }
  0x4a   :  { %911 = vmatprep.mubr.bf16.mxu0 %v2027_v27  ;;  %1103 = vmatprep.mubr.bf16.mxu1 %v2029_v28  ;;  %v2115_v27 = vld [vmem:[%s2972_s0 + $0x1b4] ss:$12 sps:$4 sm:$0xff]  }
  0x4b   :  { %v2117_v28 = vld [vmem:[%s2972_s0 + $0x1e8] ss:$12 sps:$4 sm:$0xff]  }
  0x51   :  { %912 = vmatmul.mubr.bf16.gmra.mrb[8].mxu0 %v2031_v29  ;;  %1104 = vmatmul.mubr.bf16.gmra.mrb[8].mxu1 %v2032_v30  ;;  %v2118_v29 = vld [vmem:[%s2972_s0 + $0x1b0] ss:$12 sps:$4 sm:$0xff]   ;;  %v2119_v30 = vld [vmem:[%s2972_s0 + $0x200] ss:$12 sps:$4 sm:$0xff]  }
  0x52   :  { %919 = vmatprep.mubr.bf16.mxu0 %v2033_v31  ;;  %1111 = vmatprep.mubr.bf16.mxu1 %v2035_v32  ;;  %v2120_v31 = vld [vmem:[%s2972_s0 + $0x1cc] ss:$12 sps:$4 sm:$0xff]  }
  0x53   :  { %v2122_v32 = vld [vmem:[%s2972_s0 + $0x218] ss:$12 sps:$4 sm:$0xff]  }
  0x59   :  { %920 = vmatmul.mubr.bf16.gmra.mrb[12].mxu0 %v2037_v33  ;;  %1112 = vmatmul.mubr.bf16.gmra.mrb[12].mxu1 %v2038_v34  ;;  %v2123_v33 = vld [vmem:[%s2972_s0 + $0x1c8] ss:$12 sps:$4 sm:$0xff]   ;;  %v2124_v34 = vld [vmem:[%s2972_s0 + $0x230] ss:$12 sps:$4 sm:$0xff]  }
  0x5a   :  { %927 = vmatprep.mubr.bf16.mxu0 %v2040_v35  ;;  %1119 = vmatprep.mubr.bf16.mxu1 %v2042_v36  ;;  %v2125_v35 = vld [vmem:[%s2972_s0 + $0x1e4] ss:$12 sps:$4 sm:$0xff]   ;;  %v2127_v36 = vld [vmem:[%s2972_s0 + $0x248] ss:$12 sps:$4 sm:$0xff]  }
  0x61   :  { %928 = vmatmul.mubr.bf16.gmra.mrb[16].mxu0 %v2044_v37  ;;  %1120 = vmatmul.mubr.bf16.gmra.mrb[16].mxu1 %v2045_v38  ;;  %v2128_v37 = vld [vmem:[%s2972_s0 + $0x1e0] ss:$12 sps:$4 sm:$0xff]  }
  0x62   :  { %935 = vmatprep.mubr.bf16.mxu0 %v2046_v39  ;;  %1127 = vmatprep.mubr.bf16.mxu1 %v2048_v40  ;;  %v2129_v38 = vld [vmem:[%s2972_s0 + $0x260] ss:$12 sps:$4 sm:$0xff]   ;;  %v2130_v39 = vld [vmem:[%s2972_s0 + $0x1fc] ss:$12 sps:$4 sm:$0xff]   ;;  %v2132_v40 = vld [vmem:[%s2972_s0 + $0x278] ss:$12 sps:$4 sm:$0xff]  }
  0x69   :  { %936 = vmatmul.mubr.bf16.gmra.mrb[20].mxu0 %v2050_v41  ;;  %1128 = vmatmul.mubr.bf16.gmra.mrb[20].mxu1 %v2051_v42  ;;  %v2133_v41 = vld [vmem:[%s2972_s0 + $0x1f8] ss:$12 sps:$4 sm:$0xff]   ;;  %v2134_v42 = vld [vmem:[%s2972_s0 + $0x290] ss:$12 sps:$4 sm:$0xff]  }
  0x6a   :  { %943 = vmatprep.mubr.bf16.mxu0 %v2052_v43  ;;  %1135 = vmatprep.mubr.bf16.mxu1 %v2054_v44  ;;  %v2135_v43 = vld [vmem:[%s2972_s0 + $0x214] ss:$12 sps:$4 sm:$0xff]  }
  0x6b   :  { %v2137_v44 = vld [vmem:[%s2972_s0 + $0x2a8] ss:$12 sps:$4 sm:$0xff]  }
  0x71   :  { %944 = vmatmul.mubr.bf16.gmra.mrb[24].mxu0 %v2056_v45  ;;  %1136 = vmatmul.mubr.bf16.gmra.mrb[24].mxu1 %v2057_v46  ;;  %v2138_v45 = vld [vmem:[%s2972_s0 + $0x210] ss:$12 sps:$4 sm:$0xff]   ;;  %v2139_v46 = vld [vmem:[%s2972_s0 + $0x2c0] ss:$12 sps:$4 sm:$0xff]  }
  0x72   :  { %951 = vmatprep.mubr.bf16.mxu0 %v2058_v47  ;;  %1143 = vmatprep.mubr.bf16.mxu1 %v2060_v48  ;;  %v2140_v47 = vld [vmem:[%s2972_s0 + $0x22c] ss:$12 sps:$4 sm:$0xff]  }
  0x73   :  { %v2142_v48 = vld [vmem:[%s2972_s0 + $0x2d8] ss:$12 sps:$4 sm:$0xff]  }
  0x79   :  { %952 = vmatmul.mubr.bf16.gmra.mrb[28].mxu0 %v2062_v49  ;;  %1144 = vmatmul.mubr.bf16.gmra.mrb[28].mxu1 %v2063_v50  ;;  %v2143_v49 = vld [vmem:[%s2972_s0 + $0x228] ss:$12 sps:$4 sm:$0xff]   ;;  %v2144_v50 = vld [vmem:[%s2972_s0 + $0x2f0] ss:$12 sps:$4 sm:$0xff]  }
  0x7a   :  { %959 = vmatprep.mubr.bf16.mxu0 %v2065_v51  ;;  %1902 = vmatprep.mubr.msk.bf16.mxu1 %vm766_vm0, %v2067_v52 }
  0x81   :  { %960 = vmatmul.mubr.bf16.gmra.mrb[32].mxu0 %v2068_v53  ;;  %1903 = vmatmul.mubr.msk.bf16.vlgmr.msra.gmra.mrb[32].mxu1 %vm766_vm0, %v2069_v54 }
  0x82   :  { %967 = vmatprep.mubr.bf16.mxu0 %v2070_v55  ;;  %1906 = vmatprep.mubr.msk.bf16.mxu1 %vm766_vm0, %v2072_v56 }
  0x89   :  { %968 = vmatmul.mubr.bf16.gmra.mrb[36].mxu0 %v2073_v57  ;;  %1907 = vmatmul.mubr.msk.bf16.gmra.mrb[36].mxu1 %vm766_vm0, %v2074_v58 }
  0x8a   :  { %975 = vmatprep.mubr.bf16.mxu0 %v2075_v59  ;;  %1910 = vmatprep.mubr.msk.bf16.mxu1 %vm766_vm0, %v2077_v60 }
  0x91   :  { %976 = vmatmul.mubr.bf16.gmra.mrb[40].mxu0 %v2078_v61  ;;  %1911 = vmatmul.mubr.msk.bf16.gmra.mrb[40].mxu1 %vm766_vm0, %v2079_v62 }
  0x92   :  { %983 = vmatprep.mubr.bf16.mxu0 %v2080_v63  ;;  %1914 = vmatprep.mubr.msk.bf16.mxu1 %vm766_vm0, %v2082_v0 }
  0x99   :  { %984 = vmatmul.mubr.bf16.gmra.mrb[44].mxu0 %v2083_v1  ;;  %1915 = vmatmul.mubr.msk.bf16.gmra.mrb[44].mxu1 %vm766_vm0, %v2084_v2 }
  0x9a   :  { %991 = vmatprep.mubr.bf16.mxu0 %v2085_v3  ;;  %1918 = vmatprep.mubr.msk.bf16.mxu1 %vm766_vm0, %v2087_v4 }
  0xa1   :  { %992 = vmatmul.mubr.bf16.gmra.mrb[48].mxu0 %v2088_v5  ;;  %1919 = vmatmul.mubr.msk.bf16.gmra.mrb[48].mxu1 %vm766_vm0, %v2089_v6 }
  0xa2   :  { %999 = vmatprep.mubr.bf16.mxu0 %v2090_v7  ;;  %1922 = vmatprep.mubr.msk.bf16.mxu1 %vm766_vm0, %v2092_v8 }
  0xa9   :  { %1000 = vmatmul.mubr.bf16.gmra.mrb[52].mxu0 %v2093_v9  ;;  %1923 = vmatmul.mubr.msk.bf16.gmra.mrb[52].mxu1 %vm766_vm0, %v2094_v10 }
  0xaa   :  { %1007 = vmatprep.mubr.bf16.mxu0 %v2095_v11  ;;  %1926 = vmatprep.mubr.msk.bf16.mxu1 %vm766_vm0, %v2097_v12 }
  0xb1   :  { %1008 = vmatmul.mubr.bf16.gmra.mrb[56].mxu0 %v2098_v13  ;;  %1927 = vmatmul.mubr.msk.bf16.gmra.mrb[56].mxu1 %vm766_vm0, %v2099_v14 }
  0xb2   :  { %1015 = vmatprep.mubr.bf16.mxu0 %v2100_v15  ;;  %1930 = vmatprep.mubr.msk.bf16.mxu1 %vm766_vm0, %v2102_v16 }
  0xb9   :  { %1016 = vmatmul.mubr.bf16.gmra.mrb[60].mxu0 %v2103_v17  ;;  %1931 = vmatmul.mubr.msk.bf16.gmra.mrb[60].mxu1 %vm766_vm0, %v2104_v18 }
  0xba   :  { %1023 = vmatprep.mubr.bf16.mxu0 %v2105_v19  ;;  %1934 = vmatprep.mubr.msk.bf16.mxu1 %vm766_vm0, %v2107_v20 }
  0xc1   :  { %1024 = vmatmul.mubr.bf16.gmra.mrb[64].mxu0 %v2108_v21  ;;  %1935 = vmatmul.mubr.msk.bf16.gmra.mrb[64].mxu1 %vm766_vm0, %v2109_v22 }
  0xc2   :  { %1031 = vmatprep.mubr.bf16.mxu0 %v2110_v23  ;;  %1938 = vmatprep.mubr.msk.bf16.mxu1 %vm766_vm0, %v2112_v24 }
  0xc9   :  { %1032 = vmatmul.mubr.bf16.gmra.mrb[68].mxu0 %v2113_v25  ;;  %1939 = vmatmul.mubr.msk.bf16.gmra.mrb[68].mxu1 %vm766_vm0, %v2114_v26 }
  0xca   :  { %1039 = vmatprep.mubr.bf16.mxu0 %v2115_v27  ;;  %1942 = vmatprep.mubr.msk.bf16.mxu1 %vm766_vm0, %v2117_v28 }
  0xd1   :  { %1040 = vmatmul.mubr.bf16.gmra.mrb[72].mxu0 %v2118_v29  ;;  %1943 = vmatmul.mubr.msk.bf16.gmra.mrb[72].mxu1 %vm766_vm0, %v2119_v30 }
  0xd2   :  { %1047 = vmatprep.mubr.bf16.mxu0 %v2120_v31  ;;  %1946 = vmatprep.mubr.msk.bf16.mxu1 %vm766_vm0, %v2122_v32 }
  0xd9   :  { %1048 = vmatmul.mubr.bf16.gmra.mrb[76].mxu0 %v2123_v33  ;;  %1947 = vmatmul.mubr.msk.bf16.gmra.mrb[76].mxu1 %vm766_vm0, %v2124_v34 }
  0xda   :  { %1055 = vmatprep.mubr.bf16.mxu0 %v2125_v35  ;;  %1950 = vmatprep.mubr.msk.bf16.mxu1 %vm766_vm0, %v2127_v36 }
  0xe1   :  { %1056 = vmatmul.mubr.bf16.gmra.mrb[80].mxu0 %v2128_v37  ;;  %1951 = vmatmul.mubr.msk.bf16.gmra.mrb[80].mxu1 %vm766_vm0, %v2129_v38 }
  0xe2   :  { %1063 = vmatprep.mubr.bf16.mxu0 %v2130_v39  ;;  %1954 = vmatprep.mubr.msk.bf16.mxu1 %vm766_vm0, %v2132_v40 }
  0xe9   :  { %1064 = vmatmul.mubr.bf16.gmra.mrb[84].mxu0 %v2133_v41  ;;  %1955 = vmatmul.mubr.msk.bf16.gmra.mrb[84].mxu1 %vm766_vm0, %v2134_v42 }
  0xea   :  { %1071 = vmatprep.mubr.bf16.mxu0 %v2135_v43  ;;  %1958 = vmatprep.mubr.msk.bf16.mxu1 %vm766_vm0, %v2137_v44 }
  0xf1   :  { %1072 = vmatmul.mubr.bf16.gmra.mrb[88].mxu0 %v2138_v45  ;;  %1959 = vmatmul.mubr.msk.bf16.gmra.mrb[88].mxu1 %vm766_vm0, %v2139_v46 }
  0xf2   :  { %1079 = vmatprep.mubr.bf16.mxu0 %v2140_v47  ;;  %1962 = vmatprep.mubr.msk.bf16.mxu1 %vm766_vm0, %v2142_v48 }
  0xf9   :  { %1080 = vmatmul.mubr.bf16.gmra.mrb[92].mxu0 %v2143_v49  ;;  %1963 = vmatmul.mubr.msk.bf16.gmra.mrb[92].mxu1 %vm766_vm0, %v2144_v50 }
 0x114   :  { %v2572_v51 = vpop.f32.mrb[0].mxu0  ;;  %v2574_v52 = vpop.f32.mrb[0].mxu1 }
 0x115   :  { %v899_v53 = vpop.f32.mrb[1].mxu0  ;;  %v1091_v54 = vpop.f32.mrb[1].mxu1 }
 0x116   :  { %v2576_v55 = vpop.f32.mrb[2].mxu0  ;;  %v2578_v56 = vpop.f32.mrb[2].mxu1 }
 0x117   :  { %v902_v57 = vpop.f32.mrb[3].mxu0  ;;  %v1094_v58 = vpop.f32.mrb[3].mxu1 }
 0x11c   :  { %v905_v59 = vpop.f32.mrb[4].mxu0  ;;  %v2580_v60 = vpop.f32.mrb[4].mxu1 }
 0x11d   :  { %v907_v61 = vpop.f32.mrb[5].mxu0  ;;  %v1099_v62 = vpop.f32.mrb[5].mxu1 }
 0x11e   :  { %v908_v63 = vpop.f32.mrb[6].mxu0  ;;  %v2582_v0 = vpop.f32.mrb[6].mxu1 }
 0x11f   :  { %v910_v1 = vpop.f32.mrb[7].mxu0  ;;  %v1102_v2 = vpop.f32.mrb[7].mxu1 }
 0x124   :  { %v2584_v3 = vpop.f32.mrb[8].mxu0  ;;  %v2586_v4 = vpop.f32.mrb[8].mxu1 }
 0x125   :  { %v915_v5 = vpop.f32.mrb[9].mxu0  ;;  %v1107_v6 = vpop.f32.mrb[9].mxu1 }
 0x126   :  { %v2588_v7 = vpop.f32.mrb[10].mxu0  ;;  %v2590_v8 = vpop.f32.mrb[10].mxu1 }
 0x127   :  { %v918_v9 = vpop.f32.mrb[11].mxu0  ;;  %v1110_v10 = vpop.f32.mrb[11].mxu1 }
 0x12c   :  { %v2592_v11 = vpop.f32.mrb[12].mxu0  ;;  %v2594_v12 = vpop.f32.mrb[12].mxu1 }
 0x12d   :  { %v923_v13 = vpop.f32.mrb[13].mxu0  ;;  %v1115_v14 = vpop.f32.mrb[13].mxu1 }
 0x12e   :  { %v2596_v15 = vpop.f32.mrb[14].mxu0  ;;  %v2598_v16 = vpop.f32.mrb[14].mxu1 }
 0x12f   :  { %v926_v17 = vpop.f32.mrb[15].mxu0  ;;  %v1118_v18 = vpop.f32.mrb[15].mxu1 }
 0x134   :  { %v2600_v19 = vpop.f32.mrb[16].mxu0  ;;  %v2602_v20 = vpop.f32.mrb[16].mxu1 }
 0x135   :  { %v931_v21 = vpop.f32.mrb[17].mxu0  ;;  %v1123_v22 = vpop.f32.mrb[17].mxu1 }
 0x136   :  { %v2604_v23 = vpop.f32.mrb[18].mxu0  ;;  %v2606_v24 = vpop.f32.mrb[18].mxu1 }
 0x137   :  { %v934_v25 = vpop.f32.mrb[19].mxu0  ;;  %v1126_v26 = vpop.f32.mrb[19].mxu1 }
 0x13c   :  { %v2608_v27 = vpop.f32.mrb[20].mxu0  ;;  %v2610_v28 = vpop.f32.mrb[20].mxu1 }
 0x13d   :  { %v939_v29 = vpop.f32.mrb[21].mxu0  ;;  %v1131_v30 = vpop.f32.mrb[21].mxu1 }
 0x13e   :  { %v2612_v31 = vpop.f32.mrb[22].mxu0  ;;  %v2614_v32 = vpop.f32.mrb[22].mxu1 }
 0x13f   :  { %v942_v33 = vpop.f32.mrb[23].mxu0  ;;  %v1134_v34 = vpop.f32.mrb[23].mxu1 }
 0x144   :  { %v2616_v35 = vpop.f32.mrb[24].mxu0  ;;  %v2618_v36 = vpop.f32.mrb[24].mxu1 }
 0x145   :  { %v947_v37 = vpop.f32.mrb[25].mxu0  ;;  %v1139_v38 = vpop.f32.mrb[25].mxu1 }
 0x146   :  { %v2620_v39 = vpop.f32.mrb[26].mxu0  ;;  %v2622_v40 = vpop.f32.mrb[26].mxu1 }
 0x147   :  { %v950_v41 = vpop.f32.mrb[27].mxu0  ;;  %v1142_v42 = vpop.f32.mrb[27].mxu1 }
 0x14c   :  { %v2624_v43 = vpop.f32.mrb[28].mxu0  ;;  %v2626_v44 = vpop.f32.mrb[28].mxu1 }
 0x14d   :  { %v955_v45 = vpop.f32.mrb[29].mxu0  ;;  %v1147_v46 = vpop.f32.mrb[29].mxu1 }
 0x14e   :  { %v2628_v47 = vpop.f32.mrb[30].mxu0  ;;  %v2630_v48 = vpop.f32.mrb[30].mxu1 }
 0x14f   :  { %v958_v49 = vpop.f32.mrb[31].mxu0  ;;  %v1150_v50 = vpop.f32.mrb[31].mxu1 }
 0x154   :  { %v2632_v53 = vpop.f32.mrb[32].mxu0  ;;  %v1904_v54 = vpop.f32.mrb[32].mxu1 }
 0x155   :  { %v1195_v57 = vadd.f32 %v1904_v54, %v905_v59  ;;  %v963_v58 = vpop.f32.mrb[33].mxu0  ;;  %v1186_v61 = vpop.f32.mrb[33].mxu1 }
 0x156   :  { %v1187_v62 = vadd.f32 %v1186_v61, %v2572_v51  ;;  %v2635_v1 = vpop.f32.mrb[34].mxu0  ;;  %v1905_v2 = vpop.f32.mrb[34].mxu1 }
 0x157   :  { %1443 = vst [vmem:[%s2973_s2 + $0x10] sm:$0xff] %v1195_v57  ;;  %v1198_v5 = vadd.f32 %v1905_v2, %v908_v63  ;;  %v966_v6 = vpop.f32.mrb[35].mxu0  ;;  %v1189_v9 = vpop.f32.mrb[35].mxu1  ;;  %v1576_v63 = vmul.f32 %v1195_v57, %v1195_v57 }
 0x158   :  { %1441 = vst [vmem:[%s2973_s2] sm:$0xff] %v1187_v62  ;;  %v1190_v59 = vadd.f32 %v1189_v9, %v2576_v55  ;;  %v1574_v51 = vmul.f32 %v1187_v62, %v1187_v62 }
 0x159   :  { %1444 = vst [vmem:[%s2973_s2 + $0x18] sm:$0xff] %v1198_v5  ;;  %v1577_v26 = vmul.f32 %v1198_v5, %v1198_v5 }
 0x15a   :  { %1442 = vst [vmem:[%s2973_s2 + $0x8] sm:$0xff] %v1190_v59  ;;  %v1505_v10 = vadd.f32 %v1190_v59, %v1187_v62  ;;  %v1575_v13 = vmul.f32 %v1190_v59, %v1190_v59 }
 0x15c   :  { %v1506_v14 = vadd.f32 %v1505_v10, %v1195_v57  ;;  %v1638_v17 = vadd.f32 %v1575_v13, %v1574_v51  ;;  %v2650_v18 = vpop.f32.mrb[36].mxu0  ;;  %v1908_v21 = vpop.f32.mrb[36].mxu1 }
 0x15d   :  { %v1211_v22 = vadd.f32 %v1908_v21, %v2592_v11  ;;  %v971_v55 = vpop.f32.mrb[37].mxu0  ;;  %v1202_v25 = vpop.f32.mrb[37].mxu1 }
 0x15e   :  { %v1639_v29 = vadd.f32 %v1638_v17, %v1576_v63  ;;  %v1203_v30 = vadd.f32 %v1202_v25, %v2584_v3  ;;  %v1507_v33 = vadd.f32 %v1506_v14, %v1198_v5  ;;  %v2654_v34 = vpop.f32.mrb[38].mxu0  ;;  %v1909_v37 = vpop.f32.mrb[38].mxu1 }
 0x15f   :  { %1447 = vst [vmem:[%s2973_s2 + $0x30] sm:$0xff] %v1211_v22  ;;  %v1214_v38 = vadd.f32 %v1909_v37, %v2596_v15  ;;  %v974_v41 = vpop.f32.mrb[39].mxu0  ;;  %v1205_v42 = vpop.f32.mrb[39].mxu1  ;;  %v1580_v54 = vmul.f32 %v1211_v22, %v1211_v22 }
 0x160   :  { %1445 = vst [vmem:[%s2973_s2 + $0x20] sm:$0xff] %v1203_v30  ;;  %v1508_v11 = vadd.f32 %v1507_v33, %v1203_v30  ;;  %v1578_v45 = vmul.f32 %v1203_v30, %v1203_v30  ;;  %v1640_v46 = vadd.f32 %v1639_v29, %v1577_v26  ;;  %v1206_v3 = vadd.f32 %v1205_v42, %v2588_v7 }
 0x161   :  { %1448 = vst [vmem:[%s2973_s2 + $0x38] sm:$0xff] %v1214_v38  ;;  %v1581_v6 = vmul.f32 %v1214_v38, %v1214_v38 }
 0x162   :  { %v1641_v49 = vadd.f32 %v1640_v46, %v1578_v45  ;;  %1446 = vst [vmem:[%s2973_s2 + $0x28] sm:$0xff] %v1206_v3  ;;  %v1509_v15 = vadd.f32 %v1508_v11, %v1206_v3  ;;  %v1579_v50 = vmul.f32 %v1206_v3, %v1206_v3 }
 0x164   :  { %v1510_v57 = vadd.f32 %v1509_v15, %v1211_v22  ;;  %v1642_v58 = vadd.f32 %v1641_v49, %v1579_v50  ;;  %v2670_v61 = vpop.f32.mrb[40].mxu0  ;;  %v1912_v62 = vpop.f32.mrb[40].mxu1 }
 0x165   :  { %v1227_v2 = vadd.f32 %v1912_v62, %v2608_v27  ;;  %v979_v7 = vpop.f32.mrb[41].mxu0  ;;  %v1218_v5 = vpop.f32.mrb[41].mxu1 }
 0x166   :  { %v1643_v9 = vadd.f32 %v1642_v58, %v1580_v54  ;;  %v1219_v59 = vadd.f32 %v1218_v5, %v2600_v19  ;;  %v1511_v51 = vadd.f32 %v1510_v57, %v1214_v38  ;;  %v2674_v10 = vpop.f32.mrb[42].mxu0  ;;  %v1913_v13 = vpop.f32.mrb[42].mxu1 }
 0x167   :  { %1451 = vst [vmem:[%s2973_s2 + $0x50] sm:$0xff] %v1227_v2  ;;  %v1230_v63 = vadd.f32 %v1913_v13, %v2612_v31  ;;  %v982_v14 = vpop.f32.mrb[43].mxu0  ;;  %v1221_v17 = vpop.f32.mrb[43].mxu1  ;;  %v1584_v26 = vmul.f32 %v1227_v2, %v1227_v2 }
 0x168   :  { %1449 = vst [vmem:[%s2973_s2 + $0x40] sm:$0xff] %v1219_v59  ;;  %v1512_v27 = vadd.f32 %v1511_v51, %v1219_v59  ;;  %v1582_v21 = vmul.f32 %v1219_v59, %v1219_v59  ;;  %v1644_v22 = vadd.f32 %v1643_v9, %v1581_v6  ;;  %v1222_v19 = vadd.f32 %v1221_v17, %v2604_v23 }
 0x169   :  { %1452 = vst [vmem:[%s2973_s2 + $0x58] sm:$0xff] %v1230_v63  ;;  %v1585_v42 = vmul.f32 %v1230_v63, %v1230_v63 }
 0x16a   :  { %v1645_v55 = vadd.f32 %v1644_v22, %v1582_v21  ;;  %1450 = vst [vmem:[%s2973_s2 + $0x48] sm:$0xff] %v1222_v19  ;;  %v1513_v31 = vadd.f32 %v1512_v27, %v1222_v19  ;;  %v1583_v25 = vmul.f32 %v1222_v19, %v1222_v19 }
 0x16c   :  { %v1514_v29 = vadd.f32 %v1513_v31, %v1227_v2  ;;  %v1646_v30 = vadd.f32 %v1645_v55, %v1583_v25  ;;  %v985_v33 = vpop.f32.mrb[44].mxu0  ;;  %v1916_v37 = vpop.f32.mrb[44].mxu1 }
 0x16d   :  { %v1243_v38 = vadd.f32 %v1916_v37, %v2624_v43  ;;  %v987_v41 = vpop.f32.mrb[45].mxu0  ;;  %v1234_v23 = vpop.f32.mrb[45].mxu1 }
 0x16e   :  { %v1647_v11 = vadd.f32 %v1646_v30, %v1584_v26  ;;  %v1235_v45 = vadd.f32 %v1234_v23, %v2616_v35  ;;  %v1515_v46 = vadd.f32 %v1514_v29, %v1230_v63  ;;  %v988_v3 = vpop.f32.mrb[46].mxu0  ;;  %v1917_v49 = vpop.f32.mrb[46].mxu1 }
 0x16f   :  { %1455 = vst [vmem:[%s2973_s2 + $0x70] sm:$0xff] %v1243_v38  ;;  %v1246_v15 = vadd.f32 %v1917_v49, %v2628_v47  ;;  %v990_v50 = vpop.f32.mrb[47].mxu0  ;;  %v1237_v54 = vpop.f32.mrb[47].mxu1  ;;  %v1588_v7 = vmul.f32 %v1243_v38, %v1243_v38 }
 0x170   :  { %1453 = vst [vmem:[%s2973_s2 + $0x60] sm:$0xff] %v1235_v45  ;;  %v1516_v43 = vadd.f32 %v1515_v46, %v1235_v45  ;;  %v1586_v57 = vmul.f32 %v1235_v45, %v1235_v45  ;;  %v1648_v58 = vadd.f32 %v1647_v11, %v1585_v42  ;;  %v1238_v35 = vadd.f32 %v1237_v54, %v2620_v39 }
 0x171   :  { %1456 = vst [vmem:[%s2973_s2 + $0x78] sm:$0xff] %v1246_v15  ;;  %v1589_v63 = vmul.f32 %v1246_v15, %v1246_v15 }
 0x172   :  { %v1649_v62 = vadd.f32 %v1648_v58, %v1586_v57  ;;  %1454 = vst [vmem:[%s2973_s2 + $0x68] sm:$0xff] %v1238_v35  ;;  %v1517_v47 = vadd.f32 %v1516_v43, %v1238_v35  ;;  %v1587_v2 = vmul.f32 %v1238_v35, %v1238_v35 }
 0x174   :  { %v1518_v5 = vadd.f32 %v1517_v47, %v1243_v38  ;;  %v1650_v6 = vadd.f32 %v1649_v62, %v1587_v2  ;;  %v2706_v9 = vpop.f32.mrb[48].mxu0  ;;  %v1920_v59 = vpop.f32.mrb[48].mxu1 }
 0x175   :  { %v1259_v51 = vadd.f32 %v1920_v59, %v2650_v18  ;;  %v995_v39 = vpop.f32.mrb[49].mxu0  ;;  %v1250_v13 = vpop.f32.mrb[49].mxu1 }
 0x176   :  { %v1651_v14 = vadd.f32 %v1650_v6, %v1588_v7  ;;  %v1251_v17 = vadd.f32 %v1250_v13, %v2632_v53  ;;  %v1519_v27 = vadd.f32 %v1518_v5, %v1246_v15  ;;  %v2710_v21 = vpop.f32.mrb[50].mxu0  ;;  %v1921_v22 = vpop.f32.mrb[50].mxu1 }
 0x177   :  { %1459 = vst [vmem:[%s2973_s2 + $0x90] sm:$0xff] %v1259_v51  ;;  %v1262_v19 = vadd.f32 %v1921_v22, %v2654_v34  ;;  %v998_v55 = vpop.f32.mrb[51].mxu0  ;;  %v1253_v31 = vpop.f32.mrb[51].mxu1  ;;  %v1592_v37 = vmul.f32 %v1259_v51, %v1259_v51 }
 0x178   :  { %1457 = vst [vmem:[%s2973_s2 + $0x80] sm:$0xff] %v1251_v17  ;;  %v1520_v18 = vadd.f32 %v1519_v27, %v1251_v17  ;;  %v1590_v25 = vmul.f32 %v1251_v17, %v1251_v17  ;;  %v1652_v26 = vadd.f32 %v1651_v14, %v1589_v63  ;;  %v1254_v53 = vadd.f32 %v1253_v31, %v2635_v1 }
 0x179   :  { %1460 = vst [vmem:[%s2973_s2 + $0x98] sm:$0xff] %v1262_v19  ;;  %v1593_v1 = vmul.f32 %v1262_v19, %v1262_v19 }
 0x17a   :  { %v1653_v29 = vadd.f32 %v1652_v26, %v1590_v25  ;;  %1458 = vst [vmem:[%s2973_s2 + $0x88] sm:$0xff] %v1254_v53  ;;  %v1521_v34 = vadd.f32 %v1520_v18, %v1254_v53  ;;  %v1591_v30 = vmul.f32 %v1254_v53, %v1254_v53 }
 0x17c   :  { %v1522_v38 = vadd.f32 %v1521_v34, %v1259_v51  ;;  %v1654_v41 = vadd.f32 %v1653_v29, %v1591_v30  ;;  %v1001_v23 = vpop.f32.mrb[52].mxu0  ;;  %v1924_v42 = vpop.f32.mrb[52].mxu1 }
 0x17d   :  { %v1275_v11 = vadd.f32 %v1924_v42, %v985_v33  ;;  %v1003_v45 = vpop.f32.mrb[53].mxu0  ;;  %v1266_v46 = vpop.f32.mrb[53].mxu1 }
 0x17e   :  { %v1655_v49 = vadd.f32 %v1654_v41, %v1592_v37  ;;  %v1267_v15 = vadd.f32 %v1266_v46, %v2670_v61  ;;  %v1523_v50 = vadd.f32 %v1522_v38, %v1262_v19  ;;  %v1004_v54 = vpop.f32.mrb[54].mxu0  ;;  %v1925_v43 = vpop.f32.mrb[54].mxu1 }
 0x17f   :  { %1463 = vst [vmem:[%s2973_s2 + $0xb0] sm:$0xff] %v1275_v11  ;;  %v1278_v57 = vadd.f32 %v1925_v43, %v988_v3  ;;  %v1006_v58 = vpop.f32.mrb[55].mxu0  ;;  %v1269_v35 = vpop.f32.mrb[55].mxu1  ;;  %v1596_v5 = vmul.f32 %v1275_v11, %v1275_v11 }
 0x180   :  { %1461 = vst [vmem:[%s2973_s2 + $0xa0] sm:$0xff] %v1267_v15  ;;  %v1524_v33 = vadd.f32 %v1523_v50, %v1267_v15  ;;  %v1594_v62 = vmul.f32 %v1267_v15, %v1267_v15  ;;  %v1656_v47 = vadd.f32 %v1655_v49, %v1593_v1  ;;  %v1270_v2 = vadd.f32 %v1269_v35, %v2674_v10 }
 0x181   :  { %1464 = vst [vmem:[%s2973_s2 + $0xb8] sm:$0xff] %v1278_v57  ;;  %v1597_v10 = vmul.f32 %v1278_v57, %v1278_v57 }
 0x182   :  { %v1657_v61 = vadd.f32 %v1656_v47, %v1594_v62  ;;  %1462 = vst [vmem:[%s2973_s2 + $0xa8] sm:$0xff] %v1270_v2  ;;  %v1525_v3 = vadd.f32 %v1524_v33, %v1270_v2  ;;  %v1595_v7 = vmul.f32 %v1270_v2, %v1270_v2 }
 0x184   :  { %v1526_v6 = vadd.f32 %v1525_v3, %v1275_v11  ;;  %v1658_v59 = vadd.f32 %v1657_v61, %v1595_v7  ;;  %v1009_v51 = vpop.f32.mrb[56].mxu0  ;;  %v1928_v39 = vpop.f32.mrb[56].mxu1 }
 0x185   :  { %v1291_v13 = vadd.f32 %v1928_v39, %v1001_v23  ;;  %v1011_v63 = vpop.f32.mrb[57].mxu0  ;;  %v1282_v14 = vpop.f32.mrb[57].mxu1 }
 0x186   :  { %v1659_v17 = vadd.f32 %v1658_v59, %v1596_v5  ;;  %v1283_v27 = vadd.f32 %v1282_v14, %v2706_v9  ;;  %v1527_v22 = vadd.f32 %v1526_v6, %v1278_v57  ;;  %v1012_v19 = vpop.f32.mrb[58].mxu0  ;;  %v1929_v55 = vpop.f32.mrb[58].mxu1 }
 0x187   :  { %1467 = vst [vmem:[%s2973_s2 + $0xd0] sm:$0xff] %v1291_v13  ;;  %v1294_v31 = vadd.f32 %v1929_v55, %v1004_v54  ;;  %v1014_v18 = vpop.f32.mrb[59].mxu0  ;;  %v1285_v25 = vpop.f32.mrb[59].mxu1  ;;  %v1600_v38 = vmul.f32 %v1291_v13, %v1291_v13 }
 0x188   :  { %1465 = vst [vmem:[%s2973_s2 + $0xc0] sm:$0xff] %v1283_v27  ;;  %v1528_v26 = vadd.f32 %v1527_v22, %v1283_v27  ;;  %v1598_v53 = vmul.f32 %v1283_v27, %v1283_v27  ;;  %v1660_v29 = vadd.f32 %v1659_v17, %v1597_v10  ;;  %v1286_v34 = vadd.f32 %v1285_v25, %v2710_v21 }
 0x189   :  { %1468 = vst [vmem:[%s2973_s2 + $0xd8] sm:$0xff] %v1294_v31  ;;  %v1601_v21 = vmul.f32 %v1294_v31, %v1294_v31 }
 0x18a   :  { %v1661_v9 = vadd.f32 %v1660_v29, %v1598_v53  ;;  %1466 = vst [vmem:[%s2973_s2 + $0xc8] sm:$0xff] %v1286_v34  ;;  %v1529_v30 = vadd.f32 %v1528_v26, %v1286_v34  ;;  %v1599_v37 = vmul.f32 %v1286_v34, %v1286_v34 }
 0x18c   :  { %v1530_v41 = vadd.f32 %v1529_v30, %v1291_v13  ;;  %v1662_v23 = vadd.f32 %v1661_v9, %v1599_v37  ;;  %v1017_v42 = vpop.f32.mrb[60].mxu0  ;;  %v1932_v11 = vpop.f32.mrb[60].mxu1 }
 0x18d   :  { %v1307_v45 = vadd.f32 %v1932_v11, %v1017_v42  ;;  %v1019_v46 = vpop.f32.mrb[61].mxu0  ;;  %v1298_v1 = vpop.f32.mrb[61].mxu1 }
 0x18e   :  { %v1663_v49 = vadd.f32 %v1662_v23, %v1600_v38  ;;  %v1299_v15 = vadd.f32 %v1298_v1, %v1009_v51  ;;  %v1531_v50 = vadd.f32 %v1530_v41, %v1294_v31  ;;  %v1020_v54 = vpop.f32.mrb[62].mxu0  ;;  %v1933_v43 = vpop.f32.mrb[62].mxu1 }
 0x18f   :  { %1471 = vst [vmem:[%s2973_s2 + $0xf0] sm:$0xff] %v1307_v45  ;;  %v1310_v57 = vadd.f32 %v1933_v43, %v1020_v54  ;;  %v1022_v58 = vpop.f32.mrb[63].mxu0  ;;  %v1301_v35 = vpop.f32.mrb[63].mxu1  ;;  %v1604_v5 = vmul.f32 %v1307_v45, %v1307_v45 }
 0x190   :  { %1469 = vst [vmem:[%s2973_s2 + $0xe0] sm:$0xff] %v1299_v15  ;;  %v1532_v33 = vadd.f32 %v1531_v50, %v1299_v15  ;;  %v1602_v62 = vmul.f32 %v1299_v15, %v1299_v15  ;;  %v1664_v47 = vadd.f32 %v1663_v49, %v1601_v21  ;;  %v1302_v2 = vadd.f32 %v1301_v35, %v1012_v19 }
 0x191   :  { %1472 = vst [vmem:[%s2973_s2 + $0xf8] sm:$0xff] %v1310_v57  ;;  %v1605_v14 = vmul.f32 %v1310_v57, %v1310_v57 }
 0x192   :  { %v1665_v61 = vadd.f32 %v1664_v47, %v1602_v62  ;;  %1470 = vst [vmem:[%s2973_s2 + $0xe8] sm:$0xff] %v1302_v2  ;;  %v1533_v3 = vadd.f32 %v1532_v33, %v1302_v2  ;;  %v1603_v7 = vmul.f32 %v1302_v2, %v1302_v2 }
 0x194   :  { %v1534_v6 = vadd.f32 %v1533_v3, %v1307_v45  ;;  %v1666_v59 = vadd.f32 %v1665_v61, %v1603_v7  ;;  %v1025_v51 = vpop.f32.mrb[64].mxu0  ;;  %v1936_v39 = vpop.f32.mrb[64].mxu1 }
 0x195   :  { %v1027_v13 = vpop.f32.mrb[65].mxu0  ;;  %v1314_v63 = vpop.f32.mrb[65].mxu1 }
 0x196   :  { %v1667_v10 = vadd.f32 %v1666_v59, %v1604_v5  ;;  %v1315_v17 = vadd.f32 %v1314_v63, %v1025_v51  ;;  %v1535_v27 = vadd.f32 %v1534_v6, %v1310_v57  ;;  %v1028_v22 = vpop.f32.mrb[66].mxu0  ;;  %v1937_v19 = vpop.f32.mrb[66].mxu1 }
 0x197   :  { %v1030_v55 = vpop.f32.mrb[67].mxu0  ;;  %v1317_v31 = vpop.f32.mrb[67].mxu1 }
 0x198   :  { %1473 = vst [vmem:[%s2973_s2 + $0x100] sm:$0xff] %v1315_v17  ;;  %v1536_v18 = vadd.f32 %v1535_v27, %v1315_v17  ;;  %v1606_v25 = vmul.f32 %v1315_v17, %v1315_v17  ;;  %v1668_v26 = vadd.f32 %v1667_v10, %v1605_v14  ;;  %v1318_v53 = vadd.f32 %v1317_v31, %v1028_v22 }
 0x19a   :  { %v1669_v29 = vadd.f32 %v1668_v26, %v1606_v25  ;;  %1474 = vst [vmem:[%s2973_s2 + $0x108] sm:$0xff] %v1318_v53  ;;  %v1537_v34 = vadd.f32 %v1536_v18, %v1318_v53  ;;  %v1607_v9 = vmul.f32 %v1318_v53, %v1318_v53 }
 0x19c   :  { %v1670_v30 = vadd.f32 %v1669_v29, %v1607_v9  ;;  %v1033_v37 = vpop.f32.mrb[68].mxu0  ;;  %v1940_v38 = vpop.f32.mrb[68].mxu1 }
 0x19d   :  { %v1323_v41 = vadd.f32 %v1936_v39, %v1033_v37  ;;  %v1035_v23 = vpop.f32.mrb[69].mxu0  ;;  %v1330_v42 = vpop.f32.mrb[69].mxu1 }
 0x19e   :  { %v1036_v11 = vpop.f32.mrb[70].mxu0  ;;  %v1941_v45 = vpop.f32.mrb[70].mxu1 }
 0x19f   :  { %1475 = vst [vmem:[%s2973_s2 + $0x110] sm:$0xff] %v1323_v41  ;;  %v1538_v46 = vadd.f32 %v1537_v34, %v1323_v41  ;;  %v1608_v1 = vmul.f32 %v1323_v41, %v1323_v41  ;;  %v1326_v21 = vadd.f32 %v1937_v19, %v1036_v11  ;;  %v1038_v49 = vpop.f32.mrb[71].mxu0  ;;  %v1333_v15 = vpop.f32.mrb[71].mxu1 }
 0x1a1   :  { %v1671_v50 = vadd.f32 %v1670_v30, %v1608_v1  ;;  %1476 = vst [vmem:[%s2973_s2 + $0x118] sm:$0xff] %v1326_v21  ;;  %v1539_v54 = vadd.f32 %v1538_v46, %v1326_v21  ;;  %v1609_v43 = vmul.f32 %v1326_v21, %v1326_v21 }
 0x1a3   :  { %v1672_v57 = vadd.f32 %v1671_v50, %v1609_v43 }
 0x1a4   :  { %v1041_v58 = vpop.f32.mrb[72].mxu0  ;;  %v2778_v35 = vpop.f32.mrb[72].mxu1 }
 0x1a5   :  { %v1331_v33 = vadd.f32 %v1330_v42, %v1041_v58  ;;  %v1043_v62 = vpop.f32.mrb[73].mxu0  ;;  %v1346_v47 = vpop.f32.mrb[73].mxu1 }
 0x1a6   :  { %v1044_v2 = vpop.f32.mrb[74].mxu0  ;;  %v2780_v61 = vpop.f32.mrb[74].mxu1 }
 0x1a7   :  { %1477 = vst [vmem:[%s2973_s2 + $0x120] sm:$0xff] %v1331_v33  ;;  %v1540_v3 = vadd.f32 %v1539_v54, %v1331_v33  ;;  %v1610_v7 = vmul.f32 %v1331_v33, %v1331_v33  ;;  %v1334_v5 = vadd.f32 %v1333_v15, %v1044_v2  ;;  %v1046_v6 = vpop.f32.mrb[75].mxu0  ;;  %v1349_v59 = vpop.f32.mrb[75].mxu1 }
 0x1a9   :  { %v1673_v51 = vadd.f32 %v1672_v57, %v1610_v7  ;;  %1478 = vst [vmem:[%s2973_s2 + $0x128] sm:$0xff] %v1334_v5  ;;  %v1541_v39 = vadd.f32 %v1540_v3, %v1334_v5  ;;  %v1611_v13 = vmul.f32 %v1334_v5, %v1334_v5 }
 0x1ab   :  { %v1674_v63 = vadd.f32 %v1673_v51, %v1611_v13 }
 0x1ac   :  { %v1049_v14 = vpop.f32.mrb[76].mxu0  ;;  %v2788_v10 = vpop.f32.mrb[76].mxu1 }
 0x1ad   :  { %v1339_v17 = vadd.f32 %v1940_v38, %v1049_v14  ;;  %v1051_v27 = vpop.f32.mrb[77].mxu0  ;;  %v2790_v22 = vpop.f32.mrb[77].mxu1 }
 0x1ae   :  { %v1052_v19 = vpop.f32.mrb[78].mxu0  ;;  %v2792_v55 = vpop.f32.mrb[78].mxu1 }
 0x1af   :  { %1479 = vst [vmem:[%s2973_s2 + $0x130] sm:$0xff] %v1339_v17  ;;  %v1542_v31 = vadd.f32 %v1541_v39, %v1339_v17  ;;  %v1612_v18 = vmul.f32 %v1339_v17, %v1339_v17  ;;  %v1342_v25 = vadd.f32 %v1941_v45, %v1052_v19  ;;  %v1054_v26 = vpop.f32.mrb[79].mxu0  ;;  %v2797_v53 = vpop.f32.mrb[79].mxu1 }
 0x1b1   :  { %v1675_v29 = vadd.f32 %v1674_v63, %v1612_v18  ;;  %1480 = vst [vmem:[%s2973_s2 + $0x138] sm:$0xff] %v1342_v25  ;;  %v1543_v34 = vadd.f32 %v1542_v31, %v1342_v25  ;;  %v1613_v9 = vmul.f32 %v1342_v25, %v1342_v25 }
 0x1b3   :  { %v1676_v30 = vadd.f32 %v1675_v29, %v1613_v9 }
 0x1b4   :  { %v1057_v37 = vpop.f32.mrb[80].mxu0  ;;  %v1952_v38 = vpop.f32.mrb[80].mxu1 }
 0x1b5   :  { %v1347_v41 = vadd.f32 %v1346_v47, %v1057_v37  ;;  %v2803_v23 = vadd.f32 %v1952_v38, %v2580_v60  ;;  %v1059_v42 = vpop.f32.mrb[81].mxu0  ;;  %v1378_v11 = vpop.f32.mrb[81].mxu1 }
 0x1b6   :  { %v2806_v45 = vadd.f32 %v1378_v11, %v2574_v52  ;;  %v1060_v46 = vpop.f32.mrb[82].mxu0  ;;  %v1953_v1 = vpop.f32.mrb[82].mxu1 }
 0x1b7   :  { %1481 = vst [vmem:[%s2973_s2 + $0x140] sm:$0xff] %v1347_v41  ;;  %v1544_v21 = vadd.f32 %v1543_v34, %v1347_v41  ;;  %v1614_v49 = vmul.f32 %v1347_v41, %v1347_v41  ;;  %1491 = vst [vmem:[%s2973_s2 + $0x190] sm:$0xff] %v2803_v23  ;;  %v1350_v60 = vadd.f32 %v1349_v59, %v1060_v46  ;;  %v1062_v15 = vpop.f32.mrb[83].mxu0  ;;  %v1381_v50 = vpop.f32.mrb[83].mxu1 }
 0x1b8   :  { %1489 = vst [vmem:[%s2973_s2 + $0x180] sm:$0xff] %v2806_v45  ;;  %v2820_v52 = vadd.f32 %v1953_v1, %v2582_v0  ;;  %v2823_v54 = vadd.f32 %v1381_v50, %v2578_v56 }
 0x1b9   :  { %v1677_v43 = vadd.f32 %v1676_v30, %v1614_v49  ;;  %1482 = vst [vmem:[%s2973_s2 + $0x148] sm:$0xff] %v1350_v60  ;;  %v1545_v57 = vadd.f32 %v1544_v21, %v1350_v60  ;;  %v1615_v58 = vmul.f32 %v1350_v60, %v1350_v60 }
 0x1ba   :  { %1492 = vst [vmem:[%s2973_s2 + $0x198] sm:$0xff] %v2820_v52  ;;  %1490 = vst [vmem:[%s2973_s2 + $0x188] sm:$0xff] %v2823_v54 }
 0x1bb   :  { %v1678_v0 = vadd.f32 %v1677_v43, %v1615_v58 }
 0x1bc   :  { %v1065_v56 = vpop.f32.mrb[84].mxu0  ;;  %v1956_v33 = vpop.f32.mrb[84].mxu1 }
 0x1bd   :  { %v1355_v62 = vadd.f32 %v2778_v35, %v1065_v56  ;;  %v2838_v47 = vadd.f32 %v1956_v33, %v2594_v12  ;;  %v1067_v2 = vpop.f32.mrb[85].mxu0  ;;  %v1394_v3 = vpop.f32.mrb[85].mxu1 }
 0x1be   :  { %v2841_v7 = vadd.f32 %v1394_v3, %v2586_v4  ;;  %v1068_v5 = vpop.f32.mrb[86].mxu0  ;;  %v1957_v6 = vpop.f32.mrb[86].mxu1 }
 0x1bf   :  { %1483 = vst [vmem:[%s2973_s2 + $0x150] sm:$0xff] %v1355_v62  ;;  %v1546_v59 = vadd.f32 %v1545_v57, %v1355_v62  ;;  %v1616_v51 = vmul.f32 %v1355_v62, %v1355_v62  ;;  %1495 = vst [vmem:[%s2973_s2 + $0x1b0] sm:$0xff] %v2838_v47  ;;  %v1358_v12 = vadd.f32 %v2780_v61, %v1068_v5  ;;  %v1070_v35 = vpop.f32.mrb[87].mxu0  ;;  %v1397_v39 = vpop.f32.mrb[87].mxu1 }
 0x1c0   :  { %1493 = vst [vmem:[%s2973_s2 + $0x1a0] sm:$0xff] %v2841_v7  ;;  %v2856_v4 = vadd.f32 %v1957_v6, %v2598_v16  ;;  %v2859_v13 = vadd.f32 %v1397_v39, %v2590_v8  ;;  %v1623_v62 = vmul.f32 %v2823_v54, %v2823_v54  ;;  %v1624_v5 = vmul.f32 %v2803_v23, %v2803_v23 }
 0x1c1   :  { %v1679_v63 = vadd.f32 %v1678_v0, %v1616_v51  ;;  %1484 = vst [vmem:[%s2973_s2 + $0x158] sm:$0xff] %v1358_v12  ;;  %v1547_v14 = vadd.f32 %v1546_v59, %v1358_v12  ;;  %v1617_v61 = vmul.f32 %v1358_v12, %v1358_v12  ;;  %v1625_v51 = vmul.f32 %v2820_v52, %v2820_v52 }
 0x1c2   :  { %1496 = vst [vmem:[%s2973_s2 + $0x1b8] sm:$0xff] %v2856_v4  ;;  %1494 = vst [vmem:[%s2973_s2 + $0x1a8] sm:$0xff] %v2859_v13 }
 0x1c3   :  { %v1680_v16 = vadd.f32 %v1679_v63, %v1617_v61 }
 0x1c4   :  { %v1073_v8 = vpop.f32.mrb[88].mxu0  ;;  %v1960_v17 = vpop.f32.mrb[88].mxu1 }
 0x1c5   :  { %v1363_v27 = vadd.f32 %v2790_v22, %v1073_v8  ;;  %v2874_v19 = vadd.f32 %v1960_v17, %v2610_v28  ;;  %v1075_v31 = vpop.f32.mrb[89].mxu0  ;;  %v1410_v18 = vpop.f32.mrb[89].mxu1 }
 0x1c6   :  { %v2877_v25 = vadd.f32 %v1410_v18, %v2602_v20  ;;  %v1076_v26 = vpop.f32.mrb[90].mxu0  ;;  %v1961_v29 = vpop.f32.mrb[90].mxu1 }
 0x1c7   :  { %1485 = vst [vmem:[%s2973_s2 + $0x160] sm:$0xff] %v1363_v27  ;;  %v1548_v34 = vadd.f32 %v1547_v14, %v1363_v27  ;;  %v1618_v9 = vmul.f32 %v1363_v27, %v1363_v27  ;;  %1499 = vst [vmem:[%s2973_s2 + $0x1d0] sm:$0xff] %v2874_v19  ;;  %v1366_v28 = vadd.f32 %v2797_v53, %v1076_v26  ;;  %v1078_v22 = vpop.f32.mrb[91].mxu0  ;;  %v1413_v30 = vpop.f32.mrb[91].mxu1 }
 0x1c8   :  { %1497 = vst [vmem:[%s2973_s2 + $0x1c0] sm:$0xff] %v2877_v25  ;;  %v2892_v20 = vadd.f32 %v1961_v29, %v2614_v32  ;;  %v1414_v37 = vadd.f32 %v1413_v30, %v2606_v24 }
 0x1c9   :  { %v1681_v38 = vadd.f32 %v1680_v16, %v1618_v9  ;;  %1486 = vst [vmem:[%s2973_s2 + $0x168] sm:$0xff] %v1366_v28  ;;  %v1549_v41 = vadd.f32 %v1548_v34, %v1366_v28  ;;  %v1619_v42 = vmul.f32 %v1366_v28, %v1366_v28  ;;  %v1632_v34 = vmul.f32 %v2874_v19, %v2874_v19 }
 0x1ca   :  { %1500 = vst [vmem:[%s2973_s2 + $0x1d8] sm:$0xff] %v2892_v20  ;;  %1498 = vst [vmem:[%s2973_s2 + $0x1c8] sm:$0xff] %v1414_v37  ;;  %v1633_v28 = vmul.f32 %v2892_v20, %v2892_v20 }
 0x1cb   :  { %v1682_v32 = vadd.f32 %v1681_v38, %v1619_v42 }
 0x1cc   :  { %v1081_v53 = vpop.f32.mrb[92].mxu0  ;;  %v1964_v11 = vpop.f32.mrb[92].mxu1 }
 0x1cd   :  { %v1371_v24 = vadd.f32 %v2788_v10, %v1081_v53  ;;  %v2907_v46 = vadd.f32 %v1964_v11, %v2626_v44  ;;  %v1083_v1 = vpop.f32.mrb[93].mxu0  ;;  %v1426_v21 = vpop.f32.mrb[93].mxu1 }
 0x1ce   :  { %v1427_v49 = vadd.f32 %v1426_v21, %v2618_v36  ;;  %v1084_v60 = vpop.f32.mrb[94].mxu0  ;;  %v1965_v15 = vpop.f32.mrb[94].mxu1 }
 0x1cf   :  { %1487 = vst [vmem:[%s2973_s2 + $0x170] sm:$0xff] %v1371_v24  ;;  %v1550_v50 = vadd.f32 %v1549_v41, %v1371_v24  ;;  %v1620_v43 = vmul.f32 %v1371_v24, %v1371_v24  ;;  %1503 = vst [vmem:[%s2973_s2 + $0x1f0] sm:$0xff] %v2907_v46  ;;  %v1374_v44 = vadd.f32 %v2792_v55, %v1084_v60  ;;  %v1086_v10 = vpop.f32.mrb[95].mxu0  ;;  %v1429_v57 = vpop.f32.mrb[95].mxu1 }
 0x1d0   :  { %1501 = vst [vmem:[%s2973_s2 + $0x1e0] sm:$0xff] %v1427_v49  ;;  %v1438_v36 = vadd.f32 %v1965_v15, %v2630_v48  ;;  %v1430_v58 = vadd.f32 %v1429_v57, %v2622_v40  ;;  %v1622_v48 = vmul.f32 %v2806_v45, %v2806_v45  ;;  %v1634_v30 = vmul.f32 %v1427_v49, %v1427_v49 }
 0x1d1   :  { %v1683_v0 = vadd.f32 %v1682_v32, %v1620_v43  ;;  %1488 = vst [vmem:[%s2973_s2 + $0x178] sm:$0xff] %v1374_v44  ;;  %v1551_v56 = vadd.f32 %v1550_v50, %v1374_v44  ;;  %v1621_v33 = vmul.f32 %v1374_v44, %v1374_v44 }
 0x1d2   :  { %1504 = vst [vmem:[%s2973_s2 + $0x1f8] sm:$0xff] %v1438_v36  ;;  %1502 = vst [vmem:[%s2973_s2 + $0x1e8] sm:$0xff] %v1430_v58  ;;  %v1635_v42 = vmul.f32 %v1430_v58, %v1430_v58 }
 0x1d3   :  { %v1552_v40 = vadd.f32 %v1551_v56, %v2806_v45  ;;  %v1684_v55 = vadd.f32 %v1683_v0, %v1621_v33  ;;  %v1626_v45 = vmul.f32 %v2841_v7, %v2841_v7 }
 0x1d5   :  { %v1553_v2 = vadd.f32 %v1552_v40, %v2823_v54  ;;  %v1685_v3 = vadd.f32 %v1684_v55, %v1622_v48  ;;  %v1627_v54 = vmul.f32 %v2859_v13, %v2859_v13 }
 0x1d7   :  { %v1554_v6 = vadd.f32 %v1553_v2, %v2803_v23  ;;  %v1686_v59 = vadd.f32 %v1685_v3, %v1623_v62  ;;  %v1628_v23 = vmul.f32 %v2838_v47, %v2838_v47 }
 0x1d9   :  { %v1555_v12 = vadd.f32 %v1554_v6, %v2820_v52  ;;  %v1687_v35 = vadd.f32 %v1686_v59, %v1624_v5  ;;  %v1629_v52 = vmul.f32 %v2856_v4, %v2856_v4 }
 0x1db   :  { %v1556_v39 = vadd.f32 %v1555_v12, %v2841_v7  ;;  %v1688_v63 = vadd.f32 %v1687_v35, %v1625_v51  ;;  %v1630_v7 = vmul.f32 %v2877_v25, %v2877_v25 }
 0x1dd   :  { %v1557_v14 = vadd.f32 %v1556_v39, %v2859_v13  ;;  %v1689_v61 = vadd.f32 %v1688_v63, %v1626_v45  ;;  %v1631_v13 = vmul.f32 %v1414_v37, %v1414_v37 }
 0x1df   :  { %v1690_v16 = vadd.f32 %v1689_v61, %v1627_v54  ;;  %v1558_v8 = vadd.f32 %v1557_v14, %v2838_v47 }
 0x1e1   :  { %v1559_v17 = vadd.f32 %v1558_v8, %v2856_v4  ;;  %v1691_v27 = vadd.f32 %v1690_v16, %v1628_v23 }
 0x1e3   :  { %v1560_v31 = vadd.f32 %v1559_v17, %v2877_v25  ;;  %v1692_v18 = vadd.f32 %v1691_v27, %v1629_v52 }
 0x1e5   :  { %v1561_v26 = vadd.f32 %v1560_v31, %v1414_v37  ;;  %v1693_v29 = vadd.f32 %v1692_v18, %v1630_v7  ;;  %v1636_v37 = vmul.f32 %v2907_v46, %v2907_v46 }
 0x1e7   :  { %v1562_v47 = vadd.f32 %v1561_v26, %v2874_v19  ;;  %v1694_v9 = vadd.f32 %v1693_v29, %v1631_v13  ;;  %v1637_v19 = vmul.f32 %v1438_v36, %v1438_v36 }
 0x1e9   :  { %v1563_v4 = vadd.f32 %v1562_v47, %v2892_v20  ;;  %v1695_v22 = vadd.f32 %v1694_v9, %v1632_v34 }
 0x1eb   :  { %v1564_v38 = vadd.f32 %v1563_v4, %v1427_v49  ;;  %v1696_v41 = vadd.f32 %v1695_v22, %v1633_v28 }
 0x1ed   :  { %v1565_v25 = vadd.f32 %v1564_v38, %v1430_v58  ;;  %v1697_v32 = vadd.f32 %v1696_v41, %v1634_v30 }
 0x1ef   :  { %v1566_v53 = vadd.f32 %v1565_v25, %v2907_v46  ;;  %v1698_v11 = vadd.f32 %v1697_v32, %v1635_v42 }
 0x1f1   :  { %v1567_v24 = vadd.f32 %v1566_v53, %v1438_v36  ;;  %v1699_v1 = vadd.f32 %v1698_v11, %v1636_v37 }
 0x1f3   :  { %v1568_v21 = vrot.slane %v1567_v24, 4  ;;  %v1700_v60 = vadd.f32 %v1699_v1, %v1637_v19 }
 0x1f5   :  { %v1569_v15 = vadd.f32 %v1568_v21, %v1567_v24  ;;  %v1701_v20 = vrot.slane %v1700_v60, 4 }
 0x1f7   :  { %v1570_v50 = vrot.slane %v1569_v15, 2  ;;  %v1702_v43 = vadd.f32 %v1701_v20, %v1700_v60 }
 0x1f9   :  { %v1571_v49 = vadd.f32 %v1570_v50, %v1569_v15  ;;  %v1703_v44 = vrot.slane %v1702_v43, 2 }
 0x1fb   :  { %v1572_v10 = vrot.slane %v1571_v49, 1  ;;  %v1704_v57 = vadd.f32 %v1703_v44, %v1702_v43 }
 0x1fd   :  { %v1705_v58 = vrot.slane %v1704_v57, 1  ;;  %v1573_v0 = vadd.f32 %v1572_v10, %v1571_v49 }
 0x1ff   :  { %v1706_v56 = vadd.f32 %v1705_v58, %v1704_v57 }
 0x201   :  { %v1708_v33 = vsel %vm1707_vm1, %v1573_v0, %v1706_v56 }
 0x202   :  { %1709 = vst [vmem:[%s2974_s3] sm:$0x3] %v1708_v33 }

// kernel: block35.11
= control target key start
LH: loop header
LB: loop body
LE: loop exit
PB: predicated region body
PF: predicated region fallthrough
CT: control target
= control target key end

     0   :  { %v5163_v2 = vmov 0   ;;  %s5152_s0 = inlined_call_operand.vmem [shape: f32[512,128], index: 0, kind: input, shape index: {}]   ;;  %s5153_s1 = inlined_call_operand.vmem [shape: f32[1,128], index: 1, kind: input, shape index: {}]   ;;  %s5154_s2 = inlined_call_operand.vmem [shape: f32[1,128], index: 2, kind: input, shape index: {}]   ;;  %s5155_s3 = inlined_call_operand.vmem [shape: bf16[512,128], index: 3, kind: input, shape index: {}]   ;;  %s5156_s4 = inlined_call_operand.vmem [shape: bf16[512,128], index: 4, kind: input, shape index: {}]   ;;  %s5157_s5 = inlined_call_operand.vmem [shape: bf16[128,256], index: 5, kind: input, shape index: {}]   ;;  %s5158_s6 = inlined_call_operand.vmem [shape: bf16[128,256], index: 6, kind: input, shape index: {}]   ;;  %s5159_s7 = inlined_call_operand.vmem [shape: bf16[128,256], index: 7, kind: input, shape index: {}]   ;;  %s5160_s8 = inlined_call_operand.vmem [shape: f32[1,256], index: 8, kind: input, shape index: {}]   ;;  %s5161_s9 = inlined_call_operand.vmem [shape: f32[512,256], index: 9, kind: input, shape index: {}]   ;;  %s5162_s10 = inlined_call_operand.hbm [shape: f32[512,256], index: 10, kind: output, shape index: {}]  }
   0x1   :  { %v3384_v0 = vld [vmem:[%s5158_s6 + $0x4] ss:$8 sps:$4 sm:$0xff]   ;;  %771 = vmatprep.mubr.bf16.mxu1 %v5163_v2  ;;  %1396 = vmatprep.mubr.bf16.mxu0 %v5163_v2  ;;  %v3388_v3 = vld [vmem:[%s5158_s6] ss:$8 sps:$4 sm:$0xff]   ;;  %v3390_v5 = vld [vmem:[%s5158_s6 + $0x14] ss:$8 sps:$4 sm:$0xff]  }
   0x2   :  { %v3611_v1 = vld [vmem:[%s5157_s5 + $0x4] ss:$8 sps:$4 sm:$0xff]   ;;  %739 = vmatprep.subr.bf16.mxu1 %v3384_v0  ;;  %v3621_v4 = vld [vmem:[%s5157_s5] ss:$8 sps:$4 sm:$0xff]   ;;  %v3631_v6 = vld [vmem:[%s5157_s5 + $0x14] ss:$8 sps:$4 sm:$0xff]  }
   0x3   :  { %1364 = vmatprep.subr.bf16.mxu0 %v3611_v1  ;;  %740 = vmatpush1.bf16.msra.mxu1 %v3388_v3  ;;  %v3394_v7 = vld [vmem:[%s5158_s6 + $0x10] ss:$8 sps:$4 sm:$0xff]   ;;  %v3396_v9 = vld [vmem:[%s5158_s6 + $0x24] ss:$8 sps:$4 sm:$0xff]   ;;  %v3400_v11 = vld [vmem:[%s5158_s6 + $0x20] ss:$8 sps:$4 sm:$0xff]  }
   0x4   :  { %1365 = vmatpush1.bf16.msra.mxu0 %v3621_v4  ;;  %741 = vmatprep.subr.bf16.mxu1 %v3390_v5  ;;  %v3639_v8 = vld [vmem:[%s5157_s5 + $0x10] ss:$8 sps:$4 sm:$0xff]   ;;  %v3648_v10 = vld [vmem:[%s5157_s5 + $0x24] ss:$8 sps:$4 sm:$0xff]   ;;  %v3656_v12 = vld [vmem:[%s5157_s5 + $0x20] ss:$8 sps:$4 sm:$0xff]  }
   0x5   :  { %1366 = vmatprep.subr.bf16.mxu0 %v3631_v6  ;;  %v3402_v13 = vld [vmem:[%s5158_s6 + $0x34] ss:$8 sps:$4 sm:$0xff]   ;;  %v3406_v15 = vld [vmem:[%s5158_s6 + $0x30] ss:$8 sps:$4 sm:$0xff]   ;;  %v3408_v17 = vld [vmem:[%s5158_s6 + $0x44] ss:$8 sps:$4 sm:$0xff]  }
   0x6   :  { %v3666_v14 = vld [vmem:[%s5157_s5 + $0x34] ss:$8 sps:$4 sm:$0xff]   ;;  %v3675_v16 = vld [vmem:[%s5157_s5 + $0x30] ss:$8 sps:$4 sm:$0xff]   ;;  %v3684_v18 = vld [vmem:[%s5157_s5 + $0x44] ss:$8 sps:$4 sm:$0xff]  }
   0x7   :  { %742 = vmatpush1.bf16.msra.mxu1 %v3394_v7  ;;  %v3412_v19 = vld [vmem:[%s5158_s6 + $0x40] ss:$8 sps:$4 sm:$0xff]   ;;  %v3414_v21 = vld [vmem:[%s5158_s6 + $0x54] ss:$8 sps:$4 sm:$0xff]   ;;  %v3418_v23 = vld [vmem:[%s5158_s6 + $0x50] ss:$8 sps:$4 sm:$0xff]  }
   0x8   :  { %1367 = vmatpush1.bf16.msra.mxu0 %v3639_v8  ;;  %743 = vmatprep.subr.bf16.mxu1 %v3396_v9  ;;  %v3692_v20 = vld [vmem:[%s5157_s5 + $0x40] ss:$8 sps:$4 sm:$0xff]   ;;  %v3702_v22 = vld [vmem:[%s5157_s5 + $0x54] ss:$8 sps:$4 sm:$0xff]   ;;  %v3711_v24 = vld [vmem:[%s5157_s5 + $0x50] ss:$8 sps:$4 sm:$0xff]  }
   0x9   :  { %1368 = vmatprep.subr.bf16.mxu0 %v3648_v10  ;;  %v3420_v25 = vld [vmem:[%s5158_s6 + $0x64] ss:$8 sps:$4 sm:$0xff]   ;;  %v3424_v27 = vld [vmem:[%s5158_s6 + $0x60] ss:$8 sps:$4 sm:$0xff]   ;;  %v3426_v29 = vld [vmem:[%s5158_s6 + $0x74] ss:$8 sps:$4 sm:$0xff]  }
   0xa   :  { %v3720_v26 = vld [vmem:[%s5157_s5 + $0x64] ss:$8 sps:$4 sm:$0xff]   ;;  %v3729_v28 = vld [vmem:[%s5157_s5 + $0x60] ss:$8 sps:$4 sm:$0xff]   ;;  %v3738_v30 = vld [vmem:[%s5157_s5 + $0x74] ss:$8 sps:$4 sm:$0xff]  }
   0xb   :  { %744 = vmatpush1.bf16.msra.mxu1 %v3400_v11  ;;  %v3430_v31 = vld [vmem:[%s5158_s6 + $0x70] ss:$8 sps:$4 sm:$0xff]   ;;  %v3436_v33 = vld [vmem:[%s5159_s7 + $0x4] ss:$8 sps:$4 sm:$0xff]   ;;  %v3434_v36 = vld [vmem:[%s5159_s7] ss:$8 sps:$4 sm:$0xff]  }
   0xc   :  { %1369 = vmatpush1.bf16.msra.mxu0 %v3656_v12  ;;  %745 = vmatprep.subr.bf16.mxu1 %v3402_v13  ;;  %v3747_v32 = vld [vmem:[%s5157_s5 + $0x70] ss:$8 sps:$4 sm:$0xff]   ;;  %v3432_v34 = vld [vmem:[%s5156_s4] sm:$0xff]   ;;  %v3443_v37 = vld [vmem:[%s5159_s7 + $0x14] ss:$8 sps:$4 sm:$0xff]  }
   0xd   :  { %1370 = vmatprep.subr.bf16.mxu0 %v3666_v14  ;;  %v3433_v35 = vld [vmem:[%s5155_s3] sm:$0xff]   ;;  %v3441_v38 = vld [vmem:[%s5159_s7 + $0x10] ss:$8 sps:$4 sm:$0xff]   ;;  %v3437_v40 = vld [vmem:[%s5156_s4 + $0x8] sm:$0xff]  }
   0xe   :  { %v3450_v39 = vld [vmem:[%s5159_s7 + $0x24] ss:$8 sps:$4 sm:$0xff]   ;;  %v3448_v42 = vld [vmem:[%s5159_s7 + $0x20] ss:$8 sps:$4 sm:$0xff]   ;;  %v3457_v43 = vld [vmem:[%s5159_s7 + $0x34] ss:$8 sps:$4 sm:$0xff]  }
   0xf   :  { %746 = vmatpush1.bf16.msra.mxu1 %v3406_v15  ;;  %v3438_v41 = vld [vmem:[%s5155_s3 + $0x8] sm:$0xff]   ;;  %v3439_v44 = vld [vmem:[%s5156_s4 + $0x10] sm:$0xff]   ;;  %v3444_v51 = vld [vmem:[%s5156_s4 + $0x18] sm:$0xff]  }
  0x10   :  { %1371 = vmatpush1.bf16.msra.mxu0 %v3675_v16  ;;  %747 = vmatprep.subr.bf16.mxu1 %v3408_v17  ;;  %v3455_v45 = vld [vmem:[%s5159_s7 + $0x30] ss:$8 sps:$4 sm:$0xff]   ;;  %v3464_v46 = vld [vmem:[%s5159_s7 + $0x44] ss:$8 sps:$4 sm:$0xff]   ;;  %v3462_v48 = vld [vmem:[%s5159_s7 + $0x40] ss:$8 sps:$4 sm:$0xff]  }
  0x11   :  { %1372 = vmatprep.subr.bf16.mxu0 %v3684_v18  ;;  %v3440_v47 = vld [vmem:[%s5155_s3 + $0x10] sm:$0xff]   ;;  %v3445_v52 = vld [vmem:[%s5155_s3 + $0x18] sm:$0xff]   ;;  %v3478_v53 = vld [vmem:[%s5159_s7 + $0x64] ss:$8 sps:$4 sm:$0xff]  }
  0x12   :  { %v3471_v49 = vld [vmem:[%s5159_s7 + $0x54] ss:$8 sps:$4 sm:$0xff]   ;;  %v3469_v50 = vld [vmem:[%s5159_s7 + $0x50] ss:$8 sps:$4 sm:$0xff]   ;;  %v3476_v54 = vld [vmem:[%s5159_s7 + $0x60] ss:$8 sps:$4 sm:$0xff]  }
  0x13   :  { %748 = vmatpush1.bf16.msra.mxu1 %v3412_v19  ;;  %v3483_v55 = vld [vmem:[%s5159_s7 + $0x70] ss:$8 sps:$4 sm:$0xff]   ;;  %v3485_v56 = vld [vmem:[%s5159_s7 + $0x74] ss:$8 sps:$4 sm:$0xff]   ;;  %v3446_v57 = vld [vmem:[%s5156_s4 + $0x20] sm:$0xff]  }
  0x14   :  { %1373 = vmatpush1.bf16.msra.mxu0 %v3692_v20  ;;  %749 = vmatprep.subr.bf16.mxu1 %v3414_v21  ;;  %v3447_v58 = vld [vmem:[%s5155_s3 + $0x20] sm:$0xff]   ;;  %v3451_v59 = vld [vmem:[%s5156_s4 + $0x28] sm:$0xff]   ;;  %v3453_v61 = vld [vmem:[%s5156_s4 + $0x30] sm:$0xff]  }
  0x15   :  { %1374 = vmatprep.subr.bf16.mxu0 %v3702_v22  ;;  %v3452_v60 = vld [vmem:[%s5155_s3 + $0x28] sm:$0xff]   ;;  %v3454_v62 = vld [vmem:[%s5155_s3 + $0x30] sm:$0xff]   ;;  %v3458_v63 = vld [vmem:[%s5156_s4 + $0x38] sm:$0xff]  }
  0x16   :  { %v3459_v0 = vld [vmem:[%s5155_s3 + $0x38] sm:$0xff]   ;;  %v3461_v3 = vld [vmem:[%s5155_s3 + $0x40] sm:$0xff]  }
  0x17   :  { %750 = vmatpush1.bf16.msra.mxu1 %v3418_v23 }
  0x18   :  { %1375 = vmatpush1.bf16.msra.mxu0 %v3711_v24  ;;  %751 = vmatprep.subr.bf16.mxu1 %v3420_v25 }
  0x19   :  { %1376 = vmatprep.subr.bf16.mxu0 %v3720_v26 }
  0x1b   :  { %752 = vmatpush1.bf16.msra.mxu1 %v3424_v27 }
  0x1c   :  { %1377 = vmatpush1.bf16.msra.mxu0 %v3729_v28  ;;  %753 = vmatprep.subr.bf16.mxu1 %v3426_v29 }
  0x1d   :  { %1378 = vmatprep.subr.bf16.mxu0 %v3738_v30 }
  0x1f   :  { %754 = vmatpush1.bf16.msra.mxu1 %v3430_v31 }
  0x20   :  { %1379 = vmatpush1.bf16.msra.mxu0 %v3747_v32  ;;  %3108 = vmatprep.subr.bf16.mxu1 %v3611_v1  ;;  %v3460_v1 = vld [vmem:[%s5156_s4 + $0x40] sm:$0xff]  }
  0x21   :  { %1845 = vmatprep.subr.bf16.mxu0 %v3436_v33 }
  0x22   :  { %772 = vmatmul.mubr.bf16.vlgmr.msra.gmra.mrb[0].mxu1 %v3432_v34 }
  0x23   :  { %1397 = vmatmul.mubr.bf16.vlgmr.msra.gmra.mrb[0].mxu0 %v3433_v35  ;;  %3116 = vmatpush1.bf16.msra.mxu1 %v3621_v4 }
  0x24   :  { %1846 = vmatpush1.bf16.msra.mxu0 %v3434_v36  ;;  %781 = vmatprep.mubr.bf16.mxu1 %v5163_v2 }
  0x25   :  { %1406 = vmatprep.mubr.bf16.mxu0 %v5163_v2  ;;  %1847 = vmatprep.subr.bf16.mxu0 %v3443_v37 }
  0x26   :  { %3109 = vmatprep.subr.bf16.mxu1 %v3631_v6 }
  0x27   :  { %3117 = vmatpush1.bf16.msra.mxu1 %v3639_v8 }
  0x28   :  { %1848 = vmatpush1.bf16.msra.mxu0 %v3441_v38  ;;  %3110 = vmatprep.subr.bf16.mxu1 %v3648_v10 }
  0x29   :  { %1849 = vmatprep.subr.bf16.mxu0 %v3450_v39 }
  0x2a   :  { %782 = vmatmul.mubr.bf16.gmra.mrb[4].mxu1 %v3437_v40 }
  0x2b   :  { %1407 = vmatmul.mubr.bf16.gmra.mrb[4].mxu0 %v3438_v41  ;;  %791 = vmatprep.mubr.bf16.mxu1 %v5163_v2 }
  0x2c   :  { %1416 = vmatprep.mubr.bf16.mxu0 %v5163_v2  ;;  %1850 = vmatpush1.bf16.msra.mxu0 %v3448_v42 }
  0x2d   :  { %3118 = vmatpush1.bf16.msra.mxu1 %v3656_v12  ;;  %1851 = vmatprep.subr.bf16.mxu0 %v3457_v43 }
  0x2e   :  { %3111 = vmatprep.subr.bf16.mxu1 %v3666_v14 }
  0x30   :  { %1852 = vmatpush1.bf16.msra.mxu0 %v3455_v45 }
  0x31   :  { %3119 = vmatpush1.bf16.msra.mxu1 %v3675_v16  ;;  %1853 = vmatprep.subr.bf16.mxu0 %v3464_v46 }
  0x32   :  { %3112 = vmatprep.subr.bf16.mxu1 %v3684_v18  ;;  %792 = vmatmul.mubr.bf16.gmra.mrb[8].mxu1 %v3439_v44 }
  0x33   :  { %1417 = vmatmul.mubr.bf16.gmra.mrb[8].mxu0 %v3440_v47  ;;  %801 = vmatprep.mubr.bf16.mxu1 %v5163_v2 }
  0x34   :  { %1426 = vmatprep.mubr.bf16.mxu0 %v5163_v2  ;;  %1854 = vmatpush1.bf16.msra.mxu0 %v3462_v48 }
  0x35   :  { %3120 = vmatpush1.bf16.msra.mxu1 %v3692_v20  ;;  %1855 = vmatprep.subr.bf16.mxu0 %v3471_v49 }
  0x36   :  { %3113 = vmatprep.subr.bf16.mxu1 %v3702_v22 }
  0x38   :  { %1856 = vmatpush1.bf16.msra.mxu0 %v3469_v50 }
  0x39   :  { %3121 = vmatpush1.bf16.msra.mxu1 %v3711_v24  ;;  %1857 = vmatprep.subr.bf16.mxu0 %v3478_v53 }
  0x3a   :  { %3114 = vmatprep.subr.bf16.mxu1 %v3720_v26  ;;  %802 = vmatmul.mubr.bf16.gmra.mrb[12].mxu1 %v3444_v51 }
  0x3b   :  { %1427 = vmatmul.mubr.bf16.gmra.mrb[12].mxu0 %v3445_v52  ;;  %811 = vmatprep.mubr.bf16.mxu1 %v5163_v2 }
  0x3c   :  { %1436 = vmatprep.mubr.bf16.mxu0 %v5163_v2  ;;  %1858 = vmatpush1.bf16.msra.mxu0 %v3476_v54 }
  0x3d   :  { %3122 = vmatpush1.bf16.msra.mxu1 %v3729_v28  ;;  %1859 = vmatprep.subr.bf16.mxu0 %v3485_v56 }
  0x3e   :  { %3115 = vmatprep.subr.bf16.mxu1 %v3738_v30 }
  0x40   :  { %1860 = vmatpush1.bf16.msra.mxu0 %v3483_v55 }
  0x41   :  { %3123 = vmatpush1.bf16.msra.mxu1 %v3747_v32 }
  0x42   :  { %812 = vmatmul.mubr.bf16.gmra.mrb[16].mxu1 %v3446_v57 }
  0x43   :  { %1437 = vmatmul.mubr.bf16.gmra.mrb[16].mxu0 %v3447_v58  ;;  %821 = vmatprep.mubr.bf16.mxu1 %v5163_v2 }
  0x44   :  { %1446 = vmatprep.mubr.bf16.mxu0 %v5163_v2 }
  0x4a   :  { %822 = vmatmul.mubr.bf16.gmra.mrb[20].mxu1 %v3451_v59 }
  0x4b   :  { %1447 = vmatmul.mubr.bf16.gmra.mrb[20].mxu0 %v3452_v60  ;;  %831 = vmatprep.mubr.bf16.mxu1 %v5163_v2 }
  0x4c   :  { %1456 = vmatprep.mubr.bf16.mxu0 %v5163_v2 }
  0x52   :  { %832 = vmatmul.mubr.bf16.gmra.mrb[24].mxu1 %v3453_v61 }
  0x53   :  { %1457 = vmatmul.mubr.bf16.gmra.mrb[24].mxu0 %v3454_v62  ;;  %841 = vmatprep.mubr.bf16.mxu1 %v5163_v2 }
  0x54   :  { %1466 = vmatprep.mubr.bf16.mxu0 %v5163_v2 }
  0x5a   :  { %842 = vmatmul.mubr.bf16.gmra.mrb[28].mxu1 %v3458_v63 }
  0x5b   :  { %1467 = vmatmul.mubr.bf16.gmra.mrb[28].mxu0 %v3459_v0  ;;  %851 = vmatprep.mubr.bf16.mxu1 %v5163_v2 }
  0x5c   :  { %1476 = vmatprep.mubr.bf16.mxu0 %v5163_v2 }
  0x5d   :  { %15 = vsyncpa [#allocation3], 0  ;;  %v3465_v4 = vld [vmem:[%s5156_s4 + $0x48] sm:$0xff]   ;;  %v3467_v6 = vld [vmem:[%s5156_s4 + $0x50] sm:$0xff]   ;;  %s3547_s29 = smov [#allocation2]  }
  0x5e   :  { %v3466_v5 = vld [vmem:[%s5155_s3 + $0x48] sm:$0xff]   ;;  %v3468_v7 = vld [vmem:[%s5155_s3 + $0x50] sm:$0xff]   ;;  %v3472_v8 = vld [vmem:[%s5156_s4 + $0x58] sm:$0xff]   ;;  %s2983_s30 = sshll.u32 %s3547_s29, 4  ;;  %s2984_s30 = int_to_ptr.vmem [resolvable:$true] %s2983_s30 }
  0x5f   :  { %v3473_v9 = vld [vmem:[%s5155_s3 + $0x58] sm:$0xff]   ;;  %v3474_v10 = vld [vmem:[%s5156_s4 + $0x60] sm:$0xff]   ;;  %v3479_v12 = vld [vmem:[%s5156_s4 + $0x68] sm:$0xff]   ;;  %s3522_s11 = scalar_lea.vmem %s2984_s30, 16384  ;;  %p3527_p1 = scmp.lt.s32.totalorder %s2984_s30, %s2984_s30 }
  0x60   :  { %v3475_v11 = vld [vmem:[%s5155_s3 + $0x60] sm:$0xff]   ;;  %v3480_v13 = vld [vmem:[%s5155_s3 + $0x68] sm:$0xff]   ;;  %v3481_v14 = vld [vmem:[%s5156_s4 + $0x70] sm:$0xff]   ;;  %p3523_p0 = scmp.ne.s32.totalorder %s2984_s30, %s3522_s11  ;;  %p3528_p2 = scmp.lt.s32.totalorder %s3522_s11, %s3522_s11 }
  0x61   :  { %v3482_v15 = vld [vmem:[%s5155_s3 + $0x70] sm:$0xff]   ;;  %v37_v16 = vld [vmem:[%s5152_s0] sm:$0xff]  ;;  %v38_v17 = vld [vmem:[%s5152_s0 + $0x8] sm:$0xff] }
  0x62   :  { %852 = vmatmul.mubr.bf16.gmra.mrb[32].mxu1 %v3460_v1  ;;  %v3942_v18 = vld [vmem:[%s5153_s1] ss:$0 sm:$0xff]  ;;  %v3486_v22 = vld [vmem:[%s5156_s4 + $0x78] sm:$0xff]   ;;  %v39_v26 = vld [vmem:[%s5152_s0 + $0x10] sm:$0xff]  ;;  %p3529_p3 = por %p3528_p2, %p3527_p1 }
  0x63   :  { %1477 = vmatmul.mubr.bf16.gmra.mrb[32].mxu0 %v3461_v3  ;;  %861 = vmatprep.mubr.bf16.mxu1 %v5163_v2  ;;  %v108_v19 = vmul.f32 %v3942_v18, %v37_v16  ;;  %v109_v20 = vmul.f32 %v3942_v18, %v38_v17  ;;  %v3951_v21 = vld [vmem:[%s5154_s2] ss:$0 sm:$0xff]  ;;  %v3487_v23 = vld [vmem:[%s5155_s3 + $0x78] sm:$0xff]   ;;  %v110_v30 = vmul.f32 %v3942_v18, %v39_v26  ;;  %v42_v37 = vld [vmem:[%s5152_s0 + $0x28] sm:$0xff] }
  0x64   :  { %1486 = vmatprep.mubr.bf16.mxu0 %v5163_v2  ;;  %v40_v27 = vld [vmem:[%s5152_s0 + $0x18] sm:$0xff]  ;;  %v3488_v32 = vld [vmem:[%s5156_s4 + $0x80] sm:$0xff]   ;;  %v113_v41 = vmul.f32 %v3942_v18, %v42_v37  ;;  %v3489_v42 = vld [vmem:[%s5156_s4 + $0x88] sm:$0xff]   ;;  %p3530_p4 = pnand %p3529_p3, %p3523_p0 }
  0x65   :  { %v179_v24 = vadd.f32 %v3951_v21, %v108_v19  ;;  %v180_v25 = vadd.f32 %v3951_v21, %v109_v20  ;;  %v111_v31 = vmul.f32 %v3942_v18, %v40_v27  ;;  %v181_v34 = vadd.f32 %v3951_v21, %v110_v30  ;;  %v41_v36 = vld [vmem:[%s5152_s0 + $0x20] sm:$0xff]  ;;  %v43_v46 = vld [vmem:[%s5152_s0 + $0x30] sm:$0xff]  ;;  %v44_v47 = vld [vmem:[%s5152_s0 + $0x38] sm:$0xff] }
  0x66   :  { %v112_v40 = vmul.f32 %v3942_v18, %v41_v36  ;;  %v184_v45 = vadd.f32 %v3951_v21, %v113_v41  ;;  %v114_v50 = vmul.f32 %v3942_v18, %v43_v46  ;;  %v115_v51 = vmul.f32 %v3942_v18, %v44_v47  ;;  %v3490_v52 = vld [vmem:[%s5156_s4 + $0x90] sm:$0xff]   ;;  %v45_v56 = vld [vmem:[%s5152_s0 + $0x40] sm:$0xff]  ;;  %v46_v57 = vld [vmem:[%s5152_s0 + $0x48] sm:$0xff] }
  0x67   :  { %v243_v28 = vmax.f32 %v179_v24, 0.0  ;;  %v244_v29 = vmax.f32 %v180_v25, 0.0  ;;  %v182_v35 = vadd.f32 %v3951_v21, %v111_v31  ;;  %v245_v38 = vmax.f32 %v181_v34, 0.0  ;;  %v3491_v62 = vld [vmem:[%s5156_s4 + $0x98] sm:$0xff]   ;;  %v47_v3 = vld [vmem:[%s5152_s0 + $0x50] sm:$0xff]  ;;  %v3493_v20 = vld [vmem:[%s5156_s4 + $0xa8] sm:$0xff]  }
  0x68   :  { %v183_v44 = vadd.f32 %v3951_v21, %v112_v40  ;;  %v248_v49 = vmax.f32 %v184_v45, 0.0  ;;  %v185_v54 = vadd.f32 %v3951_v21, %v114_v50  ;;  %v186_v55 = vadd.f32 %v3951_v21, %v115_v51  ;;  %v51_v25 = vld [vmem:[%s5152_s0 + $0x70] sm:$0xff]  ;;  %v52_v26 = vld [vmem:[%s5152_s0 + $0x78] sm:$0xff]  ;;  %v54_v36 = vld [vmem:[%s5152_s0 + $0x88] sm:$0xff] }
  0x69   :  { %v1717_v33 = vpack.c.bf16 %v244_v29, %v243_v28  ;;  %v246_v39 = vmax.f32 %v182_v35, 0.0  ;;  %v116_v60 = vmul.f32 %v3942_v18, %v45_v56  ;;  %v117_v61 = vmul.f32 %v3942_v18, %v46_v57  ;;  %v3494_v31 = vld [vmem:[%s5156_s4 + $0xb0] sm:$0xff]   ;;  %v53_v35 = vld [vmem:[%s5152_s0 + $0x80] sm:$0xff]  ;;  %v3495_v41 = vld [vmem:[%s5156_s4 + $0xb8] sm:$0xff]  }
  0x6a   :  { %862 = vmatmul.mubr.bf16.gmra.mrb[36].mxu1 %v3465_v4  ;;  %v247_v48 = vmax.f32 %v183_v44, 0.0  ;;  %v249_v58 = vmax.f32 %v185_v54, 0.0  ;;  %v250_v59 = vmax.f32 %v186_v55, 0.0  ;;  %v48_v4 = vld [vmem:[%s5152_s0 + $0x58] sm:$0xff]  ;;  %v122_v29 = vmul.f32 %v3942_v18, %v51_v25  ;;  %v55_v45 = vld [vmem:[%s5152_s0 + $0x90] sm:$0xff]  ;;  %v3496_v51 = vld [vmem:[%s5156_s4 + $0xc0] sm:$0xff]  }
  0x6b   :  { %1487 = vmatmul.mubr.bf16.gmra.mrb[36].mxu0 %v3466_v5  ;;  %871 = vmatprep.mubr.bf16.mxu1 %v5163_v2  ;;  %v1718_v43 = vpack.c.bf16 %v246_v39, %v245_v38  ;;  %v187_v0 = vadd.f32 %v3951_v21, %v116_v60  ;;  %v188_v1 = vadd.f32 %v3951_v21, %v117_v61  ;;  %v56_v46 = vld [vmem:[%s5152_s0 + $0x98] sm:$0xff]  ;;  %v57_v55 = vld [vmem:[%s5152_s0 + $0xa0] sm:$0xff]  ;;  %v58_v56 = vld [vmem:[%s5152_s0 + $0xa8] sm:$0xff] }
  0x6c   :  { %1496 = vmatprep.mubr.bf16.mxu0 %v5163_v2  ;;  %v1719_v53 = vpack.c.bf16 %v248_v49, %v247_v48  ;;  %v1720_v63 = vpack.c.bf16 %v250_v59, %v249_v58  ;;  %v123_v30 = vmul.f32 %v3942_v18, %v52_v26  ;;  %v124_v39 = vmul.f32 %v3942_v18, %v53_v35  ;;  %v3497_v61 = vld [vmem:[%s5156_s4 + $0xc8] sm:$0xff]  }
  0x6d   :  { %v251_v5 = vmax.f32 %v187_v0, 0.0  ;;  %v125_v40 = vmul.f32 %v3942_v18, %v54_v36  ;;  %v126_v49 = vmul.f32 %v3942_v18, %v55_v45  ;;  %v127_v50 = vmul.f32 %v3942_v18, %v56_v46  ;;  %v3500_v36 = vld [vmem:[%s5156_s4 + $0xe0] sm:$0xff]  }
  0x6e   :  { %v194_v34 = vadd.f32 %v3951_v21, %v123_v30  ;;  %v128_v59 = vmul.f32 %v3942_v18, %v57_v55  ;;  %v129_v60 = vmul.f32 %v3942_v18, %v58_v56  ;;  %v67_v55 = vld [vmem:[%s5152_s0 + $0xf0] sm:$0xff]  ;;  %v68_v56 = vld [vmem:[%s5152_s0 + $0xf8] sm:$0xff] }
  0x6f   :  { %v196_v44 = vadd.f32 %v3951_v21, %v125_v40  ;;  %v198_v54 = vadd.f32 %v3951_v21, %v127_v50  ;;  %v3501_v50 = vld [vmem:[%s5156_s4 + $0xe8] sm:$0xff]  }
  0x70   :  { %v258_v38 = vmax.f32 %v194_v34, 0.0  ;;  %v200_v0 = vadd.f32 %v3951_v21, %v129_v60  ;;  %v138_v60 = vmul.f32 %v3942_v18, %v67_v55 }
  0x71   :  { %v260_v48 = vmax.f32 %v196_v44, 0.0  ;;  %v262_v58 = vmax.f32 %v198_v54, 0.0 }
  0x72   :  { %872 = vmatmul.mubr.bf16.gmra.mrb[40].mxu1 %v3467_v6  ;;  %v252_v6 = vmax.f32 %v188_v1, 0.0  ;;  %v59_v1 = vld [vmem:[%s5152_s0 + $0xb0] sm:$0xff] }
  0x73   :  { %1497 = vmatmul.mubr.bf16.gmra.mrb[40].mxu0 %v3468_v7  ;;  %881 = vmatprep.mubr.bf16.mxu1 %v5163_v2  ;;  %v118_v7 = vmul.f32 %v3942_v18, %v47_v3  ;;  %v60_v3 = vld [vmem:[%s5152_s0 + $0xb8] sm:$0xff] }
  0x74   :  { %1506 = vmatprep.mubr.bf16.mxu0 %v5163_v2 }
  0x7a   :  { %882 = vmatmul.mubr.bf16.gmra.mrb[44].mxu1 %v3472_v8  ;;  %v119_v8 = vmul.f32 %v3942_v18, %v48_v4 }
  0x7b   :  { %1507 = vmatmul.mubr.bf16.gmra.mrb[44].mxu0 %v3473_v9  ;;  %891 = vmatprep.mubr.bf16.mxu1 %v5163_v2  ;;  %v3492_v9 = vld [vmem:[%s5156_s4 + $0xa0] sm:$0xff]  }
  0x7c   :  { %1516 = vmatprep.mubr.bf16.mxu0 %v5163_v2 }
  0x82   :  { %892 = vmatmul.mubr.bf16.gmra.mrb[48].mxu1 %v3474_v10  ;;  %v1721_v10 = vpack.c.bf16 %v252_v6, %v251_v5  ;;  %v264_v5 = vmax.f32 %v200_v0, 0.0  ;;  %v130_v6 = vmul.f32 %v3942_v18, %v59_v1  ;;  %v3502_v0 = vld [vmem:[%s5156_s4 + $0xf0] sm:$0xff]  }
  0x83   :  { %1517 = vmatmul.mubr.bf16.gmra.mrb[48].mxu0 %v3475_v11  ;;  %901 = vmatprep.mubr.bf16.mxu1 %v5163_v2  ;;  %v189_v11 = vadd.f32 %v3951_v21, %v118_v7  ;;  %v131_v7 = vmul.f32 %v3942_v18, %v60_v3  ;;  %v209_v3 = vadd.f32 %v3951_v21, %v138_v60 }
  0x84   :  { %1526 = vmatprep.mubr.bf16.mxu0 %v5163_v2 }
  0x8a   :  { %902 = vmatmul.mubr.bf16.gmra.mrb[52].mxu1 %v3479_v12  ;;  %v190_v12 = vadd.f32 %v3951_v21, %v119_v8  ;;  %v3498_v8 = vld [vmem:[%s5156_s4 + $0xd0] sm:$0xff]  }
  0x8b   :  { %1527 = vmatmul.mubr.bf16.gmra.mrb[52].mxu0 %v3480_v13  ;;  %911 = vmatprep.mubr.bf16.mxu1 %v5163_v2  ;;  %v49_v13 = vld [vmem:[%s5152_s0 + $0x60] sm:$0xff] }
  0x8c   :  { %1536 = vmatprep.mubr.bf16.mxu0 %v5163_v2  ;;  %v254_v16 = vmax.f32 %v190_v12, 0.0  ;;  %v120_v17 = vmul.f32 %v3942_v18, %v49_v13  ;;  %v61_v12 = vld [vmem:[%s5152_s0 + $0xc0] sm:$0xff]  ;;  %v62_v13 = vld [vmem:[%s5152_s0 + $0xc8] sm:$0xff] }
  0x92   :  { %912 = vmatmul.mubr.bf16.gmra.mrb[56].mxu1 %v3481_v14  ;;  %v50_v14 = vld [vmem:[%s5152_s0 + $0x68] sm:$0xff] }
  0x93   :  { %1537 = vmatmul.mubr.bf16.gmra.mrb[56].mxu0 %v3482_v15  ;;  %921 = vmatprep.mubr.bf16.mxu1 %v5163_v2  ;;  %v253_v15 = vmax.f32 %v189_v11, 0.0  ;;  %v121_v19 = vmul.f32 %v3942_v18, %v50_v14  ;;  %v202_v11 = vadd.f32 %v3951_v21, %v131_v7  ;;  %v70_v7 = vld [vmem:[%s5152_s0 + $0x108] sm:$0xff] }
  0x94   :  { %1546 = vmatprep.mubr.bf16.mxu0 %v5163_v2 }
  0x95   :  { %v192_v24 = vadd.f32 %v3951_v21, %v121_v19 }
  0x97   :  { %v256_v28 = vmax.f32 %v192_v24, 0.0 }
  0x9a   :  { %922 = vmatmul.mubr.bf16.gmra.mrb[60].mxu1 %v3486_v22  ;;  %v1722_v22 = vpack.c.bf16 %v254_v16, %v253_v15  ;;  %v266_v15 = vmax.f32 %v202_v11, 0.0  ;;  %v132_v16 = vmul.f32 %v3942_v18, %v61_v12  ;;  %v141_v12 = vmul.f32 %v3942_v18, %v70_v7 }
  0x9b   :  { %1547 = vmatmul.mubr.bf16.gmra.mrb[60].mxu0 %v3487_v23  ;;  %931 = vmatprep.mubr.bf16.mxu1 %v5163_v2  ;;  %v191_v23 = vadd.f32 %v3951_v21, %v120_v17  ;;  %v133_v17 = vmul.f32 %v3942_v18, %v62_v13 }
  0x9c   :  { %1877 = vmatprep.mubr.bf16.mxu0 %v5163_v2  ;;  %v203_v24 = vadd.f32 %v3951_v21, %v132_v16 }
  0x9d   :  { %v255_v27 = vmax.f32 %v191_v23, 0.0  ;;  %v204_v25 = vadd.f32 %v3951_v21, %v133_v17 }
  0x9e   :  { %v267_v30 = vmax.f32 %v203_v24, 0.0  ;;  %v71_v24 = vld [vmem:[%s5152_s0 + $0x110] sm:$0xff] }
  0xa2   :  { %932 = vmatmul.mubr.bf16.gmra.mrb[64].mxu1 %v3488_v32  ;;  %v1723_v32 = vpack.c.bf16 %v256_v28, %v255_v27  ;;  %v63_v27 = vld [vmem:[%s5152_s0 + $0xd0] sm:$0xff]  ;;  %v64_v28 = vld [vmem:[%s5152_s0 + $0xd8] sm:$0xff] }
  0xa3   :  { %1878 = vmatmul.mubr.bf16.vlgmr.msra.gmra.mrb[0].mxu0 %v1717_v33  ;;  %941 = vmatprep.mubr.bf16.mxu1 %v5163_v2  ;;  %v193_v33 = vadd.f32 %v3951_v21, %v122_v29 }
  0xa4   :  { %1887 = vmatprep.mubr.bf16.mxu0 %v5163_v2 }
  0xa5   :  { %v257_v37 = vmax.f32 %v193_v33, 0.0  ;;  %v135_v33 = vmul.f32 %v3942_v18, %v64_v28 }
  0xaa   :  { %942 = vmatmul.mubr.bf16.gmra.mrb[68].mxu1 %v3489_v42  ;;  %v1724_v42 = vpack.c.bf16 %v258_v38, %v257_v37 }
  0xab   :  { %1888 = vmatmul.mubr.bf16.gmra.mrb[4].mxu0 %v1718_v43  ;;  %951 = vmatprep.mubr.bf16.mxu1 %v5163_v2  ;;  %v195_v43 = vadd.f32 %v3951_v21, %v124_v39  ;;  %v206_v39 = vadd.f32 %v3951_v21, %v135_v33 }
  0xac   :  { %1897 = vmatprep.mubr.bf16.mxu0 %v5163_v2 }
  0xad   :  { %v259_v47 = vmax.f32 %v195_v43, 0.0  ;;  %v270_v45 = vmax.f32 %v206_v39, 0.0 }
  0xb2   :  { %952 = vmatmul.mubr.bf16.gmra.mrb[72].mxu1 %v3490_v52  ;;  %v1725_v52 = vpack.c.bf16 %v260_v48, %v259_v47 }
  0xb3   :  { %1898 = vmatmul.mubr.bf16.gmra.mrb[8].mxu0 %v1719_v53  ;;  %961 = vmatprep.mubr.bf16.mxu1 %v5163_v2  ;;  %v197_v53 = vadd.f32 %v3951_v21, %v126_v49 }
  0xb4   :  { %1907 = vmatprep.mubr.bf16.mxu0 %v5163_v2 }
  0xb5   :  { %v261_v57 = vmax.f32 %v197_v53, 0.0 }
  0xba   :  { %962 = vmatmul.mubr.bf16.gmra.mrb[76].mxu1 %v3491_v62  ;;  %v1726_v62 = vpack.c.bf16 %v262_v58, %v261_v57 }
  0xbb   :  { %1908 = vmatmul.mubr.bf16.gmra.mrb[12].mxu0 %v1720_v63  ;;  %971 = vmatprep.mubr.bf16.mxu1 %v5163_v2  ;;  %v199_v63 = vadd.f32 %v3951_v21, %v128_v59 }
  0xbc   :  { %1917 = vmatprep.mubr.bf16.mxu0 %v5163_v2 }
  0xbd   :  { %v263_v4 = vmax.f32 %v199_v63, 0.0 }
  0xc2   :  { %972 = vmatmul.mubr.bf16.gmra.mrb[80].mxu1 %v3492_v9  ;;  %v1727_v9 = vpack.c.bf16 %v264_v5, %v263_v4 }
  0xc3   :  { %1918 = vmatmul.mubr.bf16.gmra.mrb[16].mxu0 %v1721_v10  ;;  %981 = vmatprep.mubr.bf16.mxu1 %v5163_v2  ;;  %v201_v10 = vadd.f32 %v3951_v21, %v130_v6  ;;  %v69_v6 = vld [vmem:[%s5152_s0 + $0x100] sm:$0xff] }
  0xc4   :  { %1927 = vmatprep.mubr.bf16.mxu0 %v5163_v2  ;;  %v140_v11 = vmul.f32 %v3942_v18, %v69_v6 }
  0xc5   :  { %v265_v14 = vmax.f32 %v201_v10, 0.0 }
  0xc6   :  { %v211_v17 = vadd.f32 %v3951_v21, %v140_v11 }
  0xc7   :  { %v1728_v23 = vpack.c.bf16 %v266_v15, %v265_v14  ;;  %v3503_v15 = vld [vmem:[%s5156_s4 + $0xf8] sm:$0xff]  }
  0xc8   :  { %v275_v28 = vmax.f32 %v211_v17, 0.0 }
  0xca   :  { %982 = vmatmul.mubr.bf16.gmra.mrb[84].mxu1 %v3493_v20 }
  0xcb   :  { %1928 = vmatmul.mubr.bf16.gmra.mrb[20].mxu0 %v1722_v22  ;;  %991 = vmatprep.mubr.bf16.mxu1 %v5163_v2  ;;  %v3499_v22 = vld [vmem:[%s5156_s4 + $0xd8] sm:$0xff]  }
  0xcc   :  { %1937 = vmatprep.mubr.bf16.mxu0 %v5163_v2 }
  0xd2   :  { %992 = vmatmul.mubr.bf16.gmra.mrb[88].mxu1 %v3494_v31  ;;  %v268_v31 = vmax.f32 %v204_v25, 0.0  ;;  %v72_v25 = vld [vmem:[%s5152_s0 + $0x118] sm:$0xff] }
  0xd3   :  { %1938 = vmatmul.mubr.bf16.gmra.mrb[24].mxu0 %v1723_v32  ;;  %1001 = vmatprep.mubr.bf16.mxu1 %v5163_v2  ;;  %v134_v32 = vmul.f32 %v3942_v18, %v63_v27 }
  0xd4   :  { %1947 = vmatprep.mubr.bf16.mxu0 %v5163_v2  ;;  %v1729_v37 = vpack.c.bf16 %v268_v31, %v267_v30  ;;  %v142_v31 = vmul.f32 %v3942_v18, %v71_v24  ;;  %v77_v24 = vld [vmem:[%s5152_s0 + $0x140] sm:$0xff] }
  0xd5   :  { %v205_v38 = vadd.f32 %v3951_v21, %v134_v32  ;;  %v143_v32 = vmul.f32 %v3942_v18, %v72_v25  ;;  %v78_v25 = vld [vmem:[%s5152_s0 + $0x148] sm:$0xff] }
  0xd6   :  { %v213_v39 = vadd.f32 %v3951_v21, %v142_v31 }
  0xd7   :  { %v269_v44 = vmax.f32 %v205_v38, 0.0 }
  0xda   :  { %1002 = vmatmul.mubr.bf16.gmra.mrb[92].mxu1 %v3495_v41  ;;  %v65_v41 = vld [vmem:[%s5152_s0 + $0xe0] sm:$0xff] }
  0xdb   :  { %1948 = vmatmul.mubr.bf16.gmra.mrb[28].mxu0 %v1724_v42  ;;  %1011 = vmatprep.mubr.bf16.mxu1 %v5163_v2  ;;  %v66_v42 = vld [vmem:[%s5152_s0 + $0xe8] sm:$0xff]  ;;  %v136_v46 = vmul.f32 %v3942_v18, %v65_v41  ;;  %v214_v41 = vadd.f32 %v3951_v21, %v143_v32  ;;  %v148_v32 = vmul.f32 %v3942_v18, %v77_v24 }
  0xdc   :  { %1957 = vmatprep.mubr.bf16.mxu0 %v5163_v2  ;;  %v137_v47 = vmul.f32 %v3942_v18, %v66_v42 }
  0xde   :  { %v208_v53 = vadd.f32 %v3951_v21, %v137_v47  ;;  %v277_v47 = vmax.f32 %v213_v39, 0.0 }
  0xe0   :  { %v272_v59 = vmax.f32 %v208_v53, 0.0 }
  0xe2   :  { %1012 = vmatmul.mubr.bf16.gmra.mrb[96].mxu1 %v3496_v51  ;;  %v1730_v51 = vpack.c.bf16 %v270_v45, %v269_v44  ;;  %v73_v44 = vld [vmem:[%s5152_s0 + $0x120] sm:$0xff]  ;;  %v74_v45 = vld [vmem:[%s5152_s0 + $0x128] sm:$0xff] }
  0xe3   :  { %1958 = vmatmul.mubr.bf16.gmra.mrb[32].mxu0 %v1725_v52  ;;  %1021 = vmatprep.mubr.bf16.mxu1 %v5163_v2  ;;  %v207_v52 = vadd.f32 %v3951_v21, %v136_v46 }
  0xe4   :  { %1967 = vmatprep.mubr.bf16.mxu0 %v5163_v2 }
  0xe5   :  { %v271_v58 = vmax.f32 %v207_v52, 0.0  ;;  %v145_v52 = vmul.f32 %v3942_v18, %v74_v45  ;;  %v219_v45 = vadd.f32 %v3951_v21, %v148_v32 }
  0xe7   :  { %v1731_v1 = vpack.c.bf16 %v272_v59, %v271_v58  ;;  %v216_v60 = vadd.f32 %v3951_v21, %v145_v52  ;;  %v80_v52 = vld [vmem:[%s5152_s0 + $0x158] sm:$0xff] }
  0xe9   :  { %v280_v6 = vmax.f32 %v216_v60, 0.0 }
  0xea   :  { %1022 = vmatmul.mubr.bf16.gmra.mrb[100].mxu1 %v3497_v61  ;;  %v139_v61 = vmul.f32 %v3942_v18, %v68_v56  ;;  %v3505_v56 = vld [vmem:[%s5155_s3 + $0x88] sm:$0xff]  }
  0xeb   :  { %1968 = vmatmul.mubr.bf16.gmra.mrb[36].mxu0 %v1726_v62  ;;  %1031 = vmatprep.mubr.bf16.mxu1 %v5163_v2 }
  0xec   :  { %1977 = vmatprep.mubr.bf16.mxu0 %v5163_v2  ;;  %v210_v4 = vadd.f32 %v3951_v21, %v139_v61 }
  0xee   :  { %v274_v10 = vmax.f32 %v210_v4, 0.0 }
  0xf2   :  { %1032 = vmatmul.mubr.bf16.gmra.mrb[104].mxu1 %v3498_v8 }
  0xf3   :  { %1978 = vmatmul.mubr.bf16.gmra.mrb[40].mxu0 %v1727_v9  ;;  %1041 = vmatprep.mubr.bf16.mxu1 %v5163_v2  ;;  %v273_v9 = vmax.f32 %v209_v3, 0.0 }
  0xf4   :  { %1987 = vmatprep.mubr.bf16.mxu0 %v5163_v2 }
  0xf5   :  { %v4136_v19 = vpop.f32.mrb[0].mxu1  ;;  %v1732_v16 = vpack.c.bf16 %v274_v10, %v273_v9 }
  0xf6   :  { %v4138_v20 = vpop.f32.mrb[1].mxu1 }
  0xf7   :  { %v4145_v26 = vpop.f32.mrb[2].mxu1 }
  0xf8   :  { %v4153_v29 = vpop.f32.mrb[3].mxu1 }
  0xfa   :  { %1042 = vmatmul.mubr.bf16.gmra.mrb[108].mxu1 %v3499_v22  ;;  %v212_v22 = vadd.f32 %v3951_v21, %v141_v12  ;;  %v3506_v12 = vld [vmem:[%s5155_s3 + $0x90] sm:$0xff]  }
  0xfb   :  { %1988 = vmatmul.mubr.bf16.gmra.mrb[44].mxu0 %v1728_v23  ;;  %1051 = vmatprep.mubr.bf16.mxu1 %v5163_v2 }
  0xfc   :  { %1997 = vmatprep.mubr.bf16.mxu0 %v5163_v2  ;;  %v276_v30 = vmax.f32 %v212_v22, 0.0 }
  0xfd   :  { %v4159_v34 = vpop.f32.mrb[4].mxu1 }
  0xfe   :  { %v4161_v35 = vpop.f32.mrb[5].mxu1  ;;  %v1733_v38 = vpack.c.bf16 %v276_v30, %v275_v28 }
  0xff   :  { %v4168_v40 = vpop.f32.mrb[6].mxu1 }
 0x100   :  { %v4176_v43 = vpop.f32.mrb[7].mxu1 }
 0x102   :  { %1052 = vmatmul.mubr.bf16.gmra.mrb[112].mxu1 %v3500_v36 }
 0x103   :  { %1998 = vmatmul.mubr.bf16.gmra.mrb[48].mxu0 %v1729_v37  ;;  %1061 = vmatprep.mubr.bf16.mxu1 %v5163_v2  ;;  %v3504_v37 = vld [vmem:[%s5155_s3 + $0x80] sm:$0xff]  }
 0x104   :  { %2007 = vmatprep.mubr.bf16.mxu0 %v5163_v2 }
 0x105   :  { %v4182_v48 = vpop.f32.mrb[8].mxu1 }
 0x106   :  { %v4184_v49 = vpop.f32.mrb[9].mxu1 }
 0x107   :  { %v4191_v54 = vpop.f32.mrb[10].mxu1 }
 0x108   :  { %v4199_v57 = vpop.f32.mrb[11].mxu1 }
 0x10a   :  { %1062 = vmatmul.mubr.bf16.gmra.mrb[116].mxu1 %v3501_v50  ;;  %v278_v50 = vmax.f32 %v214_v41, 0.0  ;;  %v3507_v41 = vld [vmem:[%s5155_s3 + $0x98] sm:$0xff]  }
 0x10b   :  { %2008 = vmatmul.mubr.bf16.gmra.mrb[52].mxu0 %v1730_v51  ;;  %1071 = vmatprep.mubr.bf16.mxu1 %v5163_v2  ;;  %v144_v51 = vmul.f32 %v3942_v18, %v73_v44 }
 0x10c   :  { %2017 = vmatprep.mubr.bf16.mxu0 %v5163_v2  ;;  %v1734_v58 = vpack.c.bf16 %v278_v50, %v277_v47 }
 0x10d   :  { %v4205_v62 = vpop.f32.mrb[12].mxu1  ;;  %v215_v59 = vadd.f32 %v3951_v21, %v144_v51  ;;  %v79_v51 = vld [vmem:[%s5152_s0 + $0x150] sm:$0xff] }
 0x10e   :  { %v4207_v63 = vpop.f32.mrb[13].mxu1  ;;  %v150_v60 = vmul.f32 %v3942_v18, %v79_v51 }
 0x10f   :  { %v4214_v5 = vpop.f32.mrb[14].mxu1  ;;  %v279_v4 = vmax.f32 %v215_v59, 0.0 }
 0x110   :  { %v4222_v8 = vpop.f32.mrb[15].mxu1 }
 0x112   :  { %1072 = vmatmul.mubr.bf16.gmra.mrb[120].mxu1 %v3502_v0  ;;  %v75_v0 = vld [vmem:[%s5152_s0 + $0x130] sm:$0xff] }
 0x113   :  { %2018 = vmatmul.mubr.bf16.gmra.mrb[56].mxu0 %v1731_v1  ;;  %1081 = vmatprep.mubr.bf16.mxu1 %v5163_v2  ;;  %v76_v1 = vld [vmem:[%s5152_s0 + $0x138] sm:$0xff]  ;;  %v146_v7 = vmul.f32 %v3942_v18, %v75_v0  ;;  %v151_v0 = vmul.f32 %v3942_v18, %v80_v52 }
 0x114   :  { %2027 = vmatprep.mubr.bf16.mxu0 %v5163_v2  ;;  %v147_v9 = vmul.f32 %v3942_v18, %v76_v1 }
 0x115   :  { %v4228_v13 = vpop.f32.mrb[16].mxu1 }
 0x116   :  { %v4230_v14 = vpop.f32.mrb[17].mxu1  ;;  %v218_v17 = vadd.f32 %v3951_v21, %v147_v9  ;;  %v221_v9 = vadd.f32 %v3951_v21, %v150_v60 }
 0x117   :  { %v4237_v23 = vpop.f32.mrb[18].mxu1 }
 0x118   :  { %v4245_v27 = vpop.f32.mrb[19].mxu1  ;;  %v282_v31 = vmax.f32 %v218_v17, 0.0  ;;  %v82_v17 = vld [vmem:[%s5152_s0 + $0x168] sm:$0xff] }
 0x119   :  { %v153_v32 = vmul.f32 %v3942_v18, %v82_v17  ;;  %v3510_v17 = vld [vmem:[%s5155_s3 + $0xb0] sm:$0xff]  }
 0x11a   :  { %1082 = vmatmul.mubr.bf16.gmra.mrb[124].mxu1 %v3503_v15  ;;  %v1735_v15 = vpack.c.bf16 %v280_v6, %v279_v4  ;;  %v3508_v6 = vld [vmem:[%s5155_s3 + $0xa0] sm:$0xff]  }
 0x11b   :  { %2028 = vmatmul.mubr.bf16.gmra.mrb[60].mxu0 %v1732_v16  ;;  %1556 = vmatprep.mubr.bf16.mxu1 %v5163_v2  ;;  %v217_v16 = vadd.f32 %v3951_v21, %v146_v7  ;;  %v224_v51 = vadd.f32 %v3951_v21, %v153_v32 }
 0x11c   :  { %2037 = vmatprep.mubr.bf16.mxu0 %v5163_v2 }
 0x11d   :  { %v4251_v33 = vpop.f32.mrb[20].mxu1  ;;  %v281_v30 = vmax.f32 %v217_v16, 0.0  ;;  %v81_v16 = vld [vmem:[%s5152_s0 + $0x160] sm:$0xff] }
 0x11e   :  { %v4253_v36 = vpop.f32.mrb[21].mxu1 }
 0x11f   :  { %v4260_v42 = vpop.f32.mrb[22].mxu1  ;;  %v1736_v44 = vpack.c.bf16 %v282_v31, %v281_v30  ;;  %v152_v31 = vmul.f32 %v3942_v18, %v81_v16 }
 0x120   :  { %v4268_v46 = vpop.f32.mrb[23].mxu1 }
 0x122   :  { %1557 = vmatmul.mubr.bf16.vlgmr.msra.gmra.mrb[64].mxu1 %v3504_v37  ;;  %v149_v37 = vmul.f32 %v3942_v18, %v78_v25  ;;  %v285_v25 = vmax.f32 %v221_v9, 0.0 }
 0x123   :  { %2038 = vmatmul.mubr.bf16.gmra.mrb[64].mxu0 %v1733_v38  ;;  %1566 = vmatprep.mubr.bf16.mxu1 %v5163_v2 }
 0x124   :  { %2047 = vmatprep.mubr.bf16.mxu0 %v5163_v2  ;;  %v220_v47 = vadd.f32 %v3951_v21, %v149_v37 }
 0x125   :  { %v4274_v53 = vpop.f32.mrb[24].mxu1 }
 0x126   :  { %v4276_v55 = vpop.f32.mrb[25].mxu1  ;;  %v284_v59 = vmax.f32 %v220_v47, 0.0  ;;  %v223_v47 = vadd.f32 %v3951_v21, %v152_v31 }
 0x127   :  { %v4283_v61 = vpop.f32.mrb[26].mxu1 }
 0x128   :  { %v4291_v3 = vpop.f32.mrb[27].mxu1 }
 0x12a   :  { %1567 = vmatmul.mubr.bf16.gmra.mrb[68].mxu1 %v3505_v56 }
 0x12b   :  { %2048 = vmatmul.mubr.bf16.gmra.mrb[68].mxu0 %v1734_v58  ;;  %1576 = vmatprep.mubr.bf16.mxu1 %v5163_v2  ;;  %v283_v58 = vmax.f32 %v219_v45, 0.0 }
 0x12c   :  { %2057 = vmatprep.mubr.bf16.mxu0 %v5163_v2 }
 0x12d   :  { %v4297_v10 = vpop.f32.mrb[28].mxu1  ;;  %v1737_v7 = vpack.c.bf16 %v284_v59, %v283_v58  ;;  %v83_v58 = vld [vmem:[%s5152_s0 + $0x170] sm:$0xff]  ;;  %v84_v59 = vld [vmem:[%s5152_s0 + $0x178] sm:$0xff] }
 0x12e   :  { %v4299_v11 = vpop.f32.mrb[29].mxu1  ;;  %v155_v9 = vmul.f32 %v3942_v18, %v84_v59 }
 0x12f   :  { %v4306_v22 = vpop.f32.mrb[30].mxu1 }
 0x130   :  { %v4314_v28 = vpop.f32.mrb[31].mxu1  ;;  %v226_v31 = vadd.f32 %v3951_v21, %v155_v9  ;;  %v3511_v9 = vld [vmem:[%s5155_s3 + $0xb8] sm:$0xff]  }
 0x132   :  { %1577 = vmatmul.mubr.bf16.gmra.mrb[72].mxu1 %v3506_v12  ;;  %v222_v12 = vadd.f32 %v3951_v21, %v151_v0  ;;  %v287_v0 = vmax.f32 %v223_v47, 0.0 }
 0x133   :  { %2058 = vmatmul.mubr.bf16.gmra.mrb[72].mxu0 %v1735_v15  ;;  %1586 = vmatprep.mubr.bf16.mxu1 %v5163_v2 }
 0x134   :  { %2067 = vmatprep.mubr.bf16.mxu0 %v5163_v2  ;;  %v286_v30 = vmax.f32 %v222_v12, 0.0 }
 0x135   :  { %v4320_v38 = vpop.f32.mrb[32].mxu1 }
 0x136   :  { %v4322_v39 = vpop.f32.mrb[33].mxu1  ;;  %v1738_v45 = vpack.c.bf16 %v286_v30, %v285_v25 }
 0x137   :  { %v4329_v50 = vpop.f32.mrb[34].mxu1 }
 0x138   :  { %v4337_v56 = vpop.f32.mrb[35].mxu1 }
 0x13a   :  { %1587 = vmatmul.mubr.bf16.gmra.mrb[76].mxu1 %v3507_v41 }
 0x13b   :  { %2068 = vmatmul.mubr.bf16.gmra.mrb[76].mxu0 %v1736_v44  ;;  %1596 = vmatprep.mubr.bf16.mxu1 %v5163_v2  ;;  %v3509_v44 = vld [vmem:[%s5155_s3 + $0xa8] sm:$0xff]  }
 0x13c   :  { %2077 = vmatprep.mubr.bf16.mxu0 %v5163_v2 }
 0x13d   :  { %v4343_v1 = vpop.f32.mrb[36].mxu1 }
 0x13e   :  { %v4345_v4 = vpop.f32.mrb[37].mxu1 }
 0x13f   :  { %v4352_v15 = vpop.f32.mrb[38].mxu1 }
 0x140   :  { %v4360_v24 = vpop.f32.mrb[39].mxu1 }
 0x142   :  { %1597 = vmatmul.mubr.bf16.gmra.mrb[80].mxu1 %v3508_v6  ;;  %v288_v6 = vmax.f32 %v224_v51, 0.0 }
 0x143   :  { %2078 = vmatmul.mubr.bf16.gmra.mrb[80].mxu0 %v1737_v7  ;;  %1606 = vmatprep.mubr.bf16.mxu1 %v5163_v2  ;;  %v154_v7 = vmul.f32 %v3942_v18, %v83_v58  ;;  %v290_v58 = vmax.f32 %v226_v31, 0.0 }
 0x144   :  { %2087 = vmatprep.mubr.bf16.mxu0 %v5163_v2  ;;  %v1739_v25 = vpack.c.bf16 %v288_v6, %v287_v0 }
 0x145   :  { %v4366_v37 = vpop.f32.mrb[40].mxu1  ;;  %v225_v30 = vadd.f32 %v3951_v21, %v154_v7 }
 0x146   :  { %5165 = vst [vmem:[#allocation5_spill] sm:$0xff] %v4366_v37  ;;  %v4368_v41 = vpop.f32.mrb[41].mxu1 }
 0x147   :  { %5166 = vst [vmem:[#allocation6_spill] sm:$0xff] %v4368_v41  ;;  %v4375_v52 = vpop.f32.mrb[42].mxu1  ;;  %v289_v51 = vmax.f32 %v225_v30, 0.0 }
 0x148   :  { %5167 = vst [vmem:[#allocation7_spill] sm:$0xff] %v4375_v52  ;;  %v4383_v60 = vpop.f32.mrb[43].mxu1 }
 0x149   :  { %5168 = vst [vmem:[#allocation8_spill] sm:$0xff] %v4383_v60 }
 0x14a   :  { %1607 = vmatmul.mubr.bf16.gmra.mrb[84].mxu1 %v3509_v44  ;;  %v85_v44 = vld [vmem:[%s5152_s0 + $0x180] sm:$0xff] }
 0x14b   :  { %2088 = vmatmul.mubr.bf16.gmra.mrb[84].mxu0 %v1738_v45  ;;  %1616 = vmatprep.mubr.bf16.mxu1 %v5163_v2  ;;  %v86_v45 = vld [vmem:[%s5152_s0 + $0x188] sm:$0xff]  ;;  %v156_v59 = vmul.f32 %v3942_v18, %v85_v44  ;;  %v87_v44 = vld [vmem:[%s5152_s0 + $0x190] sm:$0xff] }
 0x14c   :  { %2097 = vmatprep.mubr.bf16.mxu0 %v5163_v2  ;;  %v157_v0 = vmul.f32 %v3942_v18, %v86_v45  ;;  %v88_v45 = vld [vmem:[%s5152_s0 + $0x198] sm:$0xff] }
 0x14d   :  { %v4389_v12 = vpop.f32.mrb[44].mxu1 }
 0x14e   :  { %5169 = vst [vmem:[#allocation9_spill] sm:$0xff] %v4389_v12  ;;  %v4391_v16 = vpop.f32.mrb[45].mxu1  ;;  %v228_v30 = vadd.f32 %v3951_v21, %v157_v0  ;;  %v5177_v0 = vmov 0  }
 0x14f   :  { %5170 = vst [vmem:[#allocation10_spill] sm:$0xff] %v4391_v16  ;;  %v4398_v32 = vpop.f32.mrb[46].mxu1  ;;  %v2326_v16 = vld [vmem:[%s5160_s8] sm:$0x3] }
 0x150   :  { %5171 = vst [vmem:[#allocation11_spill] sm:$0xff] %v4398_v32  ;;  %v4406_v47 = vpop.f32.mrb[47].mxu1 }
 0x151   :  { %5172 = vst [vmem:[#allocation12_spill] sm:$0xff] %v4406_v47 }
 0x152   :  { %1617 = vmatmul.mubr.bf16.gmra.mrb[88].mxu1 %v3510_v17  ;;  %v1740_v17 = vpack.c.bf16 %v290_v58, %v289_v51  ;;  %v292_v51 = vmax.f32 %v228_v30, 0.0  ;;  %v158_v58 = vmul.f32 %v3942_v18, %v87_v44  ;;  %v89_v44 = vld [vmem:[%s5152_s0 + $0x1a0] sm:$0xff] }
 0x153   :  { %2098 = vmatmul.mubr.bf16.gmra.mrb[88].mxu0 %v1739_v25  ;;  %1626 = vmatprep.mubr.bf16.mxu1 %v5163_v2  ;;  %v227_v25 = vadd.f32 %v3951_v21, %v156_v59  ;;  %v159_v59 = vmul.f32 %v3942_v18, %v88_v45  ;;  %v90_v45 = vld [vmem:[%s5152_s0 + $0x1a8] sm:$0xff] }
 0x154   :  { %2107 = vmatprep.mubr.bf16.mxu0 %v5163_v2 }
 0x155   :  { %v4412_v6 = vpop.f32.mrb[48].mxu1 }
 0x156   :  { %5173 = vst [vmem:[#allocation13_spill] sm:$0xff] %v4412_v6  ;;  %v4414_v7 = vpop.f32.mrb[49].mxu1 }
 0x157   :  { %5174 = vst [vmem:[#allocation14_spill] sm:$0xff] %v4414_v7  ;;  %v4421_v31 = vpop.f32.mrb[50].mxu1  ;;  %v291_v7 = vmax.f32 %v227_v25, 0.0  ;;  %v230_v25 = vadd.f32 %v3951_v21, %v159_v59 }
 0x158   :  { %5175 = vst [vmem:[#allocation15_spill] sm:$0xff] %v4421_v31  ;;  %v4429_v2 = vpop.f32.mrb[51].mxu1 }
 0x159   :  { %5176 = vst [vmem:[#allocation16_spill] sm:$0xff] %v4429_v2  ;;  %v3512_v2 = vld [vmem:[%s5155_s3 + $0xc0] sm:$0xff]  }
 0x15a   :  { %1627 = vmatmul.mubr.bf16.gmra.mrb[92].mxu1 %v3511_v9  ;;  %v1741_v9 = vpack.c.bf16 %v292_v51, %v291_v7  ;;  %v294_v7 = vmax.f32 %v230_v25, 0.0  ;;  %v160_v51 = vmul.f32 %v3942_v18, %v89_v44  ;;  %v91_v44 = vld [vmem:[%s5152_s0 + $0x1b0] sm:$0xff] }
 0x15b   :  { %2108 = vmatmul.mubr.bf16.gmra.mrb[92].mxu0 %v1740_v17  ;;  %1636 = vmatprep.mubr.bf16.mxu1 %v5177_v0  ;;  %v229_v17 = vadd.f32 %v3951_v21, %v158_v58  ;;  %v161_v58 = vmul.f32 %v3942_v18, %v90_v45  ;;  %v92_v45 = vld [vmem:[%s5152_s0 + $0x1b8] sm:$0xff] }
 0x15c   :  { %2117 = vmatprep.mubr.bf16.mxu0 %v5177_v0 }
 0x15d   :  { %v4435_v31 = vpop.f32.mrb[52].mxu1 }
 0x15e   :  { %5178 = vst [vmem:[#allocation17_spill] sm:$0xff] %v4435_v31  ;;  %v4437_v6 = vpop.f32.mrb[53].mxu1  ;;  %v293_v31 = vmax.f32 %v229_v17, 0.0  ;;  %v232_v17 = vadd.f32 %v3951_v21, %v161_v58  ;;  %v163_v58 = vmul.f32 %v3942_v18, %v92_v45 }
 0x15f   :  { %5179 = vst [vmem:[#allocation18_spill] sm:$0xff] %v4437_v6  ;;  %v4444_v30 = vpop.f32.mrb[54].mxu1 }
 0x160   :  { %5180 = vst [vmem:[#allocation19_spill] sm:$0xff] %v4444_v30  ;;  %v4452_v6 = vpop.f32.mrb[55].mxu1 }
 0x161   :  { %5181 = vst [vmem:[#allocation20_spill] sm:$0xff] %v4452_v6  ;;  %v3513_v6 = vld [vmem:[%s5155_s3 + $0xc8] sm:$0xff]  }
 0x162   :  { %1637 = vmatmul.mubr.bf16.gmra.mrb[96].mxu1 %v3512_v2  ;;  %v1742_v2 = vpack.c.bf16 %v294_v7, %v293_v31  ;;  %v296_v7 = vmax.f32 %v232_v17, 0.0  ;;  %v234_v17 = vadd.f32 %v3951_v21, %v163_v58 }
 0x163   :  { %2118 = vmatmul.mubr.bf16.gmra.mrb[96].mxu0 %v1741_v9  ;;  %1646 = vmatprep.mubr.bf16.mxu1 %v5177_v0  ;;  %v231_v9 = vadd.f32 %v3951_v21, %v160_v51  ;;  %v162_v51 = vmul.f32 %v3942_v18, %v91_v44 }
 0x164   :  { %2127 = vmatprep.mubr.bf16.mxu0 %v5177_v0  ;;  %v298_v58 = vmax.f32 %v234_v17, 0.0 }
 0x165   :  { %v4458_v59 = vpop.f32.mrb[56].mxu1  ;;  %v295_v31 = vmax.f32 %v231_v9, 0.0  ;;  %v233_v9 = vadd.f32 %v3951_v21, %v162_v51 }
 0x166   :  { %5182 = vst [vmem:[#allocation21_spill] sm:$0xff] %v4458_v59  ;;  %v4460_v30 = vpop.f32.mrb[57].mxu1  ;;  %v2328_v59 = vlaneseq }
 0x167   :  { %5183 = vst [vmem:[#allocation22_spill] sm:$0xff] %v4460_v30  ;;  %v4467_v25 = vpop.f32.mrb[58].mxu1  ;;  %v297_v51 = vmax.f32 %v233_v9, 0.0 }
 0x168   :  { %5184 = vst [vmem:[#allocation23_spill] sm:$0xff] %v4467_v25  ;;  %v4475_v30 = vpop.f32.mrb[59].mxu1  ;;  %v2329_v25 = vshrl.u32 %v2328_v59, 7  ;;  %v94_v59 = vld [vmem:[%s5152_s0 + $0x1c8] sm:$0xff] }
 0x169   :  { %5185 = vst [vmem:[#allocation24_spill] sm:$0xff] %v4475_v30  ;;  %v93_v30 = vld [vmem:[%s5152_s0 + $0x1c0] sm:$0xff] }
 0x16a   :  { %1647 = vmatmul.mubr.bf16.gmra.mrb[100].mxu1 %v3513_v6  ;;  %v3514_v6 = vld [vmem:[%s5155_s3 + $0xd0] sm:$0xff]  }
 0x16b   :  { %2128 = vmatmul.mubr.bf16.gmra.mrb[100].mxu0 %v1742_v2  ;;  %1656 = vmatprep.mubr.bf16.mxu1 %v5177_v0  ;;  %v1743_v2 = vpack.c.bf16 %v296_v7, %v295_v31  ;;  %v2334_v31 = vsub.s32 1, %v2329_v25  ;;  %v165_v7 = vmul.f32 %v3942_v18, %v94_v59 }
 0x16c   :  { %2137 = vmatprep.mubr.bf16.mxu0 %v5177_v0 }
 0x16d   :  { %v4481_v47 = vpop.f32.mrb[60].mxu1  ;;  %v4510_v12 = vrot.slane %v2326_v16, %v2334_v31  ;;  %v236_v60 = vadd.f32 %v3951_v21, %v165_v7  ;;  %v2467_v31 = vld [vmem:[%s5161_s9 + $0x8] sm:$0xff] }
 0x16e   :  { %5186 = vst [vmem:[#allocation25_spill] sm:$0xff] %v4481_v47  ;;  %v4486_v32 = vpop.f32.mrb[61].mxu1  ;;  %v2330_v47 = vsub.s32 0, %v2329_v25 }
 0x16f   :  { %5187 = vst [vmem:[#allocation26_spill] sm:$0xff] %v4486_v32  ;;  %v4496_v44 = vpop.f32.mrb[62].mxu1  ;;  %v164_v32 = vmul.f32 %v3942_v18, %v93_v30  ;;  %v300_v52 = vmax.f32 %v236_v60, 0.0 }
 0x170   :  { %5188 = vst [vmem:[#allocation27_spill] sm:$0xff] %v4496_v44  ;;  %v4498_v45 = vpop.f32.mrb[63].mxu1  ;;  %v4507_v44 = vrot.slane %v2326_v16, %v2330_v47  ;;  %v95_v47 = vld [vmem:[%s5152_s0 + $0x1d0] sm:$0xff] }
 0x171   :  { %5189 = vst [vmem:[#allocation28_spill] sm:$0xff] %v4498_v45  ;;  %v235_v45 = vadd.f32 %v3951_v21, %v164_v32  ;;  %v2466_v32 = vld [vmem:[%s5161_s9] sm:$0xff]  ;;  %v166_v41 = vmul.f32 %v3942_v18, %v95_v47 }
 0x172   :  { %1657 = vmatmul.mubr.bf16.gmra.mrb[104].mxu1 %v3514_v6  ;;  %v3515_v6 = vld [vmem:[%s5155_s3 + $0xd8] sm:$0xff]  }
 0x173   :  { %2138 = vmatmul.mubr.bf16.gmra.mrb[104].mxu0 %v1743_v2  ;;  %1666 = vmatprep.mubr.bf16.mxu1 %v5177_v0  ;;  %v1744_v2 = vpack.c.bf16 %v298_v58, %v297_v51  ;;  %v299_v58 = vmax.f32 %v235_v45, 0.0 }
 0x174   :  { %2147 = vmatprep.mubr.bf16.mxu0 %v5177_v0 }
 0x176   :  { %v1879_v30 = vpop.f32.mrb[0].mxu0 }
 0x177   :  { %v3124_v25 = vadd.f32 %v1879_v30, %v4136_v19  ;;  %v1881_v59 = vpop.f32.mrb[1].mxu0  ;;  %v96_v19 = vld [vmem:[%s5152_s0 + $0x1d8] sm:$0xff] }
 0x178   :  { %v3125_v16 = vadd.f32 %v1881_v59, %v4138_v20  ;;  %v1883_v9 = vpop.f32.mrb[2].mxu0  ;;  %v2468_v20 = vld [vmem:[%s5161_s9 + $0x10] sm:$0xff]  ;;  %v167_v45 = vmul.f32 %v3942_v18, %v96_v19 }
 0x179   :  { %v2338_v17 = vadd.f32 %v3124_v25, %v4507_v44  ;;  %v3126_v7 = vadd.f32 %v1883_v9, %v4145_v26  ;;  %v1885_v51 = vpop.f32.mrb[3].mxu0  ;;  %v2469_v26 = vld [vmem:[%s5161_s9 + $0x18] sm:$0xff] }
 0x17a   :  { %v2339_v30 = vadd.f32 %v3125_v16, %v4510_v12  ;;  %v3127_v59 = vadd.f32 %v1885_v51, %v4153_v29  ;;  %1667 = vmatmul.mubr.bf16.gmra.mrb[108].mxu1 %v3515_v6  ;;  %v97_v6 = vld [vmem:[%s5152_s0 + $0x1e0] sm:$0xff]  ;;  %v237_v51 = vadd.f32 %v3951_v21, %v166_v41 }
 0x17b   :  { %v2594_v25 = vadd.f32 %v2466_v32, %v2338_v17  ;;  %v2340_v37 = vadd.f32 %v3126_v7, %v4507_v44  ;;  %2148 = vmatmul.mubr.bf16.gmra.mrb[108].mxu0 %v1744_v2  ;;  %1676 = vmatprep.mubr.bf16.mxu1 %v5177_v0  ;;  %v1745_v7 = vpack.c.bf16 %v300_v52, %v299_v58  ;;  %v98_v52 = vld [vmem:[%s5152_s0 + $0x1e8] sm:$0xff] }
 0x17c   :  { %v2595_v16 = vadd.f32 %v2467_v31, %v2339_v30  ;;  %v2341_v9 = vadd.f32 %v3127_v59, %v4510_v12  ;;  %2157 = vmatprep.mubr.bf16.mxu0 %v5177_v0  ;;  %v3516_v31 = vld [vmem:[%s5155_s3 + $0xe0] sm:$0xff]  }
 0x17d   :  { %v2722_v29 = vmax.f32 %v2594_v25, 0.0  ;;  %v2596_v60 = vadd.f32 %v2468_v20, %v2340_v37  ;;  %v238_v37 = vadd.f32 %v3951_v21, %v167_v45  ;;  %v2470_v30 = vld [vmem:[%s5161_s9 + $0x20] sm:$0xff]  ;;  %v2471_v21 = vld [vmem:[%s5161_s9 + $0x28] sm:$0xff] }
 0x17e   :  { %v2723_v47 = vmax.f32 %v2595_v16, 0.0  ;;  %v2597_v32 = vadd.f32 %v2469_v26, %v2341_v9  ;;  %v1889_v17 = vpop.f32.mrb[4].mxu0  ;;  %v3520_v26 = vld [vmem:[%s5153_s1] ss:$0 sm:$0xff] }
 0x17f   :  { %2850 = vst [vmem:[#allocation2] sm:$0xff] %v2722_v29  ;;  %v2724_v2 = vmax.f32 %v2596_v60, 0.0  ;;  %v3128_v18 = vadd.f32 %v1889_v17, %v4159_v34  ;;  %v1891_v19 = vpop.f32.mrb[5].mxu0  ;;  %v168_v45 = vmul.f32 %v3520_v26, %v97_v6  ;;  %v169_v29 = vmul.f32 %v3520_v26, %v98_v52 }
 0x180   :  { %2851 = vst [vmem:[#allocation2 + $0x8] sm:$0xff] %v2723_v47  ;;  %v2725_v58 = vmax.f32 %v2597_v32, 0.0  ;;  %v3129_v34 = vadd.f32 %v1891_v19, %v4161_v35  ;;  %v1893_v20 = vpop.f32.mrb[6].mxu0  ;;  %v2472_v35 = vld [vmem:[%s5161_s9 + $0x30] sm:$0xff]  ;;  %v301_v32 = vmax.f32 %v237_v51, 0.0  ;;  %v302_v17 = vmax.f32 %v238_v37, 0.0 }
 0x181   :  { %2852 = vst [vmem:[#allocation2 + $0x10] sm:$0xff] %v2724_v2  ;;  %v2342_v59 = vadd.f32 %v3128_v18, %v4507_v44  ;;  %v3130_v41 = vadd.f32 %v1893_v20, %v4168_v40  ;;  %v1895_v25 = vpop.f32.mrb[7].mxu0  ;;  %v2473_v40 = vld [vmem:[%s5161_s9 + $0x38] sm:$0xff]  ;;  %v3521_v19 = vld [vmem:[%s5154_s2] ss:$0 sm:$0xff]  ;;  %v3517_v20 = vld [vmem:[%s5155_s3 + $0xe8] sm:$0xff]  }
 0x182   :  { %2853 = vst [vmem:[#allocation2 + $0x18] sm:$0xff] %v2725_v58  ;;  %v2343_v16 = vadd.f32 %v3129_v34, %v4510_v12  ;;  %v3131_v9 = vadd.f32 %v1895_v25, %v4176_v43  ;;  %1677 = vmatmul.mubr.bf16.gmra.mrb[112].mxu1 %v3516_v31  ;;  %v239_v52 = vadd.f32 %v3521_v19, %v168_v45  ;;  %v2474_v25 = vld [vmem:[%s5161_s9 + $0x40] sm:$0xff] }
 0x183   :  { %v2598_v60 = vadd.f32 %v2470_v30, %v2342_v59  ;;  %v2344_v47 = vadd.f32 %v3130_v41, %v4507_v44  ;;  %2158 = vmatmul.mubr.bf16.gmra.mrb[112].mxu0 %v1745_v7  ;;  %1686 = vmatprep.mubr.bf16.mxu1 %v5177_v0  ;;  %v240_v7 = vadd.f32 %v3521_v19, %v169_v29 }
 0x184   :  { %v2599_v6 = vadd.f32 %v2471_v21, %v2343_v16  ;;  %v2345_v2 = vadd.f32 %v3131_v9, %v4510_v12  ;;  %2167 = vmatprep.mubr.bf16.mxu0 %v5177_v0  ;;  %v1746_v59 = vpack.c.bf16 %v302_v17, %v301_v32  ;;  %v99_v21 = vld [vmem:[%s5152_s0 + $0x1f0] sm:$0xff]  ;;  %v2475_v9 = vld [vmem:[%s5161_s9 + $0x48] sm:$0xff] }
 0x185   :  { %v2726_v43 = vmax.f32 %v2598_v60, 0.0  ;;  %v2600_v18 = vadd.f32 %v2472_v35, %v2344_v47  ;;  %v303_v47 = vmax.f32 %v239_v52, 0.0  ;;  %v304_v17 = vmax.f32 %v240_v7, 0.0 }
 0x186   :  { %v2727_v58 = vmax.f32 %v2599_v6, 0.0  ;;  %v2601_v30 = vadd.f32 %v2473_v40, %v2345_v2  ;;  %v1899_v31 = vpop.f32.mrb[8].mxu0  ;;  %v170_v6 = vmul.f32 %v3520_v26, %v99_v21 }
 0x187   :  { %2854 = vst [vmem:[#allocation2 + $0x20] sm:$0xff] %v2726_v43  ;;  %v2728_v51 = vmax.f32 %v2600_v18, 0.0  ;;  %v3132_v37 = vadd.f32 %v1899_v31, %v4182_v48  ;;  %v1901_v34 = vpop.f32.mrb[9].mxu0  ;;  %v100_v48 = vld [vmem:[%s5152_s0 + $0x1f8] sm:$0xff] }
 0x188   :  { %2855 = vst [vmem:[#allocation2 + $0x28] sm:$0xff] %v2727_v58  ;;  %v2729_v41 = vmax.f32 %v2601_v30, 0.0  ;;  %v3133_v45 = vadd.f32 %v1901_v34, %v4184_v49  ;;  %v1903_v16 = vpop.f32.mrb[10].mxu0  ;;  %v2476_v49 = vld [vmem:[%s5161_s9 + $0x50] sm:$0xff]  ;;  %v171_v18 = vmul.f32 %v3520_v26, %v100_v48 }
 0x189   :  { %2856 = vst [vmem:[#allocation2 + $0x30] sm:$0xff] %v2728_v51  ;;  %v2346_v35 = vadd.f32 %v3132_v37, %v4507_v44  ;;  %v3134_v29 = vadd.f32 %v1903_v16, %v4191_v54  ;;  %v1905_v60 = vpop.f32.mrb[11].mxu0  ;;  %v2477_v54 = vld [vmem:[%s5161_s9 + $0x58] sm:$0xff]  ;;  %v1747_v37 = vpack.c.bf16 %v304_v17, %v303_v47  ;;  %v3518_v26 = vld [vmem:[%s5155_s3 + $0xf0] sm:$0xff]  }
 0x18a   :  { %2857 = vst [vmem:[#allocation2 + $0x38] sm:$0xff] %v2729_v41  ;;  %v2347_v40 = vadd.f32 %v3133_v45, %v4510_v12  ;;  %v3135_v32 = vadd.f32 %v1905_v60, %v4199_v57  ;;  %1687 = vmatmul.mubr.bf16.gmra.mrb[116].mxu1 %v3517_v20  ;;  %v242_v41 = vadd.f32 %v3521_v19, %v171_v18  ;;  %v2478_v45 = vld [vmem:[%s5161_s9 + $0x60] sm:$0xff]  ;;  %v2480_v60 = vld [vmem:[%s5161_s9 + $0x70] sm:$0xff] }
 0x18b   :  { %v2602_v2 = vadd.f32 %v2474_v25, %v2346_v35  ;;  %v2348_v43 = vadd.f32 %v3134_v29, %v4507_v44  ;;  %2168 = vmatmul.mubr.bf16.gmra.mrb[116].mxu0 %v1746_v59  ;;  %1696 = vmatprep.mubr.bf16.mxu1 %v5177_v0  ;;  %v241_v59 = vadd.f32 %v3521_v19, %v170_v6 }
 0x18c   :  { %v2603_v52 = vadd.f32 %v2475_v9, %v2347_v40  ;;  %v2349_v58 = vadd.f32 %v3135_v32, %v4510_v12  ;;  %2177 = vmatprep.mubr.bf16.mxu0 %v5177_v0  ;;  %v306_v32 = vmax.f32 %v242_v41, 0.0 }
 0x18d   :  { %v2730_v57 = vmax.f32 %v2602_v2, 0.0  ;;  %v2604_v30 = vadd.f32 %v2476_v49, %v2348_v43  ;;  %v2481_v49 = vld [vmem:[%s5161_s9 + $0x78] sm:$0xff] }
 0x18e   :  { %v2731_v31 = vmax.f32 %v2603_v52, 0.0  ;;  %v2605_v7 = vadd.f32 %v2477_v54, %v2349_v58  ;;  %v1909_v51 = vpop.f32.mrb[12].mxu0 }
 0x18f   :  { %2858 = vst [vmem:[#allocation2 + $0x40] sm:$0xff] %v2730_v57  ;;  %v2732_v34 = vmax.f32 %v2604_v30, 0.0  ;;  %v3136_v21 = vadd.f32 %v1909_v51, %v4205_v62  ;;  %v1911_v20 = vpop.f32.mrb[13].mxu0  ;;  %v2479_v62 = vld [vmem:[%s5161_s9 + $0x68] sm:$0xff]  ;;  %v3519_v30 = vld [vmem:[%s5155_s3 + $0xf8] sm:$0xff]  }
 0x190   :  { %2859 = vst [vmem:[#allocation2 + $0x48] sm:$0xff] %v2731_v31  ;;  %v2733_v25 = vmax.f32 %v2605_v7, 0.0  ;;  %v3137_v16 = vadd.f32 %v1911_v20, %v4207_v63  ;;  %v1913_v48 = vpop.f32.mrb[14].mxu0 }
 0x191   :  { %2860 = vst [vmem:[#allocation2 + $0x50] sm:$0xff] %v2732_v34  ;;  %v2350_v35 = vadd.f32 %v3136_v21, %v4507_v44  ;;  %v3138_v9 = vadd.f32 %v1913_v48, %v4214_v5  ;;  %v1915_v29 = vpop.f32.mrb[15].mxu0  ;;  %v305_v5 = vmax.f32 %v241_v59, 0.0  ;;  %v2484_v59 = vld [vmem:[%s5161_s9 + $0x90] sm:$0xff] }
 0x192   :  { %2861 = vst [vmem:[#allocation2 + $0x58] sm:$0xff] %v2733_v25  ;;  %v2351_v19 = vadd.f32 %v3137_v16, %v4510_v12  ;;  %v3139_v63 = vadd.f32 %v1915_v29, %v4222_v8  ;;  %1697 = vmatmul.mubr.bf16.gmra.mrb[120].mxu1 %v3518_v26 }
 0x193   :  { %v2606_v47 = vadd.f32 %v2478_v45, %v2350_v35  ;;  %v2352_v40 = vadd.f32 %v3138_v9, %v4507_v44  ;;  %2178 = vmatmul.mubr.bf16.gmra.mrb[120].mxu0 %v1747_v37  ;;  %1706 = vmatprep.mubr.bf16.mxu1 %v5177_v0  ;;  %v1748_v31 = vpack.c.bf16 %v306_v32, %v305_v5  ;;  %v2485_v45 = vld [vmem:[%s5161_s9 + $0x98] sm:$0xff]  ;;  %v2487_v32 = vld [vmem:[%s5161_s9 + $0xa8] sm:$0xff] }
 0x194   :  { %v2607_v17 = vadd.f32 %v2479_v62, %v2351_v19  ;;  %v2353_v6 = vadd.f32 %v3139_v63, %v4510_v12  ;;  %2187 = vmatprep.mubr.bf16.mxu0 %v5177_v0  ;;  %v2482_v0 = vld [vmem:[%s5161_s9 + $0x80] sm:$0xff] }
 0x195   :  { %v2734_v2 = vmax.f32 %v2606_v47, 0.0  ;;  %v2608_v8 = vadd.f32 %v2480_v60, %v2352_v40  ;;  %v2486_v47 = vld [vmem:[%s5161_s9 + $0xa0] sm:$0xff] }
 0x196   :  { %v2735_v43 = vmax.f32 %v2607_v17, 0.0  ;;  %v2609_v54 = vadd.f32 %v2481_v49, %v2353_v6  ;;  %v1919_v18 = vpop.f32.mrb[16].mxu0 }
 0x197   :  { %2862 = vst [vmem:[#allocation2 + $0x60] sm:$0xff] %v2734_v2  ;;  %v2736_v52 = vmax.f32 %v2608_v8, 0.0  ;;  %v3140_v58 = vadd.f32 %v1919_v18, %v4228_v13  ;;  %v1921_v57 = vpop.f32.mrb[17].mxu0  ;;  %v2483_v13 = vld [vmem:[%s5161_s9 + $0x88] sm:$0xff]  ;;  %v2488_v2 = vld [vmem:[%s5161_s9 + $0xb0] sm:$0xff] }
 0x198   :  { %2863 = vst [vmem:[#allocation2 + $0x68] sm:$0xff] %v2735_v43  ;;  %v2737_v7 = vmax.f32 %v2609_v54, 0.0  ;;  %v3141_v51 = vadd.f32 %v1921_v57, %v4230_v14  ;;  %v1923_v37 = vpop.f32.mrb[18].mxu0  ;;  %v2489_v54 = vld [vmem:[%s5161_s9 + $0xb8] sm:$0xff] }
 0x199   :  { %2864 = vst [vmem:[#allocation2 + $0x70] sm:$0xff] %v2736_v52  ;;  %v2354_v34 = vadd.f32 %v3140_v58, %v4507_v44  ;;  %v3142_v21 = vadd.f32 %v1923_v37, %v4237_v23  ;;  %v1925_v20 = vpop.f32.mrb[19].mxu0  ;;  %v2490_v37 = vld [vmem:[%s5161_s9 + $0xc0] sm:$0xff] }
 0x19a   :  { %2865 = vst [vmem:[#allocation2 + $0x78] sm:$0xff] %v2737_v7  ;;  %v2355_v26 = vadd.f32 %v3141_v51, %v4510_v12  ;;  %v3143_v14 = vadd.f32 %v1925_v20, %v4245_v27  ;;  %1707 = vmatmul.mubr.bf16.gmra.mrb[124].mxu1 %v3519_v30  ;;  %v2491_v20 = vld [vmem:[%s5161_s9 + $0xc8] sm:$0xff] }
 0x19b   :  { %v2610_v41 = vadd.f32 %v2482_v0, %v2354_v34  ;;  %v2356_v25 = vadd.f32 %v3142_v21, %v4507_v44  ;;  %2188 = vmatmul.mubr.bf16.gmra.mrb[124].mxu0 %v1748_v31 }
 0x19c   :  { %v2611_v23 = vadd.f32 %v2483_v13, %v2355_v26  ;;  %v2357_v16 = vadd.f32 %v3143_v14, %v4510_v12  ;;  %v2492_v14 = vld [vmem:[%s5161_s9 + $0xd0] sm:$0xff] }
 0x19d   :  { %v2738_v48 = vmax.f32 %v2610_v41, 0.0  ;;  %v2612_v35 = vadd.f32 %v2484_v59, %v2356_v25 }
 0x19e   :  { %v2739_v62 = vmax.f32 %v2611_v23, 0.0  ;;  %v2613_v9 = vadd.f32 %v2485_v45, %v2357_v16  ;;  %v1929_v29 = vpop.f32.mrb[20].mxu0  ;;  %v2493_v45 = vld [vmem:[%s5161_s9 + $0xd8] sm:$0xff] }
 0x19f   :  { %2866 = vst [vmem:[#allocation2 + $0x80] sm:$0xff] %v2738_v48  ;;  %v2740_v19 = vmax.f32 %v2612_v35, 0.0  ;;  %v3144_v27 = vadd.f32 %v1929_v29, %v4251_v33  ;;  %v1931_v60 = vpop.f32.mrb[21].mxu0 }
 0x1a0   :  { %2867 = vst [vmem:[#allocation2 + $0x88] sm:$0xff] %v2739_v62  ;;  %v2741_v63 = vmax.f32 %v2613_v9, 0.0  ;;  %v3145_v40 = vadd.f32 %v1931_v60, %v4253_v36  ;;  %v1933_v49 = vpop.f32.mrb[22].mxu0  ;;  %v2494_v60 = vld [vmem:[%s5161_s9 + $0xe0] sm:$0xff] }
 0x1a1   :  { %2868 = vst [vmem:[#allocation2 + $0x90] sm:$0xff] %v2740_v19  ;;  %v2358_v5 = vadd.f32 %v3144_v27, %v4507_v44  ;;  %v3146_v17 = vadd.f32 %v1933_v49, %v4260_v42  ;;  %v1935_v33 = vpop.f32.mrb[23].mxu0  ;;  %v2495_v49 = vld [vmem:[%s5161_s9 + $0xe8] sm:$0xff] }
 0x1a2   :  { %2869 = vst [vmem:[#allocation2 + $0x98] sm:$0xff] %v2741_v63  ;;  %v2359_v6 = vadd.f32 %v3145_v40, %v4510_v12  ;;  %v3147_v36 = vadd.f32 %v1935_v33, %v4268_v46 }
 0x1a3   :  { %v2614_v8 = vadd.f32 %v2486_v47, %v2358_v5  ;;  %v2360_v43 = vadd.f32 %v3146_v17, %v4507_v44  ;;  %v2496_v17 = vld [vmem:[%s5161_s9 + $0xf0] sm:$0xff] }
 0x1a4   :  { %v2615_v18 = vadd.f32 %v2487_v32, %v2359_v6  ;;  %v2361_v42 = vadd.f32 %v3147_v36, %v4510_v12 }
 0x1a5   :  { %v2742_v52 = vmax.f32 %v2614_v8, 0.0  ;;  %v2616_v58 = vadd.f32 %v2488_v2, %v2360_v43  ;;  %v2497_v2 = vld [vmem:[%s5161_s9 + $0xf8] sm:$0xff] }
 0x1a6   :  { %v2743_v57 = vmax.f32 %v2615_v18, 0.0  ;;  %v2617_v30 = vadd.f32 %v2489_v54, %v2361_v42  ;;  %v1939_v31 = vpop.f32.mrb[24].mxu0 }
 0x1a7   :  { %2870 = vst [vmem:[#allocation2 + $0xa0] sm:$0xff] %v2742_v52  ;;  %v2744_v7 = vmax.f32 %v2616_v58, 0.0  ;;  %v3148_v0 = vadd.f32 %v1939_v31, %v4274_v53  ;;  %v1941_v46 = vpop.f32.mrb[25].mxu0 }
 0x1a8   :  { %2871 = vst [vmem:[#allocation2 + $0xa8] sm:$0xff] %v2743_v57  ;;  %v2745_v51 = vmax.f32 %v2617_v30, 0.0  ;;  %v3149_v34 = vadd.f32 %v1941_v46, %v4276_v55  ;;  %v1943_v13 = vpop.f32.mrb[26].mxu0  ;;  %v2498_v30 = vld [vmem:[%s5161_s9 + $0x100] sm:$0xff]  ;;  %v2499_v46 = vld [vmem:[%s5161_s9 + $0x108] sm:$0xff] }
 0x1a9   :  { %2872 = vst [vmem:[#allocation2 + $0xb0] sm:$0xff] %v2744_v7  ;;  %v2362_v21 = vadd.f32 %v3148_v0, %v4507_v44  ;;  %v3150_v26 = vadd.f32 %v1943_v13, %v4283_v61  ;;  %v1945_v53 = vpop.f32.mrb[27].mxu0 }
 0x1aa   :  { %2873 = vst [vmem:[#allocation2 + $0xb8] sm:$0xff] %v2745_v51  ;;  %v2363_v59 = vadd.f32 %v3149_v34, %v4510_v12  ;;  %v3151_v55 = vadd.f32 %v1945_v53, %v4291_v3  ;;  %v2500_v34 = vld [vmem:[%s5161_s9 + $0x110] sm:$0xff] }
 0x1ab   :  { %v2618_v41 = vadd.f32 %v2490_v37, %v2362_v21  ;;  %v2364_v25 = vadd.f32 %v3150_v26, %v4507_v44 }
 0x1ac   :  { %v2619_v23 = vadd.f32 %v2491_v20, %v2363_v59  ;;  %v2365_v61 = vadd.f32 %v3151_v55, %v4510_v12  ;;  %v2501_v20 = vld [vmem:[%s5161_s9 + $0x118] sm:$0xff] }
 0x1ad   :  { %v2746_v16 = vmax.f32 %v2618_v41, 0.0  ;;  %v2620_v48 = vadd.f32 %v2492_v14, %v2364_v25 }
 0x1ae   :  { %v2747_v35 = vmax.f32 %v2619_v23, 0.0  ;;  %v2621_v62 = vadd.f32 %v2493_v45, %v2365_v61  ;;  %v1949_v9 = vpop.f32.mrb[28].mxu0  ;;  %v2502_v61 = vld [vmem:[%s5161_s9 + $0x120] sm:$0xff] }
 0x1af   :  { %2874 = vst [vmem:[#allocation2 + $0xc0] sm:$0xff] %v2746_v16  ;;  %v2748_v29 = vmax.f32 %v2620_v48, 0.0  ;;  %v3152_v19 = vadd.f32 %v1949_v9, %v4297_v10  ;;  %v1951_v3 = vpop.f32.mrb[29].mxu0 }
 0x1b0   :  { %2875 = vst [vmem:[#allocation2 + $0xc8] sm:$0xff] %v2747_v35  ;;  %v2749_v27 = vmax.f32 %v2621_v62, 0.0  ;;  %v3153_v63 = vadd.f32 %v1951_v3, %v4299_v11  ;;  %v1953_v47 = vpop.f32.mrb[30].mxu0  ;;  %v2503_v62 = vld [vmem:[%s5161_s9 + $0x128] sm:$0xff] }
 0x1b1   :  { %2876 = vst [vmem:[#allocation2 + $0xd0] sm:$0xff] %v2748_v29  ;;  %v2366_v40 = vadd.f32 %v3152_v19, %v4507_v44  ;;  %v3154_v5 = vadd.f32 %v1953_v47, %v4306_v22  ;;  %v1955_v10 = vpop.f32.mrb[31].mxu0  ;;  %v2504_v19 = vld [vmem:[%s5161_s9 + $0x130] sm:$0xff] }
 0x1b2   :  { %2877 = vst [vmem:[#allocation2 + $0xd8] sm:$0xff] %v2749_v27  ;;  %v2367_v32 = vadd.f32 %v3153_v63, %v4510_v12  ;;  %v3155_v11 = vadd.f32 %v1955_v10, %v4314_v28 }
 0x1b3   :  { %v2622_v33 = vadd.f32 %v2494_v60, %v2366_v40  ;;  %v2368_v6 = vadd.f32 %v3154_v5, %v4507_v44  ;;  %v2505_v60 = vld [vmem:[%s5161_s9 + $0x138] sm:$0xff] }
 0x1b4   :  { %v2623_v36 = vadd.f32 %v2495_v49, %v2367_v32  ;;  %v2369_v22 = vadd.f32 %v3155_v11, %v4510_v12 }
 0x1b5   :  { %v2750_v8 = vmax.f32 %v2622_v33, 0.0  ;;  %v2624_v43 = vadd.f32 %v2496_v17, %v2368_v6  ;;  %v5190_v17 = vld [vmem:[#allocation5_spill] sm:$0xff] }
 0x1b6   :  { %v2751_v54 = vmax.f32 %v2623_v36, 0.0  ;;  %v2625_v18 = vadd.f32 %v2497_v2, %v2369_v22  ;;  %v1959_v42 = vpop.f32.mrb[32].mxu0  ;;  %v2506_v6 = vld [vmem:[%s5161_s9 + $0x140] sm:$0xff]  ;;  %v5191_v2 = vld [vmem:[#allocation6_spill] sm:$0xff] }
 0x1b7   :  { %2878 = vst [vmem:[#allocation2 + $0xe0] sm:$0xff] %v2750_v8  ;;  %v2752_v52 = vmax.f32 %v2624_v43, 0.0  ;;  %v3156_v58 = vadd.f32 %v1959_v42, %v4320_v38  ;;  %v1961_v28 = vpop.f32.mrb[33].mxu0  ;;  %v2507_v43 = vld [vmem:[%s5161_s9 + $0x148] sm:$0xff] }
 0x1b8   :  { %2879 = vst [vmem:[#allocation2 + $0xe8] sm:$0xff] %v2751_v54  ;;  %v2753_v57 = vmax.f32 %v2625_v18, 0.0  ;;  %v3157_v31 = vadd.f32 %v1961_v28, %v4322_v39  ;;  %v1963_v7 = vpop.f32.mrb[34].mxu0  ;;  %v5192_v54 = vld [vmem:[#allocation7_spill] sm:$0xff]  ;;  %v5193_v28 = vld [vmem:[#allocation8_spill] sm:$0xff] }
 0x1b9   :  { %2880 = vst [vmem:[#allocation2 + $0xf0] sm:$0xff] %v2752_v52  ;;  %v2370_v0 = vadd.f32 %v3156_v58, %v4507_v44  ;;  %v3158_v51 = vadd.f32 %v1963_v7, %v4329_v50  ;;  %v1965_v38 = vpop.f32.mrb[35].mxu0  ;;  %v2508_v58 = vld [vmem:[%s5161_s9 + $0x150] sm:$0xff]  ;;  %v2509_v7 = vld [vmem:[%s5161_s9 + $0x158] sm:$0xff] }
 0x1ba   :  { %2881 = vst [vmem:[#allocation2 + $0xf8] sm:$0xff] %v2753_v57  ;;  %v2371_v37 = vadd.f32 %v3157_v31, %v4510_v12  ;;  %v3159_v39 = vadd.f32 %v1965_v38, %v4337_v56 }
 0x1bb   :  { %v2626_v13 = vadd.f32 %v2498_v30, %v2370_v0  ;;  %v2372_v21 = vadd.f32 %v3158_v51, %v4507_v44 }
 0x1bc   :  { %v2627_v26 = vadd.f32 %v2499_v46, %v2371_v37  ;;  %v2373_v50 = vadd.f32 %v3159_v39, %v4510_v12 }
 0x1bd   :  { %v2754_v53 = vmax.f32 %v2626_v13, 0.0  ;;  %v2628_v59 = vadd.f32 %v2500_v34, %v2372_v21  ;;  %v5194_v21 = vld [vmem:[#allocation9_spill] sm:$0xff] }
 0x1be   :  { %v2755_v14 = vmax.f32 %v2627_v26, 0.0  ;;  %v2629_v55 = vadd.f32 %v2501_v20, %v2373_v50  ;;  %v1969_v41 = vpop.f32.mrb[36].mxu0 }
 0x1bf   :  { %2882 = vst [vmem:[#allocation2 + $0x100] sm:$0xff] %v2754_v53  ;;  %v2756_v25 = vmax.f32 %v2628_v59, 0.0  ;;  %v3160_v45 = vadd.f32 %v1969_v41, %v4343_v1  ;;  %v1971_v56 = vpop.f32.mrb[37].mxu0  ;;  %v2510_v53 = vld [vmem:[%s5161_s9 + $0x160] sm:$0xff]  ;;  %v5195_v59 = vld [vmem:[#allocation10_spill] sm:$0xff] }
 0x1c0   :  { %2883 = vst [vmem:[#allocation2 + $0x108] sm:$0xff] %v2755_v14  ;;  %v2757_v23 = vmax.f32 %v2629_v55, 0.0  ;;  %v3161_v16 = vadd.f32 %v1971_v56, %v4345_v4  ;;  %v1973_v48 = vpop.f32.mrb[38].mxu0 }
 0x1c1   :  { %2884 = vst [vmem:[#allocation2 + $0x110] sm:$0xff] %v2756_v25  ;;  %v2374_v35 = vadd.f32 %v3160_v45, %v4507_v44  ;;  %v3162_v9 = vadd.f32 %v1973_v48, %v4352_v15  ;;  %v1975_v1 = vpop.f32.mrb[39].mxu0  ;;  %v2511_v25 = vld [vmem:[%s5161_s9 + $0x168] sm:$0xff]  ;;  %v5196_v45 = vld [vmem:[#allocation11_spill] sm:$0xff]  ;;  %v5197_v48 = vld [vmem:[#allocation12_spill] sm:$0xff] }
 0x1c2   :  { %2885 = vst [vmem:[#allocation2 + $0x118] sm:$0xff] %v2757_v23  ;;  %v2375_v29 = vadd.f32 %v3161_v16, %v4510_v12  ;;  %v3163_v4 = vadd.f32 %v1975_v1, %v4360_v24  ;;  %v2512_v16 = vld [vmem:[%s5161_s9 + $0x170] sm:$0xff]  ;;  %v2513_v1 = vld [vmem:[%s5161_s9 + $0x178] sm:$0xff] }
 0x1c3   :  { %v2630_v3 = vadd.f32 %v2502_v61, %v2374_v35  ;;  %v2376_v27 = vadd.f32 %v3162_v9, %v4507_v44 }
 0x1c4   :  { %v2631_v63 = vadd.f32 %v2503_v62, %v2375_v29  ;;  %v2377_v15 = vadd.f32 %v3163_v4, %v4510_v12 }
 0x1c5   :  { %v2758_v47 = vmax.f32 %v2630_v3, 0.0  ;;  %v2632_v40 = vadd.f32 %v2504_v19, %v2376_v27 }
 0x1c6   :  { %v2759_v49 = vmax.f32 %v2631_v63, 0.0  ;;  %v2633_v5 = vadd.f32 %v2505_v60, %v2377_v15  ;;  %v1979_v10 = vpop.f32.mrb[40].mxu0 }
 0x1c7   :  { %2886 = vst [vmem:[#allocation2 + $0x120] sm:$0xff] %v2758_v47  ;;  %v2760_v32 = vmax.f32 %v2632_v40, 0.0  ;;  %v3164_v11 = vadd.f32 %v1979_v10, %v5190_v17  ;;  %v1981_v24 = vpop.f32.mrb[41].mxu0  ;;  %v5198_v47 = vld [vmem:[#allocation13_spill] sm:$0xff] }
 0x1c8   :  { %2887 = vst [vmem:[#allocation2 + $0x128] sm:$0xff] %v2759_v49  ;;  %v2761_v33 = vmax.f32 %v2633_v5, 0.0  ;;  %v3165_v36 = vadd.f32 %v1981_v24, %v5191_v2  ;;  %v1983_v22 = vpop.f32.mrb[42].mxu0  ;;  %v2514_v10 = vld [vmem:[%s5161_s9 + $0x180] sm:$0xff] }
 0x1c9   :  { %2888 = vst [vmem:[#allocation2 + $0x130] sm:$0xff] %v2760_v32  ;;  %v2378_v8 = vadd.f32 %v3164_v11, %v4507_v44  ;;  %v3166_v18 = vadd.f32 %v1983_v22, %v5192_v54  ;;  %v1985_v42 = vpop.f32.mrb[43].mxu0  ;;  %v5199_v32 = vld [vmem:[#allocation14_spill] sm:$0xff] }
 0x1ca   :  { %2889 = vst [vmem:[#allocation2 + $0x138] sm:$0xff] %v2761_v33  ;;  %v2379_v52 = vadd.f32 %v3165_v36, %v4510_v12  ;;  %v3167_v57 = vadd.f32 %v1985_v42, %v5193_v28  ;;  %v2515_v33 = vld [vmem:[%s5161_s9 + $0x188] sm:$0xff] }
 0x1cb   :  { %v2634_v30 = vadd.f32 %v2506_v6, %v2378_v8  ;;  %v2380_v31 = vadd.f32 %v3166_v18, %v4507_v44  ;;  %v5200_v6 = vld [vmem:[#allocation15_spill] sm:$0xff] }
 0x1cc   :  { %v2635_v0 = vadd.f32 %v2507_v43, %v2379_v52  ;;  %v2381_v46 = vadd.f32 %v3167_v57, %v4510_v12  ;;  %v2516_v8 = vld [vmem:[%s5161_s9 + $0x190] sm:$0xff]  ;;  %v5201_v43 = vld [vmem:[#allocation16_spill] sm:$0xff] }
 0x1cd   :  { %v2762_v51 = vmax.f32 %v2634_v30, 0.0  ;;  %v2636_v38 = vadd.f32 %v2508_v58, %v2380_v31  ;;  %v2517_v52 = vld [vmem:[%s5161_s9 + $0x198] sm:$0xff] }
 0x1ce   :  { %v2763_v37 = vmax.f32 %v2635_v0, 0.0  ;;  %v2637_v34 = vadd.f32 %v2509_v7, %v2381_v46  ;;  %v1989_v39 = vpop.f32.mrb[44].mxu0 }
 0x1cf   :  { %2890 = vst [vmem:[#allocation2 + $0x140] sm:$0xff] %v2762_v51  ;;  %v2764_v13 = vmax.f32 %v2636_v38, 0.0  ;;  %v3168_v20 = vadd.f32 %v1989_v39, %v5194_v21  ;;  %v1991_v26 = vpop.f32.mrb[45].mxu0  ;;  %v5202_v51 = vld [vmem:[#allocation17_spill] sm:$0xff] }
 0x1d0   :  { %2891 = vst [vmem:[#allocation2 + $0x148] sm:$0xff] %v2763_v37  ;;  %v2765_v50 = vmax.f32 %v2637_v34, 0.0  ;;  %v3169_v14 = vadd.f32 %v1991_v26, %v5195_v59  ;;  %v1993_v55 = vpop.f32.mrb[46].mxu0  ;;  %v2518_v39 = vld [vmem:[%s5161_s9 + $0x1a0] sm:$0xff] }
 0x1d1   :  { %2892 = vst [vmem:[#allocation2 + $0x150] sm:$0xff] %v2764_v13  ;;  %v2382_v41 = vadd.f32 %v3168_v20, %v4507_v44  ;;  %v3170_v56 = vadd.f32 %v1993_v55, %v5196_v45  ;;  %v1995_v23 = vpop.f32.mrb[47].mxu0  ;;  %v5203_v13 = vld [vmem:[#allocation18_spill] sm:$0xff] }
 0x1d2   :  { %2893 = vst [vmem:[#allocation2 + $0x158] sm:$0xff] %v2765_v50  ;;  %v2383_v61 = vadd.f32 %v3169_v14, %v4510_v12  ;;  %v3171_v35 = vadd.f32 %v1995_v23, %v5197_v48  ;;  %v2519_v50 = vld [vmem:[%s5161_s9 + $0x1a8] sm:$0xff] }
 0x1d3   :  { %v2638_v62 = vadd.f32 %v2510_v53, %v2382_v41  ;;  %v2384_v9 = vadd.f32 %v3170_v56, %v4507_v44  ;;  %v5204_v53 = vld [vmem:[#allocation19_spill] sm:$0xff] }
 0x1d4   :  { %v2639_v29 = vadd.f32 %v2511_v25, %v2383_v61  ;;  %v2385_v19 = vadd.f32 %v3171_v35, %v4510_v12  ;;  %v2520_v41 = vld [vmem:[%s5161_s9 + $0x1b0] sm:$0xff]  ;;  %v5205_v25 = vld [vmem:[#allocation20_spill] sm:$0xff] }
 0x1d5   :  { %v2766_v4 = vmax.f32 %v2638_v62, 0.0  ;;  %v2640_v3 = vadd.f32 %v2512_v16, %v2384_v9  ;;  %v2521_v61 = vld [vmem:[%s5161_s9 + $0x1b8] sm:$0xff] }
 0x1d6   :  { %v2767_v27 = vmax.f32 %v2639_v29, 0.0  ;;  %v2641_v60 = vadd.f32 %v2513_v1, %v2385_v19  ;;  %v1999_v63 = vpop.f32.mrb[48].mxu0 }
 0x1d7   :  { %2894 = vst [vmem:[#allocation2 + $0x160] sm:$0xff] %v2766_v4  ;;  %v2768_v15 = vmax.f32 %v2640_v3, 0.0  ;;  %v3172_v40 = vadd.f32 %v1999_v63, %v5198_v47  ;;  %v2001_v49 = vpop.f32.mrb[49].mxu0  ;;  %v5206_v4 = vld [vmem:[#allocation21_spill] sm:$0xff] }
 0x1d8   :  { %2895 = vst [vmem:[#allocation2 + $0x168] sm:$0xff] %v2767_v27  ;;  %v2769_v5 = vmax.f32 %v2641_v60, 0.0  ;;  %v3173_v17 = vadd.f32 %v2001_v49, %v5199_v32  ;;  %v2003_v11 = vpop.f32.mrb[50].mxu0  ;;  %v2522_v63 = vld [vmem:[%s5161_s9 + $0x1c0] sm:$0xff] }
 0x1d9   :  { %2896 = vst [vmem:[#allocation2 + $0x170] sm:$0xff] %v2768_v15  ;;  %v2386_v24 = vadd.f32 %v3172_v40, %v4507_v44  ;;  %v3174_v2 = vadd.f32 %v2003_v11, %v5200_v6  ;;  %v2005_v36 = vpop.f32.mrb[51].mxu0  ;;  %v5207_v15 = vld [vmem:[#allocation22_spill] sm:$0xff] }
 0x1da   :  { %2897 = vst [vmem:[#allocation2 + $0x178] sm:$0xff] %v2769_v5  ;;  %v2387_v22 = vadd.f32 %v3173_v17, %v4510_v12  ;;  %v3175_v54 = vadd.f32 %v2005_v36, %v5201_v43  ;;  %v2523_v5 = vld [vmem:[%s5161_s9 + $0x1c8] sm:$0xff] }
 0x1db   :  { %v2642_v18 = vadd.f32 %v2514_v10, %v2386_v24  ;;  %v2388_v42 = vadd.f32 %v3174_v2, %v4507_v44  ;;  %v5208_v10 = vld [vmem:[#allocation23_spill] sm:$0xff] }
 0x1dc   :  { %v2643_v58 = vadd.f32 %v2515_v33, %v2387_v22  ;;  %v2389_v28 = vadd.f32 %v3175_v54, %v4510_v12  ;;  %v2524_v24 = vld [vmem:[%s5161_s9 + $0x1d0] sm:$0xff]  ;;  %v5209_v33 = vld [vmem:[#allocation24_spill] sm:$0xff] }
 0x1dd   :  { %v2770_v57 = vmax.f32 %v2642_v18, 0.0  ;;  %v2644_v30 = vadd.f32 %v2516_v8, %v2388_v42  ;;  %v2525_v22 = vld [vmem:[%s5161_s9 + $0x1d8] sm:$0xff] }
 0x1de   :  { %v2771_v31 = vmax.f32 %v2643_v58, 0.0  ;;  %v2645_v7 = vadd.f32 %v2517_v52, %v2389_v28  ;;  %v2009_v0 = vpop.f32.mrb[52].mxu0 }
 0x1df   :  { %2898 = vst [vmem:[#allocation2 + $0x180] sm:$0xff] %v2770_v57  ;;  %v2772_v46 = vmax.f32 %v2644_v30, 0.0  ;;  %v3176_v38 = vadd.f32 %v2009_v0, %v5202_v51  ;;  %v2011_v37 = vpop.f32.mrb[53].mxu0  ;;  %v5210_v57 = vld [vmem:[#allocation25_spill] sm:$0xff] }
 0x1e0   :  { %2899 = vst [vmem:[#allocation2 + $0x188] sm:$0xff] %v2771_v31  ;;  %v2773_v34 = vmax.f32 %v2645_v7, 0.0  ;;  %v3177_v21 = vadd.f32 %v2011_v37, %v5203_v13  ;;  %v2013_v20 = vpop.f32.mrb[54].mxu0  ;;  %v2526_v0 = vld [vmem:[%s5161_s9 + $0x1e0] sm:$0xff] }
 0x1e1   :  { %2900 = vst [vmem:[#allocation2 + $0x190] sm:$0xff] %v2772_v46  ;;  %v2390_v26 = vadd.f32 %v3176_v38, %v4507_v44  ;;  %v3178_v59 = vadd.f32 %v2013_v20, %v5204_v53  ;;  %v2015_v14 = vpop.f32.mrb[55].mxu0  ;;  %v5211_v46 = vld [vmem:[#allocation26_spill] sm:$0xff] }
 0x1e2   :  { %2901 = vst [vmem:[#allocation2 + $0x198] sm:$0xff] %v2773_v34  ;;  %v2391_v55 = vadd.f32 %v3177_v21, %v4510_v12  ;;  %v3179_v45 = vadd.f32 %v2015_v14, %v5205_v25  ;;  %v2527_v34 = vld [vmem:[%s5161_s9 + $0x1e8] sm:$0xff] }
 0x1e3   :  { %v2646_v56 = vadd.f32 %v2518_v39, %v2390_v26  ;;  %v2392_v23 = vadd.f32 %v3178_v59, %v4507_v44  ;;  %v5212_v39 = vld [vmem:[#allocation27_spill] sm:$0xff] }
 0x1e4   :  { %v2647_v16 = vadd.f32 %v2519_v50, %v2391_v55  ;;  %v2393_v48 = vadd.f32 %v3179_v45, %v4510_v12  ;;  %v2528_v26 = vld [vmem:[%s5161_s9 + $0x1f0] sm:$0xff]  ;;  %v5213_v50 = vld [vmem:[#allocation28_spill] sm:$0xff] }
 0x1e5   :  { %v2774_v35 = vmax.f32 %v2646_v56, 0.0  ;;  %v2648_v62 = vadd.f32 %v2520_v41, %v2392_v23  ;;  %v2529_v55 = vld [vmem:[%s5161_s9 + $0x1f8] sm:$0xff] }
 0x1e6   :  { %v2775_v9 = vmax.f32 %v2647_v16, 0.0  ;;  %v2649_v1 = vadd.f32 %v2521_v61, %v2393_v48  ;;  %v2019_v29 = vpop.f32.mrb[56].mxu0 }
 0x1e7   :  { %2902 = vst [vmem:[#allocation2 + $0x1a0] sm:$0xff] %v2774_v35  ;;  %v2776_v19 = vmax.f32 %v2648_v62, 0.0  ;;  %v3180_v3 = vadd.f32 %v2019_v29, %v5206_v4  ;;  %v2021_v27 = vpop.f32.mrb[57].mxu0 }
 0x1e8   :  { %2903 = vst [vmem:[#allocation2 + $0x1a8] sm:$0xff] %v2775_v9  ;;  %v2777_v60 = vmax.f32 %v2649_v1, 0.0  ;;  %v3181_v47 = vadd.f32 %v2021_v27, %v5207_v15  ;;  %v2023_v40 = vpop.f32.mrb[58].mxu0 }
 0x1e9   :  { %2904 = vst [vmem:[#allocation2 + $0x1b0] sm:$0xff] %v2776_v19  ;;  %v2394_v49 = vadd.f32 %v3180_v3, %v4507_v44  ;;  %v3182_v32 = vadd.f32 %v2023_v40, %v5208_v10  ;;  %v2025_v17 = vpop.f32.mrb[59].mxu0  ;;  %v2530_v19 = vld [vmem:[%s5161_s9 + $0x200] sm:$0xff] }
 0x1ea   :  { %2905 = vst [vmem:[#allocation2 + $0x1b8] sm:$0xff] %v2777_v60  ;;  %v2395_v11 = vadd.f32 %v3181_v47, %v4510_v12  ;;  %v3183_v6 = vadd.f32 %v2025_v17, %v5209_v33 }
 0x1eb   :  { %v2650_v2 = vadd.f32 %v2522_v63, %v2394_v49  ;;  %v2396_v36 = vadd.f32 %v3182_v32, %v4507_v44  ;;  %v2531_v63 = vld [vmem:[%s5161_s9 + $0x208] sm:$0xff] }
 0x1ec   :  { %v2651_v8 = vadd.f32 %v2523_v5, %v2395_v11  ;;  %v2397_v43 = vadd.f32 %v3183_v6, %v4510_v12  ;;  %v2532_v5 = vld [vmem:[%s5161_s9 + $0x210] sm:$0xff]  ;;  %v2533_v11 = vld [vmem:[%s5161_s9 + $0x218] sm:$0xff] }
 0x1ed   :  { %v2778_v54 = vmax.f32 %v2650_v2, 0.0  ;;  %v2652_v18 = vadd.f32 %v2524_v24, %v2396_v36 }
 0x1ee   :  { %v2779_v42 = vmax.f32 %v2651_v8, 0.0  ;;  %v2653_v52 = vadd.f32 %v2525_v22, %v2397_v43  ;;  %v2029_v58 = vpop.f32.mrb[60].mxu0 }
 0x1ef   :  { %2906 = vst [vmem:[#allocation2 + $0x1c0] sm:$0xff] %v2778_v54  ;;  %v2780_v28 = vmax.f32 %v2652_v18, 0.0  ;;  %v3184_v30 = vadd.f32 %v2029_v58, %v5210_v57  ;;  %v2031_v31 = vpop.f32.mrb[61].mxu0 }
 0x1f0   :  { %2907 = vst [vmem:[#allocation2 + $0x1c8] sm:$0xff] %v2779_v42  ;;  %v2781_v7 = vmax.f32 %v2653_v52, 0.0  ;;  %v3185_v51 = vadd.f32 %v2031_v31, %v5211_v46  ;;  %v2033_v38 = vpop.f32.mrb[62].mxu0 }
 0x1f1   :  { %2908 = vst [vmem:[#allocation2 + $0x1d0] sm:$0xff] %v2780_v28  ;;  %v2398_v37 = vadd.f32 %v3184_v30, %v4507_v44  ;;  %v3186_v13 = vadd.f32 %v2033_v38, %v5212_v39  ;;  %v2035_v21 = vpop.f32.mrb[63].mxu0  ;;  %v2534_v28 = vld [vmem:[%s5161_s9 + $0x220] sm:$0xff] }
 0x1f2   :  { %2909 = vst [vmem:[#allocation2 + $0x1d8] sm:$0xff] %v2781_v7  ;;  %v2399_v20 = vadd.f32 %v3185_v51, %v4510_v12  ;;  %v3187_v53 = vadd.f32 %v2035_v21, %v5213_v50 }
 0x1f3   :  { %v2654_v59 = vadd.f32 %v2526_v0, %v2398_v37  ;;  %v2400_v14 = vadd.f32 %v3186_v13, %v4507_v44  ;;  %v2535_v0 = vld [vmem:[%s5161_s9 + $0x228] sm:$0xff] }
 0x1f4   :  { %v2655_v41 = vadd.f32 %v2527_v34, %v2399_v20  ;;  %v2401_v25 = vadd.f32 %v3187_v53, %v4510_v12  ;;  %v2536_v34 = vld [vmem:[%s5161_s9 + $0x230] sm:$0xff]  ;;  %v2537_v20 = vld [vmem:[%s5161_s9 + $0x238] sm:$0xff] }
 0x1f5   :  { %v2782_v45 = vmax.f32 %v2654_v59, 0.0  ;;  %v2656_v56 = vadd.f32 %v2528_v26, %v2400_v14  ;;  %v1558_v16 = vpop.f32.mrb[64].mxu1 }
 0x1f6   :  { %v2783_v23 = vmax.f32 %v2655_v41, 0.0  ;;  %v2657_v61 = vadd.f32 %v2529_v55, %v2401_v25  ;;  %v2039_v48 = vpop.f32.mrb[64].mxu0  ;;  %v1560_v9 = vpop.f32.mrb[65].mxu1 }
 0x1f7   :  { %2910 = vst [vmem:[#allocation2 + $0x1e0] sm:$0xff] %v2782_v45  ;;  %v2784_v35 = vmax.f32 %v2656_v56, 0.0  ;;  %v3188_v62 = vadd.f32 %v2039_v48, %v1558_v16  ;;  %v2041_v1 = vpop.f32.mrb[65].mxu0  ;;  %v1562_v3 = vpop.f32.mrb[66].mxu1  ;;  %v2538_v48 = vld [vmem:[%s5161_s9 + $0x240] sm:$0xff] }
 0x1f8   :  { %2911 = vst [vmem:[#allocation2 + $0x1e8] sm:$0xff] %v2783_v23  ;;  %v2785_v29 = vmax.f32 %v2657_v61, 0.0  ;;  %v3189_v4 = vadd.f32 %v2041_v1, %v1560_v9  ;;  %v2043_v27 = vpop.f32.mrb[66].mxu0  ;;  %v1564_v47 = vpop.f32.mrb[67].mxu1 }
 0x1f9   :  { %2912 = vst [vmem:[#allocation2 + $0x1f0] sm:$0xff] %v2784_v35  ;;  %v2402_v60 = vadd.f32 %v3188_v62, %v4507_v44  ;;  %v3190_v15 = vadd.f32 %v2043_v27, %v1562_v3  ;;  %v2045_v40 = vpop.f32.mrb[67].mxu0 }
 0x1fa   :  { %2913 = vst [vmem:[#allocation2 + $0x1f8] sm:$0xff] %v2785_v29  ;;  %v2403_v49 = vadd.f32 %v3189_v4, %v4510_v12  ;;  %v3191_v10 = vadd.f32 %v2045_v40, %v1564_v47  ;;  %v2539_v29 = vld [vmem:[%s5161_s9 + $0x248] sm:$0xff]  ;;  %v2541_v40 = vld [vmem:[%s5161_s9 + $0x258] sm:$0xff] }
 0x1fb   :  { %v2658_v32 = vadd.f32 %v2530_v19, %v2402_v60  ;;  %v2404_v17 = vadd.f32 %v3190_v15, %v4507_v44  ;;  %v2540_v60 = vld [vmem:[%s5161_s9 + $0x250] sm:$0xff] }
 0x1fc   :  { %v2659_v24 = vadd.f32 %v2531_v63, %v2403_v49  ;;  %v2405_v33 = vadd.f32 %v3191_v10, %v4510_v12 }
 0x1fd   :  { %v2786_v6 = vmax.f32 %v2658_v32, 0.0  ;;  %v2660_v2 = vadd.f32 %v2532_v5, %v2404_v17  ;;  %v1568_v8 = vpop.f32.mrb[68].mxu1 }
 0x1fe   :  { %v2787_v36 = vmax.f32 %v2659_v24, 0.0  ;;  %v2661_v22 = vadd.f32 %v2533_v11, %v2405_v33  ;;  %v2049_v43 = vpop.f32.mrb[68].mxu0  ;;  %v1570_v42 = vpop.f32.mrb[69].mxu1 }
 0x1ff   :  { %2914 = vst [vmem:[#allocation2 + $0x200] sm:$0xff] %v2786_v6  ;;  %v2788_v54 = vmax.f32 %v2660_v2, 0.0  ;;  %v3192_v18 = vadd.f32 %v2049_v43, %v1568_v8  ;;  %v2051_v52 = vpop.f32.mrb[69].mxu0  ;;  %v1572_v30 = vpop.f32.mrb[70].mxu1  ;;  %v2542_v43 = vld [vmem:[%s5161_s9 + $0x260] sm:$0xff] }
 0x200   :  { %2915 = vst [vmem:[#allocation2 + $0x208] sm:$0xff] %v2787_v36  ;;  %v2789_v58 = vmax.f32 %v2661_v22, 0.0  ;;  %v3193_v57 = vadd.f32 %v2051_v52, %v1570_v42  ;;  %v2053_v31 = vpop.f32.mrb[70].mxu0  ;;  %v1574_v51 = vpop.f32.mrb[71].mxu1 }
 0x201   :  { %2916 = vst [vmem:[#allocation2 + $0x210] sm:$0xff] %v2788_v54  ;;  %v2406_v7 = vadd.f32 %v3192_v18, %v4507_v44  ;;  %v3194_v46 = vadd.f32 %v2053_v31, %v1572_v30  ;;  %v2055_v38 = vpop.f32.mrb[71].mxu0 }
 0x202   :  { %2917 = vst [vmem:[#allocation2 + $0x218] sm:$0xff] %v2789_v58  ;;  %v2407_v37 = vadd.f32 %v3193_v57, %v4510_v12  ;;  %v3195_v39 = vadd.f32 %v2055_v38, %v1574_v51  ;;  %v2543_v58 = vld [vmem:[%s5161_s9 + $0x268] sm:$0xff]  ;;  %v2545_v38 = vld [vmem:[%s5161_s9 + $0x278] sm:$0xff] }
 0x203   :  { %v2662_v13 = vadd.f32 %v2534_v28, %v2406_v7  ;;  %v2408_v21 = vadd.f32 %v3194_v46, %v4507_v44  ;;  %v2544_v7 = vld [vmem:[%s5161_s9 + $0x270] sm:$0xff] }
 0x204   :  { %v2663_v26 = vadd.f32 %v2535_v0, %v2407_v37  ;;  %v2409_v50 = vadd.f32 %v3195_v39, %v4510_v12 }
 0x205   :  { %v2790_v53 = vmax.f32 %v2662_v13, 0.0  ;;  %v2664_v59 = vadd.f32 %v2536_v34, %v2408_v21  ;;  %v1578_v41 = vpop.f32.mrb[72].mxu1 }
 0x206   :  { %v2791_v14 = vmax.f32 %v2663_v26, 0.0  ;;  %v2665_v55 = vadd.f32 %v2537_v20, %v2409_v50  ;;  %v2059_v25 = vpop.f32.mrb[72].mxu0  ;;  %v1580_v23 = vpop.f32.mrb[73].mxu1 }
 0x207   :  { %2918 = vst [vmem:[#allocation2 + $0x220] sm:$0xff] %v2790_v53  ;;  %v2792_v45 = vmax.f32 %v2664_v59, 0.0  ;;  %v3196_v56 = vadd.f32 %v2059_v25, %v1578_v41  ;;  %v2061_v61 = vpop.f32.mrb[73].mxu0  ;;  %v1582_v62 = vpop.f32.mrb[74].mxu1  ;;  %v2546_v25 = vld [vmem:[%s5161_s9 + $0x280] sm:$0xff] }
 0x208   :  { %2919 = vst [vmem:[#allocation2 + $0x228] sm:$0xff] %v2791_v14  ;;  %v2793_v16 = vmax.f32 %v2665_v55, 0.0  ;;  %v3197_v35 = vadd.f32 %v2061_v61, %v1580_v23  ;;  %v2063_v9 = vpop.f32.mrb[74].mxu0  ;;  %v1584_v4 = vpop.f32.mrb[75].mxu1 }
 0x209   :  { %2920 = vst [vmem:[#allocation2 + $0x230] sm:$0xff] %v2792_v45  ;;  %v2410_v1 = vadd.f32 %v3196_v56, %v4507_v44  ;;  %v3198_v19 = vadd.f32 %v2063_v9, %v1582_v62  ;;  %v2065_v3 = vpop.f32.mrb[75].mxu0 }
 0x20a   :  { %2921 = vst [vmem:[#allocation2 + $0x238] sm:$0xff] %v2793_v16  ;;  %v2411_v27 = vadd.f32 %v3197_v35, %v4510_v12  ;;  %v3199_v63 = vadd.f32 %v2065_v3, %v1584_v4  ;;  %v2547_v16 = vld [vmem:[%s5161_s9 + $0x288] sm:$0xff]  ;;  %v2549_v3 = vld [vmem:[%s5161_s9 + $0x298] sm:$0xff] }
 0x20b   :  { %v2666_v15 = vadd.f32 %v2538_v48, %v2410_v1  ;;  %v2412_v47 = vadd.f32 %v3198_v19, %v4507_v44  ;;  %v2548_v1 = vld [vmem:[%s5161_s9 + $0x290] sm:$0xff] }
 0x20c   :  { %v2667_v49 = vadd.f32 %v2539_v29, %v2411_v27  ;;  %v2413_v5 = vadd.f32 %v3199_v63, %v4510_v12 }
 0x20d   :  { %v2794_v10 = vmax.f32 %v2666_v15, 0.0  ;;  %v2668_v32 = vadd.f32 %v2540_v60, %v2412_v47  ;;  %v1588_v24 = vpop.f32.mrb[76].mxu1 }
 0x20e   :  { %v2795_v17 = vmax.f32 %v2667_v49, 0.0  ;;  %v2669_v11 = vadd.f32 %v2541_v40, %v2413_v5  ;;  %v2069_v33 = vpop.f32.mrb[76].mxu0  ;;  %v1590_v36 = vpop.f32.mrb[77].mxu1 }
 0x20f   :  { %2922 = vst [vmem:[#allocation2 + $0x240] sm:$0xff] %v2794_v10  ;;  %v2796_v6 = vmax.f32 %v2668_v32, 0.0  ;;  %v3200_v2 = vadd.f32 %v2069_v33, %v1588_v24  ;;  %v2071_v22 = vpop.f32.mrb[77].mxu0  ;;  %v1592_v18 = vpop.f32.mrb[78].mxu1  ;;  %v2550_v33 = vld [vmem:[%s5161_s9 + $0x2a0] sm:$0xff] }
 0x210   :  { %2923 = vst [vmem:[#allocation2 + $0x248] sm:$0xff] %v2795_v17  ;;  %v2797_v8 = vmax.f32 %v2669_v11, 0.0  ;;  %v3201_v54 = vadd.f32 %v2071_v22, %v1590_v36  ;;  %v2073_v42 = vpop.f32.mrb[78].mxu0  ;;  %v1594_v57 = vpop.f32.mrb[79].mxu1 }
 0x211   :  { %2924 = vst [vmem:[#allocation2 + $0x250] sm:$0xff] %v2796_v6  ;;  %v2414_v52 = vadd.f32 %v3200_v2, %v4507_v44  ;;  %v3202_v28 = vadd.f32 %v2073_v42, %v1592_v18  ;;  %v2075_v30 = vpop.f32.mrb[79].mxu0 }
 0x212   :  { %2925 = vst [vmem:[#allocation2 + $0x258] sm:$0xff] %v2797_v8  ;;  %v2415_v31 = vadd.f32 %v3201_v54, %v4510_v12  ;;  %v3203_v0 = vadd.f32 %v2075_v30, %v1594_v57  ;;  %v2551_v8 = vld [vmem:[%s5161_s9 + $0x2a8] sm:$0xff]  ;;  %v2553_v30 = vld [vmem:[%s5161_s9 + $0x2b8] sm:$0xff] }
 0x213   :  { %v2670_v46 = vadd.f32 %v2542_v43, %v2414_v52  ;;  %v2416_v51 = vadd.f32 %v3202_v28, %v4507_v44  ;;  %v2552_v52 = vld [vmem:[%s5161_s9 + $0x2b0] sm:$0xff] }
 0x214   :  { %v2671_v37 = vadd.f32 %v2543_v58, %v2415_v31  ;;  %v2417_v34 = vadd.f32 %v3203_v0, %v4510_v12 }
 0x215   :  { %v2798_v39 = vmax.f32 %v2670_v46, 0.0  ;;  %v2672_v13 = vadd.f32 %v2544_v7, %v2416_v51  ;;  %v1598_v26 = vpop.f32.mrb[80].mxu1 }
 0x216   :  { %v2799_v21 = vmax.f32 %v2671_v37, 0.0  ;;  %v2673_v20 = vadd.f32 %v2545_v38, %v2417_v34  ;;  %v2079_v50 = vpop.f32.mrb[80].mxu0  ;;  %v1600_v14 = vpop.f32.mrb[81].mxu1 }
 0x217   :  { %2926 = vst [vmem:[#allocation2 + $0x260] sm:$0xff] %v2798_v39  ;;  %v2800_v53 = vmax.f32 %v2672_v13, 0.0  ;;  %v3204_v59 = vadd.f32 %v2079_v50, %v1598_v26  ;;  %v2081_v55 = vpop.f32.mrb[81].mxu0  ;;  %v1602_v56 = vpop.f32.mrb[82].mxu1  ;;  %v2554_v50 = vld [vmem:[%s5161_s9 + $0x2c0] sm:$0xff] }
 0x218   :  { %2927 = vst [vmem:[#allocation2 + $0x268] sm:$0xff] %v2799_v21  ;;  %v2801_v41 = vmax.f32 %v2673_v20, 0.0  ;;  %v3205_v45 = vadd.f32 %v2081_v55, %v1600_v14  ;;  %v2083_v23 = vpop.f32.mrb[82].mxu0  ;;  %v1604_v35 = vpop.f32.mrb[83].mxu1 }
 0x219   :  { %2928 = vst [vmem:[#allocation2 + $0x270] sm:$0xff] %v2800_v53  ;;  %v2418_v61 = vadd.f32 %v3204_v59, %v4507_v44  ;;  %v3206_v48 = vadd.f32 %v2083_v23, %v1602_v56  ;;  %v2085_v62 = vpop.f32.mrb[83].mxu0 }
 0x21a   :  { %2929 = vst [vmem:[#allocation2 + $0x278] sm:$0xff] %v2801_v41  ;;  %v2419_v9 = vadd.f32 %v3205_v45, %v4510_v12  ;;  %v3207_v29 = vadd.f32 %v2085_v62, %v1604_v35  ;;  %v2555_v41 = vld [vmem:[%s5161_s9 + $0x2c8] sm:$0xff]  ;;  %v2557_v62 = vld [vmem:[%s5161_s9 + $0x2d8] sm:$0xff] }
 0x21b   :  { %v2674_v19 = vadd.f32 %v2546_v25, %v2418_v61  ;;  %v2420_v4 = vadd.f32 %v3206_v48, %v4507_v44  ;;  %v2556_v61 = vld [vmem:[%s5161_s9 + $0x2d0] sm:$0xff] }
 0x21c   :  { %v2675_v27 = vadd.f32 %v2547_v16, %v2419_v9  ;;  %v2421_v60 = vadd.f32 %v3207_v29, %v4510_v12 }
 0x21d   :  { %v2802_v63 = vmax.f32 %v2674_v19, 0.0  ;;  %v2676_v15 = vadd.f32 %v2548_v1, %v2420_v4  ;;  %v1608_v49 = vpop.f32.mrb[84].mxu1 }
 0x21e   :  { %v2803_v47 = vmax.f32 %v2675_v27, 0.0  ;;  %v2677_v40 = vadd.f32 %v2549_v3, %v2421_v60  ;;  %v2089_v5 = vpop.f32.mrb[84].mxu0  ;;  %v1610_v17 = vpop.f32.mrb[85].mxu1 }
 0x21f   :  { %2930 = vst [vmem:[#allocation2 + $0x280] sm:$0xff] %v2802_v63  ;;  %v2804_v10 = vmax.f32 %v2676_v15, 0.0  ;;  %v3208_v32 = vadd.f32 %v2089_v5, %v1608_v49  ;;  %v2091_v11 = vpop.f32.mrb[85].mxu0  ;;  %v1612_v2 = vpop.f32.mrb[86].mxu1  ;;  %v2558_v5 = vld [vmem:[%s5161_s9 + $0x2e0] sm:$0xff] }
 0x220   :  { %2931 = vst [vmem:[#allocation2 + $0x288] sm:$0xff] %v2803_v47  ;;  %v2805_v24 = vmax.f32 %v2677_v40, 0.0  ;;  %v3209_v6 = vadd.f32 %v2091_v11, %v1610_v17  ;;  %v2093_v36 = vpop.f32.mrb[86].mxu0  ;;  %v1614_v54 = vpop.f32.mrb[87].mxu1 }
 0x221   :  { %2932 = vst [vmem:[#allocation2 + $0x290] sm:$0xff] %v2804_v10  ;;  %v2422_v22 = vadd.f32 %v3208_v32, %v4507_v44  ;;  %v3210_v43 = vadd.f32 %v2093_v36, %v1612_v2  ;;  %v2095_v18 = vpop.f32.mrb[87].mxu0 }
 0x222   :  { %2933 = vst [vmem:[#allocation2 + $0x298] sm:$0xff] %v2805_v24  ;;  %v2423_v42 = vadd.f32 %v3209_v6, %v4510_v12  ;;  %v3211_v58 = vadd.f32 %v2095_v18, %v1614_v54  ;;  %v2559_v24 = vld [vmem:[%s5161_s9 + $0x2e8] sm:$0xff]  ;;  %v2561_v18 = vld [vmem:[%s5161_s9 + $0x2f8] sm:$0xff] }
 0x223   :  { %v2678_v28 = vadd.f32 %v2550_v33, %v2422_v22  ;;  %v2424_v57 = vadd.f32 %v3210_v43, %v4507_v44  ;;  %v2560_v22 = vld [vmem:[%s5161_s9 + $0x2f0] sm:$0xff] }
 0x224   :  { %v2679_v31 = vadd.f32 %v2551_v8, %v2423_v42  ;;  %v2425_v7 = vadd.f32 %v3211_v58, %v4510_v12 }
 0x225   :  { %v2806_v0 = vmax.f32 %v2678_v28, 0.0  ;;  %v2680_v46 = vadd.f32 %v2552_v52, %v2424_v57  ;;  %v1618_v37 = vpop.f32.mrb[88].mxu1 }
 0x226   :  { %v2807_v51 = vmax.f32 %v2679_v31, 0.0  ;;  %v2681_v38 = vadd.f32 %v2553_v30, %v2425_v7  ;;  %v2099_v34 = vpop.f32.mrb[88].mxu0  ;;  %v1620_v21 = vpop.f32.mrb[89].mxu1 }
 0x227   :  { %2934 = vst [vmem:[#allocation2 + $0x2a0] sm:$0xff] %v2806_v0  ;;  %v2808_v39 = vmax.f32 %v2680_v46, 0.0  ;;  %v3212_v13 = vadd.f32 %v2099_v34, %v1618_v37  ;;  %v2101_v20 = vpop.f32.mrb[89].mxu0  ;;  %v1622_v59 = vpop.f32.mrb[90].mxu1  ;;  %v2562_v34 = vld [vmem:[%s5161_s9 + $0x300] sm:$0xff] }
 0x228   :  { %2935 = vst [vmem:[#allocation2 + $0x2a8] sm:$0xff] %v2807_v51  ;;  %v2809_v26 = vmax.f32 %v2681_v38, 0.0  ;;  %v3213_v53 = vadd.f32 %v2101_v20, %v1620_v21  ;;  %v2103_v14 = vpop.f32.mrb[90].mxu0  ;;  %v1624_v45 = vpop.f32.mrb[91].mxu1 }
 0x229   :  { %2936 = vst [vmem:[#allocation2 + $0x2b0] sm:$0xff] %v2808_v39  ;;  %v2426_v55 = vadd.f32 %v3212_v13, %v4507_v44  ;;  %v3214_v25 = vadd.f32 %v2103_v14, %v1622_v59  ;;  %v2105_v56 = vpop.f32.mrb[91].mxu0 }
 0x22a   :  { %2937 = vst [vmem:[#allocation2 + $0x2b8] sm:$0xff] %v2809_v26  ;;  %v2427_v23 = vadd.f32 %v3213_v53, %v4510_v12  ;;  %v3215_v16 = vadd.f32 %v2105_v56, %v1624_v45  ;;  %v2563_v26 = vld [vmem:[%s5161_s9 + $0x308] sm:$0xff]  ;;  %v2565_v56 = vld [vmem:[%s5161_s9 + $0x318] sm:$0xff] }
 0x22b   :  { %v2682_v48 = vadd.f32 %v2554_v50, %v2426_v55  ;;  %v2428_v35 = vadd.f32 %v3214_v25, %v4507_v44  ;;  %v2564_v55 = vld [vmem:[%s5161_s9 + $0x310] sm:$0xff] }
 0x22c   :  { %v2683_v9 = vadd.f32 %v2555_v41, %v2427_v23  ;;  %v2429_v1 = vadd.f32 %v3215_v16, %v4510_v12 }
 0x22d   :  { %v2810_v29 = vmax.f32 %v2682_v48, 0.0  ;;  %v2684_v19 = vadd.f32 %v2556_v61, %v2428_v35  ;;  %v1628_v27 = vpop.f32.mrb[92].mxu1 }
 0x22e   :  { %v2811_v4 = vmax.f32 %v2683_v9, 0.0  ;;  %v2685_v3 = vadd.f32 %v2557_v62, %v2429_v1  ;;  %v2109_v60 = vpop.f32.mrb[92].mxu0  ;;  %v1630_v47 = vpop.f32.mrb[93].mxu1 }
 0x22f   :  { %2938 = vst [vmem:[#allocation2 + $0x2c0] sm:$0xff] %v2810_v29  ;;  %v2812_v63 = vmax.f32 %v2684_v19, 0.0  ;;  %v3216_v15 = vadd.f32 %v2109_v60, %v1628_v27  ;;  %v2111_v40 = vpop.f32.mrb[93].mxu0  ;;  %v1632_v32 = vpop.f32.mrb[94].mxu1  ;;  %v2566_v60 = vld [vmem:[%s5161_s9 + $0x320] sm:$0xff] }
 0x230   :  { %2939 = vst [vmem:[#allocation2 + $0x2c8] sm:$0xff] %v2811_v4  ;;  %v2813_v49 = vmax.f32 %v2685_v3, 0.0  ;;  %v3217_v10 = vadd.f32 %v2111_v40, %v1630_v47  ;;  %v2113_v17 = vpop.f32.mrb[94].mxu0  ;;  %v1634_v6 = vpop.f32.mrb[95].mxu1 }
 0x231   :  { %2940 = vst [vmem:[#allocation2 + $0x2d0] sm:$0xff] %v2812_v63  ;;  %v2430_v11 = vadd.f32 %v3216_v15, %v4507_v44  ;;  %v3218_v33 = vadd.f32 %v2113_v17, %v1632_v32  ;;  %v2115_v2 = vpop.f32.mrb[95].mxu0 }
 0x232   :  { %2941 = vst [vmem:[#allocation2 + $0x2d8] sm:$0xff] %v2813_v49  ;;  %v2431_v36 = vadd.f32 %v3217_v10, %v4510_v12  ;;  %v3219_v8 = vadd.f32 %v2115_v2, %v1634_v6  ;;  %v2567_v49 = vld [vmem:[%s5161_s9 + $0x328] sm:$0xff]  ;;  %v2569_v2 = vld [vmem:[%s5161_s9 + $0x338] sm:$0xff] }
 0x233   :  { %v2686_v43 = vadd.f32 %v2558_v5, %v2430_v11  ;;  %v2432_v54 = vadd.f32 %v3218_v33, %v4507_v44  ;;  %v2568_v11 = vld [vmem:[%s5161_s9 + $0x330] sm:$0xff] }
 0x234   :  { %v2687_v42 = vadd.f32 %v2559_v24, %v2431_v36  ;;  %v2433_v52 = vadd.f32 %v3219_v8, %v4510_v12 }
 0x235   :  { %v2814_v58 = vmax.f32 %v2686_v43, 0.0  ;;  %v2688_v28 = vadd.f32 %v2560_v22, %v2432_v54  ;;  %v1638_v31 = vpop.f32.mrb[96].mxu1 }
 0x236   :  { %v2815_v57 = vmax.f32 %v2687_v42, 0.0  ;;  %v2689_v30 = vadd.f32 %v2561_v18, %v2433_v52  ;;  %v2119_v7 = vpop.f32.mrb[96].mxu0  ;;  %v1640_v51 = vpop.f32.mrb[97].mxu1 }
 0x237   :  { %2942 = vst [vmem:[#allocation2 + $0x2e0] sm:$0xff] %v2814_v58  ;;  %v2816_v0 = vmax.f32 %v2688_v28, 0.0  ;;  %v3220_v46 = vadd.f32 %v2119_v7, %v1638_v31  ;;  %v2121_v38 = vpop.f32.mrb[97].mxu0  ;;  %v1642_v13 = vpop.f32.mrb[98].mxu1  ;;  %v2570_v7 = vld [vmem:[%s5161_s9 + $0x340] sm:$0xff] }
 0x238   :  { %2943 = vst [vmem:[#allocation2 + $0x2e8] sm:$0xff] %v2815_v57  ;;  %v2817_v37 = vmax.f32 %v2689_v30, 0.0  ;;  %v3221_v39 = vadd.f32 %v2121_v38, %v1640_v51  ;;  %v2123_v21 = vpop.f32.mrb[98].mxu0  ;;  %v1644_v53 = vpop.f32.mrb[99].mxu1 }
 0x239   :  { %2944 = vst [vmem:[#allocation2 + $0x2f0] sm:$0xff] %v2816_v0  ;;  %v2434_v20 = vadd.f32 %v3220_v46, %v4507_v44  ;;  %v3222_v50 = vadd.f32 %v2123_v21, %v1642_v13  ;;  %v2125_v59 = vpop.f32.mrb[99].mxu0 }
 0x23a   :  { %2945 = vst [vmem:[#allocation2 + $0x2f8] sm:$0xff] %v2817_v37  ;;  %v2435_v14 = vadd.f32 %v3221_v39, %v4510_v12  ;;  %v3223_v41 = vadd.f32 %v2125_v59, %v1644_v53  ;;  %v2571_v37 = vld [vmem:[%s5161_s9 + $0x348] sm:$0xff]  ;;  %v2573_v59 = vld [vmem:[%s5161_s9 + $0x358] sm:$0xff] }
 0x23b   :  { %v2690_v25 = vadd.f32 %v2562_v34, %v2434_v20  ;;  %v2436_v45 = vadd.f32 %v3222_v50, %v4507_v44  ;;  %v2572_v20 = vld [vmem:[%s5161_s9 + $0x350] sm:$0xff] }
 0x23c   :  { %v2691_v23 = vadd.f32 %v2563_v26, %v2435_v14  ;;  %v2437_v61 = vadd.f32 %v3223_v41, %v4510_v12 }
 0x23d   :  { %v2818_v16 = vmax.f32 %v2690_v25, 0.0  ;;  %v2692_v48 = vadd.f32 %v2564_v55, %v2436_v45  ;;  %v1648_v9 = vpop.f32.mrb[100].mxu1 }
 0x23e   :  { %v2819_v35 = vmax.f32 %v2691_v23, 0.0  ;;  %v2693_v62 = vadd.f32 %v2565_v56, %v2437_v61  ;;  %v2129_v1 = vpop.f32.mrb[100].mxu0  ;;  %v1650_v4 = vpop.f32.mrb[101].mxu1 }
 0x23f   :  { %2946 = vst [vmem:[#allocation2 + $0x300] sm:$0xff] %v2818_v16  ;;  %v2820_v29 = vmax.f32 %v2692_v48, 0.0  ;;  %v3224_v19 = vadd.f32 %v2129_v1, %v1648_v9  ;;  %v2131_v3 = vpop.f32.mrb[101].mxu0  ;;  %v1652_v15 = vpop.f32.mrb[102].mxu1  ;;  %v2574_v1 = vld [vmem:[%s5161_s9 + $0x360] sm:$0xff] }
 0x240   :  { %2947 = vst [vmem:[#allocation2 + $0x308] sm:$0xff] %v2819_v35  ;;  %v2821_v27 = vmax.f32 %v2693_v62, 0.0  ;;  %v3225_v63 = vadd.f32 %v2131_v3, %v1650_v4  ;;  %v2133_v47 = vpop.f32.mrb[102].mxu0  ;;  %v1654_v10 = vpop.f32.mrb[103].mxu1 }
 0x241   :  { %2948 = vst [vmem:[#allocation2 + $0x310] sm:$0xff] %v2820_v29  ;;  %v2438_v40 = vadd.f32 %v3224_v19, %v4507_v44  ;;  %v3226_v5 = vadd.f32 %v2133_v47, %v1652_v15  ;;  %v2135_v32 = vpop.f32.mrb[103].mxu0 }
 0x242   :  { %2949 = vst [vmem:[#allocation2 + $0x318] sm:$0xff] %v2821_v27  ;;  %v2439_v17 = vadd.f32 %v3225_v63, %v4510_v12  ;;  %v3227_v24 = vadd.f32 %v2135_v32, %v1654_v10  ;;  %v2575_v27 = vld [vmem:[%s5161_s9 + $0x368] sm:$0xff]  ;;  %v2577_v32 = vld [vmem:[%s5161_s9 + $0x378] sm:$0xff] }
 0x243   :  { %v2694_v33 = vadd.f32 %v2566_v60, %v2438_v40  ;;  %v2440_v6 = vadd.f32 %v3226_v5, %v4507_v44  ;;  %v2576_v40 = vld [vmem:[%s5161_s9 + $0x370] sm:$0xff] }
 0x244   :  { %v2695_v36 = vadd.f32 %v2567_v49, %v2439_v17  ;;  %v2441_v22 = vadd.f32 %v3227_v24, %v4510_v12 }
 0x245   :  { %v2822_v8 = vmax.f32 %v2694_v33, 0.0  ;;  %v2696_v43 = vadd.f32 %v2568_v11, %v2440_v6  ;;  %v1658_v42 = vpop.f32.mrb[104].mxu1 }
 0x246   :  { %v2823_v54 = vmax.f32 %v2695_v36, 0.0  ;;  %v2697_v18 = vadd.f32 %v2569_v2, %v2441_v22  ;;  %v2139_v52 = vpop.f32.mrb[104].mxu0  ;;  %v1660_v57 = vpop.f32.mrb[105].mxu1 }
 0x247   :  { %2950 = vst [vmem:[#allocation2 + $0x320] sm:$0xff] %v2822_v8  ;;  %v2824_v58 = vmax.f32 %v2696_v43, 0.0  ;;  %v3228_v28 = vadd.f32 %v2139_v52, %v1658_v42  ;;  %v2141_v30 = vpop.f32.mrb[105].mxu0  ;;  %v1662_v46 = vpop.f32.mrb[106].mxu1  ;;  %v2578_v52 = vld [vmem:[%s5161_s9 + $0x380] sm:$0xff] }
 0x248   :  { %2951 = vst [vmem:[#allocation2 + $0x328] sm:$0xff] %v2823_v54  ;;  %v2825_v31 = vmax.f32 %v2697_v18, 0.0  ;;  %v3229_v0 = vadd.f32 %v2141_v30, %v1660_v57  ;;  %v2143_v51 = vpop.f32.mrb[106].mxu0  ;;  %v1664_v39 = vpop.f32.mrb[107].mxu1 }
 0x249   :  { %2952 = vst [vmem:[#allocation2 + $0x330] sm:$0xff] %v2824_v58  ;;  %v2442_v38 = vadd.f32 %v3228_v28, %v4507_v44  ;;  %v3230_v34 = vadd.f32 %v2143_v51, %v1662_v46  ;;  %v2145_v13 = vpop.f32.mrb[107].mxu0 }
 0x24a   :  { %2953 = vst [vmem:[#allocation2 + $0x338] sm:$0xff] %v2825_v31  ;;  %v2443_v21 = vadd.f32 %v3229_v0, %v4510_v12  ;;  %v3231_v26 = vadd.f32 %v2145_v13, %v1664_v39  ;;  %v2579_v31 = vld [vmem:[%s5161_s9 + $0x388] sm:$0xff]  ;;  %v2581_v13 = vld [vmem:[%s5161_s9 + $0x398] sm:$0xff] }
 0x24b   :  { %v2698_v50 = vadd.f32 %v2570_v7, %v2442_v38  ;;  %v2444_v53 = vadd.f32 %v3230_v34, %v4507_v44  ;;  %v2580_v38 = vld [vmem:[%s5161_s9 + $0x390] sm:$0xff] }
 0x24c   :  { %v2699_v14 = vadd.f32 %v2571_v37, %v2443_v21  ;;  %v2445_v55 = vadd.f32 %v3231_v26, %v4510_v12 }
 0x24d   :  { %v2826_v41 = vmax.f32 %v2698_v50, 0.0  ;;  %v2700_v25 = vadd.f32 %v2572_v20, %v2444_v53  ;;  %v1668_v23 = vpop.f32.mrb[108].mxu1 }
 0x24e   :  { %v2827_v45 = vmax.f32 %v2699_v14, 0.0  ;;  %v2701_v56 = vadd.f32 %v2573_v59, %v2445_v55  ;;  %v2149_v61 = vpop.f32.mrb[108].mxu0  ;;  %v1670_v35 = vpop.f32.mrb[109].mxu1 }
 0x24f   :  { %2954 = vst [vmem:[#allocation2 + $0x340] sm:$0xff] %v2826_v41  ;;  %v2828_v16 = vmax.f32 %v2700_v25, 0.0  ;;  %v3232_v48 = vadd.f32 %v2149_v61, %v1668_v23  ;;  %v2151_v62 = vpop.f32.mrb[109].mxu0  ;;  %v1672_v19 = vpop.f32.mrb[110].mxu1  ;;  %v2582_v61 = vld [vmem:[%s5161_s9 + $0x3a0] sm:$0xff] }
 0x250   :  { %2955 = vst [vmem:[#allocation2 + $0x348] sm:$0xff] %v2827_v45  ;;  %v2829_v9 = vmax.f32 %v2701_v56, 0.0  ;;  %v3233_v29 = vadd.f32 %v2151_v62, %v1670_v35  ;;  %v2153_v4 = vpop.f32.mrb[110].mxu0  ;;  %v1674_v63 = vpop.f32.mrb[111].mxu1 }
 0x251   :  { %2956 = vst [vmem:[#allocation2 + $0x350] sm:$0xff] %v2828_v16  ;;  %v2446_v3 = vadd.f32 %v3232_v48, %v4507_v44  ;;  %v3234_v60 = vadd.f32 %v2153_v4, %v1672_v19  ;;  %v2155_v15 = vpop.f32.mrb[111].mxu0 }
 0x252   :  { %2957 = vst [vmem:[#allocation2 + $0x358] sm:$0xff] %v2829_v9  ;;  %v2447_v47 = vadd.f32 %v3233_v29, %v4510_v12  ;;  %v3235_v49 = vadd.f32 %v2155_v15, %v1674_v63  ;;  %v2583_v9 = vld [vmem:[%s5161_s9 + $0x3a8] sm:$0xff]  ;;  %v2585_v15 = vld [vmem:[%s5161_s9 + $0x3b8] sm:$0xff] }
 0x253   :  { %v2702_v5 = vadd.f32 %v2574_v1, %v2446_v3  ;;  %v2448_v10 = vadd.f32 %v3234_v60, %v4507_v44  ;;  %v2584_v3 = vld [vmem:[%s5161_s9 + $0x3b0] sm:$0xff] }
 0x254   :  { %v2703_v17 = vadd.f32 %v2575_v27, %v2447_v47  ;;  %v2449_v11 = vadd.f32 %v3235_v49, %v4510_v12 }
 0x255   :  { %v2830_v24 = vmax.f32 %v2702_v5, 0.0  ;;  %v2704_v33 = vadd.f32 %v2576_v40, %v2448_v10  ;;  %v1678_v36 = vpop.f32.mrb[112].mxu1 }
 0x256   :  { %v2831_v6 = vmax.f32 %v2703_v17, 0.0  ;;  %v2705_v2 = vadd.f32 %v2577_v32, %v2449_v11  ;;  %v2159_v22 = vpop.f32.mrb[112].mxu0  ;;  %v1680_v54 = vpop.f32.mrb[113].mxu1 }
 0x257   :  { %2958 = vst [vmem:[#allocation2 + $0x360] sm:$0xff] %v2830_v24  ;;  %v2832_v8 = vmax.f32 %v2704_v33, 0.0  ;;  %v3236_v43 = vadd.f32 %v2159_v22, %v1678_v36  ;;  %v2161_v18 = vpop.f32.mrb[113].mxu0  ;;  %v1682_v28 = vpop.f32.mrb[114].mxu1  ;;  %v2586_v22 = vld [vmem:[%s5161_s9 + $0x3c0] sm:$0xff] }
 0x258   :  { %2959 = vst [vmem:[#allocation2 + $0x368] sm:$0xff] %v2831_v6  ;;  %v2833_v42 = vmax.f32 %v2705_v2, 0.0  ;;  %v3237_v58 = vadd.f32 %v2161_v18, %v1680_v54  ;;  %v2163_v57 = vpop.f32.mrb[114].mxu0  ;;  %v1684_v0 = vpop.f32.mrb[115].mxu1 }
 0x259   :  { %2960 = vst [vmem:[#allocation2 + $0x370] sm:$0xff] %v2832_v8  ;;  %v2450_v30 = vadd.f32 %v3236_v43, %v4507_v44  ;;  %v3238_v7 = vadd.f32 %v2163_v57, %v1682_v28  ;;  %v2165_v46 = vpop.f32.mrb[115].mxu0 }
 0x25a   :  { %2961 = vst [vmem:[#allocation2 + $0x378] sm:$0xff] %v2833_v42  ;;  %v2451_v51 = vadd.f32 %v3237_v58, %v4510_v12  ;;  %v3239_v37 = vadd.f32 %v2165_v46, %v1684_v0  ;;  %v2587_v42 = vld [vmem:[%s5161_s9 + $0x3c8] sm:$0xff]  ;;  %v2589_v46 = vld [vmem:[%s5161_s9 + $0x3d8] sm:$0xff] }
 0x25b   :  { %v2706_v34 = vadd.f32 %v2578_v52, %v2450_v30  ;;  %v2452_v39 = vadd.f32 %v3238_v7, %v4507_v44  ;;  %v2588_v30 = vld [vmem:[%s5161_s9 + $0x3d0] sm:$0xff] }
 0x25c   :  { %v2707_v21 = vadd.f32 %v2579_v31, %v2451_v51  ;;  %v2453_v20 = vadd.f32 %v3239_v37, %v4510_v12 }
 0x25d   :  { %v2834_v26 = vmax.f32 %v2706_v34, 0.0  ;;  %v2708_v50 = vadd.f32 %v2580_v38, %v2452_v39  ;;  %v1688_v14 = vpop.f32.mrb[116].mxu1 }
 0x25e   :  { %v2835_v53 = vmax.f32 %v2707_v21, 0.0  ;;  %v2709_v59 = vadd.f32 %v2581_v13, %v2453_v20  ;;  %v2169_v55 = vpop.f32.mrb[116].mxu0  ;;  %v1690_v45 = vpop.f32.mrb[117].mxu1 }
 0x25f   :  { %2962 = vst [vmem:[#allocation2 + $0x380] sm:$0xff] %v2834_v26  ;;  %v2836_v41 = vmax.f32 %v2708_v50, 0.0  ;;  %v3240_v25 = vadd.f32 %v2169_v55, %v1688_v14  ;;  %v2171_v56 = vpop.f32.mrb[117].mxu0  ;;  %v1692_v48 = vpop.f32.mrb[118].mxu1  ;;  %v2590_v55 = vld [vmem:[%s5161_s9 + $0x3e0] sm:$0xff] }
 0x260   :  { %2963 = vst [vmem:[#allocation2 + $0x388] sm:$0xff] %v2835_v53  ;;  %v2837_v23 = vmax.f32 %v2709_v59, 0.0  ;;  %v3241_v16 = vadd.f32 %v2171_v56, %v1690_v45  ;;  %v2173_v35 = vpop.f32.mrb[118].mxu0  ;;  %v1694_v29 = vpop.f32.mrb[119].mxu1 }
 0x261   :  { %2964 = vst [vmem:[#allocation2 + $0x390] sm:$0xff] %v2836_v41  ;;  %v2454_v62 = vadd.f32 %v3240_v25, %v4507_v44  ;;  %v3242_v1 = vadd.f32 %v2173_v35, %v1692_v48  ;;  %v2175_v19 = vpop.f32.mrb[119].mxu0 }
 0x262   :  { %2965 = vst [vmem:[#allocation2 + $0x398] sm:$0xff] %v2837_v23  ;;  %v2455_v4 = vadd.f32 %v3241_v16, %v4510_v12  ;;  %v3243_v27 = vadd.f32 %v2175_v19, %v1694_v29  ;;  %v2591_v23 = vld [vmem:[%s5161_s9 + $0x3e8] sm:$0xff]  ;;  %v2593_v19 = vld [vmem:[%s5161_s9 + $0x3f8] sm:$0xff] }
 0x263   :  { %v2710_v60 = vadd.f32 %v2582_v61, %v2454_v62  ;;  %v2456_v63 = vadd.f32 %v3242_v1, %v4507_v44  ;;  %v2592_v62 = vld [vmem:[%s5161_s9 + $0x3f0] sm:$0xff] }
 0x264   :  { %v2711_v47 = vadd.f32 %v2583_v9, %v2455_v4  ;;  %v2457_v40 = vadd.f32 %v3243_v27, %v4510_v12 }
 0x265   :  { %v2838_v49 = vmax.f32 %v2710_v60, 0.0  ;;  %v2712_v5 = vadd.f32 %v2584_v3, %v2456_v63  ;;  %v1698_v17 = vpop.f32.mrb[120].mxu1 }
 0x266   :  { %v2839_v10 = vmax.f32 %v2711_v47, 0.0  ;;  %v2713_v32 = vadd.f32 %v2585_v15, %v2457_v40  ;;  %v2179_v11 = vpop.f32.mrb[120].mxu0  ;;  %v1700_v6 = vpop.f32.mrb[121].mxu1 }
 0x267   :  { %2966 = vst [vmem:[#allocation2 + $0x3a0] sm:$0xff] %v2838_v49  ;;  %v2840_v24 = vmax.f32 %v2712_v5, 0.0  ;;  %v3244_v33 = vadd.f32 %v2179_v11, %v1698_v17  ;;  %v2181_v2 = vpop.f32.mrb[121].mxu0  ;;  %v1702_v43 = vpop.f32.mrb[122].mxu1 }
 0x268   :  { %2967 = vst [vmem:[#allocation2 + $0x3a8] sm:$0xff] %v2839_v10  ;;  %v2841_v36 = vmax.f32 %v2713_v32, 0.0  ;;  %v3245_v8 = vadd.f32 %v2181_v2, %v1700_v6  ;;  %v2183_v54 = vpop.f32.mrb[122].mxu0  ;;  %v1704_v58 = vpop.f32.mrb[123].mxu1 }
 0x269   :  { %2968 = vst [vmem:[#allocation2 + $0x3b0] sm:$0xff] %v2840_v24  ;;  %v2458_v18 = vadd.f32 %v3244_v33, %v4507_v44  ;;  %v3246_v52 = vadd.f32 %v2183_v54, %v1702_v43  ;;  %v2185_v28 = vpop.f32.mrb[123].mxu0 }
 0x26a   :  { %2969 = vst [vmem:[#allocation2 + $0x3b8] sm:$0xff] %v2841_v36  ;;  %v2459_v57 = vadd.f32 %v3245_v8, %v4510_v12  ;;  %v3247_v31 = vadd.f32 %v2185_v28, %v1704_v58 }
 0x26b   :  { %v2714_v7 = vadd.f32 %v2586_v22, %v2458_v18  ;;  %v2460_v0 = vadd.f32 %v3246_v52, %v4507_v44 }
 0x26c   :  { %v2715_v51 = vadd.f32 %v2587_v42, %v2459_v57  ;;  %v2461_v38 = vadd.f32 %v3247_v31, %v4510_v12 }
 0x26d   :  { %v2842_v37 = vmax.f32 %v2714_v7, 0.0  ;;  %v2716_v34 = vadd.f32 %v2588_v30, %v2460_v0  ;;  %v1708_v21 = vpop.f32.mrb[124].mxu1 }
 0x26e   :  { %v2843_v39 = vmax.f32 %v2715_v51, 0.0  ;;  %v2717_v13 = vadd.f32 %v2589_v46, %v2461_v38  ;;  %v2189_v20 = vpop.f32.mrb[124].mxu0  ;;  %v1710_v53 = vpop.f32.mrb[125].mxu1 }
 0x26f   :  { %2970 = vst [vmem:[#allocation2 + $0x3c0] sm:$0xff] %v2842_v37  ;;  %v2844_v26 = vmax.f32 %v2716_v34, 0.0  ;;  %v3248_v50 = vadd.f32 %v2189_v20, %v1708_v21  ;;  %v2191_v59 = vpop.f32.mrb[125].mxu0  ;;  %v1712_v25 = vpop.f32.mrb[126].mxu1 }
 0x270   :  { %2971 = vst [vmem:[#allocation2 + $0x3c8] sm:$0xff] %v2843_v39  ;;  %v2845_v14 = vmax.f32 %v2717_v13, 0.0  ;;  %v3249_v41 = vadd.f32 %v2191_v59, %v1710_v53  ;;  %v2193_v45 = vpop.f32.mrb[126].mxu0  ;;  %v1714_v16 = vpop.f32.mrb[127].mxu1 }
 0x271   :  { %2972 = vst [vmem:[#allocation2 + $0x3d0] sm:$0xff] %v2844_v26  ;;  %v2462_v56 = vadd.f32 %v3248_v50, %v4507_v44  ;;  %v3250_v61 = vadd.f32 %v2193_v45, %v1712_v25  ;;  %v2195_v48 = vpop.f32.mrb[127].mxu0 }
 0x272   :  { %2973 = vst [vmem:[#allocation2 + $0x3d8] sm:$0xff] %v2845_v14  ;;  %v2463_v35 = vadd.f32 %v3249_v41, %v4510_v12  ;;  %v3251_v9 = vadd.f32 %v2195_v48, %v1714_v16 }
 0x273   :  { %v2718_v1 = vadd.f32 %v2590_v55, %v2462_v56  ;;  %v2464_v29 = vadd.f32 %v3250_v61, %v4507_v44 }
 0x274   :  { %v2719_v4 = vadd.f32 %v2591_v23, %v2463_v35  ;;  %v2465_v3 = vadd.f32 %v3251_v9, %v4510_v12 }
 0x275   :  { %v2846_v27 = vmax.f32 %v2718_v1, 0.0  ;;  %v2720_v60 = vadd.f32 %v2592_v62, %v2464_v29 }
 0x276   :  { %v2847_v63 = vmax.f32 %v2719_v4, 0.0  ;;  %v2721_v15 = vadd.f32 %v2593_v19, %v2465_v3 }
 0x277   :  { %2974 = vst [vmem:[#allocation2 + $0x3e0] sm:$0xff] %v2846_v27  ;;  %v2848_v47 = vmax.f32 %v2720_v60, 0.0 }
 0x278   :  { %2975 = vst [vmem:[#allocation2 + $0x3e8] sm:$0xff] %v2847_v63  ;;  %v2849_v40 = vmax.f32 %v2721_v15, 0.0 }
 0x279   :  { %2976 = vst [vmem:[#allocation2 + $0x3f0] sm:$0xff] %v2848_v47 }
 0x27a   :  { %2977 = vst [vmem:[#allocation2 + $0x3f8] sm:$0xff] %v2849_v40 }
 0x27b   :  { %3533 = shalt.err (!%p3530_p4)
}
 0x27c   :  { %s3534_s12 = scalar_lea.hbm %s5162_s10, 16384 }
 0x27d   :  { %p3535_p5 = scmp.ne.s32.totalorder %s5162_s10, %s3534_s12  ;;  %p3538_p6 = scmp.lt.u32.totalorder %s3534_s12, %s5162_s10 }
 0x27f   :  { %p3540_p7 = pnand %p3538_p6, %p3535_p5 }
 0x281   :  { %3543 = shalt.err (!%p3540_p7)
}
 0x282   :  { %s3548_s4 = smov 256   ;;  %s3549_s16 = smov 16  }
 0x283   :  { %2989 = dma.vmem_to_hbm [thread:$0]  %s2984_s30, 16384, %s5162_s10, [#allocation3], %s3548_s4, %s3548_s4, %s3549_s16  }
 0x284   :  { %3544 = dma.done.wait [#allocation3], 16384  }
 0x285   :  { %3545 = vsyncadd [#allocation3], 4294950912 }
 0x286   :  { %2993 = vsyncpa [#allocation3], 1 }

</bundles_post_ra>
